<compile_context>
chip_gen: v6e
topology: v6e:2x2x1
jax: 0.10.0
libtpu: 0.0.40
codegen_flags: <defaults>
</compile_context>

<pallas_src>
import jax
import jax.numpy as jnp
from jax import lax
from jax.experimental import pallas as pl
from jax.experimental.pallas import tpu as pltpu


# ----------------------------------------------------------------------------
# Static network geometry (DeepConvNet with input (N, 1, 2, 750))
# ----------------------------------------------------------------------------
CIN0 = 2                       # the two H rows become input channels
WP1, WP2, WP3, WP4 = 373, 184, 90, 43   # width after each conv(valid,5)+pool(2)
C1P, C2P, C3P, C4P = 128, 128, 128, 256  # lane-padded channel counts (25/50/100/200)


# ----------------------------------------------------------------------------
# Fused Pallas kernel: whole DeepConvNet forward for one sample per grid step
# ----------------------------------------------------------------------------
def _deepconvnet_kernel(x1_ref, w1_ref, w2_ref, w3_ref, w4_ref,
                        s1_ref, h1_ref, s2_ref, h2_ref,
                        s3_ref, h3_ref, s4_ref, h4_ref,
                        wfc_ref, bfc_ref,
                        o_ref,
                        a1_ref, a2_ref, a3_ref):
    mm_dtype = w2_ref.dtype          # bf16 (default) or f32 matmul operands

    def elu(y):
        # Clamp the exp argument so the discarded positive branch never
        # overflows (and exp(min(y,0))-1 == expm1(y) for the taken branch).
        return jnp.where(y > 0.0, y, jnp.exp(jnp.minimum(y, 0.0)) - 1.0)

    # ---- Block 1: im2col for both pooling parities precomputed in wrapper,
    #      one K=10 contraction per parity (both H rows + all 5 taps folded).
    w1 = w1_ref[...]
    s1 = s1_ref[...]
    h1 = h1_ref[...]

    def block1(par):
        acc = jnp.dot(x1_ref[par], w1, preferred_element_type=jnp.float32)
        return elu(acc * s1 + h1)

    a1_ref[...] = jnp.maximum(block1(0), block1(1))             # (373, 128)

    # ---- Blocks 2-4: stride-2 in-VMEM im2col + one K=5*Cin matmul per parity
    def conv_block(in_ref, w_ref, s_ref, h_ref, wp):
        w = w_ref[...]
        s = s_ref[...]
        h = h_ref[...]

        def parity(off):
            # conv output position 2*p + off needs input rows 2*p + off + k.
            taps = [in_ref[pl.ds(off + k, wp, stride=2), :] for k in range(5)]
            im = jnp.concatenate(taps, axis=-1).astype(mm_dtype)   # (wp, 5*Cin)
            acc = jnp.dot(im, w, preferred_element_type=jnp.float32)
            return elu(acc * s + h)

        # MaxPool2d((1, 2)) == max over the two conv-output parities.
        return jnp.maximum(parity(0), parity(1))

    a2_ref[...] = conv_block(a1_ref, w2_ref, s2_ref, h2_ref, WP2)   # (184, 128)
    a3_ref[...] = conv_block(a2_ref, w3_ref, s3_ref, h3_ref, WP3)   # (90, 128)
    a4 = conv_block(a3_ref, w4_ref, s4_ref, h4_ref, WP4)            # (43, 256)

    # ---- Classifier: logits[o] = sum_{w,c} a4[w, c] * wfc[o, w, c] + b[o]
    def fc(o):
        col = jnp.sum(a4 * wfc_ref[o], axis=0, keepdims=True)       # (1, 256)
        return jnp.sum(col, axis=1, keepdims=True)                  # (1, 1)

    o_ref[...] = jnp.concatenate([fc(0), fc(1)], axis=1) + bfc_ref[...]


# ----------------------------------------------------------------------------
# Parameter folding / packing helpers
# ----------------------------------------------------------------------------
def _fold_bn(bias, bnp, eps=1e-5):
    s = bnp['gamma'] / jnp.sqrt(bnp['var'] + eps)
    shift = (bias - bnp['mean']) * s + bnp['beta']
    return s, shift


def _pad_scale_shift(s, h, cpad):
    c = s.shape[0]
    s = jnp.pad(s, (0, cpad - c)).reshape(1, cpad).astype(jnp.float32)
    h = jnp.pad(h, (0, cpad - c)).reshape(1, cpad).astype(jnp.float32)
    return s, h


# ----------------------------------------------------------------------------
# Full forward pass (single fused pallas_call)
# ----------------------------------------------------------------------------
def deepconvnet_forward(params, x_nchw, use_bf16=True):
    p = params
    N = x_nchw.shape[0]
    mm_dtype = jnp.bfloat16 if use_bf16 else jnp.float32

    # ---- Block 1: exact fusion of Conv2d(1,25,(1,5)) and Conv2d(25,25,(2,1));
    #      the two H rows become the 2 input channels of a single 5-tap conv.
    w1a = p['w1a'][:, 0, 0, :]                              # (25, 5)
    w1b = p['w1b'][:, :, :, 0]                              # (25, 25, 2)
    w1 = jnp.einsum('mk,cmh->khc', w1a, w1b)                # (5, 2, 25)
    b1 = jnp.einsum('cmh,m->c', w1b, p['b1a']) + p['b1b']   # (25,)
    s1, h1 = _fold_bn(b1, p['bn1'])
    w1s = jnp.pad(w1.reshape(5 * CIN0, 25), ((0, 0), (0, C1P - 25)))
    s1, h1 = _pad_scale_shift(s1, h1, C1P)

    def prep(wkey, bkey, bnkey, cin, cin_pad, cout, cout_pad):
        w = jnp.transpose(p[wkey][:, :, 0, :], (2, 1, 0))   # (5, cin, cout)
        w = jnp.pad(w, ((0, 0), (0, cin_pad - cin), (0, cout_pad - cout)))
        ws = w.reshape(5 * cin_pad, cout_pad)               # row = k*cin_pad + c
        s, h = _fold_bn(p[bkey], p[bnkey])
        s, h = _pad_scale_shift(s, h, cout_pad)
        return ws.astype(mm_dtype), s, h

    w2s, s2, h2 = prep('w2', 'b2', 'bn2', 25, C1P, 50, C2P)
    w3s, s3, h3 = prep('w3', 'b3', 'bn3', 50, C2P, 100, C3P)
    w4s, s4, h4 = prep('w4', 'b4', 'bn4', 100, C3P, 200, C4P)

    # ---- FC weight pre-permuted from PyTorch flatten order (c*43 + w) into
    #      the kernel's (w, padded-c) activation layout; padded channels -> 0.
    wfc = jnp.transpose(p['wfc'].reshape(2, 200, WP4), (0, 2, 1))   # (2, 43, 200)
    wfc = jnp.pad(wfc, ((0, 0), (0, 0), (0, C4P - 200))).astype(jnp.float32)
    bfc = p['bfc'].reshape(1, 2).astype(jnp.float32)

    # ---- Block-1 im2col for both pooling parities, built once in XLA:
    #      x1[n, par, p, k*2 + h] = input[n, 0, h, 2*p + par + k]
    x2 = x_nchw[:, 0, :, :].astype(jnp.float32)             # (N, 2, 750)
    planes = []
    for par in range(2):
        taps = []
        for k in range(5):
            start = par + k
            sl = lax.slice_in_dim(x2, start, start + 2 * WP1 - 1, stride=2, axis=2)
            taps.append(jnp.transpose(sl, (0, 2, 1)))       # (N, 373, 2)
        planes.append(jnp.concatenate(taps, axis=-1))       # (N, 373, 10)
    x1 = jnp.stack(planes, axis=1).astype(mm_dtype)         # (N, 2, 373, 10)

    out = pl.pallas_call(
        _deepconvnet_kernel,
        out_shape=jax.ShapeDtypeStruct((N, 1, 2), jnp.float32),
        grid=(N,),
        in_specs=[
            pl.BlockSpec((None, 2, WP1, 5 * CIN0), lambda n: (n, 0, 0, 0)),
            pl.BlockSpec((5 * CIN0, C1P), lambda n: (0, 0)),
            pl.BlockSpec((5 * C1P, C2P), lambda n: (0, 0)),
            pl.BlockSpec((5 * C2P, C3P), lambda n: (0, 0)),
            pl.BlockSpec((5 * C3P, C4P), lambda n: (0, 0)),
            pl.BlockSpec((1, C1P), lambda n: (0, 0)),
            pl.BlockSpec((1, C1P), lambda n: (0, 0)),
            pl.BlockSpec((1, C2P), lambda n: (0, 0)),
            pl.BlockSpec((1, C2P), lambda n: (0, 0)),
            pl.BlockSpec((1, C3P), lambda n: (0, 0)),
            pl.BlockSpec((1, C3P), lambda n: (0, 0)),
            pl.BlockSpec((1, C4P), lambda n: (0, 0)),
            pl.BlockSpec((1, C4P), lambda n: (0, 0)),
            pl.BlockSpec((2, WP4, C4P), lambda n: (0, 0, 0)),
            pl.BlockSpec((1, 2), lambda n: (0, 0)),
        ],
        out_specs=pl.BlockSpec((None, 1, 2), lambda n: (n, 0, 0)),
        scratch_shapes=[
            pltpu.VMEM((WP1, C1P), jnp.float32),
            pltpu.VMEM((WP2, C2P), jnp.float32),
            pltpu.VMEM((WP3, C3P), jnp.float32),
        ],
        compiler_params=pltpu.CompilerParams(
            dimension_semantics=("parallel",)),
    )(x1, w1s.astype(mm_dtype), w2s, w3s, w4s,
      s1, h1, s2, h2, s3, h3, s4, h4, wfc, bfc)
    return out.reshape(N, 2)


# ----------------------------------------------------------------------------
# Parameters (deterministic, synthetic)
# ----------------------------------------------------------------------------
def init_params(key):
    keys = iter(jax.random.split(key, 40))

    def nrm(shape, s=0.1):
        return jax.random.normal(next(keys), shape, jnp.float32) * s

    def unif(shape, lo=0.5, hi=1.5):
        return jax.random.uniform(next(keys), shape, jnp.float32, lo, hi)

    def bn(c):
        return dict(gamma=unif((c,)), beta=nrm((c,)),
                    mean=nrm((c,)), var=unif((c,)))

    return dict(
        w1a=nrm((25, 1, 1, 5)),   b1a=nrm((25,)),
        w1b=nrm((25, 25, 2, 1)),  b1b=nrm((25,)),   bn1=bn(25),
        w2=nrm((50, 25, 1, 5)),   b2=nrm((50,)),    bn2=bn(50),
        w3=nrm((100, 50, 1, 5)),  b3=nrm((100,)),   bn3=bn(100),
        w4=nrm((200, 100, 1, 5)), b4=nrm((200,)),   bn4=bn(200),
        wfc=nrm((2, 8600)),       bfc=nrm((2,)),
    )


# ----------------------------------------------------------------------------
# Pure-JAX reference (mirrors the PyTorch module in eval mode)
# ----------------------------------------------------------------------------
def reference_forward(params, x):
    p = params

    def conv(x, w, b):
        y = lax.conv_general_dilated(
            x, w, window_strides=(1, 1), padding='VALID',
            dimension_numbers=('NCHW', 'OIHW', 'NCHW'))
        return y + b[None, :, None, None]

    def bn(x, bnp):
        inv = bnp['gamma'] / jnp.sqrt(bnp['var'] + 1e-5)
        return ((x - bnp['mean'][None, :, None, None])
                * inv[None, :, None, None] + bnp['beta'][None, :, None, None])

    def elu(x):
        return jnp.where(x > 0, x, jnp.expm1(x))

    def pool(x):
        n, c, h, w = x.shape
        wp = w // 2
        return jnp.max(x[..., :2 * wp].reshape(n, c, h, wp, 2), axis=-1)

    x = conv(x, p['w1a'], p['b1a'])
    x = conv(x, p['w1b'], p['b1b'])
    x = pool(elu(bn(x, p['bn1'])))
    x = pool(elu(bn(conv(x, p['w2'], p['b2']), p['bn2'])))
    x = pool(elu(bn(conv(x, p['w3'], p['b3']), p['bn3'])))
    x = pool(elu(bn(conv(x, p['w4'], p['b4']), p['bn4'])))
    flat = x.reshape(x.shape[0], -1)        # (N, 8600), index = c*43 + w
    return flat @ p['wfc'].T + p['bfc']


# ----------------------------------------------------------------------------
if __name__ == "__main__":
    key = jax.random.PRNGKey(0)
    kx, kp = jax.random.split(key)
    N = 2
    # DeepConvNet expects (N, 1, 2, 750) so that Flatten -> 200*1*43 = 8600.
    x = jax.random.normal(kx, (N, 1, 2, 750), jnp.float32)
    params = init_params(kp)

    ref = reference_forward(params, x)
    fwd = jax.jit(deepconvnet_forward, static_argnames=("use_bf16",))

    # 1) Exact-math path (f32 MXU operands): the structural rewrites (block-1
    #    fusion, BN folding, channel padding, tap stacking, FC permutation)
    #    must match the PyTorch-equivalent reference tightly.
    out_f32 = jax.block_until_ready(fwd(params, x, use_bf16=False))
    assert out_f32.shape == (N, 2) and out_f32.dtype == jnp.float32
    if not bool(jnp.allclose(out_f32, ref, rtol=1e-3, atol=1e-3)):
        raise AssertionError(
            "f32 Pallas mismatch: max abs diff = "
            f"{float(jnp.max(jnp.abs(out_f32 - ref)))}")

    # 2) Default fast path (bf16 MXU operands, f32 accumulation): tolerance is
    #    scaled to the logit magnitude to cover bf16 rounding over 4 layers.
    out = jax.block_until_ready(fwd(params, x, use_bf16=True))
    assert out.shape == (N, 2) and out.dtype == jnp.float32
    tol = 0.05 * float(jnp.max(jnp.abs(ref))) + 0.05
    err = float(jnp.max(jnp.abs(out - ref)))
    if err > tol:
        raise AssertionError(f"bf16 Pallas mismatch: max abs diff = {err} > {tol}")

    print("KERNEL_OK")
</pallas_src>

<mosaic_0001>
module attributes {stable_mosaic.version = 11 : i64} {
  func.func @_deepconvnet_kernel(%arg0: i32, %arg1: memref<1x2x373x10xf32, #tpu.memory_space<vmem>>, %arg2: memref<10x128xf32, #tpu.memory_space<vmem>>, %arg3: memref<640x128xf32, #tpu.memory_space<vmem>>, %arg4: memref<640x128xf32, #tpu.memory_space<vmem>>, %arg5: memref<640x256xf32, #tpu.memory_space<vmem>>, %arg6: memref<1x128xf32, #tpu.memory_space<vmem>>, %arg7: memref<1x128xf32, #tpu.memory_space<vmem>>, %arg8: memref<1x128xf32, #tpu.memory_space<vmem>>, %arg9: memref<1x128xf32, #tpu.memory_space<vmem>>, %arg10: memref<1x128xf32, #tpu.memory_space<vmem>>, %arg11: memref<1x128xf32, #tpu.memory_space<vmem>>, %arg12: memref<1x256xf32, #tpu.memory_space<vmem>>, %arg13: memref<1x256xf32, #tpu.memory_space<vmem>>, %arg14: memref<2x43x256xf32, #tpu.memory_space<vmem>>, %arg15: memref<1x2xf32, #tpu.memory_space<vmem>>, %arg16: memref<1x1x2xf32, #tpu.memory_space<vmem>>, %arg17: memref<373x128xf32, #tpu.memory_space<vmem>>, %arg18: memref<184x128xf32, #tpu.memory_space<vmem>>, %arg19: memref<90x128xf32, #tpu.memory_space<vmem>>) attributes {dimension_semantics = [#tpu.dimension_semantics<parallel>], iteration_bounds = array<i64: 2>, scalar_prefetch = 0 : i64, scratch_operands = 3 : i64, tpu.core_type = #tpu.core_type<tc>, window_params = [{transform_indices = @transform_0, window_bounds = array<i64: 1, 2, 373, 10>}, {pipeline_mode = #tpu.pipeline_mode<synchronous>, transform_indices = @transform_1, window_bounds = array<i64: 10, 128>}, {pipeline_mode = #tpu.pipeline_mode<synchronous>, transform_indices = @transform_2, window_bounds = array<i64: 640, 128>}, {pipeline_mode = #tpu.pipeline_mode<synchronous>, transform_indices = @transform_3, window_bounds = array<i64: 640, 128>}, {pipeline_mode = #tpu.pipeline_mode<synchronous>, transform_indices = @transform_4, window_bounds = array<i64: 640, 256>}, {pipeline_mode = #tpu.pipeline_mode<synchronous>, transform_indices = @transform_5, window_bounds = array<i64: 1, 128>}, {pipeline_mode = #tpu.pipeline_mode<synchronous>, transform_indices = @transform_6, window_bounds = array<i64: 1, 128>}, {pipeline_mode = #tpu.pipeline_mode<synchronous>, transform_indices = @transform_7, window_bounds = array<i64: 1, 128>}, {pipeline_mode = #tpu.pipeline_mode<synchronous>, transform_indices = @transform_8, window_bounds = array<i64: 1, 128>}, {pipeline_mode = #tpu.pipeline_mode<synchronous>, transform_indices = @transform_9, window_bounds = array<i64: 1, 128>}, {pipeline_mode = #tpu.pipeline_mode<synchronous>, transform_indices = @transform_10, window_bounds = array<i64: 1, 128>}, {pipeline_mode = #tpu.pipeline_mode<synchronous>, transform_indices = @transform_11, window_bounds = array<i64: 1, 256>}, {pipeline_mode = #tpu.pipeline_mode<synchronous>, transform_indices = @transform_12, window_bounds = array<i64: 1, 256>}, {pipeline_mode = #tpu.pipeline_mode<synchronous>, transform_indices = @transform_13, window_bounds = array<i64: 2, 43, 256>}, {pipeline_mode = #tpu.pipeline_mode<synchronous>, transform_indices = @transform_14, window_bounds = array<i64: 1, 2>}, {transform_indices = @transform_15, window_bounds = array<i64: 1, 1, 2>}]} {
    %c0 = arith.constant 0 : index
    %c0_0 = arith.constant 0 : index
    %0 = vector.load %arg2[%c0, %c0_0] : memref<10x128xf32, #tpu.memory_space<vmem>>, vector<10x128xf32>
    %c0_1 = arith.constant 0 : index
    %c0_2 = arith.constant 0 : index
    %1 = vector.load %arg6[%c0_1, %c0_2] : memref<1x128xf32, #tpu.memory_space<vmem>>, vector<1x128xf32>
    %c0_3 = arith.constant 0 : index
    %c0_4 = arith.constant 0 : index
    %2 = vector.load %arg7[%c0_3, %c0_4] : memref<1x128xf32, #tpu.memory_space<vmem>>, vector<1x128xf32>
    %c0_5 = arith.constant 0 : index
    %c0_6 = arith.constant 0 : index
    %c0_7 = arith.constant 0 : index
    %c0_8 = arith.constant 0 : index
    %3 = vector.load %arg1[%c0_5, %c0_6, %c0_7, %c0_8] : memref<1x2x373x10xf32, #tpu.memory_space<vmem>>, vector<1x1x373x10xf32>
    %4 = vector.shape_cast %3 : vector<1x1x373x10xf32> to vector<373x10xf32>
    %cst = arith.constant dense<0.000000e+00> : vector<373x128xf32>
    %5 = tpu.matmul %4, %0, %cst {dimension_numbers = #tpu.dot_dimension_numbers<[1], [0], [0], [1], [0, 0, 1, 1], [], []>} : vector<373x10xf32>, vector<10x128xf32>, vector<373x128xf32> -> vector<373x128xf32>
    %6 = vector.broadcast %1 : vector<1x128xf32> to vector<373x128xf32>
    %7 = arith.mulf %5, %6 : vector<373x128xf32>
    %8 = vector.broadcast %2 : vector<1x128xf32> to vector<373x128xf32>
    %9 = arith.addf %7, %8 : vector<373x128xf32>
    %cst_9 = arith.constant 0.000000e+00 : f32
    %10 = vector.broadcast %cst_9 : f32 to vector<373x128xf32>
    %11 = arith.cmpf ogt, %9, %10 : vector<373x128xf32>
    %cst_10 = arith.constant 0.000000e+00 : f32
    %12 = vector.broadcast %cst_10 : f32 to vector<373x128xf32>
    %13 = arith.minimumf %9, %12 : vector<373x128xf32>
    %14 = math.exp %13 : vector<373x128xf32>
    %cst_11 = arith.constant 1.000000e+00 : f32
    %15 = vector.broadcast %cst_11 : f32 to vector<373x128xf32>
    %16 = arith.subf %14, %15 : vector<373x128xf32>
    %17 = arith.select %11, %9, %16 : vector<373x128xi1>, vector<373x128xf32>
    %c0_12 = arith.constant 0 : index
    %c1 = arith.constant 1 : index
    %c0_13 = arith.constant 0 : index
    %c0_14 = arith.constant 0 : index
    %18 = vector.load %arg1[%c0_12, %c1, %c0_13, %c0_14] : memref<1x2x373x10xf32, #tpu.memory_space<vmem>>, vector<1x1x373x10xf32>
    %19 = vector.shape_cast %18 : vector<1x1x373x10xf32> to vector<373x10xf32>
    %cst_15 = arith.constant dense<0.000000e+00> : vector<373x128xf32>
    %20 = tpu.matmul %19, %0, %cst_15 {dimension_numbers = #tpu.dot_dimension_numbers<[1], [0], [0], [1], [0, 0, 1, 1], [], []>} : vector<373x10xf32>, vector<10x128xf32>, vector<373x128xf32> -> vector<373x128xf32>
    %21 = vector.broadcast %1 : vector<1x128xf32> to vector<373x128xf32>
    %22 = arith.mulf %20, %21 : vector<373x128xf32>
    %23 = vector.broadcast %2 : vector<1x128xf32> to vector<373x128xf32>
    %24 = arith.addf %22, %23 : vector<373x128xf32>
    %cst_16 = arith.constant 0.000000e+00 : f32
    %25 = vector.broadcast %cst_16 : f32 to vector<373x128xf32>
    %26 = arith.cmpf ogt, %24, %25 : vector<373x128xf32>
    %cst_17 = arith.constant 0.000000e+00 : f32
    %27 = vector.broadcast %cst_17 : f32 to vector<373x128xf32>
    %28 = arith.minimumf %24, %27 : vector<373x128xf32>
    %29 = math.exp %28 : vector<373x128xf32>
    %cst_18 = arith.constant 1.000000e+00 : f32
    %30 = vector.broadcast %cst_18 : f32 to vector<373x128xf32>
    %31 = arith.subf %29, %30 : vector<373x128xf32>
    %32 = arith.select %26, %24, %31 : vector<373x128xi1>, vector<373x128xf32>
    %33 = arith.maximumf %17, %32 : vector<373x128xf32>
    %c0_19 = arith.constant 0 : index
    %c0_20 = arith.constant 0 : index
    %34 = vector.load %arg17[%c0_19, %c0_20] : memref<373x128xf32, #tpu.memory_space<vmem>>, vector<373x128xf32>
    tpu.vector_store %arg17[%c0_19, %c0_20], %33 {strides = array<i32>} : memref<373x128xf32, #tpu.memory_space<vmem>>, vector<373x128xf32>,
    %c0_21 = arith.constant 0 : index
    %c0_22 = arith.constant 0 : index
    %35 = vector.load %arg3[%c0_21, %c0_22] : memref<640x128xf32, #tpu.memory_space<vmem>>, vector<640x128xf32>
    %c0_23 = arith.constant 0 : index
    %c0_24 = arith.constant 0 : index
    %36 = vector.load %arg8[%c0_23, %c0_24] : memref<1x128xf32, #tpu.memory_space<vmem>>, vector<1x128xf32>
    %c0_25 = arith.constant 0 : index
    %c0_26 = arith.constant 0 : index
    %37 = vector.load %arg9[%c0_25, %c0_26] : memref<1x128xf32, #tpu.memory_space<vmem>>, vector<1x128xf32>
    %c0_27 = arith.constant 0 : index
    %c0_28 = arith.constant 0 : index
    %38 = tpu.strided_load %arg17[%c0_27, %c0_28] {strides = array<i32: 2, 1>} : memref<373x128xf32, #tpu.memory_space<vmem>>, vector<184x128xf32>
    %c1_29 = arith.constant 1 : index
    %c0_30 = arith.constant 0 : index
    %39 = tpu.strided_load %arg17[%c1_29, %c0_30] {strides = array<i32: 2, 1>} : memref<373x128xf32, #tpu.memory_space<vmem>>, vector<184x128xf32>
    %c2 = arith.constant 2 : index
    %c0_31 = arith.constant 0 : index
    %40 = tpu.strided_load %arg17[%c2, %c0_31] {strides = array<i32: 2, 1>} : memref<373x128xf32, #tpu.memory_space<vmem>>, vector<184x128xf32>
    %c3 = arith.constant 3 : index
    %c0_32 = arith.constant 0 : index
    %41 = tpu.strided_load %arg17[%c3, %c0_32] {strides = array<i32: 2, 1>} : memref<373x128xf32, #tpu.memory_space<vmem>>, vector<184x128xf32>
    %c4 = arith.constant 4 : index
    %c0_33 = arith.constant 0 : index
    %42 = tpu.strided_load %arg17[%c4, %c0_33] {strides = array<i32: 2, 1>} : memref<373x128xf32, #tpu.memory_space<vmem>>, vector<184x128xf32>
    %43 = tpu.concatenate %38, %39, %40, %41, %42 in 1 : vector<184x128xf32>, vector<184x128xf32>, vector<184x128xf32>, vector<184x128xf32>, vector<184x128xf32> -> vector<184x640xf32>
    %cst_34 = arith.constant dense<0.000000e+00> : vector<184x128xf32>
    %44 = tpu.matmul %43, %35, %cst_34 {dimension_numbers = #tpu.dot_dimension_numbers<[1], [0], [0], [1], [0, 0, 1, 1], [], []>} : vector<184x640xf32>, vector<640x128xf32>, vector<184x128xf32> -> vector<184x128xf32>
    %45 = vector.broadcast %36 : vector<1x128xf32> to vector<184x128xf32>
    %46 = arith.mulf %44, %45 : vector<184x128xf32>
    %47 = vector.broadcast %37 : vector<1x128xf32> to vector<184x128xf32>
    %48 = arith.addf %46, %47 : vector<184x128xf32>
    %cst_35 = arith.constant 0.000000e+00 : f32
    %49 = vector.broadcast %cst_35 : f32 to vector<184x128xf32>
    %50 = arith.cmpf ogt, %48, %49 : vector<184x128xf32>
    %cst_36 = arith.constant 0.000000e+00 : f32
    %51 = vector.broadcast %cst_36 : f32 to vector<184x128xf32>
    %52 = arith.minimumf %48, %51 : vector<184x128xf32>
    %53 = math.exp %52 : vector<184x128xf32>
    %cst_37 = arith.constant 1.000000e+00 : f32
    %54 = vector.broadcast %cst_37 : f32 to vector<184x128xf32>
    %55 = arith.subf %53, %54 : vector<184x128xf32>
    %56 = arith.select %50, %48, %55 : vector<184x128xi1>, vector<184x128xf32>
    %c1_38 = arith.constant 1 : index
    %c0_39 = arith.constant 0 : index
    %57 = tpu.strided_load %arg17[%c1_38, %c0_39] {strides = array<i32: 2, 1>} : memref<373x128xf32, #tpu.memory_space<vmem>>, vector<184x128xf32>
    %c2_40 = arith.constant 2 : index
    %c0_41 = arith.constant 0 : index
    %58 = tpu.strided_load %arg17[%c2_40, %c0_41] {strides = array<i32: 2, 1>} : memref<373x128xf32, #tpu.memory_space<vmem>>, vector<184x128xf32>
    %c3_42 = arith.constant 3 : index
    %c0_43 = arith.constant 0 : index
    %59 = tpu.strided_load %arg17[%c3_42, %c0_43] {strides = array<i32: 2, 1>} : memref<373x128xf32, #tpu.memory_space<vmem>>, vector<184x128xf32>
    %c4_44 = arith.constant 4 : index
    %c0_45 = arith.constant 0 : index
    %60 = tpu.strided_load %arg17[%c4_44, %c0_45] {strides = array<i32: 2, 1>} : memref<373x128xf32, #tpu.memory_space<vmem>>, vector<184x128xf32>
    %c5 = arith.constant 5 : index
    %c0_46 = arith.constant 0 : index
    %61 = tpu.strided_load %arg17[%c5, %c0_46] {strides = array<i32: 2, 1>} : memref<373x128xf32, #tpu.memory_space<vmem>>, vector<184x128xf32>
    %62 = tpu.concatenate %57, %58, %59, %60, %61 in 1 : vector<184x128xf32>, vector<184x128xf32>, vector<184x128xf32>, vector<184x128xf32>, vector<184x128xf32> -> vector<184x640xf32>
    %cst_47 = arith.constant dense<0.000000e+00> : vector<184x128xf32>
    %63 = tpu.matmul %62, %35, %cst_47 {dimension_numbers = #tpu.dot_dimension_numbers<[1], [0], [0], [1], [0, 0, 1, 1], [], []>} : vector<184x640xf32>, vector<640x128xf32>, vector<184x128xf32> -> vector<184x128xf32>
    %64 = vector.broadcast %36 : vector<1x128xf32> to vector<184x128xf32>
    %65 = arith.mulf %63, %64 : vector<184x128xf32>
    %66 = vector.broadcast %37 : vector<1x128xf32> to vector<184x128xf32>
    %67 = arith.addf %65, %66 : vector<184x128xf32>
    %cst_48 = arith.constant 0.000000e+00 : f32
    %68 = vector.broadcast %cst_48 : f32 to vector<184x128xf32>
    %69 = arith.cmpf ogt, %67, %68 : vector<184x128xf32>
    %cst_49 = arith.constant 0.000000e+00 : f32
    %70 = vector.broadcast %cst_49 : f32 to vector<184x128xf32>
    %71 = arith.minimumf %67, %70 : vector<184x128xf32>
    %72 = math.exp %71 : vector<184x128xf32>
    %cst_50 = arith.constant 1.000000e+00 : f32
    %73 = vector.broadcast %cst_50 : f32 to vector<184x128xf32>
    %74 = arith.subf %72, %73 : vector<184x128xf32>
    %75 = arith.select %69, %67, %74 : vector<184x128xi1>, vector<184x128xf32>
    %76 = arith.maximumf %56, %75 : vector<184x128xf32>
    %c0_51 = arith.constant 0 : index
    %c0_52 = arith.constant 0 : index
    %77 = vector.load %arg18[%c0_51, %c0_52] : memref<184x128xf32, #tpu.memory_space<vmem>>, vector<184x128xf32>
    tpu.vector_store %arg18[%c0_51, %c0_52], %76 {strides = array<i32>} : memref<184x128xf32, #tpu.memory_space<vmem>>, vector<184x128xf32>,
    %c0_53 = arith.constant 0 : index
    %c0_54 = arith.constant 0 : index
    %78 = vector.load %arg4[%c0_53, %c0_54] : memref<640x128xf32, #tpu.memory_space<vmem>>, vector<640x128xf32>
    %c0_55 = arith.constant 0 : index
    %c0_56 = arith.constant 0 : index
    %79 = vector.load %arg10[%c0_55, %c0_56] : memref<1x128xf32, #tpu.memory_space<vmem>>, vector<1x128xf32>
    %c0_57 = arith.constant 0 : index
    %c0_58 = arith.constant 0 : index
    %80 = vector.load %arg11[%c0_57, %c0_58] : memref<1x128xf32, #tpu.memory_space<vmem>>, vector<1x128xf32>
    %c0_59 = arith.constant 0 : index
    %c0_60 = arith.constant 0 : index
    %81 = tpu.strided_load %arg18[%c0_59, %c0_60] {strides = array<i32: 2, 1>} : memref<184x128xf32, #tpu.memory_space<vmem>>, vector<90x128xf32>
    %c1_61 = arith.constant 1 : index
    %c0_62 = arith.constant 0 : index
    %82 = tpu.strided_load %arg18[%c1_61, %c0_62] {strides = array<i32: 2, 1>} : memref<184x128xf32, #tpu.memory_space<vmem>>, vector<90x128xf32>
    %c2_63 = arith.constant 2 : index
    %c0_64 = arith.constant 0 : index
    %83 = tpu.strided_load %arg18[%c2_63, %c0_64] {strides = array<i32: 2, 1>} : memref<184x128xf32, #tpu.memory_space<vmem>>, vector<90x128xf32>
    %c3_65 = arith.constant 3 : index
    %c0_66 = arith.constant 0 : index
    %84 = tpu.strided_load %arg18[%c3_65, %c0_66] {strides = array<i32: 2, 1>} : memref<184x128xf32, #tpu.memory_space<vmem>>, vector<90x128xf32>
    %c4_67 = arith.constant 4 : index
    %c0_68 = arith.constant 0 : index
    %85 = tpu.strided_load %arg18[%c4_67, %c0_68] {strides = array<i32: 2, 1>} : memref<184x128xf32, #tpu.memory_space<vmem>>, vector<90x128xf32>
    %86 = tpu.concatenate %81, %82, %83, %84, %85 in 1 : vector<90x128xf32>, vector<90x128xf32>, vector<90x128xf32>, vector<90x128xf32>, vector<90x128xf32> -> vector<90x640xf32>
    %cst_69 = arith.constant dense<0.000000e+00> : vector<90x128xf32>
    %87 = tpu.matmul %86, %78, %cst_69 {dimension_numbers = #tpu.dot_dimension_numbers<[1], [0], [0], [1], [0, 0, 1, 1], [], []>} : vector<90x640xf32>, vector<640x128xf32>, vector<90x128xf32> -> vector<90x128xf32>
    %88 = vector.broadcast %79 : vector<1x128xf32> to vector<90x128xf32>
    %89 = arith.mulf %87, %88 : vector<90x128xf32>
    %90 = vector.broadcast %80 : vector<1x128xf32> to vector<90x128xf32>
    %91 = arith.addf %89, %90 : vector<90x128xf32>
    %cst_70 = arith.constant 0.000000e+00 : f32
    %92 = vector.broadcast %cst_70 : f32 to vector<90x128xf32>
    %93 = arith.cmpf ogt, %91, %92 : vector<90x128xf32>
    %cst_71 = arith.constant 0.000000e+00 : f32
    %94 = vector.broadcast %cst_71 : f32 to vector<90x128xf32>
    %95 = arith.minimumf %91, %94 : vector<90x128xf32>
    %96 = math.exp %95 : vector<90x128xf32>
    %cst_72 = arith.constant 1.000000e+00 : f32
    %97 = vector.broadcast %cst_72 : f32 to vector<90x128xf32>
    %98 = arith.subf %96, %97 : vector<90x128xf32>
    %99 = arith.select %93, %91, %98 : vector<90x128xi1>, vector<90x128xf32>
    %c1_73 = arith.constant 1 : index
    %c0_74 = arith.constant 0 : index
    %100 = tpu.strided_load %arg18[%c1_73, %c0_74] {strides = array<i32: 2, 1>} : memref<184x128xf32, #tpu.memory_space<vmem>>, vector<90x128xf32>
    %c2_75 = arith.constant 2 : index
    %c0_76 = arith.constant 0 : index
    %101 = tpu.strided_load %arg18[%c2_75, %c0_76] {strides = array<i32: 2, 1>} : memref<184x128xf32, #tpu.memory_space<vmem>>, vector<90x128xf32>
    %c3_77 = arith.constant 3 : index
    %c0_78 = arith.constant 0 : index
    %102 = tpu.strided_load %arg18[%c3_77, %c0_78] {strides = array<i32: 2, 1>} : memref<184x128xf32, #tpu.memory_space<vmem>>, vector<90x128xf32>
    %c4_79 = arith.constant 4 : index
    %c0_80 = arith.constant 0 : index
    %103 = tpu.strided_load %arg18[%c4_79, %c0_80] {strides = array<i32: 2, 1>} : memref<184x128xf32, #tpu.memory_space<vmem>>, vector<90x128xf32>
    %c5_81 = arith.constant 5 : index
    %c0_82 = arith.constant 0 : index
    %104 = tpu.strided_load %arg18[%c5_81, %c0_82] {strides = array<i32: 2, 1>} : memref<184x128xf32, #tpu.memory_space<vmem>>, vector<90x128xf32>
    %105 = tpu.concatenate %100, %101, %102, %103, %104 in 1 : vector<90x128xf32>, vector<90x128xf32>, vector<90x128xf32>, vector<90x128xf32>, vector<90x128xf32> -> vector<90x640xf32>
    %cst_83 = arith.constant dense<0.000000e+00> : vector<90x128xf32>
    %106 = tpu.matmul %105, %78, %cst_83 {dimension_numbers = #tpu.dot_dimension_numbers<[1], [0], [0], [1], [0, 0, 1, 1], [], []>} : vector<90x640xf32>, vector<640x128xf32>, vector<90x128xf32> -> vector<90x128xf32>
    %107 = vector.broadcast %79 : vector<1x128xf32> to vector<90x128xf32>
    %108 = arith.mulf %106, %107 : vector<90x128xf32>
    %109 = vector.broadcast %80 : vector<1x128xf32> to vector<90x128xf32>
    %110 = arith.addf %108, %109 : vector<90x128xf32>
    %cst_84 = arith.constant 0.000000e+00 : f32
    %111 = vector.broadcast %cst_84 : f32 to vector<90x128xf32>
    %112 = arith.cmpf ogt, %110, %111 : vector<90x128xf32>
    %cst_85 = arith.constant 0.000000e+00 : f32
    %113 = vector.broadcast %cst_85 : f32 to vector<90x128xf32>
    %114 = arith.minimumf %110, %113 : vector<90x128xf32>
    %115 = math.exp %114 : vector<90x128xf32>
    %cst_86 = arith.constant 1.000000e+00 : f32
    %116 = vector.broadcast %cst_86 : f32 to vector<90x128xf32>
    %117 = arith.subf %115, %116 : vector<90x128xf32>
    %118 = arith.select %112, %110, %117 : vector<90x128xi1>, vector<90x128xf32>
    %119 = arith.maximumf %99, %118 : vector<90x128xf32>
    %c0_87 = arith.constant 0 : index
    %c0_88 = arith.constant 0 : index
    %120 = vector.load %arg19[%c0_87, %c0_88] : memref<90x128xf32, #tpu.memory_space<vmem>>, vector<90x128xf32>
    tpu.vector_store %arg19[%c0_87, %c0_88], %119 {strides = array<i32>} : memref<90x128xf32, #tpu.memory_space<vmem>>, vector<90x128xf32>,
    %c0_89 = arith.constant 0 : index
    %c0_90 = arith.constant 0 : index
    %121 = vector.load %arg5[%c0_89, %c0_90] : memref<640x256xf32, #tpu.memory_space<vmem>>, vector<640x256xf32>
    %c0_91 = arith.constant 0 : index
    %c0_92 = arith.constant 0 : index
    %122 = vector.load %arg12[%c0_91, %c0_92] : memref<1x256xf32, #tpu.memory_space<vmem>>, vector<1x256xf32>
    %c0_93 = arith.constant 0 : index
    %c0_94 = arith.constant 0 : index
    %123 = vector.load %arg13[%c0_93, %c0_94] : memref<1x256xf32, #tpu.memory_space<vmem>>, vector<1x256xf32>
    %c0_95 = arith.constant 0 : index
    %c0_96 = arith.constant 0 : index
    %124 = tpu.strided_load %arg19[%c0_95, %c0_96] {strides = array<i32: 2, 1>} : memref<90x128xf32, #tpu.memory_space<vmem>>, vector<43x128xf32>
    %c1_97 = arith.constant 1 : index
    %c0_98 = arith.constant 0 : index
    %125 = tpu.strided_load %arg19[%c1_97, %c0_98] {strides = array<i32: 2, 1>} : memref<90x128xf32, #tpu.memory_space<vmem>>, vector<43x128xf32>
    %c2_99 = arith.constant 2 : index
    %c0_100 = arith.constant 0 : index
    %126 = tpu.strided_load %arg19[%c2_99, %c0_100] {strides = array<i32: 2, 1>} : memref<90x128xf32, #tpu.memory_space<vmem>>, vector<43x128xf32>
    %c3_101 = arith.constant 3 : index
    %c0_102 = arith.constant 0 : index
    %127 = tpu.strided_load %arg19[%c3_101, %c0_102] {strides = array<i32: 2, 1>} : memref<90x128xf32, #tpu.memory_space<vmem>>, vector<43x128xf32>
    %c4_103 = arith.constant 4 : index
    %c0_104 = arith.constant 0 : index
    %128 = tpu.strided_load %arg19[%c4_103, %c0_104] {strides = array<i32: 2, 1>} : memref<90x128xf32, #tpu.memory_space<vmem>>, vector<43x128xf32>
    %129 = tpu.concatenate %124, %125, %126, %127, %128 in 1 : vector<43x128xf32>, vector<43x128xf32>, vector<43x128xf32>, vector<43x128xf32>, vector<43x128xf32> -> vector<43x640xf32>
    %cst_105 = arith.constant dense<0.000000e+00> : vector<43x256xf32>
    %130 = tpu.matmul %129, %121, %cst_105 {dimension_numbers = #tpu.dot_dimension_numbers<[1], [0], [0], [1], [0, 0, 1, 1], [], []>} : vector<43x640xf32>, vector<640x256xf32>, vector<43x256xf32> -> vector<43x256xf32>
    %131 = vector.broadcast %122 : vector<1x256xf32> to vector<43x256xf32>
    %132 = arith.mulf %130, %131 : vector<43x256xf32>
    %133 = vector.broadcast %123 : vector<1x256xf32> to vector<43x256xf32>
    %134 = arith.addf %132, %133 : vector<43x256xf32>
    %cst_106 = arith.constant 0.000000e+00 : f32
    %135 = vector.broadcast %cst_106 : f32 to vector<43x256xf32>
    %136 = arith.cmpf ogt, %134, %135 : vector<43x256xf32>
    %cst_107 = arith.constant 0.000000e+00 : f32
    %137 = vector.broadcast %cst_107 : f32 to vector<43x256xf32>
    %138 = arith.minimumf %134, %137 : vector<43x256xf32>
    %139 = math.exp %138 : vector<43x256xf32>
    %cst_108 = arith.constant 1.000000e+00 : f32
    %140 = vector.broadcast %cst_108 : f32 to vector<43x256xf32>
    %141 = arith.subf %139, %140 : vector<43x256xf32>
    %142 = arith.select %136, %134, %141 : vector<43x256xi1>, vector<43x256xf32>
    %c1_109 = arith.constant 1 : index
    %c0_110 = arith.constant 0 : index
    %143 = tpu.strided_load %arg19[%c1_109, %c0_110] {strides = array<i32: 2, 1>} : memref<90x128xf32, #tpu.memory_space<vmem>>, vector<43x128xf32>
    %c2_111 = arith.constant 2 : index
    %c0_112 = arith.constant 0 : index
    %144 = tpu.strided_load %arg19[%c2_111, %c0_112] {strides = array<i32: 2, 1>} : memref<90x128xf32, #tpu.memory_space<vmem>>, vector<43x128xf32>
    %c3_113 = arith.constant 3 : index
    %c0_114 = arith.constant 0 : index
    %145 = tpu.strided_load %arg19[%c3_113, %c0_114] {strides = array<i32: 2, 1>} : memref<90x128xf32, #tpu.memory_space<vmem>>, vector<43x128xf32>
    %c4_115 = arith.constant 4 : index
    %c0_116 = arith.constant 0 : index
    %146 = tpu.strided_load %arg19[%c4_115, %c0_116] {strides = array<i32: 2, 1>} : memref<90x128xf32, #tpu.memory_space<vmem>>, vector<43x128xf32>
    %c5_117 = arith.constant 5 : index
    %c0_118 = arith.constant 0 : index
    %147 = tpu.strided_load %arg19[%c5_117, %c0_118] {strides = array<i32: 2, 1>} : memref<90x128xf32, #tpu.memory_space<vmem>>, vector<43x128xf32>
    %148 = tpu.concatenate %143, %144, %145, %146, %147 in 1 : vector<43x128xf32>, vector<43x128xf32>, vector<43x128xf32>, vector<43x128xf32>, vector<43x128xf32> -> vector<43x640xf32>
    %cst_119 = arith.constant dense<0.000000e+00> : vector<43x256xf32>
    %149 = tpu.matmul %148, %121, %cst_119 {dimension_numbers = #tpu.dot_dimension_numbers<[1], [0], [0], [1], [0, 0, 1, 1], [], []>} : vector<43x640xf32>, vector<640x256xf32>, vector<43x256xf32> -> vector<43x256xf32>
    %150 = vector.broadcast %122 : vector<1x256xf32> to vector<43x256xf32>
    %151 = arith.mulf %149, %150 : vector<43x256xf32>
    %152 = vector.broadcast %123 : vector<1x256xf32> to vector<43x256xf32>
    %153 = arith.addf %151, %152 : vector<43x256xf32>
    %cst_120 = arith.constant 0.000000e+00 : f32
    %154 = vector.broadcast %cst_120 : f32 to vector<43x256xf32>
    %155 = arith.cmpf ogt, %153, %154 : vector<43x256xf32>
    %cst_121 = arith.constant 0.000000e+00 : f32
    %156 = vector.broadcast %cst_121 : f32 to vector<43x256xf32>
    %157 = arith.minimumf %153, %156 : vector<43x256xf32>
    %158 = math.exp %157 : vector<43x256xf32>
    %cst_122 = arith.constant 1.000000e+00 : f32
    %159 = vector.broadcast %cst_122 : f32 to vector<43x256xf32>
    %160 = arith.subf %158, %159 : vector<43x256xf32>
    %161 = arith.select %155, %153, %160 : vector<43x256xi1>, vector<43x256xf32>
    %162 = arith.maximumf %142, %161 : vector<43x256xf32>
    %c0_123 = arith.constant 0 : index
    %c0_124 = arith.constant 0 : index
    %c0_125 = arith.constant 0 : index
    %163 = vector.load %arg14[%c0_123, %c0_124, %c0_125] : memref<2x43x256xf32, #tpu.memory_space<vmem>>, vector<1x43x256xf32>
    %164 = vector.shape_cast %163 : vector<1x43x256xf32> to vector<43x256xf32>
    %165 = arith.mulf %162, %164 : vector<43x256xf32>
    %cst_126 = arith.constant dense<0.000000e+00> : vector<256xf32>
    %166 = vector.multi_reduction <add>, %165, %cst_126 [0] : vector<43x256xf32> to vector<256xf32>
    %167 = vector.shape_cast %166 : vector<256xf32> to vector<1x256xf32>
    %cst_127 = arith.constant dense<0.000000e+00> : vector<1xf32>
    %168 = vector.multi_reduction <add>, %167, %cst_127 [1] : vector<1x256xf32> to vector<1xf32>
    %169 = vector.shape_cast %168 : vector<1xf32> to vector<1x1xf32>
    %c1_128 = arith.constant 1 : index
    %c0_129 = arith.constant 0 : index
    %c0_130 = arith.constant 0 : index
    %170 = vector.load %arg14[%c1_128, %c0_129, %c0_130] : memref<2x43x256xf32, #tpu.memory_space<vmem>>, vector<1x43x256xf32>
    %171 = vector.shape_cast %170 : vector<1x43x256xf32> to vector<43x256xf32>
    %172 = arith.mulf %162, %171 : vector<43x256xf32>
    %cst_131 = arith.constant dense<0.000000e+00> : vector<256xf32>
    %173 = vector.multi_reduction <add>, %172, %cst_131 [0] : vector<43x256xf32> to vector<256xf32>
    %174 = vector.shape_cast %173 : vector<256xf32> to vector<1x256xf32>
    %cst_132 = arith.constant dense<0.000000e+00> : vector<1xf32>
    %175 = vector.multi_reduction <add>, %174, %cst_132 [1] : vector<1x256xf32> to vector<1xf32>
    %176 = vector.shape_cast %175 : vector<1xf32> to vector<1x1xf32>
    %177 = tpu.concatenate %169, %176 in 1 : vector<1x1xf32>, vector<1x1xf32> -> vector<1x2xf32>
    %c0_133 = arith.constant 0 : index
    %c0_134 = arith.constant 0 : index
    %178 = vector.load %arg15[%c0_133, %c0_134] : memref<1x2xf32, #tpu.memory_space<vmem>>, vector<1x2xf32>
    %179 = arith.addf %177, %178 : vector<1x2xf32>
    %c0_135 = arith.constant 0 : index
    %c0_136 = arith.constant 0 : index
    %c0_137 = arith.constant 0 : index
    %180 = vector.load %arg16[%c0_135, %c0_136, %c0_137] : memref<1x1x2xf32, #tpu.memory_space<vmem>>, vector<1x1x2xf32>
    %181 = vector.shape_cast %180 : vector<1x1x2xf32> to vector<1x2xf32>
    %182 = vector.shape_cast %179 : vector<1x2xf32> to vector<1x1x2xf32>
    tpu.vector_store %arg16[%c0_135, %c0_136, %c0_137], %182 {strides = array<i32>} : memref<1x1x2xf32, #tpu.memory_space<vmem>>, vector<1x1x2xf32>,
    return
  }
  func.func @transform_0(%arg0: i32) -> (i32, i32, i32, i32) {
    %c0_i32 = arith.constant 0 : i32
    %c0_i32_0 = arith.constant 0 : i32
    %c0_i32_1 = arith.constant 0 : i32
    %c0_i32_2 = arith.constant 0 : i32
    return %arg0, %c0_i32, %c0_i32_0, %c0_i32_1 : i32, i32, i32, i32
  }
  func.func @transform_1(%arg0: i32) -> (i32, i32) {
    %c0_i32 = arith.constant 0 : i32
    %c0_i32_0 = arith.constant 0 : i32
    %c0_i32_1 = arith.constant 0 : i32
    return %c0_i32, %c0_i32_0 : i32, i32
  }
  func.func @transform_2(%arg0: i32) -> (i32, i32) {
    %c0_i32 = arith.constant 0 : i32
    %c0_i32_0 = arith.constant 0 : i32
    %c0_i32_1 = arith.constant 0 : i32
    return %c0_i32, %c0_i32_0 : i32, i32
  }
  func.func @transform_3(%arg0: i32) -> (i32, i32) {
    %c0_i32 = arith.constant 0 : i32
    %c0_i32_0 = arith.constant 0 : i32
    %c0_i32_1 = arith.constant 0 : i32
    return %c0_i32, %c0_i32_0 : i32, i32
  }
  func.func @transform_4(%arg0: i32) -> (i32, i32) {
    %c0_i32 = arith.constant 0 : i32
    %c0_i32_0 = arith.constant 0 : i32
    %c0_i32_1 = arith.constant 0 : i32
    return %c0_i32, %c0_i32_0 : i32, i32
  }
  func.func @transform_5(%arg0: i32) -> (i32, i32) {
    %c0_i32 = arith.constant 0 : i32
    %c0_i32_0 = arith.constant 0 : i32
    %c0_i32_1 = arith.constant 0 : i32
    return %c0_i32, %c0_i32_0 : i32, i32
  }
  func.func @transform_6(%arg0: i32) -> (i32, i32) {
    %c0_i32 = arith.constant 0 : i32
    %c0_i32_0 = arith.constant 0 : i32
    %c0_i32_1 = arith.constant 0 : i32
    return %c0_i32, %c0_i32_0 : i32, i32
  }
  func.func @transform_7(%arg0: i32) -> (i32, i32) {
    %c0_i32 = arith.constant 0 : i32
    %c0_i32_0 = arith.constant 0 : i32
    %c0_i32_1 = arith.constant 0 : i32
    return %c0_i32, %c0_i32_0 : i32, i32
  }
  func.func @transform_8(%arg0: i32) -> (i32, i32) {
    %c0_i32 = arith.constant 0 : i32
    %c0_i32_0 = arith.constant 0 : i32
    %c0_i32_1 = arith.constant 0 : i32
    return %c0_i32, %c0_i32_0 : i32, i32
  }
  func.func @transform_9(%arg0: i32) -> (i32, i32) {
    %c0_i32 = arith.constant 0 : i32
    %c0_i32_0 = arith.constant 0 : i32
    %c0_i32_1 = arith.constant 0 : i32
    return %c0_i32, %c0_i32_0 : i32, i32
  }
  func.func @transform_10(%arg0: i32) -> (i32, i32) {
    %c0_i32 = arith.constant 0 : i32
    %c0_i32_0 = arith.constant 0 : i32
    %c0_i32_1 = arith.constant 0 : i32
    return %c0_i32, %c0_i32_0 : i32, i32
  }
  func.func @transform_11(%arg0: i32) -> (i32, i32) {
    %c0_i32 = arith.constant 0 : i32
    %c0_i32_0 = arith.constant 0 : i32
    %c0_i32_1 = arith.constant 0 : i32
    return %c0_i32, %c0_i32_0 : i32, i32
  }
  func.func @transform_12(%arg0: i32) -> (i32, i32) {
    %c0_i32 = arith.constant 0 : i32
    %c0_i32_0 = arith.constant 0 : i32
    %c0_i32_1 = arith.constant 0 : i32
    return %c0_i32, %c0_i32_0 : i32, i32
  }
  func.func @transform_13(%arg0: i32) -> (i32, i32, i32) {
    %c0_i32 = arith.constant 0 : i32
    %c0_i32_0 = arith.constant 0 : i32
    %c0_i32_1 = arith.constant 0 : i32
    %c0_i32_2 = arith.constant 0 : i32
    return %c0_i32, %c0_i32_0, %c0_i32_1 : i32, i32, i32
  }
  func.func @transform_14(%arg0: i32) -> (i32, i32) {
    %c0_i32 = arith.constant 0 : i32
    %c0_i32_0 = arith.constant 0 : i32
    %c0_i32_1 = arith.constant 0 : i32
    return %c0_i32, %c0_i32_0 : i32, i32
  }
  func.func @transform_15(%arg0: i32) -> (i32, i32, i32) {
    %c0_i32 = arith.constant 0 : i32
    %c0_i32_0 = arith.constant 0 : i32
    %c0_i32_1 = arith.constant 0 : i32
    return %arg0, %c0_i32, %c0_i32_0 : i32, i32, i32
  }
}

</mosaic_0001>

<bundles_post_ra>
// kernel: deepconvnet_forward.1
= control target key start
LH: loop header
LB: loop body
LE: loop exit
PB: predicated region body
PF: predicated region fallthrough
CT: control target
= control target key end

     0   :  { %s14603_s0 = inlined_call_operand.vmem [shape: f32[2,2,373,10], index: 0, kind: input, shape index: {}]   ;;  %s14604_s1 = inlined_call_operand.vmem [shape: f32[10,128], index: 1, kind: input, shape index: {}]   ;;  %s14605_s2 = inlined_call_operand.vmem [shape: f32[640,128], index: 2, kind: input, shape index: {}]   ;;  %s14606_s3 = inlined_call_operand.vmem [shape: f32[640,128], index: 3, kind: input, shape index: {}]   ;;  %s14607_s4 = inlined_call_operand.vmem [shape: f32[640,256], index: 4, kind: input, shape index: {}]   ;;  %s14608_s5 = inlined_call_operand.vmem [shape: f32[1,128], index: 5, kind: input, shape index: {}]   ;;  %s14609_s6 = inlined_call_operand.vmem [shape: f32[1,128], index: 6, kind: input, shape index: {}]   ;;  %s14610_s7 = inlined_call_operand.vmem [shape: f32[1,128], index: 7, kind: input, shape index: {}]   ;;  %s14611_s8 = inlined_call_operand.vmem [shape: f32[1,128], index: 8, kind: input, shape index: {}]   ;;  %s14612_s9 = inlined_call_operand.vmem [shape: f32[1,128], index: 9, kind: input, shape index: {}]   ;;  %s14613_s10 = inlined_call_operand.vmem [shape: f32[1,128], index: 10, kind: input, shape index: {}]   ;;  %s14614_s11 = inlined_call_operand.vmem [shape: f32[1,256], index: 11, kind: input, shape index: {}]   ;;  %s14615_s12 = inlined_call_operand.vmem [shape: f32[1,256], index: 12, kind: input, shape index: {}]   ;;  %s14616_s13 = inlined_call_operand.vmem [shape: f32[2,43,256], index: 13, kind: input, shape index: {}]   ;;  %s14617_s14 = inlined_call_operand.vmem [shape: f32[1,2], index: 14, kind: input, shape index: {}]   ;;  %s14618_s15 = inlined_call_operand.hbm [shape: f32[2,1,2], index: 15, kind: output, shape index: {}]  }
   0x1   :  { %14625 = sst [smem:[#allocation16_spill]] %s14603_s0 }
   0x2   :  { %14626 = sst [smem:[#allocation17_spill]] %s14604_s1 }
   0x3   :  { %14627 = sst [smem:[#allocation18_spill]] %s14605_s2 }
   0x4   :  { %14628 = sst [smem:[#allocation19_spill]] %s14606_s3 }
   0x5   :  { %14629 = sst [smem:[#allocation20_spill]] %s14607_s4 }
   0x6   :  { %20 = vsyncpa [#allocation6], 0 }
   0x7   :  { %22 = vsyncpa [#allocation6 + $0x1], 0  ;;  %s9024_s18 = smov 0   ;;  %s9026_s19 = smov 0  }
   0x8   :  { %s9028_s20 = smov 0   ;;  %s9030_s21 = smov 0  }
   0x9 LB: > { %s9045_s22 = sadd.s32 4294967295, %s8939_s21   ;;  %s6645_s23 = sadd.s32 4294967294, %s8939_s21   ;;  %s8939_s21 = sphi %s9030_s21, %s14661_s21   ;;  %s8935_s20 = sphi %s9028_s20, %s14660_s20   ;;  %s8931_s19 = sphi %s9026_s19, %s14659_s19   ;;  %s8927_s18 = sphi %s9024_s18, %s14658_s18  }
   0xa   : > { %s9049_s24 = sadd.s32 1, %s8939_s21   ;;  %s355_s25 = sadd.s32 1, %s8935_s20 }
   0xb   : > { %s352_s26 = ssub.s32 %s8939_s21, %s9049_s24  ;;  %p365_p0 = scmp.ne.s32.totalorder %s8935_s20, %s8931_s19 }
   0xc   : > { %p353_p1 = scmp.eq.s32.totalorder %s352_s26, 0  ;;  %p366_p2 = scmp.eq.s32.totalorder %s9045_s22, 1 }
   0xd   : > { %p371_p3 = scmp.ne.s32.totalorder %s8931_s19, %s8927_s18  ;;  %p372_p4 = scmp.eq.s32.totalorder %s6645_s23, 1 }
   0xe   : > { %s9060_s27 = scalar_select %p353_p1, %s8935_s20, %s355_s25  }
   0xf   : > { %p9062_p5 = por %p366_p2, %p365_p0  ;;  %p9066_p6 = por %p372_p4, %p371_p3 }
  0x10   : > { %14630 = sst [smem:[#allocation8_spill]] %s9060_s27  ;;  %p6648_p7 = scmp.ge.s32.totalorder %s8939_s21, 1 }
  0x11   : > { %p440_p8 = scmp.lt.s32.totalorder %s8939_s21, 3 }
  0x13   : > { %p441_p9 = pnand %p6648_p7, %p440_p8 }
  0x15   : > { %444 = sbr.rel (%p441_p9) target bundleno = 1741 (0x6cd), region = 80 }
  0x1a   : > { %s14633_s1 = sld [smem:[#allocation17_spill]]  ;;  %vm685_vm0 = vcmask 1041408   ;;  %v14619_v1 = vmov 0.0   ;;  %p487_p10 = scmp.lt.s32.totalorder %s9045_s22, 1  ;;  %vm8942_vm1 = vmmov 0   ;;  %vm543_vm2 = vcmask 80896  }
  0x1b   : > { %7506 = vmatprep.subr.mxu0 %v14619_v1  ;;  %7651 = vmatprep.subr.mxu1 %v14619_v1  ;;  %s14634_s0 = sld [smem:[#allocation16_spill]]  ;;  %s6999_s30 = sshll.u32 %s9045_s22, 4 }
  0x1c   : > { %s488_s25 = scalar_select %p487_p10, %s9045_s22, 1  ;;  %7510 = vmatprep.mubr.msk.f32.mxu0 %vm8942_vm1, %v14619_v1  ;;  %7655 = vmatprep.mubr.msk.f32.mxu1 %vm8942_vm1, %v14619_v1 }
  0x1d   : > { %s14635_s2 = sld [smem:[#allocation18_spill]] }
  0x1e   : > { %s8130_s26 = smul.u32 752, %s488_s25  ;;  %s14636_s3 = sld [smem:[#allocation19_spill]] }
  0x1f   : > { %s14651_s4 = sld [smem:[#allocation20_spill]]  ;;  %s8943_s25 = smov [#allocation5]  }
  0x20   : > { %v493_v0 = vld [vmem:[%s14633_s1 + $0x8] sm:$0x3]  ;;  %v492_v2 = vld [vmem:[%s14633_s1] sm:$0xff]  ;;  %s6588_s1 = scalar_lea.hbm %s14618_s15, %s6999_s30  ;;  %s8883_s22 = sshll.u32 %s8943_s25, 4  ;;  %s8884_s22 = int_to_ptr.vmem [resolvable:$false] %s8883_s22 }
  0x21   : > { %7507 = vmatpush3.msk.msra.mxu0 %vm685_vm0, %v493_v0  ;;  %7652 = vmatpush3.msk.msra.mxu1 %vm685_vm0, %v493_v0  ;;  %s9093_s17 = scalar_lea.vmem %s14634_s0, %s8130_s26  ;;  %s8885_s26 = scalar_lea.vmem %s8884_s22, 32 }
  0x22   : > { %7508 = vmatprep.subr.mxu0 %v14619_v1  ;;  %7653 = vmatprep.subr.mxu1 %v14619_v1  ;;  %v496_v3 = vld [vmem:[%s9093_s17] sm:$0xff]  ;;  %v6747_v4 = vld [vmem:[%s9093_s17 + $0x178] sm:$0xff]  ;;  %v497_v5 = vld [vmem:[%s9093_s17 + $0x8] sm:$0xff] }
  0x23   : > { %7509 = vmatpush3.msra.mxu0 %v492_v2  ;;  %7654 = vmatpush3.msra.mxu1 %v492_v2  ;;  %v6748_v6 = vld [vmem:[%s9093_s17 + $0x180] sm:$0xff]  ;;  %v498_v7 = vld [vmem:[%s9093_s17 + $0x10] sm:$0xff]  ;;  %v6749_v8 = vld [vmem:[%s9093_s17 + $0x188] sm:$0xff] }
  0x24   : > { %2647 = vmatprep.subr.mxu0 %v14619_v1  ;;  %2827 = vmatprep.subr.mxu1 %v14619_v1  ;;  %v499_v9 = vld [vmem:[%s9093_s17 + $0x18] sm:$0xff]  ;;  %v6750_v10 = vld [vmem:[%s9093_s17 + $0x190] sm:$0xff]  ;;  %v500_v11 = vld [vmem:[%s9093_s17 + $0x20] sm:$0xff] }
  0x25   : > { %7511 = vmatmul.mubr.msk.f32.vlgmr.msra.gmra.mxu0 %vm543_vm2, %v496_v3  ;;  %7656 = vmatmul.mubr.msk.f32.vlgmr.msra.gmra.mxu1 %vm543_vm2, %v6747_v4  ;;  %v6751_v12 = vld [vmem:[%s9093_s17 + $0x198] sm:$0xff]  ;;  %v501_v13 = vld [vmem:[%s9093_s17 + $0x28] sm:$0xff]  ;;  %v6752_v14 = vld [vmem:[%s9093_s17 + $0x1a0] sm:$0xff] }
  0x26   : > { %7513 = vmatprep.mubr.msk.f32.mxu0 %vm8942_vm1, %v14619_v1  ;;  %7658 = vmatprep.mubr.msk.f32.mxu1 %vm8942_vm1, %v14619_v1  ;;  %v502_v15 = vld [vmem:[%s9093_s17 + $0x30] sm:$0xff]  ;;  %v6753_v16 = vld [vmem:[%s9093_s17 + $0x1a8] sm:$0xff]  ;;  %v2351_v17 = vld [vmem:[%s14635_s2 + $0x78] sm:$0xff] }
  0x27   : > { %2648 = vmatpush1.msra.mxu0 %v2351_v17  ;;  %v2383_v18 = vld [vmem:[%s14635_s2 + $0x178] sm:$0xff]  ;;  %v2350_v19 = vld [vmem:[%s14635_s2 + $0x70] sm:$0xff]  ;;  %v2349_v23 = vld [vmem:[%s14635_s2 + $0x68] sm:$0xff] }
  0x28   : > { %2828 = vmatpush1.msra.mxu1 %v2383_v18  ;;  %2649 = vmatprep.subr.mxu0 %v14619_v1  ;;  %v2382_v20 = vld [vmem:[%s14635_s2 + $0x170] sm:$0xff]  ;;  %v503_v21 = vld [vmem:[%s9093_s17 + $0x38] sm:$0xff]  ;;  %v2381_v24 = vld [vmem:[%s14635_s2 + $0x168] sm:$0xff] }
  0x29   : > { %7514 = vmatmul.mubr.msk.f32.gmra.mxu0 %vm543_vm2, %v497_v5  ;;  %7659 = vmatmul.mubr.msk.f32.gmra.mxu1 %vm543_vm2, %v6748_v6  ;;  %v6754_v22 = vld [vmem:[%s9093_s17 + $0x1b0] sm:$0xff]  ;;  %v504_v25 = vld [vmem:[%s9093_s17 + $0x40] sm:$0xff]  ;;  %v6755_v26 = vld [vmem:[%s9093_s17 + $0x1b8] sm:$0xff] }
  0x2a   : > { %7516 = vmatprep.mubr.msk.f32.mxu0 %vm8942_vm1, %v14619_v1  ;;  %7661 = vmatprep.mubr.msk.f32.mxu1 %vm8942_vm1, %v14619_v1  ;;  %v2348_v27 = vld [vmem:[%s14635_s2 + $0x60] sm:$0xff]  ;;  %v505_v29 = vld [vmem:[%s9093_s17 + $0x48] sm:$0xff]  ;;  %v2347_v31 = vld [vmem:[%s14635_s2 + $0x58] sm:$0xff] }
  0x2b   : > { %2650 = vmatpush1.msra.mxu0 %v2350_v19  ;;  %2829 = vmatprep.subr.mxu1 %v14619_v1  ;;  %v2380_v28 = vld [vmem:[%s14635_s2 + $0x160] sm:$0xff]  ;;  %v2379_v32 = vld [vmem:[%s14635_s2 + $0x158] sm:$0xff]  ;;  %v506_v33 = vld [vmem:[%s9093_s17 + $0x50] sm:$0xff] }
  0x2c   : > { %2830 = vmatpush1.msra.mxu1 %v2382_v20  ;;  %2651 = vmatprep.subr.mxu0 %v14619_v1  ;;  %v6756_v30 = vld [vmem:[%s9093_s17 + $0x1c0] sm:$0xff]  ;;  %v6757_v34 = vld [vmem:[%s9093_s17 + $0x1c8] sm:$0xff]  ;;  %v2346_v35 = vld [vmem:[%s14635_s2 + $0x50] sm:$0xff] }
  0x2d   : > { %7517 = vmatmul.mubr.msk.f32.gmra.mxu0 %vm543_vm2, %v498_v7  ;;  %7662 = vmatmul.mubr.msk.f32.gmra.mxu1 %vm543_vm2, %v6749_v8  ;;  %v2378_v36 = vld [vmem:[%s14635_s2 + $0x150] sm:$0xff]  ;;  %v507_v37 = vld [vmem:[%s9093_s17 + $0x58] sm:$0xff]  ;;  %v2345_v39 = vld [vmem:[%s14635_s2 + $0x48] sm:$0xff] }
  0x2e   : > { %7519 = vmatprep.mubr.msk.f32.mxu0 %vm8942_vm1, %v14619_v1  ;;  %7664 = vmatprep.mubr.msk.f32.mxu1 %vm8942_vm1, %v14619_v1  ;;  %v6758_v38 = vld [vmem:[%s9093_s17 + $0x1d0] sm:$0xff]  ;;  %v2377_v40 = vld [vmem:[%s14635_s2 + $0x148] sm:$0xff]  ;;  %v508_v41 = vld [vmem:[%s9093_s17 + $0x60] sm:$0xff] }
  0x2f   : > { %2652 = vmatpush1.msra.mxu0 %v2349_v23  ;;  %2831 = vmatprep.subr.mxu1 %v14619_v1  ;;  %v6759_v42 = vld [vmem:[%s9093_s17 + $0x1d8] sm:$0xff]  ;;  %v2344_v43 = vld [vmem:[%s14635_s2 + $0x40] sm:$0xff]  ;;  %v509_v44 = vld [vmem:[%s9093_s17 + $0x68] sm:$0xff] }
  0x30   : > { %2832 = vmatpush1.msra.mxu1 %v2381_v24  ;;  %2653 = vmatprep.subr.mxu0 %v14619_v1  ;;  %v6760_v45 = vld [vmem:[%s9093_s17 + $0x1e0] sm:$0xff]  ;;  %v2343_v47 = vld [vmem:[%s14635_s2 + $0x38] sm:$0xff]  ;;  %v510_v48 = vld [vmem:[%s9093_s17 + $0x70] sm:$0xff] }
  0x31   : > { %7520 = vmatmul.mubr.msk.f32.gmra.mxu0 %vm543_vm2, %v499_v9  ;;  %7665 = vmatmul.mubr.msk.f32.gmra.mxu1 %vm543_vm2, %v6750_v10  ;;  %v2376_v46 = vld [vmem:[%s14635_s2 + $0x140] sm:$0xff]  ;;  %v6761_v49 = vld [vmem:[%s9093_s17 + $0x1e8] sm:$0xff]  ;;  %v2375_v50 = vld [vmem:[%s14635_s2 + $0x138] sm:$0xff] }
  0x32   : > { %7522 = vmatprep.mubr.msk.f32.mxu0 %vm8942_vm1, %v14619_v1  ;;  %7667 = vmatprep.mubr.msk.f32.mxu1 %vm8942_vm1, %v14619_v1  ;;  %v2342_v51 = vld [vmem:[%s14635_s2 + $0x30] sm:$0xff]  ;;  %v511_v52 = vld [vmem:[%s9093_s17 + $0x78] sm:$0xff]  ;;  %v2341_v54 = vld [vmem:[%s14635_s2 + $0x28] sm:$0xff] }
  0x33   : > { %2654 = vmatpush1.msra.mxu0 %v2348_v27  ;;  %2833 = vmatprep.subr.mxu1 %v14619_v1  ;;  %v6762_v53 = vld [vmem:[%s9093_s17 + $0x1f0] sm:$0xff]  ;;  %v512_v56 = vld [vmem:[%s9093_s17 + $0x80] sm:$0xff]  ;;  %v6763_v57 = vld [vmem:[%s9093_s17 + $0x1f8] sm:$0xff] }
  0x34   : > { %2834 = vmatpush1.msra.mxu1 %v2380_v28  ;;  %2655 = vmatprep.subr.mxu0 %v14619_v1  ;;  %v2374_v55 = vld [vmem:[%s14635_s2 + $0x130] sm:$0xff]  ;;  %v2340_v58 = vld [vmem:[%s14635_s2 + $0x20] sm:$0xff]  ;;  %v513_v59 = vld [vmem:[%s9093_s17 + $0x88] sm:$0xff] }
  0x35   : > { %7523 = vmatmul.mubr.msk.f32.gmra.mxu0 %vm543_vm2, %v500_v11  ;;  %7668 = vmatmul.mubr.msk.f32.gmra.mxu1 %vm543_vm2, %v6751_v12  ;;  %v6764_v60 = vld [vmem:[%s9093_s17 + $0x200] sm:$0xff]  ;;  %v2373_v61 = vld [vmem:[%s14635_s2 + $0x128] sm:$0xff]  ;;  %v2339_v62 = vld [vmem:[%s14635_s2 + $0x18] sm:$0xff] }
  0x36   : > { %7525 = vmatprep.mubr.msk.f32.mxu0 %vm8942_vm1, %v14619_v1  ;;  %7670 = vmatprep.mubr.msk.f32.mxu1 %vm8942_vm1, %v14619_v1  ;;  %v514_v63 = vld [vmem:[%s9093_s17 + $0x90] sm:$0xff]  ;;  %v6765_v0 = vld [vmem:[%s9093_s17 + $0x208] sm:$0xff]  ;;  %v2372_v2 = vld [vmem:[%s14635_s2 + $0x120] sm:$0xff] }
  0x37   : > { %2656 = vmatpush1.msra.mxu0 %v2347_v31  ;;  %2835 = vmatprep.subr.mxu1 %v14619_v1  ;;  %v2338_v3 = vld [vmem:[%s14635_s2 + $0x10] sm:$0xff]  ;;  %v2371_v4 = vld [vmem:[%s14635_s2 + $0x118] sm:$0xff]  ;;  %v2337_v7 = vld [vmem:[%s14635_s2 + $0x8] sm:$0xff] }
  0x38   : > { %2836 = vmatpush1.msra.mxu1 %v2379_v32  ;;  %2657 = vmatprep.subr.mxu0 %v14619_v1  ;;  %v515_v5 = vld [vmem:[%s9093_s17 + $0x98] sm:$0xff]  ;;  %v6766_v6 = vld [vmem:[%s9093_s17 + $0x210] sm:$0xff]  ;;  %v516_v9 = vld [vmem:[%s9093_s17 + $0xa0] sm:$0xff] }
  0x39   : > { %7526 = vmatmul.mubr.msk.f32.gmra.mxu0 %vm543_vm2, %v501_v13  ;;  %7671 = vmatmul.mubr.msk.f32.gmra.mxu1 %vm543_vm2, %v6752_v14  ;;  %v2370_v8 = vld [vmem:[%s14635_s2 + $0x110] sm:$0xff]  ;;  %v6767_v10 = vld [vmem:[%s9093_s17 + $0x218] sm:$0xff]  ;;  %v2336_v11 = vld [vmem:[%s14635_s2] sm:$0xff] }
  0x3a   : > { %7528 = vmatprep.mubr.msk.f32.mxu0 %vm8942_vm1, %v14619_v1  ;;  %7673 = vmatprep.mubr.msk.f32.mxu1 %vm8942_vm1, %v14619_v1  ;;  %v2369_v12 = vld [vmem:[%s14635_s2 + $0x108] sm:$0xff]  ;;  %v6768_v14 = vld [vmem:[%s9093_s17 + $0x220] sm:$0xff]  ;;  %v518_v17 = vld [vmem:[%s9093_s17 + $0xb0] sm:$0xff] }
  0x3b   : > { %2658 = vmatpush1.msra.mxu0 %v2346_v35  ;;  %2837 = vmatprep.subr.mxu1 %v14619_v1  ;;  %v517_v13 = vld [vmem:[%s9093_s17 + $0xa8] sm:$0xff]  ;;  %v2366_v19 = vld [vmem:[%s14635_s2 + $0xf0] sm:$0xff]  ;;  %v2399_v20 = vld [vmem:[%s14635_s2 + $0x1f8] sm:$0xff] }
  0x3c   : > { %2838 = vmatpush1.msra.mxu1 %v2378_v36  ;;  %2659 = vmatprep.subr.mxu0 %v14619_v1  ;;  %v6769_v18 = vld [vmem:[%s9093_s17 + $0x228] sm:$0xff]  ;;  %v2398_v24 = vld [vmem:[%s14635_s2 + $0x1f0] sm:$0xff]  ;;  %v2364_v27 = vld [vmem:[%s14635_s2 + $0xe0] sm:$0xff] }
  0x3d   : > { %7529 = vmatmul.mubr.msk.f32.gmra.mxu0 %vm543_vm2, %v502_v15  ;;  %7674 = vmatmul.mubr.msk.f32.gmra.mxu1 %vm543_vm2, %v6753_v16  ;;  %v2367_v15 = vld [vmem:[%s14635_s2 + $0xf8] sm:$0xff]  ;;  %v2368_v16 = vld [vmem:[%s14635_s2 + $0x100] sm:$0xff]  ;;  %v2365_v23 = vld [vmem:[%s14635_s2 + $0xe8] sm:$0xff] }
  0x3e   : > { %7531 = vmatprep.mubr.msk.f32.mxu0 %vm8942_vm1, %v14619_v1  ;;  %7676 = vmatprep.mubr.msk.f32.mxu1 %vm8942_vm1, %v14619_v1  ;;  %v2397_v28 = vld [vmem:[%s14635_s2 + $0x1e8] sm:$0xff]  ;;  %v2363_v31 = vld [vmem:[%s14635_s2 + $0xd8] sm:$0xff]  ;;  %v2396_v32 = vld [vmem:[%s14635_s2 + $0x1e0] sm:$0xff] }
  0x3f   : > { %2660 = vmatpush1.msra.mxu0 %v2345_v39  ;;  %2839 = vmatprep.subr.mxu1 %v14619_v1  ;;  %v2362_v35 = vld [vmem:[%s14635_s2 + $0xd0] sm:$0xff]  ;;  %v2395_v36 = vld [vmem:[%s14635_s2 + $0x1d8] sm:$0xff]  ;;  %v2361_v39 = vld [vmem:[%s14635_s2 + $0xc8] sm:$0xff] }
  0x40   : > { %2840 = vmatpush1.msra.mxu1 %v2377_v40  ;;  %2661 = vmatprep.subr.mxu0 %v14619_v1  ;;  %v2394_v40 = vld [vmem:[%s14635_s2 + $0x1d0] sm:$0xff] }
  0x41   : > { %7532 = vmatmul.mubr.msk.f32.gmra.mxu0 %vm543_vm2, %v503_v21  ;;  %7677 = vmatmul.mubr.msk.f32.gmra.mxu1 %vm543_vm2, %v6754_v22  ;;  %v519_v21 = vld [vmem:[%s9093_s17 + $0xb8] sm:$0xff]  ;;  %v6770_v22 = vld [vmem:[%s9093_s17 + $0x230] sm:$0xff] }
  0x42   : > { %7534 = vmatprep.mubr.msk.f32.mxu0 %vm8942_vm1, %v14619_v1  ;;  %7679 = vmatprep.mubr.msk.f32.mxu1 %vm8942_vm1, %v14619_v1 }
  0x43   : > { %2662 = vmatpush1.msra.mxu0 %v2344_v43  ;;  %2841 = vmatprep.subr.mxu1 %v14619_v1  ;;  %v2360_v43 = vld [vmem:[%s14635_s2 + $0xc0] sm:$0xff] }
  0x44   : > { %2842 = vmatpush1.msra.mxu1 %v2376_v46  ;;  %2663 = vmatprep.subr.mxu0 %v14619_v1  ;;  %v6776_v46 = vld [vmem:[%s9093_s17 + $0x260] sm:$0xff] }
  0x45   : > { %7535 = vmatmul.mubr.msk.f32.gmra.mxu0 %vm543_vm2, %v504_v25  ;;  %7680 = vmatmul.mubr.msk.f32.gmra.mxu1 %vm543_vm2, %v6755_v26  ;;  %v520_v25 = vld [vmem:[%s9093_s17 + $0xc0] sm:$0xff]  ;;  %v6771_v26 = vld [vmem:[%s9093_s17 + $0x238] sm:$0xff] }
  0x46   : > { %7537 = vmatprep.mubr.msk.f32.mxu0 %vm8942_vm1, %v14619_v1  ;;  %7682 = vmatprep.mubr.msk.f32.mxu1 %vm8942_vm1, %v14619_v1 }
  0x47   : > { %2664 = vmatpush1.msra.mxu0 %v2343_v47  ;;  %2843 = vmatprep.subr.mxu1 %v14619_v1  ;;  %v2359_v47 = vld [vmem:[%s14635_s2 + $0xb8] sm:$0xff] }
  0x48   : > { %2665 = vmatprep.subr.mxu0 %v14619_v1  ;;  %2844 = vmatpush1.msra.mxu1 %v2375_v50  ;;  %v6777_v50 = vld [vmem:[%s9093_s17 + $0x268] sm:$0xff] }
  0x49   : > { %7538 = vmatmul.mubr.msk.f32.gmra.mxu0 %vm543_vm2, %v505_v29  ;;  %7683 = vmatmul.mubr.msk.f32.gmra.mxu1 %vm543_vm2, %v6756_v30  ;;  %v521_v29 = vld [vmem:[%s9093_s17 + $0xc8] sm:$0xff]  ;;  %v6772_v30 = vld [vmem:[%s9093_s17 + $0x240] sm:$0xff] }
  0x4a   : > { %7540 = vmatprep.mubr.msk.f32.mxu0 %vm8942_vm1, %v14619_v1  ;;  %7685 = vmatprep.mubr.msk.f32.mxu1 %vm8942_vm1, %v14619_v1 }
  0x4b   : > { %2666 = vmatpush1.msra.mxu0 %v2342_v51  ;;  %2845 = vmatprep.subr.mxu1 %v14619_v1  ;;  %v2358_v51 = vld [vmem:[%s14635_s2 + $0xb0] sm:$0xff] }
  0x4c   : > { %2667 = vmatprep.subr.mxu0 %v14619_v1  ;;  %2846 = vmatpush1.msra.mxu1 %v2374_v55  ;;  %v2357_v55 = vld [vmem:[%s14635_s2 + $0xa8] sm:$0xff] }
  0x4d   : > { %7541 = vmatmul.mubr.msk.f32.gmra.mxu0 %vm543_vm2, %v506_v33  ;;  %7686 = vmatmul.mubr.msk.f32.gmra.mxu1 %vm543_vm2, %v6757_v34  ;;  %v522_v33 = vld [vmem:[%s9093_s17 + $0xd0] sm:$0xff]  ;;  %v6773_v34 = vld [vmem:[%s9093_s17 + $0x248] sm:$0xff] }
  0x4e   : > { %7543 = vmatprep.mubr.msk.f32.mxu0 %vm8942_vm1, %v14619_v1  ;;  %7688 = vmatprep.mubr.msk.f32.mxu1 %vm8942_vm1, %v14619_v1 }
  0x4f   : > { %2668 = vmatpush1.msra.mxu0 %v2341_v54  ;;  %2847 = vmatprep.subr.mxu1 %v14619_v1  ;;  %v6778_v54 = vld [vmem:[%s9093_s17 + $0x270] sm:$0xff] }
  0x50   : > { %2669 = vmatprep.subr.mxu0 %v14619_v1  ;;  %2848 = vmatpush1.msra.mxu1 %v2373_v61  ;;  %v529_v61 = vld [vmem:[%s9093_s17 + $0x108] sm:$0xff] }
  0x51   : > { %7544 = vmatmul.mubr.msk.f32.gmra.mxu0 %vm543_vm2, %v507_v37  ;;  %7689 = vmatmul.mubr.msk.f32.gmra.mxu1 %vm543_vm2, %v6758_v38  ;;  %v523_v37 = vld [vmem:[%s9093_s17 + $0xd8] sm:$0xff]  ;;  %v6774_v38 = vld [vmem:[%s9093_s17 + $0x250] sm:$0xff] }
  0x52   : > { %7546 = vmatprep.mubr.msk.f32.mxu0 %vm8942_vm1, %v14619_v1  ;;  %7691 = vmatprep.mubr.msk.f32.mxu1 %vm8942_vm1, %v14619_v1 }
  0x53   : > { %2670 = vmatpush1.msra.mxu0 %v2340_v58  ;;  %2849 = vmatprep.subr.mxu1 %v14619_v1  ;;  %v6779_v58 = vld [vmem:[%s9093_s17 + $0x278] sm:$0xff] }
  0x54   : > { %2671 = vmatprep.subr.mxu0 %v14619_v1  ;;  %2850 = vmatpush1.msra.mxu1 %v2372_v2  ;;  %v530_v2 = vld [vmem:[%s9093_s17 + $0x110] sm:$0xff] }
  0x55   : > { %7547 = vmatmul.mubr.msk.f32.gmra.mxu0 %vm543_vm2, %v508_v41  ;;  %7692 = vmatmul.mubr.msk.f32.gmra.mxu1 %vm543_vm2, %v6759_v42  ;;  %v524_v41 = vld [vmem:[%s9093_s17 + $0xe0] sm:$0xff]  ;;  %v6775_v42 = vld [vmem:[%s9093_s17 + $0x258] sm:$0xff] }
  0x56   : > { %7549 = vmatprep.mubr.msk.f32.mxu0 %vm8942_vm1, %v14619_v1  ;;  %7694 = vmatprep.mubr.msk.f32.mxu1 %vm8942_vm1, %v14619_v1 }
  0x57   : > { %2672 = vmatpush1.msra.mxu0 %v2339_v62  ;;  %2851 = vmatprep.subr.mxu1 %v14619_v1  ;;  %v6780_v62 = vld [vmem:[%s9093_s17 + $0x280] sm:$0xff] }
  0x58   : > { %2673 = vmatprep.subr.mxu0 %v14619_v1  ;;  %2852 = vmatpush1.msra.mxu1 %v2371_v4  ;;  %v2354_v4 = vld [vmem:[%s14635_s2 + $0x90] sm:$0xff] }
  0x59   : > { %7550 = vmatmul.mubr.msk.f32.gmra.mxu0 %vm543_vm2, %v509_v44  ;;  %7695 = vmatmul.mubr.msk.f32.gmra.mxu1 %vm543_vm2, %v6760_v45  ;;  %v2393_v44 = vld [vmem:[%s14635_s2 + $0x1c8] sm:$0xff] }
  0x5a   : > { %7552 = vmatprep.mubr.msk.f32.mxu0 %vm8942_vm1, %v14619_v1  ;;  %7697 = vmatprep.mubr.msk.f32.mxu1 %vm8942_vm1, %v14619_v1  ;;  %v525_v45 = vld [vmem:[%s9093_s17 + $0xe8] sm:$0xff] }
  0x5b   : > { %2674 = vmatpush1.msra.mxu0 %v2338_v3  ;;  %2853 = vmatprep.subr.mxu1 %v14619_v1  ;;  %v6781_v3 = vld [vmem:[%s9093_s17 + $0x288] sm:$0xff] }
  0x5c   : > { %2675 = vmatprep.subr.mxu0 %v14619_v1  ;;  %2854 = vmatpush1.msra.mxu1 %v2370_v8  ;;  %v2353_v8 = vld [vmem:[%s14635_s2 + $0x88] sm:$0xff] }
  0x5d   : > { %7553 = vmatmul.mubr.msk.f32.gmra.mxu0 %vm543_vm2, %v510_v48  ;;  %7698 = vmatmul.mubr.msk.f32.gmra.mxu1 %vm543_vm2, %v6761_v49  ;;  %v2392_v48 = vld [vmem:[%s14635_s2 + $0x1c0] sm:$0xff]  ;;  %v526_v49 = vld [vmem:[%s9093_s17 + $0xf0] sm:$0xff] }
  0x5e   : > { %7555 = vmatprep.mubr.msk.f32.mxu0 %vm8942_vm1, %v14619_v1  ;;  %7700 = vmatprep.mubr.msk.f32.mxu1 %vm8942_vm1, %v14619_v1 }
  0x5f   : > { %2676 = vmatpush1.msra.mxu0 %v2337_v7  ;;  %2855 = vmatprep.subr.mxu1 %v14619_v1  ;;  %v6782_v7 = vld [vmem:[%s9093_s17 + $0x290] sm:$0xff] }
  0x60   : > { %2677 = vmatprep.subr.mxu0 %v14619_v1  ;;  %2856 = vmatpush1.msra.mxu1 %v2369_v12  ;;  %v2352_v12 = vld [vmem:[%s14635_s2 + $0x80] sm:$0xff] }
  0x61   : > { %7556 = vmatmul.mubr.msk.f32.gmra.mxu0 %vm543_vm2, %v511_v52  ;;  %7701 = vmatmul.mubr.msk.f32.gmra.mxu1 %vm543_vm2, %v6762_v53  ;;  %v2391_v52 = vld [vmem:[%s14635_s2 + $0x1b8] sm:$0xff] }
  0x62   : > { %7558 = vmatprep.mubr.msk.f32.mxu0 %vm8942_vm1, %v14619_v1  ;;  %7703 = vmatprep.mubr.msk.f32.mxu1 %vm8942_vm1, %v14619_v1  ;;  %v527_v53 = vld [vmem:[%s9093_s17 + $0xf8] sm:$0xff] }
  0x63   : > { %2678 = vmatpush1.msra.mxu0 %v2336_v11  ;;  %2857 = vmatprep.subr.mxu1 %v14619_v1  ;;  %v6783_v11 = vld [vmem:[%s9093_s17 + $0x298] sm:$0xff] }
  0x64   : > { %2679 = vmatprep.subr.mxu0 %v14619_v1  ;;  %2858 = vmatpush1.msra.mxu1 %v2368_v16  ;;  %v2384_v16 = vld [vmem:[%s14635_s2 + $0x180] sm:$0xff] }
  0x65   : > { %7559 = vmatmul.mubr.msk.f32.gmra.mxu0 %vm543_vm2, %v512_v56  ;;  %7704 = vmatmul.mubr.msk.f32.gmra.mxu1 %vm543_vm2, %v6763_v57  ;;  %v2390_v56 = vld [vmem:[%s14635_s2 + $0x1b0] sm:$0xff]  ;;  %v528_v57 = vld [vmem:[%s9093_s17 + $0x100] sm:$0xff] }
  0x66   : > { %7561 = vmatprep.mubr.msk.f32.mxu0 %vm8942_vm1, %v14619_v1  ;;  %7706 = vmatprep.mubr.msk.f32.mxu1 %vm8942_vm1, %v14619_v1 }
  0x67   : > { %2680 = vmatpush2.msra.mxu0 %v2367_v15  ;;  %2859 = vmatprep.subr.mxu1 %v14619_v1  ;;  %v6784_v15 = vld [vmem:[%s9093_s17 + $0x2a0] sm:$0xff] }
  0x68   : > { %2681 = vmatprep.subr.mxu0 %v14619_v1  ;;  %2860 = vmatpush2.msra.mxu1 %v2399_v20  ;;  %v6786_v20 = vld [vmem:[%s9093_s17 + $0x2b0] sm:$0xff] }
  0x69   : > { %7562 = vmatmul.mubr.msk.f32.gmra.mxu0 %vm543_vm2, %v513_v59  ;;  %7707 = vmatmul.mubr.msk.f32.gmra.mxu1 %vm543_vm2, %v6764_v60  ;;  %v2356_v59 = vld [vmem:[%s14635_s2 + $0xa0] sm:$0xff]  ;;  %v2389_v60 = vld [vmem:[%s14635_s2 + $0x1a8] sm:$0xff] }
  0x6a   : > { %7564 = vmatprep.mubr.msk.f32.mxu0 %vm8942_vm1, %v14619_v1  ;;  %7709 = vmatprep.mubr.msk.f32.mxu1 %vm8942_vm1, %v14619_v1 }
  0x6b   : > { %2682 = vmatpush2.msra.mxu0 %v2366_v19  ;;  %2861 = vmatprep.subr.mxu1 %v14619_v1  ;;  %v535_v19 = vld [vmem:[%s9093_s17 + $0x138] sm:$0xff] }
  0x6c   : > { %2683 = vmatprep.subr.mxu0 %v14619_v1  ;;  %2862 = vmatpush2.msra.mxu1 %v2398_v24  ;;  %v6788_v24 = vld [vmem:[%s9093_s17 + $0x2c0] sm:$0xff] }
  0x6d   : > { %7565 = vmatmul.mubr.msk.f32.gmra.mxu0 %vm543_vm2, %v514_v63  ;;  %7710 = vmatmul.mubr.msk.f32.gmra.mxu1 %vm543_vm2, %v6765_v0  ;;  %v2355_v63 = vld [vmem:[%s14635_s2 + $0x98] sm:$0xff]  ;;  %v2388_v0 = vld [vmem:[%s14635_s2 + $0x1a0] sm:$0xff] }
  0x6e   : > { %7567 = vmatprep.mubr.msk.f32.mxu0 %vm8942_vm1, %v14619_v1  ;;  %7712 = vmatprep.mubr.msk.f32.mxu1 %vm8942_vm1, %v14619_v1 }
  0x6f   : > { %2684 = vmatpush2.msra.mxu0 %v2365_v23  ;;  %2863 = vmatprep.subr.mxu1 %v14619_v1  ;;  %v537_v23 = vld [vmem:[%s9093_s17 + $0x148] sm:$0xff] }
  0x70   : > { %2685 = vmatprep.subr.mxu0 %v14619_v1  ;;  %2864 = vmatpush2.msra.mxu1 %v2397_v28  ;;  %v6790_v28 = vld [vmem:[%s9093_s17 + $0x2d0] sm:$0xff] }
  0x71   : > { %7568 = vmatmul.mubr.msk.f32.gmra.mxu0 %vm543_vm2, %v515_v5  ;;  %7713 = vmatmul.mubr.msk.f32.gmra.mxu1 %vm543_vm2, %v6766_v6  ;;  %v2387_v5 = vld [vmem:[%s14635_s2 + $0x198] sm:$0xff] }
  0x72   : > { %7570 = vmatprep.mubr.msk.f32.mxu0 %vm8942_vm1, %v14619_v1  ;;  %7715 = vmatprep.mubr.msk.f32.mxu1 %vm8942_vm1, %v14619_v1  ;;  %v531_v6 = vld [vmem:[%s9093_s17 + $0x118] sm:$0xff] }
  0x73   : > { %2686 = vmatpush2.msra.mxu0 %v2364_v27  ;;  %2865 = vmatprep.subr.mxu1 %v14619_v1  ;;  %v539_v27 = vld [vmem:[%s9093_s17 + $0x158] sm:$0xff] }
  0x74   : > { %2687 = vmatprep.subr.mxu0 %v14619_v1  ;;  %2866 = vmatpush2.msra.mxu1 %v2396_v32  ;;  %v6792_v32 = vld [vmem:[%s9093_s17 + $0x2e0] sm:$0xff] }
  0x75   : > { %7571 = vmatmul.mubr.msk.f32.gmra.mxu0 %vm543_vm2, %v516_v9  ;;  %7716 = vmatmul.mubr.msk.f32.gmra.mxu1 %vm543_vm2, %v6767_v10  ;;  %v2386_v9 = vld [vmem:[%s14635_s2 + $0x190] sm:$0xff]  ;;  %v532_v10 = vld [vmem:[%s9093_s17 + $0x120] sm:$0xff] }
  0x76   : > { %7573 = vmatprep.mubr.msk.f32.mxu0 %vm8942_vm1, %v14619_v1  ;;  %7718 = vmatprep.mubr.msk.f32.mxu1 %vm8942_vm1, %v14619_v1 }
  0x77   : > { %2688 = vmatpush2.msra.mxu0 %v2363_v31  ;;  %2867 = vmatprep.subr.mxu1 %v14619_v1  ;;  %v541_v31 = vld [vmem:[%s9093_s17 + $0x168] sm:$0xff] }
  0x78   : > { %2689 = vmatprep.subr.mxu0 %v14619_v1  ;;  %2868 = vmatpush2.msra.mxu1 %v2395_v36  ;;  %v9731_v36 = vld [vmem:[%s14609_s6] ss:$0 sm:$0xff] }
  0x79   : > { %7574 = vmatmul.mubr.msk.f32.gmra.mxu0 %vm543_vm2, %v517_v13  ;;  %7719 = vmatmul.mubr.msk.f32.gmra.mxu1 %vm543_vm2, %v6768_v14  ;;  %v2385_v13 = vld [vmem:[%s14635_s2 + $0x188] sm:$0xff] }
  0x7a   : > { %7576 = vmatprep.mubr.msk.f32.mxu0 %vm8942_vm1, %v14619_v1  ;;  %7721 = vmatprep.mubr.msk.f32.mxu1 %vm8942_vm1, %v14619_v1  ;;  %v533_v14 = vld [vmem:[%s9093_s17 + $0x128] sm:$0xff] }
  0x7b   : > { %2690 = vmatpush2.msra.mxu0 %v2362_v35  ;;  %2869 = vmatprep.subr.mxu1 %v14619_v1  ;;  %v9726_v35 = vld [vmem:[%s14608_s5] ss:$0 sm:$0xff] }
  0x7c   : > { %2691 = vmatprep.subr.mxu0 %v14619_v1  ;;  %2870 = vmatpush2.msra.mxu1 %v2394_v40 }
  0x7d   : > { %7577 = vmatmul.mubr.msk.f32.gmra.mxu0 %vm543_vm2, %v518_v17  ;;  %7722 = vmatmul.mubr.msk.f32.gmra.mxu1 %vm543_vm2, %v6769_v18  ;;  %v534_v17 = vld [vmem:[%s9093_s17 + $0x130] sm:$0xff]  ;;  %v6785_v18 = vld [vmem:[%s9093_s17 + $0x2a8] sm:$0xff] }
  0x7e   : > { %7579 = vmatprep.mubr.msk.f32.mxu0 %vm8942_vm1, %v14619_v1  ;;  %7724 = vmatprep.mubr.msk.f32.mxu1 %vm8942_vm1, %v14619_v1 }
  0x7f   : > { %2692 = vmatpush2.msra.mxu0 %v2361_v39  ;;  %2871 = vmatprep.subr.mxu1 %v14619_v1 }
  0x80   : > { %2693 = vmatprep.subr.mxu0 %v14619_v1  ;;  %2872 = vmatpush2.msra.mxu1 %v2393_v44 }
  0x81   : > { %7580 = vmatmul.mubr.msk.f32.gmra.mxu0 %vm543_vm2, %v519_v21  ;;  %7725 = vmatmul.mubr.msk.f32.gmra.mxu1 %vm543_vm2, %v6770_v22  ;;  %v536_v21 = vld [vmem:[%s9093_s17 + $0x140] sm:$0xff]  ;;  %v6787_v22 = vld [vmem:[%s9093_s17 + $0x2b8] sm:$0xff] }
  0x82   : > { %7582 = vmatprep.mubr.msk.f32.mxu0 %vm8942_vm1, %v14619_v1  ;;  %7727 = vmatprep.mubr.msk.f32.mxu1 %vm8942_vm1, %v14619_v1 }
  0x83   : > { %2694 = vmatpush2.msra.mxu0 %v2360_v43  ;;  %2873 = vmatprep.subr.mxu1 %v14619_v1 }
  0x84   : > { %2695 = vmatprep.subr.mxu0 %v14619_v1  ;;  %2874 = vmatpush2.msra.mxu1 %v2392_v48 }
  0x85   : > { %7583 = vmatmul.mubr.msk.f32.gmra.mxu0 %vm543_vm2, %v520_v25  ;;  %7728 = vmatmul.mubr.msk.f32.gmra.mxu1 %vm543_vm2, %v6771_v26  ;;  %v538_v25 = vld [vmem:[%s9093_s17 + $0x150] sm:$0xff]  ;;  %v6789_v26 = vld [vmem:[%s9093_s17 + $0x2c8] sm:$0xff] }
  0x86   : > { %7585 = vmatprep.mubr.msk.f32.mxu0 %vm8942_vm1, %v14619_v1  ;;  %7730 = vmatprep.mubr.msk.f32.mxu1 %vm8942_vm1, %v14619_v1 }
  0x87   : > { %2696 = vmatpush2.msra.mxu0 %v2359_v47  ;;  %2875 = vmatprep.subr.mxu1 %v14619_v1 }
  0x88   : > { %2697 = vmatprep.subr.mxu0 %v14619_v1  ;;  %2876 = vmatpush2.msra.mxu1 %v2391_v52 }
  0x89   : > { %7586 = vmatmul.mubr.msk.f32.gmra.mxu0 %vm543_vm2, %v521_v29  ;;  %7731 = vmatmul.mubr.msk.f32.gmra.mxu1 %vm543_vm2, %v6772_v30  ;;  %v540_v29 = vld [vmem:[%s9093_s17 + $0x160] sm:$0xff]  ;;  %v6791_v30 = vld [vmem:[%s9093_s17 + $0x2d8] sm:$0xff] }
  0x8a   : > { %7588 = vmatprep.mubr.msk.f32.mxu0 %vm8942_vm1, %v14619_v1  ;;  %7733 = vmatprep.mubr.msk.f32.mxu1 %vm8942_vm1, %v14619_v1 }
  0x8b   : > { %2698 = vmatpush2.msra.mxu0 %v2358_v51  ;;  %2877 = vmatprep.subr.mxu1 %v14619_v1 }
  0x8c   : > { %2699 = vmatprep.subr.mxu0 %v14619_v1  ;;  %2878 = vmatpush2.msra.mxu1 %v2390_v56 }
  0x8d   : > { %7589 = vmatmul.mubr.msk.f32.gmra.mxu0 %vm543_vm2, %v522_v33  ;;  %7734 = vmatmul.mubr.msk.f32.gmra.mxu1 %vm543_vm2, %v6773_v34  ;;  %v542_v33 = vld [vmem:[%s9093_s17 + $0x170] sm:$0x1f]  ;;  %v6793_v34 = vld [vmem:[%s9093_s17 + $0x2e8] sm:$0x1f]  ;;  %s485_s17 = sand.u32 1, %s8931_s19  }
  0x8e   : > { %7591 = vmatprep.mubr.msk.f32.mxu0 %vm8942_vm1, %v14619_v1  ;;  %7736 = vmatprep.mubr.msk.f32.mxu1 %vm8942_vm1, %v14619_v1  ;;  %s486_s16 = scalar_lea.vmem [#allocation5], %s485_s17  ;;  %s6578_s27 = scalar_lea.sflag [#allocation6], %s485_s17 }
  0x8f   : > { %2700 = vmatpush2.msra.mxu0 %v2357_v55  ;;  %2879 = vmatprep.subr.mxu1 %v14619_v1 }
  0x90   : > { %2701 = vmatprep.subr.mxu0 %v14619_v1  ;;  %2880 = vmatpush2.msra.mxu1 %v2389_v60 }
  0x91   : > { %7592 = vmatmul.mubr.msk.f32.gmra.mxu0 %vm543_vm2, %v523_v37  ;;  %7737 = vmatmul.mubr.msk.f32.gmra.mxu1 %vm543_vm2, %v6774_v38 }
  0x92   : > { %7594 = vmatprep.mubr.msk.f32.mxu0 %vm8942_vm1, %v14619_v1  ;;  %7739 = vmatprep.mubr.msk.f32.mxu1 %vm8942_vm1, %v14619_v1 }
  0x93   : > { %2702 = vmatpush2.msra.mxu0 %v2356_v59  ;;  %2881 = vmatprep.subr.mxu1 %v14619_v1 }
  0x94   : > { %2703 = vmatprep.subr.mxu0 %v14619_v1  ;;  %2882 = vmatpush2.msra.mxu1 %v2388_v0 }
  0x95   : > { %7595 = vmatmul.mubr.msk.f32.gmra.mxu0 %vm543_vm2, %v524_v41  ;;  %7740 = vmatmul.mubr.msk.f32.gmra.mxu1 %vm543_vm2, %v6775_v42 }
  0x96   : > { %7597 = vmatprep.mubr.msk.f32.mxu0 %vm8942_vm1, %v14619_v1  ;;  %7742 = vmatprep.mubr.msk.f32.mxu1 %vm8942_vm1, %v14619_v1 }
  0x97   : > { %2704 = vmatpush2.msra.mxu0 %v2355_v63  ;;  %2883 = vmatprep.subr.mxu1 %v14619_v1 }
  0x98   : > { %2705 = vmatprep.subr.mxu0 %v14619_v1  ;;  %2884 = vmatpush2.msra.mxu1 %v2387_v5 }
  0x99   : > { %7598 = vmatmul.mubr.msk.f32.gmra.mxu0 %vm543_vm2, %v525_v45  ;;  %7743 = vmatmul.mubr.msk.f32.gmra.mxu1 %vm543_vm2, %v6776_v46 }
  0x9a   : > { %7600 = vmatprep.mubr.msk.f32.mxu0 %vm8942_vm1, %v14619_v1  ;;  %7745 = vmatprep.mubr.msk.f32.mxu1 %vm8942_vm1, %v14619_v1 }
  0x9b   : > { %2706 = vmatpush2.msra.mxu0 %v2354_v4  ;;  %2885 = vmatprep.subr.mxu1 %v14619_v1 }
  0x9c   : > { %2707 = vmatprep.subr.mxu0 %v14619_v1  ;;  %2886 = vmatpush2.msra.mxu1 %v2386_v9 }
  0x9d   : > { %7601 = vmatmul.mubr.msk.f32.gmra.mxu0 %vm543_vm2, %v526_v49  ;;  %7746 = vmatmul.mubr.msk.f32.gmra.mxu1 %vm543_vm2, %v6777_v50 }
  0x9e   : > { %7603 = vmatprep.mubr.msk.f32.mxu0 %vm8942_vm1, %v14619_v1  ;;  %7748 = vmatprep.mubr.msk.f32.mxu1 %vm8942_vm1, %v14619_v1 }
  0x9f   : > { %2708 = vmatpush2.msra.mxu0 %v2353_v8  ;;  %2887 = vmatprep.subr.mxu1 %v14619_v1 }
  0xa0   : > { %2709 = vmatprep.subr.mxu0 %v14619_v1  ;;  %2888 = vmatpush2.msra.mxu1 %v2385_v13 }
  0xa1   : > { %7604 = vmatmul.mubr.msk.f32.gmra.mxu0 %vm543_vm2, %v527_v53  ;;  %7749 = vmatmul.mubr.msk.f32.gmra.mxu1 %vm543_vm2, %v6778_v54 }
  0xa2   : > { %7606 = vmatprep.mubr.msk.f32.mxu0 %vm8942_vm1, %v14619_v1  ;;  %7751 = vmatprep.mubr.msk.f32.mxu1 %vm8942_vm1, %v14619_v1 }
  0xa3   : > { %2710 = vmatpush2.msra.mxu0 %v2352_v12  ;;  %2889 = vmatprep.subr.mxu1 %v14619_v1 }
  0xa4   : > { %7796 = vmatprep.subr.mxu0 %v14619_v1  ;;  %2890 = vmatpush2.msra.mxu1 %v2384_v16 }
  0xa5   : > { %7607 = vmatmul.mubr.msk.f32.gmra.mxu0 %vm543_vm2, %v528_v57  ;;  %7752 = vmatmul.mubr.msk.f32.gmra.mxu1 %vm543_vm2, %v6779_v58 }
  0xa6   : > { %7609 = vmatprep.mubr.msk.f32.mxu0 %vm8942_vm1, %v14619_v1  ;;  %7754 = vmatprep.mubr.msk.f32.mxu1 %vm8942_vm1, %v14619_v1 }
  0xa7   : > { %3429 = vmatprep.subr.mxu1 %v14619_v1 }
  0xa9   : > { %7610 = vmatmul.mubr.msk.f32.gmra.mxu0 %vm543_vm2, %v529_v61  ;;  %7755 = vmatmul.mubr.msk.f32.gmra.mxu1 %vm543_vm2, %v6780_v62 }
  0xaa   : > { %7612 = vmatprep.mubr.msk.f32.mxu0 %vm8942_vm1, %v14619_v1  ;;  %7757 = vmatprep.mubr.msk.f32.mxu1 %vm8942_vm1, %v14619_v1 }
  0xad   : > { %7613 = vmatmul.mubr.msk.f32.gmra.mxu0 %vm543_vm2, %v530_v2  ;;  %7758 = vmatmul.mubr.msk.f32.gmra.mxu1 %vm543_vm2, %v6781_v3 }
  0xae   : > { %7615 = vmatprep.mubr.msk.f32.mxu0 %vm8942_vm1, %v14619_v1  ;;  %7760 = vmatprep.mubr.msk.f32.mxu1 %vm8942_vm1, %v14619_v1 }
  0xb1   : > { %7616 = vmatmul.mubr.msk.f32.gmra.mxu0 %vm543_vm2, %v531_v6  ;;  %7761 = vmatmul.mubr.msk.f32.gmra.mxu1 %vm543_vm2, %v6782_v7 }
  0xb2   : > { %7618 = vmatprep.mubr.msk.f32.mxu0 %vm8942_vm1, %v14619_v1  ;;  %7763 = vmatprep.mubr.msk.f32.mxu1 %vm8942_vm1, %v14619_v1 }
  0xb5   : > { %7619 = vmatmul.mubr.msk.f32.gmra.mxu0 %vm543_vm2, %v532_v10  ;;  %7764 = vmatmul.mubr.msk.f32.gmra.mxu1 %vm543_vm2, %v6783_v11 }
  0xb6   : > { %7621 = vmatprep.mubr.msk.f32.mxu0 %vm8942_vm1, %v14619_v1  ;;  %7766 = vmatprep.mubr.msk.f32.mxu1 %vm8942_vm1, %v14619_v1 }
  0xb9   : > { %7622 = vmatmul.mubr.msk.f32.gmra.mxu0 %vm543_vm2, %v533_v14  ;;  %7767 = vmatmul.mubr.msk.f32.gmra.mxu1 %vm543_vm2, %v6784_v15 }
  0xba   : > { %7624 = vmatprep.mubr.msk.f32.mxu0 %vm8942_vm1, %v14619_v1  ;;  %7769 = vmatprep.mubr.msk.f32.mxu1 %vm8942_vm1, %v14619_v1 }
  0xbd   : > { %7625 = vmatmul.mubr.msk.f32.gmra.mxu0 %vm543_vm2, %v534_v17  ;;  %7770 = vmatmul.mubr.msk.f32.gmra.mxu1 %vm543_vm2, %v6785_v18 }
  0xbe   : > { %7627 = vmatprep.mubr.msk.f32.mxu0 %vm8942_vm1, %v14619_v1  ;;  %7772 = vmatprep.mubr.msk.f32.mxu1 %vm8942_vm1, %v14619_v1 }
  0xc1   : > { %7628 = vmatmul.mubr.msk.f32.gmra.mxu0 %vm543_vm2, %v535_v19  ;;  %7773 = vmatmul.mubr.msk.f32.gmra.mxu1 %vm543_vm2, %v6786_v20 }
  0xc2   : > { %7630 = vmatprep.mubr.msk.f32.mxu0 %vm8942_vm1, %v14619_v1  ;;  %7775 = vmatprep.mubr.msk.f32.mxu1 %vm8942_vm1, %v14619_v1 }
  0xc5   : > { %7631 = vmatmul.mubr.msk.f32.gmra.mxu0 %vm543_vm2, %v536_v21  ;;  %7776 = vmatmul.mubr.msk.f32.gmra.mxu1 %vm543_vm2, %v6787_v22 }
  0xc6   : > { %7633 = vmatprep.mubr.msk.f32.mxu0 %vm8942_vm1, %v14619_v1  ;;  %7778 = vmatprep.mubr.msk.f32.mxu1 %vm8942_vm1, %v14619_v1 }
  0xc9   : > { %7634 = vmatmul.mubr.msk.f32.gmra.mxu0 %vm543_vm2, %v537_v23  ;;  %7779 = vmatmul.mubr.msk.f32.gmra.mxu1 %vm543_vm2, %v6788_v24 }
  0xca   : > { %7636 = vmatprep.mubr.msk.f32.mxu0 %vm8942_vm1, %v14619_v1  ;;  %7781 = vmatprep.mubr.msk.f32.mxu1 %vm8942_vm1, %v14619_v1 }
  0xcd   : > { %7637 = vmatmul.mubr.msk.f32.gmra.mxu0 %vm543_vm2, %v538_v25  ;;  %7782 = vmatmul.mubr.msk.f32.gmra.mxu1 %vm543_vm2, %v6789_v26 }
  0xce   : > { %7639 = vmatprep.mubr.msk.f32.mxu0 %vm8942_vm1, %v14619_v1  ;;  %7784 = vmatprep.mubr.msk.f32.mxu1 %vm8942_vm1, %v14619_v1 }
  0xd1   : > { %7640 = vmatmul.mubr.msk.f32.gmra.mxu0 %vm543_vm2, %v539_v27  ;;  %7785 = vmatmul.mubr.msk.f32.gmra.mxu1 %vm543_vm2, %v6790_v28 }
  0xd2   : > { %7642 = vmatprep.mubr.msk.f32.mxu0 %vm8942_vm1, %v14619_v1  ;;  %7787 = vmatprep.mubr.msk.f32.mxu1 %vm8942_vm1, %v14619_v1 }
  0xd5   : > { %7643 = vmatmul.mubr.msk.f32.gmra.mxu0 %vm543_vm2, %v540_v29  ;;  %7788 = vmatmul.mubr.msk.f32.gmra.mxu1 %vm543_vm2, %v6791_v30 }
  0xd6   : > { %7645 = vmatprep.mubr.msk.f32.mxu0 %vm8942_vm1, %v14619_v1  ;;  %7790 = vmatprep.mubr.msk.f32.mxu1 %vm8942_vm1, %v14619_v1 }
  0xd9   : > { %7646 = vmatmul.mubr.msk.f32.gmra.mxu0 %vm543_vm2, %v541_v31  ;;  %7791 = vmatmul.mubr.msk.f32.gmra.mxu1 %vm543_vm2, %v6792_v32 }
  0xda   : > { %7648 = vmatprep.mubr.msk.f32.mxu0 %vm8942_vm1, %v14619_v1  ;;  %7793 = vmatprep.mubr.msk.f32.mxu1 %vm8942_vm1, %v14619_v1 }
  0xdd   : > { %7649 = vmatmul.mubr.msk.f32.gmra.mxu0 %vm543_vm2, %v542_v33  ;;  %7794 = vmatmul.mubr.msk.f32.gmra.mxu1 %vm543_vm2, %v6793_v34 }
  0xe5   : > { %v755_v37 = vpop.f32.mrf.mxu0  ;;  %v1632_v38 = vpop.f32.mrf.mxu1 }
  0xe6   : > { %v995_v39 = vmul.f32 %v9726_v35, %v755_v37  ;;  %v1866_v40 = vmul.f32 %v9726_v35, %v1632_v38 }
  0xe7   : > { %v7512_v41 = vpop.f32.mrf.mxu0  ;;  %v7657_v42 = vpop.f32.mrf.mxu1 }
  0xe8   : > { %v9736_v43 = vadd.f32 %v9731_v36, %v995_v39  ;;  %v9739_v44 = vadd.f32 %v9731_v36, %v1866_v40 }
  0xe9   : > { %v760_v45 = vpop.f32.mrf.mxu0  ;;  %v1637_v46 = vpop.f32.mrf.mxu1 }
  0xea   : > { %v1142_v47 = vmin.f32 %v9736_v43, 0.0  ;;  %v2007_v48 = vmin.f32 %v9739_v44, 0.0  ;;  %v996_v49 = vmul.f32 %v9726_v35, %v760_v45  ;;  %v1867_v50 = vmul.f32 %v9726_v35, %v1637_v46 }
  0xeb   : > { %v7515_v51 = vpop.f32.mrf.mxu0  ;;  %v7660_v52 = vpop.f32.mrf.mxu1  ;;  %vm1095_vm3 = vcmp.gt.f32.partialorder %v9736_v43, 0.0  ;;  %vm1960_vm4 = vcmp.gt.f32.partialorder %v9739_v44, 0.0 }
  0xec   : > { %v1189_v53 = vmul.f32 1.442695, %v1142_v47  ;;  %v2054_v54 = vmul.f32 1.442695, %v2007_v48  ;;  %v9746_v55 = vadd.f32 %v9731_v36, %v996_v49  ;;  %v9749_v56 = vadd.f32 %v9731_v36, %v1867_v50 }
  0xed   : > { %v765_v57 = vpop.f32.mrf.mxu0  ;;  %v1642_v58 = vpop.f32.mrf.mxu1 }
  0xee   : > { %8172 = vpow2.f32 %v1189_v53  ;;  %v997_v59 = vmul.f32 %v9726_v35, %v765_v57  ;;  %v1868_v60 = vmul.f32 %v9726_v35, %v1642_v58  ;;  %v1143_v61 = vmin.f32 %v9746_v55, 0.0 }
  0xef   : > { %8174 = vpow2.f32 %v2054_v54  ;;  %v7518_v62 = vpop.f32.mrf.mxu0  ;;  %v7663_v63 = vpop.f32.mrf.mxu1  ;;  %v2008_v0 = vmin.f32 %v9749_v56, 0.0  ;;  %vm1096_vm5 = vcmp.gt.f32.partialorder %v9746_v55, 0.0  ;;  %vm1961_vm6 = vcmp.gt.f32.partialorder %v9749_v56, 0.0 }
  0xf0   : > { %v9756_v2 = vadd.f32 %v9731_v36, %v997_v59  ;;  %v9759_v3 = vadd.f32 %v9731_v36, %v1868_v60  ;;  %v1191_v4 = vmul.f32 1.442695, %v1143_v61 }
  0xf1   : > { %v770_v5 = vpop.f32.mrf.mxu0  ;;  %v1647_v6 = vpop.f32.mrf.mxu1  ;;  %v2056_v7 = vmul.f32 1.442695, %v2008_v0 }
  0xf2   : > { %v1144_v8 = vmin.f32 %v9756_v2, 0.0  ;;  %8176 = vpow2.f32 %v1191_v4  ;;  %v2009_v9 = vmin.f32 %v9759_v3, 0.0  ;;  %v998_v10 = vmul.f32 %v9726_v35, %v770_v5 }
  0xf3   : > { %v1869_v11 = vmul.f32 %v9726_v35, %v1647_v6  ;;  %v7521_v12 = vpop.f32.mrf.mxu0  ;;  %v7666_v13 = vpop.f32.mrf.mxu1  ;;  %8178 = vpow2.f32 %v2056_v7  ;;  %vm1097_vm7 = vcmp.gt.f32.partialorder %v9756_v2, 0.0  ;;  %vm1962_vm8 = vcmp.gt.f32.partialorder %v9759_v3, 0.0 }
  0xf4   : > { %v1193_v14 = vmul.f32 1.442695, %v1144_v8  ;;  %v2058_v15 = vmul.f32 1.442695, %v2009_v9  ;;  %v9766_v16 = vadd.f32 %v9731_v36, %v998_v10 }
  0xf5   : > { %v9769_v17 = vadd.f32 %v9731_v36, %v1869_v11  ;;  %v775_v18 = vpop.f32.mrf.mxu0  ;;  %v1652_v19 = vpop.f32.mrf.mxu1 }
  0xf6   : > { %8180 = vpow2.f32 %v1193_v14  ;;  %v999_v20 = vmul.f32 %v9726_v35, %v775_v18  ;;  %v1870_v21 = vmul.f32 %v9726_v35, %v1652_v19  ;;  %v1145_v22 = vmin.f32 %v9766_v16, 0.0 }
  0xf7   : > { %8182 = vpow2.f32 %v2058_v15  ;;  %v7524_v23 = vpop.f32.mrf.mxu0  ;;  %v7669_v24 = vpop.f32.mrf.mxu1  ;;  %v2010_v25 = vmin.f32 %v9769_v17, 0.0  ;;  %vm1098_vm9 = vcmp.gt.f32.partialorder %v9766_v16, 0.0  ;;  %vm1963_vm10 = vcmp.gt.f32.partialorder %v9769_v17, 0.0 }
  0xf8   : > { %v9776_v26 = vadd.f32 %v9731_v36, %v999_v20  ;;  %v9779_v27 = vadd.f32 %v9731_v36, %v1870_v21  ;;  %v1195_v28 = vmul.f32 1.442695, %v1145_v22 }
  0xf9   : > { %v780_v29 = vpop.f32.mrf.mxu0  ;;  %v1657_v30 = vpop.f32.mrf.mxu1  ;;  %v2060_v31 = vmul.f32 1.442695, %v2010_v25 }
  0xfa   : > { %v1146_v32 = vmin.f32 %v9776_v26, 0.0  ;;  %8184 = vpow2.f32 %v1195_v28  ;;  %v2011_v34 = vmin.f32 %v9779_v27, 0.0  ;;  %v1000_v37 = vmul.f32 %v9726_v35, %v780_v29 }
  0xfb   : > { %v8173_v33 = vpop.eup %8172  ;;  %v1871_v38 = vmul.f32 %v9726_v35, %v1657_v30  ;;  %v7527_v39 = vpop.f32.mrf.mxu0  ;;  %8186 = vpow2.f32 %v2060_v31  ;;  %vm1099_vm11 = vcmp.gt.f32.partialorder %v9776_v26, 0.0  ;;  %vm1964_vm12 = vcmp.gt.f32.partialorder %v9779_v27, 0.0 }
  0xfc   : > { %v7672_v40 = vpop.f32.mrf.mxu1  ;;  %v8175_v41 = vpop.eup %8174  ;;  %v6700_v42 = vadd.f32 -1.0, %v8173_v33  ;;  %v1197_v45 = vmul.f32 1.442695, %v1146_v32  ;;  %v2062_v47 = vmul.f32 1.442695, %v2011_v34  ;;  %v9788_v48 = vadd.f32 %v9731_v36, %v1000_v37 }
  0xfd   : > { %v6842_v46 = vadd.f32 -1.0, %v8175_v41  ;;  %v9791_v49 = vadd.f32 %v9731_v36, %v1871_v38  ;;  %v785_v50 = vpop.f32.mrf.mxu0 }
  0xfe   : > { %v1662_v51 = vpop.f32.mrf.mxu1  ;;  %v1330_v52 = vsel %vm1095_vm3, %v9736_v43, %v6700_v42  ;;  %8188 = vpow2.f32 %v1197_v45  ;;  %v1001_v53 = vmul.f32 %v9726_v35, %v785_v50  ;;  %v1147_v58 = vmin.f32 %v9788_v48, 0.0 }
  0xff   : > { %v1872_v54 = vmul.f32 %v9726_v35, %v1662_v51  ;;  %v2195_v57 = vsel %vm1960_vm4, %v9739_v44, %v6842_v46  ;;  %8190 = vpow2.f32 %v2062_v47  ;;  %v7530_v59 = vpop.f32.mrf.mxu0  ;;  %v8177_v61 = vpop.eup %8176  ;;  %v2012_v63 = vmin.f32 %v9791_v49, 0.0 }
 0x100   : > { %v7675_v60 = vpop.f32.mrf.mxu1  ;;  %v2242_v62 = vmax.f32 %v1330_v52, %v2195_v57  ;;  %v9803_v43 = vadd.f32 %v9731_v36, %v1001_v53  ;;  %v8179_v0 = vpop.eup %8178  ;;  %v6701_v4 = vadd.f32 -1.0, %v8177_v61  ;;  %v1199_v5 = vmul.f32 1.442695, %v1147_v58 }
 0x101   : > { %v9807_v44 = vadd.f32 %v9731_v36, %v1872_v54  ;;  %v790_v6 = vpop.f32.mrf.mxu0  ;;  %v6843_v8 = vadd.f32 -1.0, %v8179_v0  ;;  %v2064_v9 = vmul.f32 1.442695, %v2012_v63  ;;  %vm1100_vm13 = vcmp.gt.f32.partialorder %v9788_v48, 0.0 }
 0x102   : > { %v1667_v7 = vpop.f32.mrf.mxu1  ;;  %2289 = vst [vmem:[#allocation2] sm:$0xff] %v2242_v62  ;;  %v1148_v10 = vmin.f32 %v9803_v43, 0.0  ;;  %v1331_v12 = vsel %vm1096_vm5, %v9746_v55, %v6701_v4  ;;  %8192 = vpow2.f32 %v1199_v5  ;;  %v1002_v55 = vmul.f32 %v9726_v35, %v790_v6 }
 0x103   : > { %v8181_v11 = vpop.eup %8180  ;;  %v2013_v13 = vmin.f32 %v9807_v44, 0.0  ;;  %v7533_v14 = vpop.f32.mrf.mxu0  ;;  %v2196_v19 = vsel %vm1961_vm6, %v9749_v56, %v6843_v8  ;;  %8194 = vpow2.f32 %v2064_v9  ;;  %v1873_v30 = vmul.f32 %v9726_v35, %v1667_v7  ;;  %v2415_v8 = vld [vmem:[%s14635_s2 + $0x278] sm:$0xff] }
 0x104   : > { %v7678_v15 = vpop.f32.mrf.mxu1  ;;  %v8183_v18 = vpop.eup %8182  ;;  %v6702_v20 = vadd.f32 -1.0, %v8181_v11  ;;  %v1201_v21 = vmul.f32 1.442695, %v1148_v10  ;;  %v2243_v22 = vmax.f32 %v1331_v12, %v2196_v19  ;;  %v9829_v32 = vadd.f32 %v9731_v36, %v1002_v55 }
 0x105   : > { %v6844_v23 = vadd.f32 -1.0, %v8183_v18  ;;  %v2066_v24 = vmul.f32 1.442695, %v2013_v13  ;;  %v795_v25 = vpop.f32.mrf.mxu0  ;;  %v9833_v39 = vadd.f32 %v9731_v36, %v1873_v30  ;;  %vm1965_vm14 = vcmp.gt.f32.partialorder %v9791_v49, 0.0 }
 0x106   : > { %v1672_v28 = vpop.f32.mrf.mxu1  ;;  %v1332_v29 = vsel %vm1097_vm7, %v9756_v2, %v6702_v20  ;;  %8196 = vpow2.f32 %v1201_v21  ;;  %v1003_v31 = vmul.f32 %v9726_v35, %v795_v25  ;;  %2290 = vst [vmem:[#allocation2 + $0x8] sm:$0xff] %v2243_v22  ;;  %v1149_v42 = vmin.f32 %v9829_v32, 0.0 }
 0x107   : > { %v2197_v56 = vsel %vm1962_vm8, %v9759_v3, %v6844_v23  ;;  %8198 = vpow2.f32 %v2066_v24  ;;  %v1874_v33 = vmul.f32 %v9726_v35, %v1672_v28  ;;  %v7536_v34 = vpop.f32.mrf.mxu0  ;;  %v8185_v38 = vpop.eup %8184  ;;  %v2014_v51 = vmin.f32 %v9833_v39, 0.0 }
 0x108   : > { %v7681_v37 = vpop.f32.mrf.mxu1  ;;  %v2244_v2 = vmax.f32 %v1332_v29, %v2197_v56  ;;  %v9836_v40 = vadd.f32 %v9731_v36, %v1003_v31  ;;  %v8187_v41 = vpop.eup %8186  ;;  %v6703_v3 = vadd.f32 -1.0, %v8185_v38  ;;  %v1203_v54 = vmul.f32 1.442695, %v1149_v42 }
 0x109   : > { %v9841_v45 = vadd.f32 %v9731_v36, %v1874_v33  ;;  %v800_v46 = vpop.f32.mrf.mxu0  ;;  %v6845_v50 = vadd.f32 -1.0, %v8187_v41  ;;  %v2068_v63 = vmul.f32 1.442695, %v2014_v51  ;;  %vm1101_vm15 = vcmp.gt.f32.partialorder %v9803_v43, 0.0 }
 0x10a   : > { %v1677_v47 = vpop.f32.mrf.mxu1  ;;  %2291 = vst [vmem:[#allocation2 + $0x10] sm:$0xff] %v2244_v2  ;;  %v1333_v53 = vsel %vm1098_vm9, %v9766_v16, %v6703_v3  ;;  %v1150_v57 = vmin.f32 %v9836_v40, 0.0  ;;  %8200 = vpow2.f32 %v1203_v54  ;;  %v1004_v10 = vmul.f32 %v9726_v35, %v800_v46 }
 0x10b   : > { %v8189_v52 = vpop.eup %8188  ;;  %v7539_v58 = vpop.f32.mrf.mxu0  ;;  %v2198_v61 = vsel %vm1963_vm10, %v9769_v17, %v6845_v50  ;;  %v2015_v0 = vmin.f32 %v9841_v45, 0.0  ;;  %8202 = vpow2.f32 %v2068_v63  ;;  %v1875_v14 = vmul.f32 %v9726_v35, %v1677_v47 }
 0x10c   : > { %v7684_v59 = vpop.f32.mrf.mxu1  ;;  %v8191_v60 = vpop.eup %8190  ;;  %v6704_v62 = vadd.f32 -1.0, %v8189_v52  ;;  %v2245_v4 = vmax.f32 %v1333_v53, %v2198_v61  ;;  %v1205_v6 = vmul.f32 1.442695, %v1150_v57  ;;  %v9864_v21 = vadd.f32 %v9731_v36, %v1004_v10 }
 0x10d   : > { %v6846_v5 = vadd.f32 -1.0, %v8191_v60  ;;  %v805_v7 = vpop.f32.mrf.mxu0  ;;  %v2070_v17 = vmul.f32 1.442695, %v2015_v0  ;;  %v2464_v11 = vld [vmem:[#allocation2 + $0x1] ss:$2 sm:$0xff]  ;;  %vm1966_vm0 = vcmp.gt.f32.partialorder %v9807_v44, 0.0 }
 0x10e   : > { %v1682_v16 = vpop.f32.mrf.mxu1  ;;  %v1334_v9 = vsel %vm1099_vm11, %v9776_v26, %v6704_v62  ;;  %v2418_v12 = vld [vmem:[#allocation2] ss:$2 sm:$0xff]  ;;  %2292 = vst [vmem:[#allocation2 + $0x18] sm:$0xff] %v2245_v4  ;;  %8204 = vpow2.f32 %v1205_v6  ;;  %v1005_v15 = vmul.f32 %v9726_v35, %v805_v7  ;;  %2711 = vmatprep.mubr.f32.mxu0 %v2464_v11  ;;  %v1151_v56 = vmin.f32 %v9864_v21, 0.0  ;;  %v8549_v62 = vld [vmem:[%s14635_s2 + $0x70] sm:$0xff] }
 0x10f   : > { %v2199_v13 = vsel %vm1964_vm12, %v9779_v27, %v6846_v5  ;;  %v7542_v18 = vpop.f32.mrf.mxu0  ;;  %v8193_v26 = vpop.eup %8192  ;;  %8206 = vpow2.f32 %v2070_v17  ;;  %v1876_v22 = vmul.f32 %v9726_v35, %v1682_v16  ;;  %2712 = vmatmul.mubr.f32.vlgmr.msra.gmra.mxu0 %v2418_v12  ;;  %v9868_v27 = vadd.f32 %v9731_v36, %v1875_v14 }
 0x110   : > { %v7687_v19 = vpop.f32.mrf.mxu1  ;;  %v2246_v20 = vmax.f32 %v1334_v9, %v2199_v13  ;;  %v8195_v23 = vpop.eup %8194  ;;  %v6705_v24 = vadd.f32 -1.0, %v8193_v26  ;;  %v9871_v55 = vadd.f32 %v9731_v36, %v1005_v15  ;;  %7797 = vmatpush3.msra.mxu0 %v2415_v8  ;;  %v1207_v47 = vmul.f32 1.442695, %v1151_v56  ;;  %v2413_v9 = vld [vmem:[%s14635_s2 + $0x268] sm:$0xff]  ;;  %v8551_v26 = vld [vmem:[%s14635_s2 + $0x60] sm:$0xff] }
 0x111   : > { %v810_v25 = vpop.f32.mrf.mxu0  ;;  %v2556_v29 = vld [vmem:[#allocation2 + $0x3] ss:$2 sm:$0xff]  ;;  %v2510_v30 = vld [vmem:[#allocation2 + $0x2] ss:$2 sm:$0xff]  ;;  %v6847_v31 = vadd.f32 -1.0, %v8195_v23  ;;  %v9876_v33 = vadd.f32 %v9731_v36, %v1876_v22  ;;  %7798 = vmatprep.subr.mxu0 %v14619_v1  ;;  %v2016_v38 = vmin.f32 %v9868_v27, 0.0 }
 0x112   : > { %v1687_v28 = vpop.f32.mrf.mxu1  ;;  %2293 = vst [vmem:[#allocation2 + $0x20] sm:$0xff] %v2246_v20  ;;  %2891 = vmatprep.mubr.f32.mxu1 %v2556_v29  ;;  %v1335_v37 = vsel %vm1100_vm13, %v9788_v48, %v6705_v24  ;;  %v1152_v50 = vmin.f32 %v9871_v55, 0.0  ;;  %v8548_v48 = vld [vmem:[%s14635_s2 + $0x78] sm:$0xff]  ;;  %8208 = vpow2.f32 %v1207_v47  ;;  %v1006_v0 = vmul.f32 %v9726_v35, %v810_v25 }
 0x113   : > { %v8197_v34 = vpop.eup %8196  ;;  %2892 = vmatmul.mubr.f32.vlgmr.msra.gmra.mxu1 %v2510_v30  ;;  %v7545_v2 = vpop.f32.mrf.mxu0  ;;  %v2200_v42 = vsel %vm1965_vm14, %v9791_v49, %v6847_v31  ;;  %v2072_v53 = vmul.f32 1.442695, %v2016_v38  ;;  %v2414_v49 = vld [vmem:[%s14635_s2 + $0x270] sm:$0xff]  ;;  %v2017_v60 = vmin.f32 %v9876_v33, 0.0  ;;  %vm1102_vm2 = vcmp.gt.f32.partialorder %v9829_v32, 0.0  ;;  %v8552_v47 = vld [vmem:[%s14635_s2 + $0x58] sm:$0xff] }
 0x114   : > { %v7690_v41 = vpop.f32.mrf.mxu1  ;;  %v8199_v3 = vpop.eup %8198  ;;  %v6706_v46 = vadd.f32 -1.0, %v8197_v34  ;;  %3430 = vmatpush1.msra.mxu1 %v8548_v48  ;;  %v2247_v51 = vmax.f32 %v1335_v37, %v2200_v42  ;;  %v1209_v59 = vmul.f32 1.442695, %v1152_v50  ;;  %7799 = vmatpush3.msra.mxu0 %v2414_v49  ;;  %v9915_v17 = vadd.f32 %v9731_v36, %v1006_v0 }
 0x115   : > { %v6848_v52 = vadd.f32 -1.0, %v8199_v3  ;;  %v815_v54 = vpop.f32.mrf.mxu0  ;;  %3431 = vmatprep.subr.mxu1 %v14619_v1  ;;  %v2466_v61 = vld [vmem:[#allocation2 + $0x11] ss:$2 sm:$0xff]  ;;  %8210 = vpow2.f32 %v2072_v53  ;;  %v2420_v4 = vld [vmem:[#allocation2 + $0x10] ss:$2 sm:$0xff]  ;;  %7800 = vmatprep.subr.mxu0 %v14619_v1  ;;  %vm1967_vm3 = vcmp.gt.f32.partialorder %v9833_v39, 0.0 }
 0x116   : > { %v1692_v57 = vpop.f32.mrf.mxu1  ;;  %v1336_v58 = vsel %vm1101_vm15, %v9803_v43, %v6706_v46  ;;  %3432 = vmatpush1.msra.mxu1 %v8549_v62  ;;  %2294 = vst [vmem:[#allocation2 + $0x28] sm:$0xff] %v2247_v51  ;;  %v1877_v43 = vmul.f32 %v9726_v35, %v1687_v28  ;;  %2716 = vmatprep.mubr.f32.mxu0 %v2466_v61  ;;  %8212 = vpow2.f32 %v1209_v59  ;;  %v2074_v16 = vmul.f32 1.442695, %v2017_v60 }
 0x117   : > { %v2201_v63 = vsel %vm1966_vm0, %v9807_v44, %v6848_v52  ;;  %v7548_v5 = vpop.f32.mrf.mxu0  ;;  %3433 = vmatprep.subr.mxu1 %v14619_v1  ;;  %v1007_v8 = vmul.f32 %v9726_v35, %v815_v54  ;;  %2717 = vmatmul.mubr.f32.gmra.mxu0 %v2420_v4  ;;  %v8550_v44 = vld [vmem:[%s14635_s2 + $0x68] sm:$0xff]  ;;  %v1878_v11 = vmul.f32 %v9726_v35, %v1692_v57  ;;  %v8201_v18 = vpop.eup %8200  ;;  %vm1103_vm4 = vcmp.gt.f32.partialorder %v9836_v40, 0.0 }
 0x118   : > { %v7693_v6 = vpop.f32.mrf.mxu1  ;;  %v2248_v7 = vmax.f32 %v1336_v58, %v2201_v63  ;;  %3434 = vmatpush1.msra.mxu1 %v8550_v44  ;;  %v9918_v10 = vadd.f32 %v9731_v36, %v1877_v43  ;;  %8214 = vpow2.f32 %v2074_v16  ;;  %v8203_v20 = vpop.eup %8202  ;;  %v6707_v22 = vadd.f32 -1.0, %v8201_v18  ;;  %7801 = vmatpush3.msra.mxu0 %v2413_v9  ;;  %v2412_v5 = vld [vmem:[%s14635_s2 + $0x260] sm:$0xff] }
 0x119   : > { %v820_v12 = vpop.f32.mrf.mxu0  ;;  %v2558_v14 = vld [vmem:[#allocation2 + $0x13] ss:$2 sm:$0xff]  ;;  %v2512_v15 = vld [vmem:[#allocation2 + $0x12] ss:$2 sm:$0xff]  ;;  %3435 = vmatprep.subr.mxu1 %v14619_v1  ;;  %v9926_v19 = vadd.f32 %v9731_v36, %v1007_v8  ;;  %vm1968_vm5 = vcmp.gt.f32.partialorder %v9841_v45, 0.0  ;;  %v1153_v23 = vmin.f32 %v9915_v17, 0.0  ;;  %7802 = vmatprep.subr.mxu0 %v14619_v1  ;;  %v9943_v3 = vadd.f32 %v9731_v36, %v1878_v11 }
 0x11a   : > { %v1697_v13 = vpop.f32.mrf.mxu1  ;;  %2295 = vst [vmem:[#allocation2 + $0x30] sm:$0xff] %v2248_v7  ;;  %2896 = vmatprep.mubr.f32.mxu1 %v2558_v14  ;;  %3436 = vmatpush1.msra.mxu1 %v8551_v26  ;;  %v1008_v24 = vmul.f32 %v9726_v35, %v820_v12  ;;  %v6849_v30 = vadd.f32 -1.0, %v8203_v20  ;;  %v2018_v31 = vmin.f32 %v9918_v10, 0.0  ;;  %v1337_v38 = vsel %vm1102_vm2, %v9829_v32, %v6707_v22  ;;  %v8554_v6 = vld [vmem:[%s14635_s2 + $0x48] sm:$0xff] }
 0x11b   : > { %2897 = vmatmul.mubr.f32.gmra.mxu1 %v2512_v15  ;;  %v7551_v25 = vpop.f32.mrf.mxu0  ;;  %v8205_v29 = vpop.eup %8204  ;;  %v1154_v56 = vmin.f32 %v9926_v19, 0.0  ;;  %v1879_v34 = vmul.f32 %v9726_v35, %v1697_v13  ;;  %3437 = vmatprep.subr.mxu1 %v14619_v1  ;;  %v1211_v41 = vmul.f32 1.442695, %v1153_v23  ;;  %vm1104_vm6 = vcmp.gt.f32.partialorder %v9864_v21, 0.0 }
 0x11c   : > { %v7696_v28 = vpop.f32.mrf.mxu1  ;;  %v8207_v37 = vpop.eup %8206  ;;  %v6708_v2 = vadd.f32 -1.0, %v8205_v29  ;;  %3438 = vmatpush1.msra.mxu1 %v8552_v47  ;;  %v2202_v50 = vsel %vm1967_vm3, %v9833_v39, %v6849_v30  ;;  %v2076_v51 = vmul.f32 1.442695, %v2018_v31  ;;  %v8553_v39 = vld [vmem:[%s14635_s2 + $0x50] sm:$0xff]  ;;  %v2019_v60 = vmin.f32 %v9943_v3, 0.0  ;;  %7803 = vmatpush3.msra.mxu0 %v2412_v5  ;;  %v8555_v30 = vld [vmem:[%s14635_s2 + $0x40] sm:$0xff] }
 0x11d   : > { %v825_v42 = vpop.f32.mrf.mxu0  ;;  %v6850_v48 = vadd.f32 -1.0, %v8207_v37  ;;  %v1213_v52 = vmul.f32 1.442695, %v1154_v56  ;;  %3439 = vmatprep.subr.mxu1 %v14619_v1  ;;  %v2249_v32 = vmax.f32 %v1337_v38, %v2202_v50  ;;  %8216 = vpow2.f32 %v1211_v41  ;;  %v2468_v54 = vld [vmem:[#allocation2 + $0x21] ss:$2 sm:$0xff]  ;;  %7804 = vmatprep.subr.mxu0 %v14619_v1 }
 0x11e   : > { %v1702_v46 = vpop.f32.mrf.mxu1  ;;  %v1338_v53 = vsel %vm1103_vm4, %v9836_v40, %v6708_v2  ;;  %v2422_v57 = vld [vmem:[#allocation2 + $0x20] ss:$2 sm:$0xff]  ;;  %3440 = vmatpush1.msra.mxu1 %v8553_v39  ;;  %8218 = vpow2.f32 %v2076_v51  ;;  %v9964_v40 = vadd.f32 %v9731_v36, %v1008_v24  ;;  %2721 = vmatprep.mubr.f32.mxu0 %v2468_v54  ;;  %v9968_v62 = vadd.f32 %v9731_v36, %v1879_v34  ;;  %v2411_v34 = vld [vmem:[%s14635_s2 + $0x258] sm:$0xff] }
 0x11f   : > { %v7554_v49 = vpop.f32.mrf.mxu0  ;;  %v2203_v59 = vsel %vm1968_vm5, %v9841_v45, %v6850_v48  ;;  %3441 = vmatprep.subr.mxu1 %v14619_v1  ;;  %2296 = vst [vmem:[#allocation2 + $0x38] sm:$0xff] %v2249_v32  ;;  %8220 = vpow2.f32 %v1213_v52  ;;  %v1009_v63 = vmul.f32 %v9726_v35, %v825_v42  ;;  %2722 = vmatmul.mubr.f32.gmra.mxu0 %v2422_v57  ;;  %vm1969_vm7 = vcmp.gt.f32.partialorder %v9868_v27, 0.0  ;;  %v8209_v44 = vpop.eup %8208 }
 0x120   : > { %v7699_v58 = vpop.f32.mrf.mxu1  ;;  %v2250_v61 = vmax.f32 %v1338_v53, %v2203_v59  ;;  %3442 = vmatpush1.msra.mxu1 %v8554_v6  ;;  %v2078_v7 = vmul.f32 1.442695, %v2019_v60  ;;  %v1155_v16 = vmin.f32 %v9964_v40, 0.0  ;;  %v1880_v8 = vmul.f32 %v9726_v35, %v1702_v46  ;;  %7805 = vmatpush3.msra.mxu0 %v2411_v34  ;;  %v8556_v46 = vld [vmem:[%s14635_s2 + $0x38] sm:$0xff]  ;;  %v8557_v49 = vld [vmem:[%s14635_s2 + $0x30] sm:$0xff] }
 0x121   : > { %v830_v0 = vpop.f32.mrf.mxu0  ;;  %v2560_v43 = vld [vmem:[#allocation2 + $0x23] ss:$2 sm:$0xff]  ;;  %v2514_v4 = vld [vmem:[#allocation2 + $0x22] ss:$2 sm:$0xff]  ;;  %vm1105_vm8 = vcmp.gt.f32.partialorder %v9871_v55, 0.0  ;;  %v2020_v9 = vmin.f32 %v9968_v62, 0.0  ;;  %v9985_v11 = vadd.f32 %v9731_v36, %v1009_v63  ;;  %3443 = vmatprep.subr.mxu1 %v14619_v1  ;;  %7806 = vmatprep.subr.mxu0 %v14619_v1 }
 0x122   : > { %v9971_v45 = vpop.f32.mrf.mxu1  ;;  %2901 = vmatprep.mubr.f32.mxu1 %v2560_v43  ;;  %2297 = vst [vmem:[#allocation2 + $0x40] sm:$0xff] %v2250_v61  ;;  %v1010_v12 = vmul.f32 %v9726_v35, %v830_v0  ;;  %v8211_v15 = vpop.eup %8210  ;;  %v6709_v18 = vadd.f32 -1.0, %v8209_v44  ;;  %8222 = vpow2.f32 %v2078_v7  ;;  %v1215_v26 = vmul.f32 1.442695, %v1155_v16  ;;  %3444 = vmatpush1.msra.mxu1 %v8555_v30 }
 0x123   : > { %2902 = vmatmul.mubr.f32.gmra.mxu1 %v2514_v4  ;;  %v7557_v13 = vpop.f32.mrf.mxu0  ;;  %v9990_v20 = vadd.f32 %v9731_v36, %v1880_v8  ;;  %v8213_v22 = vpop.eup %8212  ;;  %v6851_v23 = vadd.f32 -1.0, %v8211_v15  ;;  %vm1970_vm9 = vcmp.gt.f32.partialorder %v9876_v33, 0.0  ;;  %v2080_v24 = vmul.f32 1.442695, %v2020_v9  ;;  %3445 = vmatprep.subr.mxu1 %v14619_v1  ;;  %v8558_v4 = vld [vmem:[%s14635_s2 + $0x28] sm:$0xff]  ;;  %v2410_v15 = vld [vmem:[%s14635_s2 + $0x250] sm:$0xff] }
 0x124   : > { %v7702_v14 = vpop.f32.mrf.mxu1  ;;  %v1156_v25 = vmin.f32 %v9985_v11, 0.0  ;;  %v1339_v31 = vsel %vm1104_vm6, %v9864_v21, %v6709_v18  ;;  %v6710_v56 = vadd.f32 -1.0, %v8213_v22  ;;  %vm1106_vm10 = vcmp.gt.f32.partialorder %v9915_v17, 0.0  ;;  %3446 = vmatpush1.msra.mxu1 %v8556_v46  ;;  %v8559_v18 = vld [vmem:[%s14635_s2 + $0x20] sm:$0xff]  ;;  %7807 = vmatpush3.msra.mxu0 %v2410_v15 }
 0x125   : > { %v835_v28 = vpop.f32.mrf.mxu0  ;;  %8224 = vpow2.f32 %v1215_v26  ;;  %v8215_v37 = vpop.eup %8214  ;;  %v2204_v38 = vsel %vm1969_vm7, %v9868_v27, %v6851_v23  ;;  %vm1971_vm11 = vcmp.gt.f32.partialorder %v9918_v10, 0.0  ;;  %v2021_v21 = vmin.f32 %v9990_v20, 0.0  ;;  %3447 = vmatprep.subr.mxu1 %v14619_v1  ;;  %7808 = vmatprep.subr.mxu0 %v14619_v1 }
 0x126   : > { %v1712_v29 = vpop.f32.mrf.mxu1  ;;  %8226 = vpow2.f32 %v2080_v24  ;;  %v1217_v2 = vmul.f32 1.442695, %v1156_v25  ;;  %v2251_v47 = vmax.f32 %v1339_v31, %v2204_v38  ;;  %v1340_v50 = vsel %vm1105_vm8, %v9871_v55, %v6710_v56  ;;  %v2470_v51 = vld [vmem:[#allocation2 + $0x31] ss:$2 sm:$0xff]  ;;  %v2424_v52 = vld [vmem:[#allocation2 + $0x30] ss:$2 sm:$0xff]  ;;  %3448 = vmatpush1.msra.mxu1 %v8557_v49 }
 0x127   : > { %v7560_v41 = vpop.f32.mrf.mxu0  ;;  %v6852_v27 = vadd.f32 -1.0, %v8215_v37  ;;  %v10018_v48 = vadd.f32 %v9731_v36, %v1010_v12  ;;  %v2082_v32 = vmul.f32 1.442695, %v2021_v21  ;;  %v1881_v53 = vmul.f32 %v9726_v35, %v9971_v45  ;;  %2726 = vmatprep.mubr.f32.mxu0 %v2470_v51  ;;  %3449 = vmatprep.subr.mxu1 %v14619_v1  ;;  %v8560_v56 = vld [vmem:[%s14635_s2 + $0x18] sm:$0xff]  ;;  %v8562_v49 = vld [vmem:[%s14635_s2 + $0x8] sm:$0xff] }
 0x128   : > { %v7705_v42 = vpop.f32.mrf.mxu1  ;;  %8228 = vpow2.f32 %v1217_v2  ;;  %v1011_v54 = vmul.f32 %v9726_v35, %v835_v28  ;;  %2298 = vst [vmem:[#allocation2 + $0x48] sm:$0xff] %v2251_v47  ;;  %vm1107_vm12 = vcmp.gt.f32.partialorder %v9926_v19, 0.0  ;;  %v1882_v59 = vmul.f32 %v9726_v35, %v1712_v29  ;;  %2727 = vmatmul.mubr.f32.gmra.mxu0 %v2424_v52  ;;  %3450 = vmatpush1.msra.mxu1 %v8558_v4 }
 0x129   : > { %v840_v57 = vpop.f32.mrf.mxu0  ;;  %v2205_v58 = vsel %vm1970_vm9, %v9876_v33, %v6852_v27  ;;  %v1157_v39 = vmin.f32 %v10018_v48, 0.0  ;;  %v2562_v60 = vld [vmem:[#allocation2 + $0x33] ss:$2 sm:$0xff]  ;;  %v2516_v61 = vld [vmem:[#allocation2 + $0x32] ss:$2 sm:$0xff]  ;;  %8230 = vpow2.f32 %v2082_v32  ;;  %v10036_v0 = vadd.f32 %v9731_v36, %v1881_v53  ;;  %3451 = vmatprep.subr.mxu1 %v14619_v1  ;;  %v2409_v32 = vld [vmem:[%s14635_s2 + $0x248] sm:$0xff] }
 0x12a   : > { %v1717_v55 = vpop.f32.mrf.mxu1  ;;  %v2252_v63 = vmax.f32 %v1340_v50, %v2205_v58  ;;  %v10039_v45 = vadd.f32 %v9731_v36, %v1011_v54  ;;  %2906 = vmatprep.mubr.f32.mxu1 %v2562_v60  ;;  %v8217_v5 = vpop.eup %8216  ;;  %v10045_v7 = vadd.f32 %v9731_v36, %v1882_v59  ;;  %v1012_v16 = vmul.f32 %v9726_v35, %v840_v57 }
 0x12b   : > { %v7563_v33 = vpop.f32.mrf.mxu0  ;;  %v1219_v6 = vmul.f32 1.442695, %v1157_v39  ;;  %v1883_v8 = vmul.f32 %v9726_v35, %v1717_v55  ;;  %2907 = vmatmul.mubr.f32.gmra.mxu1 %v2516_v61  ;;  %v8219_v44 = vpop.eup %8218  ;;  %v6711_v9 = vadd.f32 -1.0, %v8217_v5  ;;  %vm1972_vm13 = vcmp.gt.f32.partialorder %v9943_v3, 0.0  ;;  %7809 = vmatpush3.msra.mxu0 %v2409_v32 }
 0x12c   : > { %v7708_v43 = vpop.f32.mrf.mxu1  ;;  %2299 = vst [vmem:[#allocation2 + $0x50] sm:$0xff] %v2252_v63  ;;  %vm1108_vm14 = vcmp.gt.f32.partialorder %v9964_v40, 0.0  ;;  %v2022_v12 = vmin.f32 %v10036_v0, 0.0  ;;  %3452 = vmatpush1.msra.mxu1 %v8559_v18  ;;  %v8221_v26 = vpop.eup %8220  ;;  %v6853_v22 = vadd.f32 -1.0, %v8219_v44  ;;  %vm1973_vm15 = vcmp.gt.f32.partialorder %v9968_v62, 0.0  ;;  %7810 = vmatprep.subr.mxu0 %v14619_v1 }
 0x12d   : > { %v845_v13 = vpop.f32.mrf.mxu0  ;;  %8232 = vpow2.f32 %v1219_v6  ;;  %v1158_v23 = vmin.f32 %v10039_v45, 0.0  ;;  %3453 = vmatprep.subr.mxu1 %v14619_v1  ;;  %v1341_v24 = vsel %vm1106_vm10, %v9915_v17, %v6711_v9  ;;  %v6712_v25 = vadd.f32 -1.0, %v8221_v26 }
 0x12e   : > { %v1722_v14 = vpop.f32.mrf.mxu1  ;;  %v2084_v28 = vmul.f32 1.442695, %v2022_v12  ;;  %v2023_v29 = vmin.f32 %v10045_v7, 0.0  ;;  %3454 = vmatpush1.msra.mxu1 %v8560_v56  ;;  %v2206_v34 = vsel %vm1971_vm11, %v9918_v10, %v6853_v22  ;;  %v10074_v17 = vadd.f32 %v9731_v36, %v1012_v16  ;;  %v8561_v10 = vld [vmem:[%s14635_s2 + $0x10] sm:$0xff]  ;;  %v8566_v56 = vld [vmem:[%s14635_s2 + $0xf8] sm:$0xff] }
 0x12f   : > { %v7566_v30 = vpop.f32.mrf.mxu0  ;;  %v1221_v37 = vmul.f32 1.442695, %v1158_v23  ;;  %v10077_v38 = vadd.f32 %v9731_v36, %v1883_v8  ;;  %3455 = vmatprep.subr.mxu1 %v14619_v1  ;;  %v8223_v2 = vpop.eup %8222  ;;  %v2253_v21 = vmax.f32 %v1341_v24, %v2206_v34  ;;  %v2472_v42 = vld [vmem:[#allocation2 + $0x41] ss:$2 sm:$0xff]  ;;  %v2426_v46 = vld [vmem:[#allocation2 + $0x40] ss:$2 sm:$0xff]  ;;  %v1342_v27 = vsel %vm1107_vm12, %v9926_v19, %v6712_v25 }
 0x130   : > { %v7711_v31 = vpop.f32.mrf.mxu1  ;;  %8234 = vpow2.f32 %v2084_v28  ;;  %v2086_v41 = vmul.f32 1.442695, %v2023_v29  ;;  %3456 = vmatpush1.msra.mxu1 %v8561_v10  ;;  %v6854_v51 = vadd.f32 -1.0, %v8223_v2  ;;  %v1159_v52 = vmin.f32 %v10074_v17, 0.0  ;;  %2731 = vmatprep.mubr.f32.mxu0 %v2472_v42  ;;  %v10132_v24 = vld [vmem:[%s14609_s6] ss:$0 sm:$0xff] }
 0x131   : > { %v850_v47 = vpop.f32.mrf.mxu0  ;;  %8236 = vpow2.f32 %v1221_v37  ;;  %3457 = vmatprep.subr.mxu1 %v14619_v1  ;;  %2300 = vst [vmem:[#allocation2 + $0x58] sm:$0xff] %v2253_v21  ;;  %vm1109_vm0 = vcmp.gt.f32.partialorder %v9985_v11, 0.0  ;;  %v2024_v54 = vmin.f32 %v10077_v38, 0.0  ;;  %v1013_v19 = vmul.f32 %v9726_v35, %v845_v13  ;;  %2732 = vmatmul.mubr.f32.gmra.mxu0 %v2426_v46  ;;  %v10140_v28 = vld [vmem:[%s14608_s5] ss:$0 sm:$0xff] }
 0x132   : > { %v10080_v50 = vpop.f32.mrf.mxu1  ;;  %v8225_v53 = vpop.eup %8224  ;;  %8238 = vpow2.f32 %v2086_v41  ;;  %3458 = vmatpush1.msra.mxu1 %v8562_v49  ;;  %v2207_v39 = vsel %vm1972_vm13, %v9943_v3, %v6854_v51  ;;  %v1223_v60 = vmul.f32 1.442695, %v1159_v52  ;;  %v1884_v61 = vmul.f32 %v9726_v35, %v1722_v14 }
 0x133   : > { %v7569_v57 = vpop.f32.mrf.mxu0  ;;  %v8227_v58 = vpop.eup %8226  ;;  %v6713_v59 = vadd.f32 -1.0, %v8225_v53  ;;  %v2564_v63 = vld [vmem:[#allocation2 + $0x43] ss:$2 sm:$0xff]  ;;  %3459 = vmatprep.subr.mxu1 %v14619_v1  ;;  %v2254_v33 = vmax.f32 %v1342_v27, %v2207_v39  ;;  %v2088_v4 = vmul.f32 1.442695, %v2024_v54  ;;  %v10105_v5 = vadd.f32 %v9731_v36, %v1013_v19 }
 0x134   : > { %v7714_v55 = vpop.f32.mrf.mxu1  ;;  %v6855_v43 = vadd.f32 -1.0, %v8227_v58  ;;  %2911 = vmatprep.mubr.f32.mxu1 %v2564_v63  ;;  %v2518_v6 = vld [vmem:[#allocation2 + $0x42] ss:$2 sm:$0xff]  ;;  %8240 = vpow2.f32 %v1223_v60  ;;  %v10112_v9 = vadd.f32 %v9731_v36, %v1884_v61  ;;  %v1014_v12 = vmul.f32 %v9726_v35, %v850_v47 }
 0x135   : > { %v855_v16 = vpop.f32.mrf.mxu0  ;;  %v8229_v3 = vpop.eup %8228  ;;  %v1343_v44 = vsel %vm1108_vm14, %v9964_v40, %v6713_v59  ;;  %2912 = vmatmul.mubr.f32.gmra.mxu1 %v2518_v6  ;;  %2301 = vst [vmem:[#allocation2 + $0x60] sm:$0xff] %v2254_v33  ;;  %vm1974_vm2 = vcmp.gt.f32.partialorder %v9990_v20, 0.0  ;;  %8242 = vpow2.f32 %v2088_v4  ;;  %v8563_v40 = vld [vmem:[%s14635_s2] sm:$0xff]  ;;  %vm1110_vm3 = vcmp.gt.f32.partialorder %v10018_v48, 0.0  ;;  %v8568_v63 = vld [vmem:[%s14635_s2 + $0xe8] sm:$0xff] }
 0x136   : > { %v1732_v8 = vpop.f32.mrf.mxu1  ;;  %v2208_v13 = vsel %vm1973_vm15, %v9968_v62, %v6855_v43  ;;  %v6714_v14 = vadd.f32 -1.0, %v8229_v3  ;;  %3460 = vmatpush1.msra.mxu1 %v8563_v40  ;;  %v8231_v36 = vpop.eup %8230  ;;  %v1160_v35 = vmin.f32 %v10105_v5, 0.0  ;;  %v2025_v22 = vmin.f32 %v10112_v9, 0.0 }
 0x137   : > { %v7572_v15 = vpop.f32.mrf.mxu0  ;;  %v2255_v26 = vmax.f32 %v1343_v44, %v2208_v13  ;;  %3461 = vmatprep.subr.mxu1 %v14619_v1  ;;  %v6856_v23 = vadd.f32 -1.0, %v8231_v36  ;;  %v10135_v25 = vadd.f32 %v10132_v24, %v1014_v12  ;;  %v1885_v29 = vmul.f32 %v10140_v28, %v10080_v50 }
 0x138   : > { %v7717_v18 = vpop.f32.mrf.mxu1  ;;  %v1344_v62 = vsel %vm1109_vm0, %v9985_v11, %v6714_v14  ;;  %v2408_v11 = vld [vmem:[%s14635_s2 + $0x240] sm:$0xff]  ;;  %3462 = vmatpush2.msra.mxu1 %v8566_v56  ;;  %v1225_v34 = vmul.f32 1.442695, %v1160_v35  ;;  %v2090_v37 = vmul.f32 1.442695, %v2025_v22  ;;  %v1015_v2 = vmul.f32 %v10140_v28, %v855_v16 }
 0x139   : > { %v860_v30 = vpop.f32.mrf.mxu0  ;;  %2302 = vst [vmem:[#allocation2 + $0x68] sm:$0xff] %v2255_v26  ;;  %v1886_v21 = vmul.f32 %v10140_v28, %v1732_v8  ;;  %v2474_v41 = vld [vmem:[#allocation2 + $0x51] ss:$2 sm:$0xff]  ;;  %7811 = vmatpush3.msra.mxu0 %v2408_v11  ;;  %3463 = vmatprep.subr.mxu1 %v14619_v1  ;;  %v2209_v46 = vsel %vm1974_vm2, %v9990_v20, %v6856_v23  ;;  %vm1975_vm4 = vcmp.gt.f32.partialorder %v10036_v0, 0.0  ;;  %v1161_v47 = vmin.f32 %v10135_v25, 0.0  ;;  %v8569_v22 = vld [vmem:[%s14635_s2 + $0xe0] sm:$0xff] }
 0x13a   : > { %v10144_v31 = vpop.f32.mrf.mxu1  ;;  %v8233_v42 = vpop.eup %8232  ;;  %v10161_v50 = vadd.f32 %v10132_v24, %v1885_v29  ;;  %2736 = vmatprep.mubr.f32.mxu0 %v2474_v41  ;;  %v2428_v10 = vld [vmem:[#allocation2 + $0x50] ss:$2 sm:$0xff]  ;;  %7812 = vmatprep.subr.mxu0 %v14619_v1  ;;  %v2256_v52 = vmax.f32 %v1344_v62, %v2209_v46  ;;  %8244 = vpow2.f32 %v1225_v34  ;;  %v10165_v53 = vadd.f32 %v10132_v24, %v1015_v2 }
 0x13b   : > { %v7575_v27 = vpop.f32.mrf.mxu0  ;;  %v6715_v32 = vadd.f32 -1.0, %v8233_v42  ;;  %2737 = vmatmul.mubr.f32.gmra.mxu0 %v2428_v10  ;;  %v8567_v20 = vld [vmem:[%s14635_s2 + $0xf0] sm:$0xff]  ;;  %vm1111_vm5 = vcmp.gt.f32.partialorder %v10039_v45, 0.0  ;;  %8246 = vpow2.f32 %v2090_v37  ;;  %v1227_v54 = vmul.f32 1.442695, %v1161_v47  ;;  %v2407_v8 = vld [vmem:[%s14635_s2 + $0x238] sm:$0xff] }
 0x13c   : > { %v7720_v51 = vpop.f32.mrf.mxu1  ;;  %3464 = vmatpush2.msra.mxu1 %v8567_v20  ;;  %v2026_v19 = vmin.f32 %v10161_v50, 0.0  ;;  %2303 = vst [vmem:[#allocation2 + $0x70] sm:$0xff] %v2256_v52  ;;  %vm1976_vm6 = vcmp.gt.f32.partialorder %v10045_v7, 0.0  ;;  %v1162_v39 = vmin.f32 %v10165_v53, 0.0  ;;  %v10183_v59 = vadd.f32 %v10132_v24, %v1886_v21  ;;  %v2566_v60 = vld [vmem:[#allocation2 + $0x53] ss:$2 sm:$0xff]  ;;  %7813 = vmatpush3.msra.mxu0 %v2407_v8 }
 0x13d   : > { %v10172_v57 = vpop.f32.mrf.mxu0  ;;  %3465 = vmatprep.subr.mxu1 %v14619_v1  ;;  %v8235_v49 = vpop.eup %8234  ;;  %v1345_v58 = vsel %vm1110_vm3, %v10018_v48, %v6715_v32  ;;  %v2520_v61 = vld [vmem:[#allocation2 + $0x52] ss:$2 sm:$0xff]  ;;  %8248 = vpow2.f32 %v1227_v54  ;;  %v1016_v48 = vmul.f32 %v10140_v28, %v860_v30  ;;  %2916 = vmatprep.mubr.f32.mxu1 %v2566_v60  ;;  %vm1112_vm7 = vcmp.gt.f32.partialorder %v10074_v17, 0.0 }
 0x13e   : > { %v10174_v55 = vpop.f32.mrf.mxu1  ;;  %3466 = vmatpush2.msra.mxu1 %v8568_v63  ;;  %v8237_v33 = vpop.eup %8236  ;;  %v6857_v43 = vadd.f32 -1.0, %v8235_v49  ;;  %v2092_v4 = vmul.f32 1.442695, %v2026_v19  ;;  %v1229_v12 = vmul.f32 1.442695, %v1162_v39  ;;  %v2027_v13 = vmin.f32 %v10183_v59, 0.0  ;;  %7814 = vmatprep.subr.mxu0 %v14619_v1 }
 0x13f   : > { %v7578_v6 = vpop.f32.mrf.mxu0  ;;  %3467 = vmatprep.subr.mxu1 %v14619_v1  ;;  %v8239_v3 = vpop.eup %8238  ;;  %v6716_v44 = vadd.f32 -1.0, %v8237_v33  ;;  %2917 = vmatmul.mubr.f32.gmra.mxu1 %v2520_v61  ;;  %v10199_v18 = vadd.f32 %v10132_v24, %v1016_v48  ;;  %v2406_v29 = vld [vmem:[%s14635_s2 + $0x230] sm:$0xff]  ;;  %vm1977_vm8 = vcmp.gt.f32.partialorder %v10077_v38, 0.0  ;;  %v8570_v2 = vld [vmem:[%s14635_s2 + $0xd8] sm:$0xff]  ;;  %v1888_v27 = vmul.f32 %v10140_v28, %v10174_v55 }
 0x140   : > { %v7723_v16 = vpop.f32.mrf.mxu1  ;;  %v2210_v14 = vsel %vm1975_vm4, %v10036_v0, %v6857_v43  ;;  %v6858_v15 = vadd.f32 -1.0, %v8239_v3  ;;  %8250 = vpow2.f32 %v2092_v4  ;;  %v2476_v40 = vld [vmem:[#allocation2 + $0x61] ss:$2 sm:$0xff]  ;;  %v2430_v36 = vld [vmem:[#allocation2 + $0x60] ss:$2 sm:$0xff]  ;;  %3468 = vmatpush2.msra.mxu1 %v8569_v22  ;;  %7815 = vmatpush3.msra.mxu0 %v2406_v29  ;;  %v8571_v20 = vld [vmem:[%s14635_s2 + $0xd0] sm:$0xff] }
 0x141   : > { %v870_v26 = vpop.f32.mrf.mxu0  ;;  %v2257_v62 = vmax.f32 %v1345_v58, %v2210_v14  ;;  %v1346_v0 = vsel %vm1111_vm5, %v10039_v45, %v6716_v44  ;;  %8252 = vpow2.f32 %v1229_v12  ;;  %v2094_v23 = vmul.f32 1.442695, %v2027_v13  ;;  %2741 = vmatprep.mubr.f32.mxu0 %v2476_v40  ;;  %3469 = vmatprep.subr.mxu1 %v14619_v1  ;;  %v8241_v30 = vpop.eup %8240  ;;  %v2404_v58 = vld [vmem:[%s14635_s2 + $0x220] sm:$0xff]  ;;  %v8572_v44 = vld [vmem:[%s14635_s2 + $0xc8] sm:$0xff] }
 0x142   : > { %v1747_v35 = vpop.f32.mrf.mxu1  ;;  %v2211_v11 = vsel %vm1976_vm6, %v10045_v7, %v6858_v15  ;;  %v1163_v56 = vmin.f32 %v10199_v18, 0.0  ;;  %v1887_v45 = vmul.f32 %v10140_v28, %v10144_v31  ;;  %2742 = vmatmul.mubr.f32.gmra.mxu0 %v2430_v36  ;;  %3470 = vmatpush2.msra.mxu1 %v8570_v2  ;;  %v8243_v21 = vpop.eup %8242  ;;  %v6717_v42 = vadd.f32 -1.0, %v8241_v30  ;;  %v2405_v31 = vld [vmem:[%s14635_s2 + $0x228] sm:$0xff] }
 0x143   : > { %v7581_v34 = vpop.f32.mrf.mxu0  ;;  %2304 = vst [vmem:[#allocation2 + $0x78] sm:$0xff] %v2257_v62  ;;  %v2258_v41 = vmax.f32 %v1346_v0, %v2211_v11  ;;  %8254 = vpow2.f32 %v2094_v23  ;;  %v1017_v7 = vmul.f32 %v10140_v28, %v10172_v57  ;;  %3471 = vmatprep.subr.mxu1 %v14619_v1  ;;  %v6859_v46 = vadd.f32 -1.0, %v8243_v21  ;;  %v2568_v51 = vld [vmem:[#allocation2 + $0x63] ss:$2 sm:$0xff]  ;;  %7816 = vmatprep.subr.mxu0 %v14619_v1  ;;  %v2522_v49 = vld [vmem:[#allocation2 + $0x62] ss:$2 sm:$0xff] }
 0x144   : > { %v7726_v37 = vpop.f32.mrf.mxu1  ;;  %v1231_v47 = vmul.f32 1.442695, %v1163_v56  ;;  %v10229_v10 = vadd.f32 %v10132_v24, %v1887_v45  ;;  %3472 = vmatpush2.msra.mxu1 %v8571_v20  ;;  %v1347_v54 = vsel %vm1112_vm7, %v10074_v17, %v6717_v42  ;;  %v1018_v57 = vmul.f32 %v10140_v28, %v870_v26  ;;  %2921 = vmatprep.mubr.f32.mxu1 %v2568_v51  ;;  %v8573_v0 = vld [vmem:[%s14635_s2 + $0xc0] sm:$0xff]  ;;  %v2402_v56 = vld [vmem:[%s14635_s2 + $0x210] sm:$0xff]  ;;  %v8574_v42 = vld [vmem:[%s14635_s2 + $0xb8] sm:$0xff] }
 0x145   : > { %v875_v52 = vpop.f32.mrf.mxu0  ;;  %2305 = vst [vmem:[#allocation2 + $0x80] sm:$0xff] %v2258_v41  ;;  %v10243_v19 = vadd.f32 %v10132_v24, %v1017_v7  ;;  %v1889_v55 = vmul.f32 %v10140_v28, %v1747_v35  ;;  %v2212_v39 = vsel %vm1977_vm8, %v10077_v38, %v6859_v46  ;;  %2922 = vmatmul.mubr.f32.gmra.mxu1 %v2522_v49  ;;  %vm1113_vm9 = vcmp.gt.f32.partialorder %v10105_v5, 0.0  ;;  %v2403_v38 = vld [vmem:[%s14635_s2 + $0x218] sm:$0xff] }
 0x146   : > { %v10233_v32 = vpop.f32.mrf.mxu1  ;;  %8256 = vpow2.f32 %v1231_v47  ;;  %v2028_v17 = vmin.f32 %v10229_v10, 0.0  ;;  %7817 = vmatpush3.msra.mxu0 %v2405_v31  ;;  %v2259_v63 = vmax.f32 %v1347_v54, %v2212_v39  ;;  %v10257_v43 = vadd.f32 %v10132_v24, %v1888_v27  ;;  %3473 = vmatprep.subr.mxu1 %v14619_v1 }
 0x147   : > { %v7584_v60 = vpop.f32.mrf.mxu0  ;;  %v1164_v33 = vmin.f32 %v10243_v19, 0.0  ;;  %7818 = vmatprep.subr.mxu0 %v14619_v1  ;;  %v8245_v4 = vpop.eup %8244  ;;  %vm1978_vm10 = vcmp.gt.f32.partialorder %v10112_v9, 0.0  ;;  %v10266_v6 = vadd.f32 %v10132_v24, %v1018_v57  ;;  %v10269_v16 = vadd.f32 %v10132_v24, %v1889_v55  ;;  %3474 = vmatpush2.msra.mxu1 %v8572_v44  ;;  %v8576_v44 = vld [vmem:[%s14635_s2 + $0xa8] sm:$0xff] }
 0x148   : > { %v7729_v61 = vpop.f32.mrf.mxu1  ;;  %v2096_v48 = vmul.f32 1.442695, %v2028_v17  ;;  %7819 = vmatpush3.msra.mxu0 %v2404_v58  ;;  %v8247_v12 = vpop.eup %8246  ;;  %2306 = vst [vmem:[#allocation2 + $0x88] sm:$0xff] %v2259_v63  ;;  %v6718_v13 = vadd.f32 -1.0, %v8245_v4  ;;  %v2029_v15 = vmin.f32 %v10257_v43, 0.0  ;;  %v1019_v40 = vmul.f32 %v10140_v28, %v875_v52  ;;  %3475 = vmatprep.subr.mxu1 %v14619_v1 }
 0x149   : > { %v10271_v8 = vpop.f32.mrf.mxu0  ;;  %v1233_v14 = vmul.f32 1.442695, %v1164_v33  ;;  %7820 = vmatprep.subr.mxu0 %v14619_v1  ;;  %v6860_v36 = vadd.f32 -1.0, %v8247_v12  ;;  %vm1114_vm11 = vcmp.gt.f32.partialorder %v10135_v25, 0.0  ;;  %v1165_v26 = vmin.f32 %v10266_v6, 0.0  ;;  %3476 = vmatpush2.msra.mxu1 %v8573_v0 }
 0x14a   : > { %v10273_v3 = vpop.f32.mrf.mxu1  ;;  %8258 = vpow2.f32 %v2096_v48  ;;  %v2478_v35 = vld [vmem:[#allocation2 + $0x71] ss:$2 sm:$0xff]  ;;  %7821 = vmatpush3.msra.mxu0 %v2403_v38  ;;  %v8249_v23 = vpop.eup %8248  ;;  %v1348_v29 = vsel %vm1113_vm9, %v10105_v5, %v6718_v13  ;;  %vm1979_vm12 = vcmp.gt.f32.partialorder %v10161_v50, 0.0  ;;  %v2098_v30 = vmul.f32 1.442695, %v2029_v15  ;;  %3477 = vmatprep.subr.mxu1 %v14619_v1 }
 0x14b   : > { %v7587_v22 = vpop.f32.mrf.mxu0  ;;  %8260 = vpow2.f32 %v1233_v14  ;;  %2746 = vmatprep.mubr.f32.mxu0 %v2478_v35  ;;  %v2432_v11 = vld [vmem:[#allocation2 + $0x70] ss:$2 sm:$0xff]  ;;  %v2213_v45 = vsel %vm1978_vm10, %v10112_v9, %v6860_v36  ;;  %v6719_v34 = vadd.f32 -1.0, %v8249_v23  ;;  %v1235_v37 = vmul.f32 1.442695, %v1165_v26  ;;  %3478 = vmatpush2.msra.mxu1 %v8574_v42 }
 0x14c   : > { %v7732_v62 = vpop.f32.mrf.mxu1  ;;  %v2030_v5 = vmin.f32 %v10269_v16, 0.0  ;;  %2747 = vmatmul.mubr.f32.gmra.mxu0 %v2432_v11  ;;  %v2570_v2 = vld [vmem:[#allocation2 + $0x73] ss:$2 sm:$0xff]  ;;  %v2260_v31 = vmax.f32 %v1348_v29, %v2213_v45  ;;  %8262 = vpow2.f32 %v2098_v30  ;;  %v10303_v46 = vadd.f32 %v10132_v24, %v1019_v40  ;;  %v2524_v47 = vld [vmem:[#allocation2 + $0x72] ss:$2 sm:$0xff]  ;;  %3479 = vmatprep.subr.mxu1 %v14619_v1 }
 0x14d   : > { %v885_v21 = vpop.f32.mrf.mxu0  ;;  %v8251_v7 = vpop.eup %8250  ;;  %v1890_v9 = vmul.f32 %v10140_v28, %v10233_v32  ;;  %2926 = vmatprep.mubr.f32.mxu1 %v2570_v2  ;;  %v1349_v51 = vsel %vm1114_vm11, %v10135_v25, %v6719_v34  ;;  %8264 = vpow2.f32 %v1235_v37  ;;  %7822 = vmatprep.subr.mxu0 %v14619_v1  ;;  %vm1115_vm13 = vcmp.gt.f32.partialorder %v10165_v53, 0.0  ;;  %v8575_v25 = vld [vmem:[%s14635_s2 + $0xb0] sm:$0xff]  ;;  %v2400_v40 = vld [vmem:[%s14635_s2 + $0x200] sm:$0xff]  ;;  %v8578_v34 = vld [vmem:[%s14635_s2 + $0x98] sm:$0xff] }
 0x14e   : > { %v1762_v41 = vpop.f32.mrf.mxu1  ;;  %v8253_v27 = vpop.eup %8252  ;;  %v6861_v52 = vadd.f32 -1.0, %v8251_v7  ;;  %v2100_v20 = vmul.f32 1.442695, %v2030_v5  ;;  %2927 = vmatmul.mubr.f32.gmra.mxu1 %v2524_v47  ;;  %2307 = vst [vmem:[#allocation2 + $0x90] sm:$0xff] %v2260_v31  ;;  %v1166_v55 = vmin.f32 %v10303_v46, 0.0  ;;  %7823 = vmatpush3.msra.mxu0 %v2402_v56  ;;  %v1020_v17 = vmul.f32 %v10140_v28, %v10271_v8  ;;  %v8577_v62 = vld [vmem:[%s14635_s2 + $0xa0] sm:$0xff] }
 0x14f   : > { %v7590_v54 = vpop.f32.mrf.mxu0  ;;  %v6720_v32 = vadd.f32 -1.0, %v8253_v27  ;;  %v10315_v49 = vadd.f32 %v10132_v24, %v1890_v9  ;;  %3480 = vmatpush2.msra.mxu1 %v8575_v25  ;;  %v1891_v60 = vmul.f32 %v10140_v28, %v10273_v3  ;;  %v2480_v61 = vld [vmem:[#allocation2 + $0x81] ss:$2 sm:$0xff]  ;;  %v2434_v63 = vld [vmem:[#allocation2 + $0x80] ss:$2 sm:$0xff]  ;;  %7824 = vmatprep.subr.mxu0 %v14619_v1  ;;  %vm1980_vm14 = vcmp.gt.f32.partialorder %v10183_v59, 0.0 }
 0x150   : > { %v7735_v57 = vpop.f32.mrf.mxu1  ;;  %v8255_v58 = vpop.eup %8254  ;;  %v2214_v39 = vsel %vm1979_vm12, %v10161_v50, %v6861_v52  ;;  %8266 = vpow2.f32 %v2100_v20  ;;  %3481 = vmatprep.subr.mxu1 %v14619_v1  ;;  %v2401_v50 = vld [vmem:[%s14635_s2 + $0x208] sm:$0xff]  ;;  %v1237_v3 = vmul.f32 1.442695, %v1166_v55  ;;  %2751 = vmatprep.mubr.f32.mxu0 %v2480_v61  ;;  %v10343_v13 = vadd.f32 %v10132_v24, %v1020_v17  ;;  %v8579_v27 = vld [vmem:[%s14635_s2 + $0x90] sm:$0xff] }
 0x151   : > { %v890_v33 = vpop.f32.mrf.mxu0  ;;  %v2261_v4 = vmax.f32 %v1349_v51, %v2214_v39  ;;  %v1350_v48 = vsel %vm1115_vm13, %v10165_v53, %v6720_v32  ;;  %v6862_v8 = vadd.f32 -1.0, %v8255_v58  ;;  %3482 = vmatpush2.msra.mxu1 %v8576_v44  ;;  %v2031_v12 = vmin.f32 %v10315_v49, 0.0  ;;  %2752 = vmatmul.mubr.f32.gmra.mxu0 %v2434_v63 }
 0x152   : > { %v10327_v38 = vpop.f32.mrf.mxu1  ;;  %v10346_v14 = vadd.f32 %v10132_v24, %v1891_v60  ;;  %3483 = vmatprep.subr.mxu1 %v14619_v1  ;;  %8268 = vpow2.f32 %v1237_v3  ;;  %v1021_v35 = vmul.f32 %v10140_v28, %v885_v21  ;;  %v1892_v22 = vmul.f32 %v10140_v28, %v1762_v41  ;;  %7825 = vmatpush3.msra.mxu0 %v2401_v50 }
 0x153   : > { %v7593_v53 = vpop.f32.mrf.mxu0  ;;  %v8257_v36 = vpop.eup %8256  ;;  %2308 = vst [vmem:[#allocation2 + $0x98] sm:$0xff] %v2261_v4  ;;  %v2215_v26 = vsel %vm1980_vm14, %v10183_v59, %v6862_v8  ;;  %3484 = vmatpush2.msra.mxu1 %v8577_v62  ;;  %vm1116_vm15 = vcmp.gt.f32.partialorder %v10199_v18, 0.0  ;;  %v2102_v29 = vmul.f32 1.442695, %v2031_v12  ;;  %7826 = vmatprep.subr.mxu0 %v14619_v1  ;;  %vm1981_vm0 = vcmp.gt.f32.partialorder %v10229_v10, 0.0 }
 0x154   : > { %v7738_v15 = vpop.f32.mrf.mxu1  ;;  %v2262_v0 = vmax.f32 %v1350_v48, %v2215_v26  ;;  %v6721_v23 = vadd.f32 -1.0, %v8257_v36  ;;  %3485 = vmatprep.subr.mxu1 %v14619_v1  ;;  %v1167_v59 = vmin.f32 %v10343_v13, 0.0  ;;  %v2032_v56 = vmin.f32 %v10346_v14, 0.0  ;;  %7827 = vmatpush3.msra.mxu0 %v2400_v40 }
 0x155   : > { %v10359_v30 = vpop.f32.mrf.mxu0  ;;  %v10369_v45 = vadd.f32 %v10132_v24, %v1021_v35  ;;  %3486 = vmatpush2.msra.mxu1 %v8578_v34  ;;  %vm1117_vm2 = vcmp.gt.f32.partialorder %v10243_v19, 0.0  ;;  %8270 = vpow2.f32 %v2102_v29  ;;  %v10376_v37 = vadd.f32 %v10132_v24, %v1892_v22  ;;  %v2572_v2 = vld [vmem:[#allocation2 + $0x83] ss:$2 sm:$0xff]  ;;  %v2526_v21 = vld [vmem:[#allocation2 + $0x82] ss:$2 sm:$0xff]  ;;  %3609 = vmatprep.subr.mxu0 %v14619_v1 }
 0x156   : > { %v10361_v11 = vpop.f32.mrf.mxu1  ;;  %2309 = vst [vmem:[#allocation2 + $0xa0] sm:$0xff] %v2262_v0  ;;  %v1022_v5 = vmul.f32 %v10140_v28, %v890_v33  ;;  %3487 = vmatprep.subr.mxu1 %v14619_v1  ;;  %vm1982_vm3 = vcmp.gt.f32.partialorder %v10257_v43, 0.0  ;;  %v1239_v31 = vmul.f32 1.442695, %v1167_v59  ;;  %v2104_v9 = vmul.f32 1.442695, %v2032_v56  ;;  %2931 = vmatprep.mubr.f32.mxu1 %v2572_v2 }
 0x157   : > { %v7596_v41 = vpop.f32.mrf.mxu0  ;;  %v8259_v7 = vpop.eup %8258  ;;  %v1168_v47 = vmin.f32 %v10369_v45, 0.0  ;;  %3488 = vmatpush2.msra.mxu1 %v8579_v27  ;;  %v1351_v52 = vsel %vm1116_vm15, %v10199_v18, %v6721_v23  ;;  %v2033_v54 = vmin.f32 %v10376_v37, 0.0  ;;  %v1893_v39 = vmul.f32 %v10140_v28, %v10327_v38  ;;  %v8580_v18 = vld [vmem:[%s14635_s2 + $0x88] sm:$0xff] }
 0x158   : > { %v7741_v42 = vpop.f32.mrf.mxu1  ;;  %v8261_v51 = vpop.eup %8260  ;;  %v6863_v20 = vadd.f32 -1.0, %v8259_v7  ;;  %v10391_v57 = vadd.f32 %v10132_v24, %v1022_v5  ;;  %2932 = vmatmul.mubr.f32.gmra.mxu1 %v2526_v21  ;;  %3489 = vmatprep.subr.mxu1 %v14619_v1  ;;  %8272 = vpow2.f32 %v1239_v31  ;;  %vm1118_vm4 = vcmp.gt.f32.partialorder %v10266_v6, 0.0 }
 0x159   : > { %v900_v32 = vpop.f32.mrf.mxu0  ;;  %v6722_v25 = vadd.f32 -1.0, %v8261_v51  ;;  %v1241_v58 = vmul.f32 1.442695, %v1168_v47  ;;  %3490 = vmatpush2.msra.mxu1 %v8580_v18  ;;  %v8263_v17 = vpop.eup %8262  ;;  %8274 = vpow2.f32 %v2104_v9  ;;  %v2106_v61 = vmul.f32 1.442695, %v2033_v54 }
 0x15a   : > { %v1777_v55 = vpop.f32.mrf.mxu1  ;;  %v2216_v60 = vsel %vm1981_vm0, %v10229_v10, %v6863_v20  ;;  %v2482_v63 = vld [vmem:[#allocation2 + $0x91] ss:$2 sm:$0xff]  ;;  %3491 = vmatprep.subr.mxu1 %v14619_v1  ;;  %v8265_v38 = vpop.eup %8264  ;;  %v6864_v8 = vadd.f32 -1.0, %v8263_v17  ;;  %v2436_v3 = vld [vmem:[#allocation2 + $0x90] ss:$2 sm:$0xff]  ;;  %v8581_v10 = vld [vmem:[%s14635_s2 + $0x80] sm:$0xff]  ;;  %v10412_v53 = vadd.f32 %v10132_v24, %v1893_v39  ;;  %v1023_v26 = vmul.f32 %v10140_v28, %v10359_v30 }
 0x15b   : > { %v7599_v33 = vpop.f32.mrf.mxu0  ;;  %v2263_v4 = vmax.f32 %v1351_v52, %v2216_v60  ;;  %v1352_v48 = vsel %vm1117_vm2, %v10243_v19, %v6722_v25  ;;  %8276 = vpow2.f32 %v1241_v58  ;;  %2756 = vmatprep.mubr.f32.mxu0 %v2482_v63  ;;  %3492 = vmatpush2.msra.mxu1 %v8581_v10  ;;  %v6723_v44 = vadd.f32 -1.0, %v8265_v38 }
 0x15c   : > { %v7744_v50 = vpop.f32.mrf.mxu1  ;;  %8278 = vpow2.f32 %v2106_v61  ;;  %v1169_v12 = vmin.f32 %v10391_v57, 0.0  ;;  %2757 = vmatmul.mubr.f32.gmra.mxu0 %v2436_v3  ;;  %7897 = vmatprep.subr.mxu1 %v14619_v1  ;;  %v2217_v36 = vsel %vm1982_vm3, %v10257_v43, %v6864_v8  ;;  %v1894_v35 = vmul.f32 %v10140_v28, %v10361_v11 }
 0x15d   : > { %v905_v15 = vpop.f32.mrf.mxu0  ;;  %v8267_v19 = vpop.eup %8266  ;;  %2310 = vst [vmem:[#allocation2 + $0xa8] sm:$0xff] %v2263_v4  ;;  %v1024_v22 = vmul.f32 %v10140_v28, %v900_v32  ;;  %v2574_v62 = vld [vmem:[#allocation2 + $0x93] ss:$2 sm:$0xff]  ;;  %v2528_v0 = vld [vmem:[#allocation2 + $0x92] ss:$2 sm:$0xff]  ;;  %v2264_v23 = vmax.f32 %v1352_v48, %v2217_v36  ;;  %v1353_v29 = vsel %vm1118_vm4, %v10266_v6, %v6723_v44  ;;  %vm1983_vm5 = vcmp.gt.f32.partialorder %v10269_v16, 0.0 }
 0x15e   : > { %v1782_v40 = vpop.f32.mrf.mxu1  ;;  %v6865_v59 = vadd.f32 -1.0, %v8267_v19  ;;  %v1243_v56 = vmul.f32 1.442695, %v1169_v12  ;;  %2936 = vmatprep.mubr.f32.mxu1 %v2574_v62  ;;  %v2034_v30 = vmin.f32 %v10412_v53, 0.0  ;;  %v10429_v11 = vadd.f32 %v10132_v24, %v1023_v26 }
 0x15f   : > { %v7602_v34 = vpop.f32.mrf.mxu0  ;;  %v10432_v5 = vadd.f32 %v10132_v24, %v1894_v35  ;;  %2937 = vmatmul.mubr.f32.gmra.mxu1 %v2528_v0  ;;  %v8269_v2 = vpop.eup %8268  ;;  %2311 = vst [vmem:[#allocation2 + $0xb0] sm:$0xff] %v2264_v23  ;;  %v10436_v21 = vadd.f32 %v10132_v24, %v1024_v22  ;;  %v1895_v41 = vmul.f32 %v10140_v28, %v1777_v55  ;;  %vm1119_vm6 = vcmp.gt.f32.partialorder %v10303_v46, 0.0 }
 0x160   : > { %v7747_v43 = vpop.f32.mrf.mxu1  ;;  %v2218_v6 = vsel %vm1983_vm5, %v10269_v16, %v6865_v59  ;;  %8280 = vpow2.f32 %v1243_v56  ;;  %v6724_v9 = vadd.f32 -1.0, %v8269_v2  ;;  %v2108_v47 = vmul.f32 1.442695, %v2034_v30 }
 0x161   : > { %v910_v42 = vpop.f32.mrf.mxu0  ;;  %v2265_v31 = vmax.f32 %v1353_v29, %v2218_v6  ;;  %vm1984_vm7 = vcmp.gt.f32.partialorder %v10315_v49, 0.0  ;;  %vm1120_vm8 = vcmp.gt.f32.partialorder %v10343_v13, 0.0  ;;  %v1170_v16 = vmin.f32 %v10429_v11, 0.0 }
 0x162   : > { %v10439_v7 = vpop.f32.mrf.mxu1  ;;  %v2035_v27 = vmin.f32 %v10432_v5, 0.0  ;;  %v8271_v20 = vpop.eup %8270  ;;  %v1354_v54 = vsel %vm1119_vm6, %v10303_v46, %v6724_v9  ;;  %8282 = vpow2.f32 %v2108_v47  ;;  %v1171_v32 = vmin.f32 %v10436_v21, 0.0 }
 0x163   : > { %v7605_v51 = vpop.f32.mrf.mxu0  ;;  %2312 = vst [vmem:[#allocation2 + $0xb8] sm:$0xff] %v2265_v31  ;;  %v10449_v55 = vadd.f32 %v10132_v24, %v1895_v41  ;;  %v6866_v25 = vadd.f32 -1.0, %v8271_v20  ;;  %v1245_v58 = vmul.f32 1.442695, %v1170_v16  ;;  %v1025_v18 = vmul.f32 %v10140_v28, %v905_v15 }
 0x164   : > { %v7750_v52 = vpop.f32.mrf.mxu1  ;;  %v2110_v39 = vmul.f32 1.442695, %v2035_v27  ;;  %vm1985_vm9 = vcmp.gt.f32.partialorder %v10346_v14, 0.0  ;;  %v1247_v61 = vmul.f32 1.442695, %v1171_v32  ;;  %v1896_v63 = vmul.f32 %v10140_v28, %v1782_v40 }
 0x165   : > { %v10452_v17 = vpop.f32.mrf.mxu0  ;;  %v2036_v46 = vmin.f32 %v10449_v55, 0.0  ;;  %v2484_v33 = vld [vmem:[#allocation2 + $0xa1] ss:$2 sm:$0xff]  ;;  %v8273_v50 = vpop.eup %8272  ;;  %v2219_v38 = vsel %vm1984_vm7, %v10315_v49, %v6866_v25  ;;  %8284 = vpow2.f32 %v1245_v58  ;;  %v10463_v4 = vadd.f32 %v10132_v24, %v1025_v18  ;;  %v2438_v48 = vld [vmem:[#allocation2 + $0xa0] ss:$2 sm:$0xff] }
 0x166   : > { %v10454_v60 = vpop.f32.mrf.mxu1  ;;  %2761 = vmatprep.mubr.f32.mxu0 %v2484_v33  ;;  %v1026_v8 = vmul.f32 %v10140_v28, %v910_v42  ;;  %v8275_v44 = vpop.eup %8274  ;;  %v2266_v12 = vmax.f32 %v1354_v54, %v2219_v38  ;;  %v6725_v15 = vadd.f32 -1.0, %v8273_v50  ;;  %8286 = vpow2.f32 %v2110_v39  ;;  %v2576_v19 = vld [vmem:[#allocation2 + $0xa3] ss:$2 sm:$0xff]  ;;  %v2530_v35 = vld [vmem:[#allocation2 + $0xa2] ss:$2 sm:$0xff] }
 0x167   : > { %v7608_v3 = vpop.f32.mrf.mxu0  ;;  %v2112_v40 = vmul.f32 1.442695, %v2036_v46  ;;  %2762 = vmatmul.mubr.f32.gmra.mxu0 %v2438_v48  ;;  %v6867_v26 = vadd.f32 -1.0, %v8275_v44  ;;  %vm1121_vm10 = vcmp.gt.f32.partialorder %v10369_v45, 0.0  ;;  %8288 = vpow2.f32 %v1247_v61  ;;  %2941 = vmatprep.mubr.f32.mxu1 %v2576_v19 }
 0x168   : > { %v7753_v10 = vpop.f32.mrf.mxu1  ;;  %v8277_v36 = vpop.eup %8276  ;;  %v1172_v49 = vmin.f32 %v10463_v4, 0.0  ;;  %2313 = vst [vmem:[#allocation2 + $0xc0] sm:$0xff] %v2266_v12  ;;  %v1355_v23 = vsel %vm1120_vm8, %v10343_v13, %v6725_v15  ;;  %v10472_v59 = vadd.f32 %v10132_v24, %v1896_v63  ;;  %2942 = vmatmul.mubr.f32.gmra.mxu1 %v2530_v35  ;;  %v10478_v30 = vadd.f32 %v10132_v24, %v1026_v8 }
 0x169   : > { %v920_v22 = vpop.f32.mrf.mxu0  ;;  %v8279_v0 = vpop.eup %8278  ;;  %v6726_v29 = vadd.f32 -1.0, %v8277_v36  ;;  %8290 = vpow2.f32 %v2112_v40  ;;  %v2220_v56 = vsel %vm1985_vm9, %v10346_v14, %v6867_v26  ;;  %vm1986_vm11 = vcmp.gt.f32.partialorder %v10376_v37, 0.0 }
 0x16a   : > { %v1797_v62 = vpop.f32.mrf.mxu1  ;;  %v6868_v34 = vadd.f32 -1.0, %v8279_v0  ;;  %v1249_v43 = vmul.f32 1.442695, %v1172_v49  ;;  %v2486_v2 = vld [vmem:[#allocation2 + $0xb1] ss:$2 sm:$0xff]  ;;  %v2267_v42 = vmax.f32 %v1355_v23, %v2220_v56  ;;  %v2037_v31 = vmin.f32 %v10472_v59, 0.0 }
 0x16b   : > { %v7611_v6 = vpop.f32.mrf.mxu0  ;;  %v1356_v13 = vsel %vm1121_vm10, %v10369_v45, %v6726_v29  ;;  %2766 = vmatprep.mubr.f32.mxu0 %v2486_v2  ;;  %v2440_v9 = vld [vmem:[#allocation2 + $0xb0] ss:$2 sm:$0xff]  ;;  %vm1122_vm12 = vcmp.gt.f32.partialorder %v10391_v57, 0.0  ;;  %v1173_v47 = vmin.f32 %v10478_v30, 0.0  ;;  %v1897_v20 = vmul.f32 %v10140_v28, %v10439_v7 }
 0x16c   : > { %v7756_v41 = vpop.f32.mrf.mxu1  ;;  %v2221_v14 = vsel %vm1986_vm11, %v10376_v37, %v6868_v34  ;;  %8292 = vpow2.f32 %v1249_v43  ;;  %2767 = vmatmul.mubr.f32.gmra.mxu0 %v2440_v9  ;;  %2314 = vst [vmem:[#allocation2 + $0xc8] sm:$0xff] %v2267_v42  ;;  %v2114_v52 = vmul.f32 1.442695, %v2037_v31  ;;  %v1027_v37 = vmul.f32 %v10140_v28, %v10452_v17 }
 0x16d   : > { %v10488_v16 = vpop.f32.mrf.mxu0  ;;  %v8281_v51 = vpop.eup %8280  ;;  %v2268_v45 = vmax.f32 %v1356_v13, %v2221_v14  ;;  %v1251_v32 = vmul.f32 1.442695, %v1173_v47  ;;  %v1898_v25 = vmul.f32 %v10140_v28, %v10454_v60  ;;  %v1028_v58 = vmul.f32 %v10140_v28, %v920_v22 }
 0x16e   : > { %v10490_v27 = vpop.f32.mrf.mxu1  ;;  %v6727_v54 = vadd.f32 -1.0, %v8281_v51  ;;  %8294 = vpow2.f32 %v2114_v52  ;;  %v10500_v61 = vadd.f32 %v10132_v24, %v1897_v20  ;;  %v10503_v46 = vadd.f32 %v10132_v24, %v1027_v37 }
 0x16f   : > { %v7614_v39 = vpop.f32.mrf.mxu0  ;;  %2315 = vst [vmem:[#allocation2 + $0xd0] sm:$0xff] %v2268_v45  ;;  %v1899_v7 = vmul.f32 %v10140_v28, %v1797_v62  ;;  %v8283_v17 = vpop.eup %8282  ;;  %vm1987_vm13 = vcmp.gt.f32.partialorder %v10412_v53, 0.0  ;;  %8296 = vpow2.f32 %v1251_v32  ;;  %v10508_v60 = vadd.f32 %v10132_v24, %v1898_v25  ;;  %v2578_v33 = vld [vmem:[#allocation2 + $0xb3] ss:$2 sm:$0xff]  ;;  %v2532_v50 = vld [vmem:[#allocation2 + $0xb2] ss:$2 sm:$0xff] }
 0x170   : > { %v7759_v18 = vpop.f32.mrf.mxu1  ;;  %v10511_v63 = vadd.f32 %v10132_v24, %v1028_v58  ;;  %v1357_v8 = vsel %vm1122_vm12, %v10391_v57, %v6727_v54  ;;  %v6869_v3 = vadd.f32 -1.0, %v8283_v17  ;;  %vm1123_vm14 = vcmp.gt.f32.partialorder %v10429_v11, 0.0  ;;  %2946 = vmatprep.mubr.f32.mxu1 %v2578_v33 }
 0x171   : > { %v930_v38 = vpop.f32.mrf.mxu0  ;;  %v2038_v10 = vmin.f32 %v10500_v61, 0.0  ;;  %vm1988_vm15 = vcmp.gt.f32.partialorder %v10432_v5, 0.0  ;;  %vm1124_vm0 = vcmp.gt.f32.partialorder %v10436_v21, 0.0  ;;  %v1174_v44 = vmin.f32 %v10503_v46, 0.0  ;;  %2947 = vmatmul.mubr.f32.gmra.mxu1 %v2532_v50 }
 0x172   : > { %v10513_v48 = vpop.f32.mrf.mxu1  ;;  %v2039_v12 = vmin.f32 %v10508_v60, 0.0  ;;  %v8285_v19 = vpop.eup %8284  ;;  %v2222_v57 = vsel %vm1987_vm13, %v10412_v53, %v6869_v3  ;;  %v1175_v26 = vmin.f32 %v10511_v63, 0.0  ;;  %v10529_v49 = vadd.f32 %v10132_v24, %v1899_v7 }
 0x173   : > { %v7617_v15 = vpop.f32.mrf.mxu0  ;;  %v2116_v36 = vmul.f32 1.442695, %v2038_v10  ;;  %v8287_v35 = vpop.eup %8286  ;;  %v2269_v22 = vmax.f32 %v1357_v8, %v2222_v57  ;;  %v6728_v62 = vadd.f32 -1.0, %v8285_v19  ;;  %v1253_v0 = vmul.f32 1.442695, %v1174_v44 }
 0x174   : > { %v7762_v40 = vpop.f32.mrf.mxu1  ;;  %v2118_v23 = vmul.f32 1.442695, %v2039_v12  ;;  %v8289_v34 = vpop.eup %8288  ;;  %v6870_v43 = vadd.f32 -1.0, %v8287_v35  ;;  %vm1989_vm2 = vcmp.gt.f32.partialorder %v10449_v55, 0.0  ;;  %v1255_v2 = vmul.f32 1.442695, %v1175_v26 }
 0x175   : > { %v935_v29 = vpop.f32.mrf.mxu0  ;;  %8298 = vpow2.f32 %v2116_v36  ;;  %v2488_v53 = vld [vmem:[#allocation2 + $0xc1] ss:$2 sm:$0xff]  ;;  %2316 = vst [vmem:[#allocation2 + $0xd8] sm:$0xff] %v2269_v22  ;;  %v1358_v41 = vsel %vm1123_vm14, %v10429_v11, %v6728_v62  ;;  %v6729_v42 = vadd.f32 -1.0, %v8289_v34  ;;  %v2040_v13 = vmin.f32 %v10529_v49, 0.0 }
 0x176   : > { %v1812_v56 = vpop.f32.mrf.mxu1  ;;  %v8291_v6 = vpop.eup %8290  ;;  %8300 = vpow2.f32 %v1253_v0  ;;  %2771 = vmatprep.mubr.f32.mxu0 %v2488_v53  ;;  %v2442_v31 = vld [vmem:[#allocation2 + $0xc0] ss:$2 sm:$0xff]  ;;  %v2580_v9 = vld [vmem:[#allocation2 + $0xc3] ss:$2 sm:$0xff]  ;;  %v2223_v51 = vsel %vm1988_vm15, %v10432_v5, %v6870_v43  ;;  %v1029_v52 = vmul.f32 %v10140_v28, %v10488_v16  ;;  %v1900_v39 = vmul.f32 %v10140_v28, %v10490_v27 }
 0x177   : > { %v7620_v14 = vpop.f32.mrf.mxu0  ;;  %v6871_v45 = vadd.f32 -1.0, %v8291_v6  ;;  %8302 = vpow2.f32 %v2118_v23  ;;  %2772 = vmatmul.mubr.f32.gmra.mxu0 %v2442_v31  ;;  %2951 = vmatprep.mubr.f32.mxu1 %v2580_v9  ;;  %v2534_v11 = vld [vmem:[#allocation2 + $0xc2] ss:$2 sm:$0xff]  ;;  %v2270_v20 = vmax.f32 %v1358_v41, %v2223_v51  ;;  %v1359_v37 = vsel %vm1124_vm0, %v10436_v21, %v6729_v42  ;;  %v10593_v43 = vld [vmem:[%s14609_s6] ss:$0 sm:$0xff] }
 0x178   : > { %v7765_v47 = vpop.f32.mrf.mxu1  ;;  %8304 = vpow2.f32 %v1255_v2  ;;  %v2120_v54 = vmul.f32 1.442695, %v2040_v13  ;;  %2952 = vmatmul.mubr.f32.gmra.mxu1 %v2534_v11  ;;  %v10550_v16 = vadd.f32 %v10132_v24, %v1029_v52  ;;  %v1030_v18 = vmul.f32 %v10140_v28, %v930_v38 }
 0x179   : > { %v940_v32 = vpop.f32.mrf.mxu0  ;;  %v8293_v5 = vpop.eup %8292  ;;  %v2224_v58 = vsel %vm1989_vm2, %v10449_v55, %v6871_v45  ;;  %2317 = vst [vmem:[#allocation2 + $0xe0] sm:$0xff] %v2270_v20  ;;  %v1901_v17 = vmul.f32 %v10140_v28, %v10513_v48  ;;  %vm1125_vm3 = vcmp.gt.f32.partialorder %v10463_v4, 0.0  ;;  %v10560_v8 = vadd.f32 %v10132_v24, %v1900_v39 }
 0x17a   : > { %v10544_v25 = vpop.f32.mrf.mxu1  ;;  %v2271_v21 = vmax.f32 %v1359_v37, %v2224_v58  ;;  %v6730_v7 = vadd.f32 -1.0, %v8293_v5  ;;  %8306 = vpow2.f32 %v2120_v54  ;;  %v1176_v55 = vmin.f32 %v10550_v16, 0.0 }
 0x17b   : > { %v7623_v33 = vpop.f32.mrf.mxu0  ;;  %v10563_v27 = vadd.f32 %v10132_v24, %v1030_v18  ;;  %v8295_v38 = vpop.eup %8294  ;;  %vm1990_vm4 = vcmp.gt.f32.partialorder %v10472_v59, 0.0  ;;  %v10568_v48 = vadd.f32 %v10132_v24, %v1901_v17  ;;  %v1031_v10 = vmul.f32 %v10140_v28, %v935_v29 }
 0x17c   : > { %v7768_v50 = vpop.f32.mrf.mxu1  ;;  %2318 = vst [vmem:[#allocation2 + $0xe8] sm:$0xff] %v2271_v21  ;;  %v1360_v3 = vsel %vm1125_vm3, %v10463_v4, %v6730_v7  ;;  %v8297_v15 = vpop.eup %8296  ;;  %v6872_v40 = vadd.f32 -1.0, %v8295_v38  ;;  %v1257_v19 = vmul.f32 1.442695, %v1176_v55  ;;  %v2041_v57 = vmin.f32 %v10560_v8, 0.0 }
 0x17d   : > { %v10571_v44 = vpop.f32.mrf.mxu0  ;;  %v10579_v4 = vld [vmem:[%s14608_s5] ss:$0 sm:$0xff]  ;;  %vm1126_vm5 = vcmp.gt.f32.partialorder %v10478_v30, 0.0  ;;  %v6731_v24 = vadd.f32 -1.0, %v8297_v15  ;;  %vm1991_vm6 = vcmp.gt.f32.partialorder %v10500_v61, 0.0  ;;  %v1177_v28 = vmin.f32 %v10563_v27, 0.0 }
 0x17e   : > { %v10573_v12 = vpop.f32.mrf.mxu1  ;;  %v1902_v36 = vmul.f32 %v10579_v4, %v1812_v56  ;;  %v2490_v26 = vld [vmem:[#allocation2 + $0xd1] ss:$2 sm:$0xff]  ;;  %v2225_v62 = vsel %vm1990_vm4, %v10472_v59, %v6872_v40  ;;  %8308 = vpow2.f32 %v1257_v19  ;;  %v2122_v0 = vmul.f32 1.442695, %v2041_v57  ;;  %v2444_v29 = vld [vmem:[#allocation2 + $0xd0] ss:$2 sm:$0xff] }
 0x17f   : > { %v7626_v35 = vpop.f32.mrf.mxu0  ;;  %v2042_v23 = vmin.f32 %v10568_v48, 0.0  ;;  %2776 = vmatprep.mubr.f32.mxu0 %v2490_v26  ;;  %v2272_v56 = vmax.f32 %v1360_v3, %v2225_v62  ;;  %vm1127_vm7 = vcmp.gt.f32.partialorder %v10503_v46, 0.0  ;;  %v1259_v34 = vmul.f32 1.442695, %v1177_v28 }
 0x180   : > { %v7771_v22 = vpop.f32.mrf.mxu1  ;;  %v10596_v2 = vadd.f32 %v10593_v43, %v1031_v10  ;;  %2777 = vmatmul.mubr.f32.gmra.mxu0 %v2444_v29  ;;  %8310 = vpow2.f32 %v2122_v0  ;;  %v10603_v41 = vadd.f32 %v10593_v43, %v1902_v36  ;;  %v1032_v42 = vmul.f32 %v10579_v4, %v940_v32  ;;  %v2582_v13 = vld [vmem:[#allocation2 + $0xd3] ss:$2 sm:$0xff]  ;;  %v2536_v31 = vld [vmem:[#allocation2 + $0xd2] ss:$2 sm:$0xff] }
 0x181   : > { %v10598_v59 = vpop.f32.mrf.mxu0  ;;  %v2124_v6 = vmul.f32 1.442695, %v2042_v23  ;;  %2319 = vst [vmem:[#allocation2 + $0xf0] sm:$0xff] %v2272_v56  ;;  %vm1992_vm8 = vcmp.gt.f32.partialorder %v10508_v60, 0.0  ;;  %8312 = vpow2.f32 %v1259_v34  ;;  %v1903_v47 = vmul.f32 %v10579_v4, %v10544_v25  ;;  %2956 = vmatprep.mubr.f32.mxu1 %v2582_v13 }
 0x182   : > { %v10600_v53 = vpop.f32.mrf.mxu1  ;;  %v8299_v9 = vpop.eup %8298  ;;  %v1178_v14 = vmin.f32 %v10596_v2, 0.0  ;;  %v1361_v11 = vsel %vm1126_vm5, %v10478_v30, %v6731_v24  ;;  %v2043_v37 = vmin.f32 %v10603_v41, 0.0  ;;  %2957 = vmatmul.mubr.f32.gmra.mxu1 %v2536_v31  ;;  %v10615_v39 = vadd.f32 %v10593_v43, %v1032_v42 }
 0x183   : > { %v7629_v51 = vpop.f32.mrf.mxu0  ;;  %v8301_v52 = vpop.eup %8300  ;;  %v6873_v20 = vadd.f32 -1.0, %v8299_v9  ;;  %8314 = vpow2.f32 %v2124_v6  ;;  %v2492_v54 = vld [vmem:[#allocation2 + $0xe1] ss:$2 sm:$0xff]  ;;  %v10618_v25 = vadd.f32 %v10593_v43, %v1903_v47  ;;  %v2446_v18 = vld [vmem:[#allocation2 + $0xe0] ss:$2 sm:$0xff]  ;;  %v1033_v55 = vmul.f32 %v10579_v4, %v10571_v44 }
 0x184   : > { %v7774_v45 = vpop.f32.mrf.mxu1  ;;  %v8303_v32 = vpop.eup %8302  ;;  %v6732_v5 = vadd.f32 -1.0, %v8301_v52  ;;  %v1261_v58 = vmul.f32 1.442695, %v1178_v14  ;;  %2781 = vmatprep.mubr.f32.mxu0 %v2492_v54  ;;  %v2126_v50 = vmul.f32 1.442695, %v2043_v37  ;;  %vm1128_vm9 = vcmp.gt.f32.partialorder %v10511_v63, 0.0 }
 0x185   : > { %v955_v21 = vpop.f32.mrf.mxu0  ;;  %v8305_v30 = vpop.eup %8304  ;;  %v2226_v17 = vsel %vm1991_vm6, %v10500_v61, %v6873_v20  ;;  %v6874_v33 = vadd.f32 -1.0, %v8303_v32  ;;  %2782 = vmatmul.mubr.f32.gmra.mxu0 %v2446_v18  ;;  %v1179_v44 = vmin.f32 %v10615_v39, 0.0  ;;  %vm1993_vm10 = vcmp.gt.f32.partialorder %v10529_v49, 0.0 }
 0x186   : > { %v10620_v7 = vpop.f32.mrf.mxu1  ;;  %v2273_v38 = vmax.f32 %v1361_v11, %v2226_v17  ;;  %v1362_v3 = vsel %vm1127_vm7, %v10503_v46, %v6732_v5  ;;  %v6733_v10 = vadd.f32 -1.0, %v8305_v30  ;;  %8316 = vpow2.f32 %v1261_v58 }
 0x187   : > { %v7632_v15 = vpop.f32.mrf.mxu0  ;;  %v8307_v19 = vpop.eup %8306  ;;  %v2227_v61 = vsel %vm1992_vm8, %v10508_v60, %v6874_v33  ;;  %8318 = vpow2.f32 %v2126_v50  ;;  %v1263_v26 = vmul.f32 1.442695, %v1179_v44  ;;  %v2044_v35 = vmin.f32 %v10618_v25, 0.0 }
 0x188   : > { %v7777_v40 = vpop.f32.mrf.mxu1  ;;  %2320 = vst [vmem:[#allocation2 + $0xf8] sm:$0xff] %v2273_v38  ;;  %v2274_v57 = vmax.f32 %v1362_v3, %v2227_v61  ;;  %v1363_v36 = vsel %vm1128_vm9, %v10511_v63, %v6733_v10  ;;  %v6875_v46 = vadd.f32 -1.0, %v8307_v19  ;;  %v10643_v60 = vadd.f32 %v10593_v43, %v1033_v55  ;;  %v2584_v62 = vld [vmem:[#allocation2 + $0xe3] ss:$2 sm:$0xff]  ;;  %v10652_v29 = vld [vmem:[#allocation2 + $0xe2] ss:$2 sm:$0xff] }
 0x189   : > { %v10637_v24 = vpop.f32.mrf.mxu0  ;;  %v1904_v22 = vmul.f32 %v10579_v4, %v10573_v12  ;;  %v1034_v0 = vmul.f32 %v10579_v4, %v10598_v59  ;;  %v1905_v23 = vmul.f32 %v10579_v4, %v10600_v53  ;;  %2961 = vmatprep.mubr.f32.mxu1 %v2584_v62  ;;  %v1035_v56 = vmul.f32 %v10579_v4, %v955_v21 }
 0x18a   : > { %v10639_v28 = vpop.f32.mrf.mxu1  ;;  %2321 = vst [vmem:[#allocation2 + $0x100] sm:$0xff] %v2274_v57  ;;  %v2228_v63 = vsel %vm1993_vm10, %v10529_v49, %v6875_v46  ;;  %vm1129_vm11 = vcmp.gt.f32.partialorder %v10550_v16, 0.0  ;;  %8320 = vpow2.f32 %v1263_v26  ;;  %v2128_v12 = vmul.f32 1.442695, %v2044_v35  ;;  %2962 = vmatmul.mubr.f32.gmra.mxu1 %v10652_v29 }
 0x18b   : > { %v7635_v34 = vpop.f32.mrf.mxu0  ;;  %v2275_v42 = vmax.f32 %v1363_v36, %v2228_v63  ;;  %v8309_v49 = vpop.eup %8308  ;;  %v1180_v59 = vmin.f32 %v10643_v60, 0.0  ;;  %v10659_v13 = vadd.f32 %v10593_v43, %v1904_v22  ;;  %v10662_v53 = vadd.f32 %v10593_v43, %v1034_v0 }
 0x18c   : > { %v7780_v6 = vpop.f32.mrf.mxu1  ;;  %v10665_v31 = vadd.f32 %v10593_v43, %v1905_v23  ;;  %v6734_v47 = vadd.f32 -1.0, %v8309_v49  ;;  %vm1994_vm12 = vcmp.gt.f32.partialorder %v10560_v8, 0.0  ;;  %vm1130_vm13 = vcmp.gt.f32.partialorder %v10563_v27, 0.0 }
 0x18d   : > { %v10667_v9 = vpop.f32.mrf.mxu0  ;;  %2322 = vst [vmem:[#allocation2 + $0x108] sm:$0xff] %v2275_v42  ;;  %8322 = vpow2.f32 %v2128_v12  ;;  %v8311_v51 = vpop.eup %8310  ;;  %vm1995_vm14 = vcmp.gt.f32.partialorder %v10568_v48, 0.0  ;;  %v1265_v45 = vmul.f32 1.442695, %v1180_v59  ;;  %v2045_v52 = vmin.f32 %v10659_v13, 0.0 }
 0x18e   : > { %v10669_v14 = vpop.f32.mrf.mxu1  ;;  %v10676_v11 = vadd.f32 %v10593_v43, %v1035_v56  ;;  %v8313_v54 = vpop.eup %8312  ;;  %v1364_v32 = vsel %vm1129_vm11, %v10550_v16, %v6734_v47  ;;  %v6876_v5 = vadd.f32 -1.0, %v8311_v51  ;;  %v1181_v58 = vmin.f32 %v10662_v53, 0.0 }
 0x18f   : > { %v7638_v20 = vpop.f32.mrf.mxu0  ;;  %v1906_v18 = vmul.f32 %v10579_v4, %v10620_v7  ;;  %v10684_v21 = vld [vmem:[#allocation2 + $0xf1] ss:$2 sm:$0xff]  ;;  %v6735_v17 = vadd.f32 -1.0, %v8313_v54  ;;  %8324 = vpow2.f32 %v1265_v45  ;;  %v2130_v33 = vmul.f32 1.442695, %v2045_v52 }
 0x190   : > { %v7783_v37 = vpop.f32.mrf.mxu1  ;;  %v8315_v30 = vpop.eup %8314  ;;  %v2046_v50 = vmin.f32 %v10665_v31, 0.0  ;;  %2786 = vmatprep.mubr.f32.mxu0 %v10684_v21  ;;  %v2448_v55 = vld [vmem:[#allocation2 + $0xf0] ss:$2 sm:$0xff]  ;;  %v2229_v3 = vsel %vm1994_vm12, %v10560_v8, %v6876_v5  ;;  %vm1131_vm15 = vcmp.gt.f32.partialorder %v10596_v2, 0.0  ;;  %v1267_v10 = vmul.f32 1.442695, %v1181_v58 }
 0x191   : > { %v10688_v38 = vpop.f32.mrf.mxu0  ;;  %v6877_v7 = vadd.f32 -1.0, %v8315_v30  ;;  %2787 = vmatmul.mubr.f32.gmra.mxu0 %v2448_v55  ;;  %v2586_v15 = vld [vmem:[#allocation2 + $0xf3] ss:$2 sm:$0xff]  ;;  %v2276_v40 = vmax.f32 %v1364_v32, %v2229_v3  ;;  %v1365_v19 = vsel %vm1130_vm13, %v10563_v27, %v6735_v17  ;;  %8326 = vpow2.f32 %v2130_v33  ;;  %v10699_v44 = vld [vmem:[#allocation2 + $0xf2] ss:$2 sm:$0xff] }
 0x192   : > { %v10690_v16 = vpop.f32.mrf.mxu1  ;;  %v2132_v61 = vmul.f32 1.442695, %v2046_v50  ;;  %2966 = vmatprep.mubr.f32.mxu1 %v2586_v15  ;;  %8328 = vpow2.f32 %v1267_v10  ;;  %v1182_v26 = vmin.f32 %v10676_v11, 0.0  ;;  %v10706_v35 = vadd.f32 %v10593_v43, %v1906_v18 }
 0x193   : > { %v7641_v57 = vpop.f32.mrf.mxu0  ;;  %v8317_v46 = vpop.eup %8316  ;;  %v2230_v8 = vsel %vm1995_vm14, %v10568_v48, %v6877_v7  ;;  %2967 = vmatmul.mubr.f32.gmra.mxu1 %v10699_v44  ;;  %2323 = vst [vmem:[#allocation2 + $0x110] sm:$0xff] %v2276_v40  ;;  %v1036_v63 = vmul.f32 %v10579_v4, %v10637_v24  ;;  %vm1996_vm0 = vcmp.gt.f32.partialorder %v10603_v41, 0.0  ;;  %v1907_v49 = vmul.f32 %v10579_v4, %v10639_v28 }
 0x194   : > { %v7786_v36 = vpop.f32.mrf.mxu1  ;;  %v8319_v27 = vpop.eup %8318  ;;  %v2277_v22 = vmax.f32 %v1365_v19, %v2230_v8  ;;  %v6736_v62 = vadd.f32 -1.0, %v8317_v46  ;;  %8330 = vpow2.f32 %v2132_v61  ;;  %v10711_v0 = vld [vmem:[#allocation2 + $0x101] ss:$2 sm:$0xff]  ;;  %v2450_v23 = vld [vmem:[#allocation2 + $0x100] ss:$2 sm:$0xff]  ;;  %v2047_v42 = vmin.f32 %v10706_v35, 0.0 }
 0x195   : > { %v10713_v48 = vpop.f32.mrf.mxu0  ;;  %v6878_v34 = vadd.f32 -1.0, %v8319_v27  ;;  %v1269_v6 = vmul.f32 1.442695, %v1182_v26  ;;  %2791 = vmatprep.mubr.f32.mxu0 %v10711_v0  ;;  %v10724_v12 = vadd.f32 %v10593_v43, %v1036_v63  ;;  %v1037_v59 = vmul.f32 %v10579_v4, %v10667_v9 }
 0x196   : > { %v10715_v56 = vpop.f32.mrf.mxu1  ;;  %2324 = vst [vmem:[#allocation2 + $0x118] sm:$0xff] %v2277_v22  ;;  %v1366_v24 = vsel %vm1131_vm15, %v10596_v2, %v6736_v62  ;;  %2792 = vmatmul.mubr.f32.gmra.mxu0 %v2450_v23  ;;  %v2134_v52 = vmul.f32 1.442695, %v2047_v42  ;;  %v1908_v20 = vmul.f32 %v10579_v4, %v10669_v14  ;;  %vm1132_vm2 = vcmp.gt.f32.partialorder %v10615_v39, 0.0 }
 0x197   : > { %v7644_v47 = vpop.f32.mrf.mxu0  ;;  %v2231_v45 = vsel %vm1996_vm0, %v10603_v41, %v6878_v34  ;;  %8332 = vpow2.f32 %v1269_v6  ;;  %v8321_v2 = vpop.eup %8320  ;;  %v1183_v54 = vmin.f32 %v10724_v12, 0.0  ;;  %v10736_v28 = vadd.f32 %v10593_v43, %v1907_v49 }
 0x198   : > { %v7789_v51 = vpop.f32.mrf.mxu1  ;;  %v2278_v37 = vmax.f32 %v1366_v24, %v2231_v45  ;;  %v6737_v5 = vadd.f32 -1.0, %v8321_v2  ;;  %8334 = vpow2.f32 %v2134_v52  ;;  %v10743_v41 = vadd.f32 %v10593_v43, %v1037_v59 }
 0x199   : > { %v10738_v9 = vpop.f32.mrf.mxu0  ;;  %v10746_v14 = vadd.f32 %v10593_v43, %v1908_v20  ;;  %vm1997_vm3 = vcmp.gt.f32.partialorder %v10618_v25, 0.0  ;;  %v1271_v18 = vmul.f32 1.442695, %v1183_v54  ;;  %v2048_v30 = vmin.f32 %v10736_v28, 0.0 }
 0x19a   : > { %v10740_v32 = vpop.f32.mrf.mxu1  ;;  %v8323_v58 = vpop.eup %8322  ;;  %2325 = vst [vmem:[#allocation2 + $0x120] sm:$0xff] %v2278_v37  ;;  %v1038_v17 = vmul.f32 %v10579_v4, %v10688_v38  ;;  %v1367_v55 = vsel %vm1132_vm2, %v10615_v39, %v6737_v5  ;;  %vm1133_vm4 = vcmp.gt.f32.partialorder %v10643_v60, 0.0  ;;  %v1184_v7 = vmin.f32 %v10743_v41, 0.0  ;;  %v2588_v10 = vld [vmem:[#allocation2 + $0x103] ss:$2 sm:$0xff] }
 0x19b   : > { %v7647_v33 = vpop.f32.mrf.mxu0  ;;  %v6879_v3 = vadd.f32 -1.0, %v8323_v58  ;;  %vm1998_vm5 = vcmp.gt.f32.partialorder %v10659_v13, 0.0  ;;  %8336 = vpow2.f32 %v1271_v18  ;;  %v2136_v15 = vmul.f32 1.442695, %v2048_v30  ;;  %2971 = vmatprep.mubr.f32.mxu1 %v2588_v10  ;;  %v10759_v38 = vld [vmem:[#allocation2 + $0x102] ss:$2 sm:$0xff] }
 0x19c   : > { %v7792_v50 = vpop.f32.mrf.mxu1  ;;  %v2049_v40 = vmin.f32 %v10746_v14, 0.0  ;;  %v8325_v39 = vpop.eup %8324  ;;  %v1273_v36 = vmul.f32 1.442695, %v1184_v7  ;;  %v10769_v46 = vadd.f32 %v10593_v43, %v1038_v17  ;;  %v1909_v8 = vmul.f32 %v10579_v4, %v10690_v16  ;;  %2972 = vmatmul.mubr.f32.gmra.mxu1 %v10759_v38 }
 0x19d   : > { %v10761_v19 = vpop.f32.mrf.mxu0  ;;  %v2232_v57 = vsel %vm1997_vm3, %v10618_v25, %v6879_v3  ;;  %v10774_v26 = vld [vmem:[#allocation2 + $0x111] ss:$2 sm:$0xff]  ;;  %v2452_v27 = vld [vmem:[#allocation2 + $0x110] ss:$2 sm:$0xff]  ;;  %v6738_v62 = vadd.f32 -1.0, %v8325_v39  ;;  %8338 = vpow2.f32 %v2136_v15  ;;  %vm1134_vm6 = vcmp.gt.f32.partialorder %v10662_v53, 0.0 }
 0x19e   : > { %v10763_v61 = vpop.f32.mrf.mxu1  ;;  %v2279_v22 = vmax.f32 %v1367_v55, %v2232_v57  ;;  %v2138_v63 = vmul.f32 1.442695, %v2049_v40  ;;  %2796 = vmatprep.mubr.f32.mxu0 %v10774_v26  ;;  %v8327_v34 = vpop.eup %8326  ;;  %8340 = vpow2.f32 %v1273_v36  ;;  %v1185_v6 = vmin.f32 %v10769_v46, 0.0 }
 0x19f   : > { %v7650_v23 = vpop.f32.mrf.mxu0  ;;  %v10780_v16 = vadd.f32 %v10593_v43, %v1909_v8  ;;  %2797 = vmatmul.mubr.f32.gmra.mxu0 %v2452_v27  ;;  %v8329_v42 = vpop.eup %8328  ;;  %v1368_v24 = vsel %vm1133_vm4, %v10643_v60, %v6738_v62  ;;  %v6880_v49 = vadd.f32 -1.0, %v8327_v34  ;;  %v1039_v59 = vmul.f32 %v10579_v4, %v10713_v48 }
 0x1a0   : > { %v7795_v25 = vpop.f32.mrf.mxu1  ;;  %2326 = vst [vmem:[#allocation2 + $0x128] sm:$0xff] %v2279_v22  ;;  %8342 = vpow2.f32 %v2138_v63  ;;  %v6739_v51 = vadd.f32 -1.0, %v8329_v42  ;;  %vm1999_vm7 = vcmp.gt.f32.partialorder %v10665_v31, 0.0  ;;  %v1275_v45 = vmul.f32 1.442695, %v1185_v6 }
 0x1a1   : > { %v8331_v47 = vpop.eup %8330  ;;  %v2050_v52 = vmin.f32 %v10780_v16, 0.0  ;;  %v2233_v20 = vsel %vm1998_vm5, %v10659_v13, %v6880_v49  ;;  %v10793_v37 = vadd.f32 %v10593_v43, %v1039_v59  ;;  %v1910_v60 = vmul.f32 %v10579_v4, %v10715_v56  ;;  %v2590_v54 = vld [vmem:[#allocation2 + $0x113] ss:$2 sm:$0xff]  ;;  %v10797_v48 = vld [vmem:[#allocation2 + $0x112] ss:$2 sm:$0xff] }
 0x1a2   : > { %v6881_v2 = vadd.f32 -1.0, %v8331_v47  ;;  %v2280_v5 = vmax.f32 %v1368_v24, %v2233_v20  ;;  %v1369_v58 = vsel %vm1134_vm6, %v10662_v53, %v6739_v51  ;;  %8344 = vpow2.f32 %v1275_v45  ;;  %2976 = vmatprep.mubr.f32.mxu1 %v2590_v54 }
 0x1a3   : > { %v2140_v18 = vmul.f32 1.442695, %v2050_v52  ;;  %vm1135_vm8 = vcmp.gt.f32.partialorder %v10676_v11, 0.0  ;;  %v1186_v17 = vmin.f32 %v10793_v37, 0.0  ;;  %v10806_v56 = vadd.f32 %v10593_v43, %v1910_v60  ;;  %2977 = vmatmul.mubr.f32.gmra.mxu1 %v10797_v48 }
 0x1a4   : > { %v8333_v30 = vpop.eup %8332  ;;  %v2234_v13 = vsel %vm1999_vm7, %v10665_v31, %v6881_v2  ;;  %2327 = vst [vmem:[#allocation2 + $0x130] sm:$0xff] %v2280_v5  ;;  %v1040_v53 = vmul.f32 %v10579_v4, %v10738_v9  ;;  %vm2000_vm9 = vcmp.gt.f32.partialorder %v10706_v35, 0.0  ;;  %v1911_v7 = vmul.f32 %v10579_v4, %v10740_v32 }
 0x1a5   : > { %v2281_v33 = vmax.f32 %v1369_v58, %v2234_v13  ;;  %v6740_v50 = vadd.f32 -1.0, %v8333_v30  ;;  %8346 = vpow2.f32 %v2140_v18  ;;  %v8335_v55 = vpop.eup %8334  ;;  %v1277_v31 = vmul.f32 1.442695, %v1186_v17 }
 0x1a6   : > { %v2051_v3 = vmin.f32 %v10806_v56, 0.0  ;;  %v6882_v15 = vadd.f32 -1.0, %v8335_v55  ;;  %v10817_v40 = vadd.f32 %v10593_v43, %v1040_v53  ;;  %v1041_v39 = vmul.f32 %v10579_v4, %v10761_v19 }
 0x1a7   : > { %2328 = vst [vmem:[#allocation2 + $0x138] sm:$0xff] %v2281_v33  ;;  %v1370_v10 = vsel %vm1135_vm8, %v10676_v11, %v6740_v50  ;;  %v10821_v9 = vld [vmem:[#allocation2 + $0x121] ss:$2 sm:$0xff]  ;;  %v2454_v57 = vld [vmem:[#allocation2 + $0x120] ss:$2 sm:$0xff]  ;;  %8348 = vpow2.f32 %v1277_v31  ;;  %v10824_v8 = vadd.f32 %v10593_v43, %v1911_v7  ;;  %v1912_v32 = vmul.f32 %v10579_v4, %v10763_v61 }
 0x1a8   : > { %v2142_v36 = vmul.f32 1.442695, %v2051_v3  ;;  %2801 = vmatprep.mubr.f32.mxu0 %v10821_v9  ;;  %v8337_v11 = vpop.eup %8336  ;;  %v2235_v27 = vsel %vm2000_vm9, %v10706_v35, %v6882_v15  ;;  %v1187_v19 = vmin.f32 %v10817_v40, 0.0  ;;  %v10834_v22 = vadd.f32 %v10593_v43, %v1041_v39 }
 0x1a9   : > { %2802 = vmatmul.mubr.f32.gmra.mxu0 %v2454_v57  ;;  %v2282_v62 = vmax.f32 %v1370_v10, %v2235_v27  ;;  %v6741_v63 = vadd.f32 -1.0, %v8337_v11  ;;  %vm1136_vm10 = vcmp.gt.f32.partialorder %v10724_v12, 0.0  ;;  %v2052_v61 = vmin.f32 %v10824_v8, 0.0 }
 0x1aa   : > { %8350 = vpow2.f32 %v2142_v36  ;;  %v8339_v23 = vpop.eup %8338  ;;  %v1279_v4 = vmul.f32 1.442695, %v1187_v19  ;;  %v1188_v25 = vmin.f32 %v10834_v22, 0.0  ;;  %vm2001_vm11 = vcmp.gt.f32.partialorder %v10736_v28, 0.0 }
 0x1ab   : > { %v8341_v34 = vpop.eup %8340  ;;  %2329 = vst [vmem:[#allocation2 + $0x140] sm:$0xff] %v2282_v62  ;;  %v1371_v35 = vsel %vm1136_vm10, %v10724_v12, %v6741_v63  ;;  %v6883_v6 = vadd.f32 -1.0, %v8339_v23  ;;  %v10842_v42 = vadd.f32 %v10593_v43, %v1912_v32  ;;  %v10844_v24 = vld [vmem:[#allocation2 + $0x123] ss:$2 sm:$0xff]  ;;  %v10846_v49 = vld [vmem:[#allocation2 + $0x122] ss:$2 sm:$0xff] }
 0x1ac   : > { %v6742_v47 = vadd.f32 -1.0, %v8341_v34  ;;  %8352 = vpow2.f32 %v1279_v4  ;;  %v2144_v51 = vmul.f32 1.442695, %v2052_v61  ;;  %v1281_v45 = vmul.f32 1.442695, %v1188_v25  ;;  %2981 = vmatprep.mubr.f32.mxu1 %v10844_v24 }
 0x1ad   : > { %v8343_v59 = vpop.eup %8342  ;;  %v2236_v52 = vsel %vm2001_vm11, %v10736_v28, %v6883_v6  ;;  %vm1137_vm12 = vcmp.gt.f32.partialorder %v10743_v41, 0.0  ;;  %v2053_v20 = vmin.f32 %v10842_v42, 0.0  ;;  %2982 = vmatmul.mubr.f32.gmra.mxu1 %v10846_v49  ;;  %vm2002_vm13 = vcmp.gt.f32.partialorder %v10746_v14, 0.0 }
 0x1ae   : > { %v6884_v12 = vadd.f32 -1.0, %v8343_v59  ;;  %v10853_v43 = vld [vmem:[#allocation2 + $0x131] ss:$2 sm:$0xff]  ;;  %v2283_v2 = vmax.f32 %v1371_v35, %v2236_v52  ;;  %v1372_v60 = vsel %vm1137_vm12, %v10743_v41, %v6742_v47  ;;  %8354 = vpow2.f32 %v2144_v51  ;;  %v2456_v54 = vld [vmem:[#allocation2 + $0x130] ss:$2 sm:$0xff] }
 0x1af   : > { %2806 = vmatprep.mubr.f32.mxu0 %v10853_v43  ;;  %v8345_v5 = vpop.eup %8344  ;;  %8356 = vpow2.f32 %v1281_v45  ;;  %v2146_v58 = vmul.f32 1.442695, %v2053_v20  ;;  %vm1138_vm14 = vcmp.gt.f32.partialorder %v10769_v46, 0.0  ;;  %vm2003_vm15 = vcmp.gt.f32.partialorder %v10780_v16, 0.0  ;;  %v10910_v45 = vld [vmem:[#allocation2 + $0x4] ss:$2 sm:$0xff] }
 0x1b0   : > { %v2237_v28 = vsel %vm2002_vm13, %v10746_v14, %v6884_v12  ;;  %2807 = vmatmul.mubr.f32.gmra.mxu0 %v2456_v54  ;;  %2330 = vst [vmem:[#allocation2 + $0x148] sm:$0xff] %v2283_v2  ;;  %v6743_v30 = vadd.f32 -1.0, %v8345_v5  ;;  %vm1139_vm0 = vcmp.gt.f32.partialorder %v10793_v37, 0.0  ;;  %vm2004_vm2 = vcmp.gt.f32.partialorder %v10806_v56, 0.0  ;;  %v8584_v52 = vld [vmem:[#allocation2 + $0x2] ss:$2 sm:$0xff] }
 0x1b1   : > { %v2284_v18 = vmax.f32 %v1372_v60, %v2237_v28  ;;  %8358 = vpow2.f32 %v2146_v58  ;;  %vm1140_vm3 = vcmp.gt.f32.partialorder %v10817_v40, 0.0  ;;  %vm2005_vm4 = vcmp.gt.f32.partialorder %v10824_v8, 0.0  ;;  %v8585_v20 = vld [vmem:[%s14635_s2 + $0x178] sm:$0xff]  ;;  %v8586_v54 = vld [vmem:[#allocation2 + $0x1] ss:$2 sm:$0xff]  ;;  %v8587_v5 = vld [vmem:[%s14635_s2 + $0x170] sm:$0xff] }
 0x1b2   : > { %v8347_v13 = vpop.eup %8346  ;;  %v1373_v41 = vsel %vm1138_vm14, %v10769_v46, %v6743_v30  ;;  %v10861_v33 = vld [vmem:[#allocation2 + $0x133] ss:$2 sm:$0xff]  ;;  %v10863_v50 = vld [vmem:[#allocation2 + $0x132] ss:$2 sm:$0xff]  ;;  %vm1141_vm5 = vcmp.gt.f32.partialorder %v10834_v22, 0.0  ;;  %vm2006_vm6 = vcmp.gt.f32.partialorder %v10842_v42, 0.0 }
 0x1b3   : > { %2331 = vst [vmem:[#allocation2 + $0x150] sm:$0xff] %v2284_v18  ;;  %v6885_v17 = vadd.f32 -1.0, %v8347_v13  ;;  %2986 = vmatprep.mubr.f32.mxu1 %v10861_v33  ;;  %v10919_v60 = vld [vmem:[#allocation2 + $0x14] ss:$2 sm:$0xff] }
 0x1b4   : > { %v8349_v14 = vpop.eup %8348  ;;  %2987 = vmatmul.mubr.f32.gmra.mxu1 %v10863_v50  ;;  %v8588_v58 = vld [vmem:[%s14635_s2 + $0x278] sm:$0xff] }
 0x1b5   : > { %v2238_v53 = vsel %vm2003_vm15, %v10780_v16, %v6885_v17  ;;  %v6744_v31 = vadd.f32 -1.0, %v8349_v14  ;;  %v8589_v30 = vld [vmem:[#allocation2 + $0x12] ss:$2 sm:$0xff]  ;;  %v8590_v17 = vld [vmem:[#allocation2 + $0x11] ss:$2 sm:$0xff]  ;;  %v8591_v14 = vld [vmem:[%s14635_s2 + $0x168] sm:$0xff] }
 0x1b6   : > { %v2285_v55 = vmax.f32 %v1373_v41, %v2238_v53  ;;  %v10934_v41 = vld [vmem:[#allocation2 + $0x24] ss:$2 sm:$0xff] }
 0x1b7   : > { %v8351_v3 = vpop.eup %8350  ;;  %v1374_v46 = vsel %vm1139_vm0, %v10793_v37, %v6744_v31  ;;  %v10871_v10 = vld [vmem:[#allocation2 + $0x141] ss:$2 sm:$0xff]  ;;  %v2458_v15 = vld [vmem:[#allocation2 + $0x140] ss:$2 sm:$0xff]  ;;  %v8593_v31 = vld [vmem:[%s14635_s2 + $0x270] sm:$0xff] }
 0x1b8   : > { %2332 = vst [vmem:[#allocation2 + $0x158] sm:$0xff] %v2285_v55  ;;  %v6886_v7 = vadd.f32 -1.0, %v8351_v3  ;;  %2811 = vmatprep.mubr.f32.mxu0 %v10871_v10  ;;  %v8592_v53 = vld [vmem:[#allocation2 + $0x22] ss:$2 sm:$0xff] }
 0x1b9   : > { %v8353_v39 = vpop.eup %8352  ;;  %2812 = vmatmul.mubr.f32.gmra.mxu0 %v2458_v15  ;;  %v8594_v3 = vld [vmem:[%s14635_s2 + $0x160] sm:$0xff] }
 0x1ba   : > { %v2239_v16 = vsel %vm2004_vm2, %v10806_v56, %v6886_v7  ;;  %v10876_v57 = vld [vmem:[#allocation2 + $0x143] ss:$2 sm:$0xff]  ;;  %v10878_v36 = vld [vmem:[#allocation2 + $0x142] ss:$2 sm:$0xff]  ;;  %v6745_v11 = vadd.f32 -1.0, %v8353_v39 }
 0x1bb   : > { %v2286_v32 = vmax.f32 %v1374_v46, %v2239_v16  ;;  %2991 = vmatprep.mubr.f32.mxu1 %v10876_v57  ;;  %v8355_v37 = vpop.eup %8354  ;;  %v10949_v7 = vld [vmem:[#allocation2 + $0x34] ss:$2 sm:$0xff]  ;;  %v8595_v15 = vld [vmem:[#allocation2 + $0x21] ss:$2 sm:$0xff] }
 0x1bc   : > { %2992 = vmatmul.mubr.f32.gmra.mxu1 %v10878_v36  ;;  %v8357_v27 = vpop.eup %8356  ;;  %v1375_v19 = vsel %vm1140_vm3, %v10817_v40, %v6745_v11  ;;  %v6887_v62 = vadd.f32 -1.0, %v8355_v37  ;;  %v8596_v16 = vld [vmem:[#allocation2 + $0x32] ss:$2 sm:$0xff] }
 0x1bd   : > { %2333 = vst [vmem:[#allocation2 + $0x160] sm:$0xff] %v2286_v32  ;;  %v6746_v56 = vadd.f32 -1.0, %v8357_v27  ;;  %v8597_v11 = vld [vmem:[%s14635_s2 + $0x158] sm:$0xff]  ;;  %v10962_v27 = vld [vmem:[#allocation2 + $0x44] ss:$2 sm:$0xff] }
 0x1be   : > { %v8359_v63 = vpop.eup %8358  ;;  %v2240_v23 = vsel %vm2005_vm4, %v10824_v8, %v6887_v62  ;;  %v8599_v62 = vld [vmem:[%s14635_s2 + $0x150] sm:$0xff] }
 0x1bf   : > { %v10887_v4 = vld [vmem:[#allocation2 + $0x151] ss:$2 sm:$0xff]  ;;  %v2460_v61 = vld [vmem:[#allocation2 + $0x150] ss:$2 sm:$0xff]  ;;  %v2287_v25 = vmax.f32 %v1375_v19, %v2240_v23  ;;  %v1376_v34 = vsel %vm1141_vm5, %v10834_v22, %v6746_v56  ;;  %v6888_v35 = vadd.f32 -1.0, %v8359_v63  ;;  %v8600_v56 = vld [vmem:[%s14635_s2 + $0x268] sm:$0xff] }
 0x1c0   : > { %2816 = vmatprep.mubr.f32.mxu0 %v10887_v4  ;;  %v8598_v19 = vld [vmem:[#allocation2 + $0x31] ss:$2 sm:$0xff]  ;;  %v8601_v63 = vld [vmem:[#allocation2 + $0x42] ss:$2 sm:$0xff] }
 0x1c1   : > { %2817 = vmatmul.mubr.f32.gmra.mxu0 %v2460_v61  ;;  %2334 = vst [vmem:[#allocation2 + $0x168] sm:$0xff] %v2287_v25  ;;  %v2241_v40 = vsel %vm2006_vm6, %v10842_v42, %v6888_v35  ;;  %v10975_v61 = vld [vmem:[#allocation2 + $0x54] ss:$2 sm:$0xff]  ;;  %v8602_v25 = vld [vmem:[#allocation2 + $0x41] ss:$2 sm:$0xff] }
 0x1c2   : > { %v2288_v6 = vmax.f32 %v1376_v34, %v2241_v40  ;;  %v8603_v34 = vld [vmem:[%s14635_s2 + $0x148] sm:$0xff] }
 0x1c4   : > { %v10893_v59 = vld [vmem:[#allocation2 + $0x153] ss:$2 sm:$0xff]  ;;  %v10895_v8 = vld [vmem:[#allocation2 + $0x152] ss:$2 sm:$0xff]  ;;  %2335 = vst [vmem:[#allocation2 + $0x170] sm:$0x1f] %v2288_v6 }
 0x1c5   : > { %2996 = vmatprep.mubr.f32.mxu1 %v10893_v59  ;;  %v8604_v6 = vld [vmem:[#allocation2 + $0x52] ss:$2 sm:$0xff] }
 0x1c6   : > { %2997 = vmatmul.mubr.f32.gmra.mxu1 %v10895_v8 }
 0x1c8   : > { %v10899_v22 = vld [vmem:[#allocation2 + $0x161] ss:$2 sm:$0xff]  ;;  %v2462_v47 = vld [vmem:[#allocation2 + $0x160] ss:$2 sm:$0xff] }
 0x1c9   : > { %2821 = vmatprep.mubr.f32.mxu0 %v10899_v22 }
 0x1ca   : > { %2822 = vmatmul.mubr.f32.gmra.mxu0 %v2462_v47 }
 0x1cb   : > { %v10902_v51 = vld [vmem:[#allocation2 + $0x163] ss:$2 sm:$0xff]  ;;  %7828 = vmatprep.mubr.msk.f32.mxu0 %vm8942_vm1, %v14619_v1  ;;  %v10906_v42 = vld [vmem:[#allocation2 + $0x162] ss:$2 sm:$0xff] }
 0x1cc   : > { %3001 = vmatprep.mubr.f32.mxu1 %v10902_v51 }
 0x1cd   : > { %3002 = vmatmul.mubr.f32.gmra.mxu1 %v10906_v42 }
 0x1ce   : > { %7829 = vmatmul.mubr.f32.vlgmr.msra.gmra.mxu0 %v10910_v45  ;;  %3493 = vmatprep.mubr.f32.mxu1 %v8584_v52  ;;  %v8605_v52 = vld [vmem:[%s14635_s2 + $0x260] sm:$0xff] }
 0x1cf   : > { %v2713_v12 = vpop.f32.mrf.mxu0  ;;  %3610 = vmatpush1.msra.mxu0 %v8585_v20  ;;  %7831 = vmatprep.mubr.msk.f32.mxu0 %vm8942_vm1, %v14619_v1  ;;  %v8606_v20 = vld [vmem:[%s14635_s2 + $0x140] sm:$0xff] }
 0x1d0   : > { %3611 = vmatprep.subr.mxu0 %v14619_v1 }
 0x1d1   : > { %v2715_v2 = vpop.f32.mrf.mxu0  ;;  %3494 = vmatmul.mubr.f32.vlgmr.msra.gmra.mxu1 %v8586_v54  ;;  %3612 = vmatpush1.msra.mxu0 %v8587_v5  ;;  %v8607_v54 = vld [vmem:[#allocation2 + $0x51] ss:$2 sm:$0xff]  ;;  %v8608_v5 = vld [vmem:[#allocation2 + $0x62] ss:$2 sm:$0xff] }
 0x1d2   : > { %7832 = vmatmul.mubr.f32.gmra.mxu0 %v10919_v60  ;;  %7898 = vmatpush3.msra.mxu1 %v8588_v58  ;;  %v10992_v2 = vld [vmem:[#allocation2 + $0x64] ss:$2 sm:$0xff] }
 0x1d3   : > { %v2893_v28 = vpop.f32.mrf.mxu1  ;;  %3498 = vmatprep.mubr.f32.mxu1 %v8589_v30  ;;  %7834 = vmatprep.mubr.msk.f32.mxu0 %vm8942_vm1, %v14619_v1  ;;  %v8610_v30 = vld [vmem:[%s14635_s2 + $0x258] sm:$0xff] }
 0x1d4   : > { %v10928_v18 = vadd.f32 %v2893_v28, %v2713_v12  ;;  %3613 = vmatprep.subr.mxu0 %v14619_v1  ;;  %7899 = vmatprep.subr.mxu1 %v14619_v1  ;;  %v8609_v28 = vld [vmem:[%s14635_s2 + $0x138] sm:$0xff] }
 0x1d5   : > { %v2895_v13 = vpop.f32.mrf.mxu1  ;;  %3499 = vmatmul.mubr.f32.gmra.mxu1 %v8590_v17  ;;  %3614 = vmatpush1.msra.mxu0 %v8591_v14  ;;  %v8611_v17 = vld [vmem:[%s14635_s2 + $0x130] sm:$0xff]  ;;  %v8612_v14 = vld [vmem:[#allocation2 + $0x61] ss:$2 sm:$0xff] }
 0x1d6   : > { %7835 = vmatmul.mubr.f32.gmra.mxu0 %v10934_v41  ;;  %3503 = vmatprep.mubr.f32.mxu1 %v8592_v53  ;;  %v11006_v13 = vld [vmem:[#allocation2 + $0x74] ss:$2 sm:$0xff] }
 0x1d7   : > { %v2718_v55 = vpop.f32.mrf.mxu0  ;;  %3615 = vmatprep.subr.mxu0 %v14619_v1  ;;  %7900 = vmatpush3.msra.mxu1 %v8593_v31  ;;  %v8613_v31 = vld [vmem:[#allocation2 + $0x72] ss:$2 sm:$0xff] }
 0x1d8   : > { %7837 = vmatprep.mubr.msk.f32.mxu0 %vm8942_vm1, %v14619_v1  ;;  %3616 = vmatpush1.msra.mxu0 %v8594_v3 }
 0x1d9   : > { %v2720_v46 = vpop.f32.mrf.mxu0  ;;  %3504 = vmatmul.mubr.f32.gmra.mxu1 %v8595_v15  ;;  %3617 = vmatprep.subr.mxu0 %v14619_v1 }
 0x1da   : > { %7838 = vmatmul.mubr.f32.gmra.mxu0 %v10949_v7  ;;  %3508 = vmatprep.mubr.f32.mxu1 %v8596_v16  ;;  %v8614_v46 = vld [vmem:[%s14635_s2 + $0x128] sm:$0xff]  ;;  %v8615_v16 = vld [vmem:[#allocation2 + $0x71] ss:$2 sm:$0xff] }
 0x1db   : > { %v2898_v39 = vpop.f32.mrf.mxu1  ;;  %3618 = vmatpush1.msra.mxu0 %v8597_v11  ;;  %7840 = vmatprep.mubr.msk.f32.mxu0 %vm8942_vm1, %v14619_v1  ;;  %v8616_v11 = vld [vmem:[#allocation2 + $0x82] ss:$2 sm:$0xff] }
 0x1dc   : > { %v10953_v32 = vadd.f32 %v2898_v39, %v2718_v55  ;;  %7901 = vmatprep.subr.mxu1 %v14619_v1  ;;  %3619 = vmatprep.subr.mxu0 %v14619_v1  ;;  %v11020_v39 = vld [vmem:[#allocation2 + $0x84] ss:$2 sm:$0xff] }
 0x1dd   : > { %v2900_v37 = vpop.f32.mrf.mxu1  ;;  %3509 = vmatmul.mubr.f32.gmra.mxu1 %v8598_v19  ;;  %3620 = vmatpush1.msra.mxu0 %v8599_v62  ;;  %v8618_v19 = vld [vmem:[%s14635_s2 + $0x120] sm:$0xff] }
 0x1de   : > { %7841 = vmatmul.mubr.f32.gmra.mxu0 %v10962_v27  ;;  %7902 = vmatpush3.msra.mxu1 %v8600_v56  ;;  %v8617_v37 = vld [vmem:[%s14635_s2 + $0x250] sm:$0xff] }
 0x1df   : > { %3513 = vmatprep.mubr.f32.mxu1 %v8601_v63  ;;  %7843 = vmatprep.mubr.msk.f32.mxu0 %vm8942_vm1, %v14619_v1  ;;  %v2723_v23 = vpop.f32.mrf.mxu0  ;;  %v11033_v62 = vld [vmem:[#allocation2 + $0x94] ss:$2 sm:$0xff]  ;;  %v8619_v63 = vld [vmem:[#allocation2 + $0x81] ss:$2 sm:$0xff] }
 0x1e0   : > { %3621 = vmatprep.subr.mxu0 %v14619_v1  ;;  %7903 = vmatprep.subr.mxu1 %v14619_v1 }
 0x1e1   : > { %3514 = vmatmul.mubr.f32.gmra.mxu1 %v8602_v25  ;;  %3622 = vmatpush1.msra.mxu0 %v8603_v34  ;;  %v2725_v35 = vpop.f32.mrf.mxu0  ;;  %v8621_v25 = vld [vmem:[%s14635_s2 + $0x118] sm:$0xff] }
 0x1e2   : > { %7844 = vmatmul.mubr.f32.gmra.mxu0 %v10975_v61  ;;  %3518 = vmatprep.mubr.f32.mxu1 %v8604_v6  ;;  %v11047_v6 = vld [vmem:[#allocation2 + $0xa4] ss:$2 sm:$0xff] }
 0x1e3   : > { %v2903_v40 = vpop.f32.mrf.mxu1  ;;  %3623 = vmatprep.subr.mxu0 %v14619_v1  ;;  %7904 = vmatpush3.msra.mxu1 %v8605_v52  ;;  %v8623_v52 = vld [vmem:[%s14635_s2 + $0x110] sm:$0xff] }
 0x1e4   : > { %v10981_v47 = vadd.f32 %v2903_v40, %v2723_v23  ;;  %7846 = vmatprep.mubr.msk.f32.mxu0 %vm8942_vm1, %v14619_v1  ;;  %3624 = vmatpush1.msra.mxu0 %v8606_v20  ;;  %v8620_v23 = vld [vmem:[#allocation2 + $0x92] ss:$2 sm:$0xff]  ;;  %v8622_v40 = vld [vmem:[%s14635_s2 + $0x248] sm:$0xff]  ;;  %v8624_v20 = vld [vmem:[#allocation2 + $0x91] ss:$2 sm:$0xff] }
 0x1e5   : > { %v2905_v12 = vpop.f32.mrf.mxu1  ;;  %3519 = vmatmul.mubr.f32.gmra.mxu1 %v8607_v54  ;;  %3625 = vmatprep.subr.mxu0 %v14619_v1 }
 0x1e6   : > { %7847 = vmatmul.mubr.f32.gmra.mxu0 %v10992_v2  ;;  %3523 = vmatprep.mubr.f32.mxu1 %v8608_v5  ;;  %v8625_v5 = vld [vmem:[#allocation2 + $0xa2] ss:$2 sm:$0xff] }
 0x1e7   : > { %3626 = vmatpush1.msra.mxu0 %v8609_v28  ;;  %7905 = vmatprep.subr.mxu1 %v14619_v1  ;;  %v8626_v28 = vld [vmem:[%s14635_s2 + $0x108] sm:$0xff] }
 0x1e8   : > { %7849 = vmatprep.mubr.msk.f32.mxu0 %vm8942_vm1, %v14619_v1  ;;  %3627 = vmatprep.subr.mxu0 %v14619_v1  ;;  %v2728_v58 = vpop.f32.mrf.mxu0 }
 0x1e9   : > { %7906 = vmatpush3.msra.mxu1 %v8610_v30  ;;  %3628 = vmatpush1.msra.mxu0 %v8611_v17  ;;  %v8627_v30 = vld [vmem:[#allocation2 + $0xa1] ss:$2 sm:$0xff] }
 0x1ea   : > { %7850 = vmatmul.mubr.f32.gmra.mxu0 %v11006_v13  ;;  %3524 = vmatmul.mubr.f32.gmra.mxu1 %v8612_v14  ;;  %v2730_v53 = vpop.f32.mrf.mxu0  ;;  %v8628_v14 = vld [vmem:[#allocation2 + $0xb2] ss:$2 sm:$0xff] }
 0x1eb   : > { %v2908_v55 = vpop.f32.mrf.mxu1  ;;  %3528 = vmatprep.mubr.f32.mxu1 %v8613_v31  ;;  %3629 = vmatprep.subr.mxu0 %v14619_v1  ;;  %v8629_v53 = vld [vmem:[%s14635_s2 + $0x240] sm:$0xff] }
 0x1ec   : > { %v11013_v3 = vadd.f32 %v2908_v55, %v2728_v58  ;;  %7852 = vmatprep.mubr.msk.f32.mxu0 %vm8942_vm1, %v14619_v1  ;;  %3630 = vmatpush1.msra.mxu0 %v8614_v46  ;;  %v11061_v58 = vld [vmem:[#allocation2 + $0xb4] ss:$2 sm:$0xff]  ;;  %v11075_v46 = vld [vmem:[#allocation2 + $0xc4] ss:$2 sm:$0xff] }
 0x1ed   : > { %v2910_v15 = vpop.f32.mrf.mxu1  ;;  %7907 = vmatprep.subr.mxu1 %v14619_v1  ;;  %3631 = vmatprep.subr.mxu0 %v14619_v1  ;;  %v8630_v55 = vld [vmem:[%s14635_s2 + $0x100] sm:$0xff] }
 0x1ee   : > { %7853 = vmatmul.mubr.f32.gmra.mxu0 %v11020_v39  ;;  %3529 = vmatmul.mubr.f32.gmra.mxu1 %v8615_v16  ;;  %v8631_v15 = vld [vmem:[#allocation2 + $0xb1] ss:$2 sm:$0xff] }
 0x1ef   : > { %3533 = vmatprep.mubr.f32.mxu1 %v8616_v11  ;;  %7908 = vmatpush3.msra.mxu1 %v8617_v37  ;;  %v8632_v11 = vld [vmem:[%s14635_s2 + $0x1f8] sm:$0xff]  ;;  %v8633_v37 = vld [vmem:[#allocation2 + $0xc2] ss:$2 sm:$0xff] }
 0x1f0   : > { %3632 = vmatpush1.msra.mxu0 %v8618_v19  ;;  %7855 = vmatprep.mubr.msk.f32.mxu0 %vm8942_vm1, %v14619_v1 }
 0x1f1   : > { %3633 = vmatprep.subr.mxu0 %v14619_v1  ;;  %7909 = vmatprep.subr.mxu1 %v14619_v1  ;;  %v2733_v56 = vpop.f32.mrf.mxu0 }
 0x1f2   : > { %7856 = vmatmul.mubr.f32.gmra.mxu0 %v11033_v62  ;;  %3534 = vmatmul.mubr.f32.gmra.mxu1 %v8619_v63 }
 0x1f3   : > { %3538 = vmatprep.mubr.f32.mxu1 %v8620_v23  ;;  %3634 = vmatpush1.msra.mxu0 %v8621_v25  ;;  %v2735_v34 = vpop.f32.mrf.mxu0  ;;  %v8635_v23 = vld [vmem:[%s14635_s2 + $0x1f0] sm:$0xff] }
 0x1f4   : > { %7858 = vmatprep.mubr.msk.f32.mxu0 %vm8942_vm1, %v14619_v1  ;;  %3635 = vmatprep.subr.mxu0 %v14619_v1  ;;  %v11093_v25 = vld [vmem:[#allocation2 + $0xd4] ss:$2 sm:$0xff] }
 0x1f5   : > { %v2913_v35 = vpop.f32.mrf.mxu1  ;;  %7910 = vmatpush3.msra.mxu1 %v8622_v40  ;;  %3636 = vmatpush1.msra.mxu0 %v8623_v52  ;;  %v8637_v40 = vld [vmem:[#allocation2 + $0xd2] ss:$2 sm:$0xff] }
 0x1f6   : > { %v11052_v12 = vadd.f32 %v2913_v35, %v2733_v56  ;;  %7859 = vmatmul.mubr.f32.gmra.mxu0 %v11047_v6  ;;  %3539 = vmatmul.mubr.f32.gmra.mxu1 %v8624_v20  ;;  %v8634_v56 = vld [vmem:[%s14635_s2 + $0x238] sm:$0xff]  ;;  %v8636_v35 = vld [vmem:[#allocation2 + $0xc1] ss:$2 sm:$0xff] }
 0x1f7   : > { %v2915_v54 = vpop.f32.mrf.mxu1  ;;  %3543 = vmatprep.mubr.f32.mxu1 %v8625_v5  ;;  %3637 = vmatprep.subr.mxu0 %v14619_v1  ;;  %v8638_v20 = vld [vmem:[%s14635_s2 + $0x1e8] sm:$0xff] }
 0x1f8   : > { %7861 = vmatprep.mubr.msk.f32.mxu0 %vm8942_vm1, %v14619_v1  ;;  %3638 = vmatpush1.msra.mxu0 %v8626_v28  ;;  %v11103_v54 = vld [vmem:[#allocation2 + $0xe4] ss:$2 sm:$0xff]  ;;  %v8639_v28 = vld [vmem:[#allocation2 + $0xd1] ss:$2 sm:$0xff] }
 0x1f9   : > { %7911 = vmatprep.subr.mxu1 %v14619_v1  ;;  %3639 = vmatprep.subr.mxu0 %v14619_v1 }
 0x1fa   : > { %7862 = vmatmul.mubr.f32.gmra.mxu0 %v11061_v58  ;;  %3544 = vmatmul.mubr.f32.gmra.mxu1 %v8627_v30 }
 0x1fb   : > { %v2738_v17 = vpop.f32.mrf.mxu0  ;;  %3548 = vmatprep.mubr.f32.mxu1 %v8628_v14  ;;  %7912 = vmatpush3.msra.mxu1 %v8629_v53  ;;  %v8641_v53 = vld [vmem:[%s14635_s2 + $0x1e0] sm:$0xff] }
 0x1fc   : > { %3640 = vmatpush1.msra.mxu0 %v8630_v55  ;;  %7864 = vmatprep.mubr.msk.f32.mxu0 %vm8942_vm1, %v14619_v1  ;;  %v11119_v55 = vld [vmem:[#allocation2 + $0xf4] ss:$2 sm:$0xff] }
 0x1fd   : > { %v2740_v31 = vpop.f32.mrf.mxu0  ;;  %3641 = vmatprep.subr.mxu0 %v14619_v1  ;;  %7913 = vmatprep.subr.mxu1 %v14619_v1 }
 0x1fe   : > { %7865 = vmatmul.mubr.f32.gmra.mxu0 %v11075_v46  ;;  %3549 = vmatmul.mubr.f32.gmra.mxu1 %v8631_v15  ;;  %v8642_v31 = vld [vmem:[#allocation2 + $0xe1] ss:$2 sm:$0xff] }
 0x1ff   : > { %v2918_v16 = vpop.f32.mrf.mxu1  ;;  %3642 = vmatpush2.msra.mxu0 %v8632_v11  ;;  %3553 = vmatprep.mubr.f32.mxu1 %v8633_v37  ;;  %v8645_v11 = vld [vmem:[%s14635_s2 + $0x1d0] sm:$0xff] }
 0x200   : > { %v11082_v19 = vadd.f32 %v2918_v16, %v2738_v17  ;;  %3643 = vmatprep.subr.mxu0 %v14619_v1  ;;  %7914 = vmatpush3.msra.mxu1 %v8634_v56  ;;  %v8640_v17 = vld [vmem:[%s14635_s2 + $0x230] sm:$0xff]  ;;  %v8644_v16 = vld [vmem:[%s14635_s2 + $0x228] sm:$0xff] }
 0x201   : > { %v2920_v63 = vpop.f32.mrf.mxu1  ;;  %7867 = vmatprep.mubr.msk.f32.mxu0 %vm8942_vm1, %v14619_v1  ;;  %3644 = vmatpush2.msra.mxu0 %v8635_v23  ;;  %v11136_v37 = vld [vmem:[#allocation2 + $0x104] ss:$2 sm:$0xff] }
 0x202   : > { %v2743_v34 = vpop.f32.mrf.mxu0  ;;  %7868 = vmatmul.mubr.f32.gmra.mxu0 %v11093_v25  ;;  %3554 = vmatmul.mubr.f32.gmra.mxu1 %v8636_v35  ;;  %v11150_v35 = vld [vmem:[#allocation2 + $0x114] ss:$2 sm:$0xff] }
 0x203   : > { %3558 = vmatprep.mubr.f32.mxu1 %v8637_v40  ;;  %3645 = vmatprep.subr.mxu0 %v14619_v1 }
 0x204   : > { %v2745_v52 = vpop.f32.mrf.mxu0  ;;  %3646 = vmatpush2.msra.mxu0 %v8638_v20  ;;  %7870 = vmatprep.mubr.msk.f32.mxu0 %vm8942_vm1, %v14619_v1  ;;  %v11169_v20 = vld [vmem:[#allocation2 + $0x124] ss:$2 sm:$0xff] }
 0x205   : > { %7915 = vmatprep.subr.mxu1 %v14619_v1  ;;  %3647 = vmatprep.subr.mxu0 %v14619_v1  ;;  %v2923_v5 = vpop.f32.mrf.mxu1  ;;  %v8648_v52 = vld [vmem:[%s14635_s2 + $0x1c0] sm:$0xff] }
 0x206   : > { %7871 = vmatmul.mubr.f32.gmra.mxu0 %v11103_v54  ;;  %3559 = vmatmul.mubr.f32.gmra.mxu1 %v8639_v28  ;;  %v11107_v30 = vadd.f32 %v2923_v5, %v2743_v34  ;;  %v8646_v34 = vld [vmem:[%s14635_s2 + $0x1c8] sm:$0xff]  ;;  %v8650_v5 = vld [vmem:[%s14635_s2 + $0x218] sm:$0xff] }
 0x207   : > { %7916 = vmatpush3.msra.mxu1 %v8640_v17  ;;  %3563 = vmatprep.mubr.f32.mxu1 %v10652_v29  ;;  %v2925_v14 = vpop.f32.mrf.mxu1  ;;  %v8643_v29 = vld [vmem:[%s14635_s2 + $0x1d8] sm:$0xff]  ;;  %v8651_v17 = vld [vmem:[%s14635_s2 + $0x1b0] sm:$0xff] }
 0x208   : > { %3648 = vmatpush2.msra.mxu0 %v8641_v53  ;;  %7873 = vmatprep.mubr.msk.f32.mxu0 %vm8942_vm1, %v14619_v1  ;;  %v8652_v53 = vld [vmem:[%s14635_s2 + $0x1a8] sm:$0xff] }
 0x209   : > { %3649 = vmatprep.subr.mxu0 %v14619_v1  ;;  %7917 = vmatprep.subr.mxu1 %v14619_v1 }
 0x20a   : > { %7874 = vmatmul.mubr.f32.gmra.mxu0 %v11119_v55  ;;  %3564 = vmatmul.mubr.f32.gmra.mxu1 %v8642_v31  ;;  %v8653_v31 = vld [vmem:[%s14635_s2 + $0x210] sm:$0xff] }
 0x20b   : > { %3650 = vmatpush2.msra.mxu0 %v8643_v29  ;;  %3568 = vmatprep.mubr.f32.mxu1 %v10699_v44  ;;  %v8654_v29 = vld [vmem:[%s14635_s2 + $0x1a0] sm:$0xff] }
 0x20c   : > { %v2748_v15 = vpop.f32.mrf.mxu0  ;;  %3651 = vmatprep.subr.mxu0 %v14619_v1  ;;  %7918 = vmatpush3.msra.mxu1 %v8644_v16 }
 0x20d   : > { %7876 = vmatprep.mubr.msk.f32.mxu0 %vm8942_vm1, %v14619_v1  ;;  %3652 = vmatpush2.msra.mxu0 %v8645_v11 }
 0x20e   : > { %v2750_v56 = vpop.f32.mrf.mxu0  ;;  %v2928_v44 = vpop.f32.mrf.mxu1  ;;  %7877 = vmatmul.mubr.f32.gmra.mxu0 %v11136_v37  ;;  %3569 = vmatmul.mubr.f32.gmra.mxu1 %v10684_v21 }
 0x20f   : > { %v11140_v63 = vadd.f32 %v2928_v44, %v2748_v15  ;;  %3573 = vmatprep.mubr.f32.mxu1 %v10759_v38  ;;  %3653 = vmatprep.subr.mxu0 %v14619_v1  ;;  %v8647_v38 = vld [vmem:[%s14635_s2 + $0x220] sm:$0xff]  ;;  %v8655_v56 = vld [vmem:[%s14635_s2 + $0x198] sm:$0xff] }
 0x210   : > { %v2930_v23 = vpop.f32.mrf.mxu1  ;;  %3654 = vmatpush2.msra.mxu0 %v8646_v34  ;;  %7879 = vmatprep.mubr.msk.f32.mxu0 %vm8942_vm1, %v14619_v1  ;;  %v11217_v44 = vld [vmem:[#allocation2 + $0x154] ss:$2 sm:$0xff] }
 0x211   : > { %7919 = vmatprep.subr.mxu1 %v14619_v1  ;;  %3655 = vmatprep.subr.mxu0 %v14619_v1  ;;  %v2753_v21 = vpop.f32.mrf.mxu0  ;;  %v11232_v23 = vld [vmem:[#allocation2 + $0x164] ss:$2 sm:$0xff] }
 0x212   : > { %7880 = vmatmul.mubr.f32.gmra.mxu0 %v11150_v35  ;;  %3574 = vmatmul.mubr.f32.gmra.mxu1 %v10711_v0  ;;  %v8649_v0 = vld [vmem:[%s14635_s2 + $0x1b8] sm:$0xff] }
 0x213   : > { %7920 = vmatpush3.msra.mxu1 %v8647_v38  ;;  %3578 = vmatprep.mubr.f32.mxu1 %v10797_v48  ;;  %v2755_v40 = vpop.f32.mrf.mxu0 }
 0x214   : > { %3656 = vmatpush2.msra.mxu0 %v8648_v52  ;;  %7882 = vmatprep.mubr.msk.f32.mxu0 %vm8942_vm1, %v14619_v1  ;;  %v8659_v40 = vld [vmem:[%s14635_s2 + $0x180] sm:$0xff] }
 0x215   : > { %3657 = vmatprep.subr.mxu0 %v14619_v1  ;;  %7921 = vmatprep.subr.mxu1 %v14619_v1  ;;  %v8661_v52 = vld [vmem:[#allocation2 + $0x3] ss:$2 sm:$0xff] }
 0x216   : > { %3658 = vmatpush2.msra.mxu0 %v8649_v0  ;;  %3579 = vmatmul.mubr.f32.gmra.mxu1 %v10774_v26 }
 0x217   : > { %7883 = vmatmul.mubr.f32.gmra.mxu0 %v11169_v20  ;;  %3583 = vmatprep.mubr.f32.mxu1 %v10846_v49  ;;  %v11185_v49 = vld [vmem:[#allocation2 + $0x134] ss:$2 sm:$0xff] }
 0x218   : > { %v2933_v48 = vpop.f32.mrf.mxu1  ;;  %3659 = vmatprep.subr.mxu0 %v14619_v1  ;;  %7922 = vmatpush3.msra.mxu1 %v8650_v5  ;;  %v8662_v5 = vld [vmem:[#allocation2 + $0x13] ss:$2 sm:$0xff] }
 0x219   : > { %v11178_v28 = vadd.f32 %v2933_v48, %v2753_v21  ;;  %3660 = vmatpush2.msra.mxu0 %v8651_v17  ;;  %7885 = vmatprep.mubr.msk.f32.mxu0 %vm8942_vm1, %v14619_v1  ;;  %v3384_v48 = vld [vmem:[#allocation2 + $0x5] ss:$2 sm:$0xff] }
 0x21a   : > { %v2935_v26 = vpop.f32.mrf.mxu1  ;;  %3584 = vmatmul.mubr.f32.gmra.mxu1 %v10821_v9  ;;  %3661 = vmatprep.subr.mxu0 %v14619_v1 }
 0x21b   : > { %7886 = vmatmul.mubr.f32.gmra.mxu0 %v11185_v49  ;;  %3588 = vmatprep.mubr.f32.mxu1 %v10863_v50  ;;  %v11201_v50 = vld [vmem:[#allocation2 + $0x144] ss:$2 sm:$0xff] }
 0x21c   : > { %v2758_v14 = vpop.f32.mrf.mxu0  ;;  %3662 = vmatpush2.msra.mxu0 %v8652_v53  ;;  %7923 = vmatprep.subr.mxu1 %v14619_v1  ;;  %v3388_v53 = vld [vmem:[#allocation2 + $0x25] ss:$2 sm:$0xff] }
 0x21d   : > { %7888 = vmatprep.mubr.msk.f32.mxu0 %vm8942_vm1, %v14619_v1  ;;  %3663 = vmatprep.subr.mxu0 %v14619_v1 }
 0x21e   : > { %v2760_v9 = vpop.f32.mrf.mxu0  ;;  %7924 = vmatpush3.msra.mxu1 %v8653_v31  ;;  %3664 = vmatpush2.msra.mxu0 %v8654_v29  ;;  %v8664_v31 = vld [vmem:[#allocation2 + $0x33] ss:$2 sm:$0xff] }
 0x21f   : > { %v2938_v15 = vpop.f32.mrf.mxu1  ;;  %7889 = vmatmul.mubr.f32.gmra.mxu0 %v11201_v50  ;;  %3589 = vmatmul.mubr.f32.gmra.mxu1 %v10853_v43  ;;  %v8656_v43 = vld [vmem:[%s14635_s2 + $0x208] sm:$0xff] }
 0x220   : > { %v11208_v16 = vadd.f32 %v2938_v15, %v2758_v14  ;;  %3593 = vmatprep.mubr.f32.mxu1 %v10878_v36  ;;  %3665 = vmatprep.subr.mxu0 %v14619_v1  ;;  %v8657_v36 = vld [vmem:[%s14635_s2 + $0x190] sm:$0xff] }
 0x221   : > { %v2940_v11 = vpop.f32.mrf.mxu1  ;;  %7891 = vmatprep.mubr.msk.f32.mxu0 %vm8942_vm1, %v14619_v1  ;;  %3666 = vmatpush2.msra.mxu0 %v8655_v56  ;;  %v8663_v14 = vld [vmem:[#allocation2 + $0x23] ss:$2 sm:$0xff] }
 0x222   : > { %7925 = vmatprep.subr.mxu1 %v14619_v1  ;;  %3667 = vmatprep.subr.mxu0 %v14619_v1  ;;  %v3390_v56 = vld [vmem:[#allocation2 + $0x35] ss:$2 sm:$0xff] }
 0x223   : > { %7892 = vmatmul.mubr.f32.gmra.mxu0 %v11217_v44  ;;  %3594 = vmatmul.mubr.f32.gmra.mxu1 %v10871_v10 }
 0x224   : > { %3598 = vmatprep.mubr.f32.mxu1 %v10895_v8  ;;  %7926 = vmatpush3.msra.mxu1 %v8656_v43  ;;  %v8658_v8 = vld [vmem:[%s14635_s2 + $0x188] sm:$0xff] }
 0x225   : > { %3668 = vmatpush2.msra.mxu0 %v8657_v36  ;;  %7894 = vmatprep.mubr.msk.f32.mxu0 %vm8942_vm1, %v14619_v1  ;;  %v3392_v43 = vld [vmem:[#allocation2 + $0x45] ss:$2 sm:$0xff] }
 0x226   : > { %3669 = vmatprep.subr.mxu0 %v14619_v1  ;;  %7927 = vmatprep.subr.mxu1 %v14619_v1  ;;  %v8666_v36 = vld [vmem:[#allocation2 + $0x53] ss:$2 sm:$0xff] }
 0x227   : > { %v2763_v10 = vpop.f32.mrf.mxu0  ;;  %7895 = vmatmul.mubr.f32.gmra.mxu0 %v11232_v23  ;;  %3599 = vmatmul.mubr.f32.gmra.mxu1 %v10887_v4  ;;  %v8660_v4 = vld [vmem:[%s14635_s2 + $0x200] sm:$0xff]  ;;  %s6590_s2 = sshll.u32 %s486_s16, 4  ;;  %s6591_s2 = int_to_ptr.vmem [resolvable:$true] %s6590_s2 }
 0x228   : > { %3603 = vmatprep.mubr.f32.mxu1 %v10906_v42  ;;  %3670 = vmatpush2.msra.mxu0 %v8658_v8  ;;  %v2943_v21 = vpop.f32.mrf.mxu1  ;;  %v3394_v8 = vld [vmem:[#allocation2 + $0x55] ss:$2 sm:$0xff]  ;;  %p8886_p0 = scmp.lt.s32.totalorder %s6591_s2, %s8884_s22 }
 0x229   : > { %v2765_v34 = vpop.f32.mrf.mxu0  ;;  %3673 = vmatprep.mubr.f32.mxu0 %v10910_v45  ;;  %3671 = vmatprep.subr.mxu0 %v14619_v1  ;;  %v11244_v38 = vadd.f32 %v2943_v21, %v2763_v10  ;;  %v8667_v21 = vld [vmem:[#allocation2 + $0x63] ss:$2 sm:$0xff] }
 0x22a   : > { %3672 = vmatpush2.msra.mxu0 %v8659_v40  ;;  %7928 = vmatpush3.msra.mxu1 %v8660_v4  ;;  %v2945_v42 = vpop.f32.mrf.mxu1 }
 0x22b   : > { %3604 = vmatmul.mubr.f32.gmra.mxu1 %v10899_v22  ;;  %3674 = vmatmul.mubr.f32.vlgmr.msra.gmra.mxu0 %v8661_v52  ;;  %v3386_v22 = vld [vmem:[#allocation2 + $0x15] ss:$2 sm:$0xff]  ;;  %v3396_v42 = vld [vmem:[#allocation2 + $0x65] ss:$2 sm:$0xff] }
 0x22c   : > { %v2768_v45 = vpop.f32.mrf.mxu0  ;;  %3678 = vmatprep.mubr.f32.mxu0 %v10919_v60  ;;  %7929 = vmatprep.mubr.msk.f32.mxu1 %vm8942_vm1, %v14619_v1  ;;  %v8668_v52 = vld [vmem:[#allocation2 + $0x73] ss:$2 sm:$0xff] }
 0x22e   : > { %v2770_v0 = vpop.f32.mrf.mxu0 }
 0x22f   : > { %3679 = vmatmul.mubr.f32.gmra.mxu0 %v8662_v5  ;;  %7930 = vmatmul.mubr.f32.vlgmr.msra.gmra.mxu1 %v3384_v48  ;;  %v8669_v48 = vld [vmem:[#allocation2 + $0x83] ss:$2 sm:$0xff] }
 0x230   : > { %3683 = vmatprep.mubr.f32.mxu0 %v10934_v41  ;;  %7932 = vmatprep.mubr.msk.f32.mxu1 %vm8942_vm1, %v14619_v1 }
 0x231   : > { %v2948_v17 = vpop.f32.mrf.mxu1 }
 0x232   : > { %v11259_v26 = vadd.f32 %v2948_v17, %v2768_v45  ;;  %v3398_v45 = vld [vmem:[#allocation2 + $0x75] ss:$2 sm:$0xff]  ;;  %v3400_v17 = vld [vmem:[#allocation2 + $0x85] ss:$2 sm:$0xff] }
 0x233   : > { %3684 = vmatmul.mubr.f32.gmra.mxu0 %v8663_v14  ;;  %7933 = vmatmul.mubr.f32.gmra.mxu1 %v3386_v22  ;;  %v2950_v60 = vpop.f32.mrf.mxu1  ;;  %v8670_v22 = vld [vmem:[#allocation2 + $0x93] ss:$2 sm:$0xff] }
 0x234   : > { %3688 = vmatprep.mubr.f32.mxu0 %v10949_v7  ;;  %7935 = vmatprep.mubr.msk.f32.mxu1 %vm8942_vm1, %v14619_v1  ;;  %v8665_v7 = vld [vmem:[#allocation2 + $0x43] ss:$2 sm:$0xff] }
 0x235   : > { %v3402_v14 = vld [vmem:[#allocation2 + $0x95] ss:$2 sm:$0xff] }
 0x237   : > { %v2773_v9 = vpop.f32.mrf.mxu0  ;;  %3689 = vmatmul.mubr.f32.gmra.mxu0 %v8664_v31  ;;  %7936 = vmatmul.mubr.f32.gmra.mxu1 %v3388_v53 }
 0x238   : > { %v2953_v41 = vpop.f32.mrf.mxu1  ;;  %3693 = vmatprep.mubr.f32.mxu0 %v10962_v27  ;;  %7938 = vmatprep.mubr.msk.f32.mxu1 %vm8942_vm1, %v14619_v1 }
 0x239   : > { %v2775_v29 = vpop.f32.mrf.mxu0  ;;  %v11267_v15 = vadd.f32 %v2953_v41, %v2773_v9  ;;  %v8671_v9 = vld [vmem:[#allocation2 + $0xa3] ss:$2 sm:$0xff] }
 0x23a   : > { %v2955_v11 = vpop.f32.mrf.mxu1  ;;  %v8672_v29 = vld [vmem:[#allocation2 + $0xb3] ss:$2 sm:$0xff] }
 0x23b   : > { %3694 = vmatmul.mubr.f32.gmra.mxu0 %v8665_v7  ;;  %7939 = vmatmul.mubr.f32.gmra.mxu1 %v3390_v56  ;;  %v3406_v56 = vld [vmem:[#allocation2 + $0xb5] ss:$2 sm:$0xff] }
 0x23c   : > { %3698 = vmatprep.mubr.f32.mxu0 %v10975_v61  ;;  %7941 = vmatprep.mubr.msk.f32.mxu1 %vm8942_vm1, %v14619_v1  ;;  %v8673_v7 = vld [vmem:[#allocation2 + $0xc3] ss:$2 sm:$0xff] }
 0x23f   : > { %3699 = vmatmul.mubr.f32.gmra.mxu0 %v8666_v36  ;;  %7942 = vmatmul.mubr.f32.gmra.mxu1 %v3392_v43  ;;  %v3408_v36 = vld [vmem:[#allocation2 + $0xc5] ss:$2 sm:$0xff] }
 0x240   : > { %v2778_v27 = vpop.f32.mrf.mxu0  ;;  %3703 = vmatprep.mubr.f32.mxu0 %v10992_v2  ;;  %7944 = vmatprep.mubr.msk.f32.mxu1 %vm8942_vm1, %v14619_v1 }
 0x242   : > { %v2780_v10 = vpop.f32.mrf.mxu0  ;;  %v2958_v34 = vpop.f32.mrf.mxu1 }
 0x243   : > { %3704 = vmatmul.mubr.f32.gmra.mxu0 %v8667_v21  ;;  %7945 = vmatmul.mubr.f32.gmra.mxu1 %v3394_v8  ;;  %v11275_v61 = vadd.f32 %v2958_v34, %v2778_v27  ;;  %v8674_v8 = vld [vmem:[#allocation2 + $0xd3] ss:$2 sm:$0xff] }
 0x244   : > { %3708 = vmatprep.mubr.f32.mxu0 %v11006_v13  ;;  %7947 = vmatprep.mubr.msk.f32.mxu1 %vm8942_vm1, %v14619_v1  ;;  %v2960_v40 = vpop.f32.mrf.mxu1  ;;  %v3410_v34 = vld [vmem:[#allocation2 + $0xd5] ss:$2 sm:$0xff] }
 0x245   : > { %v2783_v4 = vpop.f32.mrf.mxu0 }
 0x247   : > { %v2785_v2 = vpop.f32.mrf.mxu0  ;;  %3709 = vmatmul.mubr.f32.gmra.mxu0 %v8668_v52  ;;  %7948 = vmatmul.mubr.f32.gmra.mxu1 %v3396_v42  ;;  %v3412_v42 = vld [vmem:[#allocation2 + $0xe5] ss:$2 sm:$0xff]  ;;  %v3414_v52 = vld [vmem:[#allocation2 + $0xf5] ss:$2 sm:$0xff] }
 0x248   : > { %3713 = vmatprep.mubr.f32.mxu0 %v11020_v39  ;;  %7950 = vmatprep.mubr.msk.f32.mxu1 %vm8942_vm1, %v14619_v1  ;;  %v8676_v2 = vld [vmem:[#allocation2 + $0xf3] ss:$2 sm:$0xff] }
 0x24a   : > { %v2963_v0 = vpop.f32.mrf.mxu1 }
 0x24b   : > { %3714 = vmatmul.mubr.f32.gmra.mxu0 %v8669_v48  ;;  %7951 = vmatmul.mubr.f32.gmra.mxu1 %v3398_v45  ;;  %v11283_v13 = vadd.f32 %v2963_v0, %v2783_v4  ;;  %v8677_v0 = vld [vmem:[#allocation2 + $0x103] ss:$2 sm:$0xff] }
 0x24c   : > { %3718 = vmatprep.mubr.f32.mxu0 %v11033_v62  ;;  %7953 = vmatprep.mubr.msk.f32.mxu1 %vm8942_vm1, %v14619_v1  ;;  %v2965_v5 = vpop.f32.mrf.mxu1 }
 0x24d   : > { %v3416_v5 = vld [vmem:[#allocation2 + $0x105] ss:$2 sm:$0xff] }
 0x24f   : > { %3719 = vmatmul.mubr.f32.gmra.mxu0 %v8670_v22  ;;  %7954 = vmatmul.mubr.f32.gmra.mxu1 %v3400_v17  ;;  %v8678_v17 = vld [vmem:[#allocation2 + $0x113] ss:$2 sm:$0xff] }
 0x250   : > { %3723 = vmatprep.mubr.f32.mxu0 %v11047_v6  ;;  %7956 = vmatprep.mubr.msk.f32.mxu1 %vm8942_vm1, %v14619_v1  ;;  %v3404_v6 = vld [vmem:[#allocation2 + $0xa5] ss:$2 sm:$0xff] }
 0x251   : > { %v2788_v39 = vpop.f32.mrf.mxu0 }
 0x253   : > { %v2790_v60 = vpop.f32.mrf.mxu0  ;;  %v2968_v53 = vpop.f32.mrf.mxu1  ;;  %3724 = vmatmul.mubr.f32.gmra.mxu0 %v8671_v9  ;;  %7957 = vmatmul.mubr.f32.gmra.mxu1 %v3402_v14  ;;  %v3418_v14 = vld [vmem:[#allocation2 + $0x115] ss:$2 sm:$0xff] }
 0x254   : > { %v11291_v62 = vadd.f32 %v2968_v53, %v2788_v39  ;;  %3728 = vmatprep.mubr.f32.mxu0 %v11061_v58  ;;  %7959 = vmatprep.mubr.msk.f32.mxu1 %vm8942_vm1, %v14619_v1  ;;  %v3420_v53 = vld [vmem:[#allocation2 + $0x125] ss:$2 sm:$0xff] }
 0x255   : > { %v2970_v31 = vpop.f32.mrf.mxu1 }
 0x256   : > { %v2793_v41 = vpop.f32.mrf.mxu0 }
 0x257   : > { %3729 = vmatmul.mubr.f32.gmra.mxu0 %v8672_v29  ;;  %7960 = vmatmul.mubr.f32.gmra.mxu1 %v3404_v6  ;;  %v3424_v29 = vld [vmem:[#allocation2 + $0x145] ss:$2 sm:$0xff] }
 0x258   : > { %v2795_v11 = vpop.f32.mrf.mxu0  ;;  %3733 = vmatprep.mubr.f32.mxu0 %v11075_v46  ;;  %7962 = vmatprep.mubr.msk.f32.mxu1 %vm8942_vm1, %v14619_v1 }
 0x259   : > { %v4229_v11 = vld [vmem:[%s14636_s3 + $0xf0] sm:$0xff] }
 0x25b   : > { %3734 = vmatmul.mubr.f32.gmra.mxu0 %v8673_v7  ;;  %7963 = vmatmul.mubr.f32.gmra.mxu1 %v3406_v56  ;;  %v4213_v56 = vld [vmem:[%s14636_s3 + $0x70] sm:$0xff] }
 0x25c   : > { %3738 = vmatprep.mubr.f32.mxu0 %v11093_v25  ;;  %7965 = vmatprep.mubr.msk.f32.mxu1 %vm8942_vm1, %v14619_v1  ;;  %v2973_v58 = vpop.f32.mrf.mxu1  ;;  %v8675_v25 = vld [vmem:[#allocation2 + $0xe3] ss:$2 sm:$0xff] }
 0x25d   : > { %v11302_v43 = vadd.f32 %v2973_v58, %v2793_v41  ;;  %v3426_v58 = vld [vmem:[#allocation2 + $0x155] ss:$2 sm:$0xff] }
 0x25e   : > { %v2975_v27 = vpop.f32.mrf.mxu1 }
 0x25f   : > { %v2798_v10 = vpop.f32.mrf.mxu0  ;;  %3739 = vmatmul.mubr.f32.gmra.mxu0 %v8674_v8  ;;  %7966 = vmatmul.mubr.f32.gmra.mxu1 %v3408_v36  ;;  %v4245_v27 = vld [vmem:[%s14636_s3 + $0x170] sm:$0xff]  ;;  %v4212_v8 = vld [vmem:[%s14636_s3 + $0x68] sm:$0xff] }
 0x260   : > { %3743 = vmatprep.mubr.f32.mxu0 %v11103_v54  ;;  %7968 = vmatprep.mubr.msk.f32.mxu1 %vm8942_vm1, %v14619_v1 }
 0x261   : > { %v2800_v46 = vpop.f32.mrf.mxu0 }
 0x262   : > { %v4227_v46 = vld [vmem:[%s14636_s3 + $0xe0] sm:$0xff] }
 0x263   : > { %3744 = vmatmul.mubr.f32.gmra.mxu0 %v8675_v25  ;;  %7969 = vmatmul.mubr.f32.gmra.mxu1 %v3410_v34  ;;  %v2978_v21 = vpop.f32.mrf.mxu1  ;;  %v4211_v25 = vld [vmem:[%s14636_s3 + $0x60] sm:$0xff] }
 0x264   : > { %3748 = vmatprep.mubr.f32.mxu0 %v11119_v55  ;;  %7971 = vmatprep.mubr.msk.f32.mxu1 %vm8942_vm1, %v14619_v1  ;;  %v11310_v40 = vadd.f32 %v2978_v21, %v2798_v10  ;;  %v4260_v10 = vld [vmem:[%s14636_s3 + $0x1e8] sm:$0xff] }
 0x265   : > { %v2980_v4 = vpop.f32.mrf.mxu1 }
 0x266   : > { %v3428_v4 = vld [vmem:[#allocation2 + $0x165] ss:$2 sm:$0xff] }
 0x267   : > { %3749 = vmatmul.mubr.f32.gmra.mxu0 %v8676_v2  ;;  %7972 = vmatmul.mubr.f32.gmra.mxu1 %v3412_v42  ;;  %v4259_v42 = vld [vmem:[%s14636_s3 + $0x1e0] sm:$0xff]  ;;  %v4226_v2 = vld [vmem:[%s14636_s3 + $0xd8] sm:$0xff] }
 0x268   : > { %3753 = vmatprep.mubr.f32.mxu0 %v11136_v37  ;;  %7974 = vmatprep.mubr.msk.f32.mxu1 %vm8942_vm1, %v14619_v1 }
 0x269   : > { %v2803_v54 = vpop.f32.mrf.mxu0 }
 0x26b   : > { %v2805_v45 = vpop.f32.mrf.mxu0  ;;  %3754 = vmatmul.mubr.f32.gmra.mxu0 %v8677_v0  ;;  %7975 = vmatmul.mubr.f32.gmra.mxu1 %v3414_v52  ;;  %v4243_v52 = vld [vmem:[%s14636_s3 + $0x160] sm:$0xff]  ;;  %v4258_v0 = vld [vmem:[%s14636_s3 + $0x1d8] sm:$0xff] }
 0x26c   : > { %3758 = vmatprep.mubr.f32.mxu0 %v11150_v35  ;;  %7977 = vmatprep.mubr.msk.f32.mxu1 %vm8942_vm1, %v14619_v1  ;;  %v4210_v45 = vld [vmem:[%s14636_s3 + $0x58] sm:$0xff] }
 0x26d   : > { %v2983_v55 = vpop.f32.mrf.mxu1 }
 0x26e   : > { %v11318_v48 = vadd.f32 %v2983_v55, %v2803_v54  ;;  %v4225_v55 = vld [vmem:[%s14636_s3 + $0xd0] sm:$0xff] }
 0x26f   : > { %3759 = vmatmul.mubr.f32.gmra.mxu0 %v8678_v17  ;;  %7978 = vmatmul.mubr.f32.gmra.mxu1 %v3416_v5  ;;  %v2985_v37 = vpop.f32.mrf.mxu1  ;;  %v4242_v5 = vld [vmem:[%s14636_s3 + $0x158] sm:$0xff]  ;;  %v4209_v17 = vld [vmem:[%s14636_s3 + $0x50] sm:$0xff] }
 0x270   : > { %v2808_v22 = vpop.f32.mrf.mxu0  ;;  %3763 = vmatprep.mubr.f32.mxu0 %v11169_v20  ;;  %7980 = vmatprep.mubr.msk.f32.mxu1 %vm8942_vm1, %v14619_v1  ;;  %v3422_v20 = vld [vmem:[#allocation2 + $0x135] ss:$2 sm:$0xff] }
 0x272   : > { %v2810_v39 = vpop.f32.mrf.mxu0 }
 0x273   : > { %3764 = vmatmul.mubr.f32.gmra.mxu0 %v10844_v24  ;;  %7981 = vmatmul.mubr.f32.gmra.mxu1 %v3418_v14  ;;  %v4257_v39 = vld [vmem:[%s14636_s3 + $0x1d0] sm:$0xff]  ;;  %v4208_v14 = vld [vmem:[%s14636_s3 + $0x48] sm:$0xff] }
 0x274   : > { %3768 = vmatprep.mubr.f32.mxu0 %v11185_v49  ;;  %7983 = vmatprep.mubr.msk.f32.mxu1 %vm8942_vm1, %v14619_v1  ;;  %v2988_v35 = vpop.f32.mrf.mxu1  ;;  %v11336_v49 = vld [vmem:[%s14636_s3 + $0xf8] sm:$0xff] }
 0x275   : > { %v11327_v60 = vadd.f32 %v2988_v35, %v2808_v22  ;;  %7178 = vmatprep.subr.mxu0 %v11336_v49  ;;  %v4224_v22 = vld [vmem:[%s14636_s3 + $0xc8] sm:$0xff]  ;;  %v4241_v35 = vld [vmem:[%s14636_s3 + $0x150] sm:$0xff] }
 0x276   : > { %v2990_v9 = vpop.f32.mrf.mxu1 }
 0x277   : > { %3769 = vmatmul.mubr.f32.gmra.mxu0 %v10861_v33  ;;  %7984 = vmatmul.mubr.f32.gmra.mxu1 %v3420_v53  ;;  %v4214_v33 = vld [vmem:[%s14636_s3 + $0x78] sm:$0xff]  ;;  %v4223_v9 = vld [vmem:[%s14636_s3 + $0xc0] sm:$0xff] }
 0x278   : > { %3773 = vmatprep.mubr.f32.mxu0 %v11201_v50  ;;  %7986 = vmatprep.mubr.msk.f32.mxu1 %vm8942_vm1, %v14619_v1 }
 0x279   : > { %v2813_v24 = vpop.f32.mrf.mxu0  ;;  %7179 = vmatpush3.msra.mxu0 %v4214_v33 }
 0x27a   : > { %7180 = vmatprep.subr.mxu0 %v4229_v11 }
 0x27b   : > { %3774 = vmatmul.mubr.f32.gmra.mxu0 %v10876_v57  ;;  %7987 = vmatmul.mubr.f32.gmra.mxu1 %v3422_v20  ;;  %v2815_v31 = vpop.f32.mrf.mxu0  ;;  %v4262_v57 = vld [vmem:[%s14636_s3 + $0x1f8] sm:$0xff] }
 0x27c   : > { %v2993_v41 = vpop.f32.mrf.mxu1  ;;  %3778 = vmatprep.mubr.f32.mxu0 %v11217_v44  ;;  %7989 = vmatprep.mubr.msk.f32.mxu1 %vm8942_vm1, %v14619_v1  ;;  %v4246_v44 = vld [vmem:[%s14636_s3 + $0x178] sm:$0xff]  ;;  %v4207_v31 = vld [vmem:[%s14636_s3 + $0x40] sm:$0xff] }
 0x27d   : > { %v11345_v50 = vadd.f32 %v2993_v41, %v2813_v24  ;;  %7246 = vmatprep.subr.mxu1 %v4262_v57  ;;  %7181 = vmatpush3.msra.mxu0 %v4213_v56  ;;  %v4256_v24 = vld [vmem:[%s14636_s3 + $0x1c8] sm:$0xff]  ;;  %v4255_v57 = vld [vmem:[%s14636_s3 + $0x1c0] sm:$0xff]  ;;  %v4206_v56 = vld [vmem:[%s14636_s3 + $0x38] sm:$0xff] }
 0x27e   : > { %v2995_v6 = vpop.f32.mrf.mxu1  ;;  %7247 = vmatpush3.msra.mxu1 %v4246_v44  ;;  %v4240_v41 = vld [vmem:[%s14636_s3 + $0x148] sm:$0xff] }
 0x27f   : > { %3779 = vmatmul.mubr.f32.gmra.mxu0 %v10893_v59  ;;  %7990 = vmatmul.mubr.f32.gmra.mxu1 %v3424_v29  ;;  %v4261_v59 = vld [vmem:[%s14636_s3 + $0x1f0] sm:$0xff]  ;;  %v4222_v29 = vld [vmem:[%s14636_s3 + $0xb8] sm:$0xff] }
 0x280   : > { %3783 = vmatprep.mubr.f32.mxu0 %v11232_v23  ;;  %7992 = vmatprep.mubr.msk.f32.mxu1 %vm8942_vm1, %v14619_v1  ;;  %v4228_v23 = vld [vmem:[%s14636_s3 + $0xe8] sm:$0xff] }
 0x281   : > { %v2818_v7 = vpop.f32.mrf.mxu0  ;;  %7248 = vmatprep.subr.mxu1 %v4261_v59  ;;  %7182 = vmatprep.subr.mxu0 %v4228_v23  ;;  %v4238_v23 = vld [vmem:[%s14636_s3 + $0x138] sm:$0xff] }
 0x282   : > { %7249 = vmatpush3.msra.mxu1 %v4245_v27  ;;  %7183 = vmatpush3.msra.mxu0 %v4212_v8  ;;  %v4205_v27 = vld [vmem:[%s14636_s3 + $0x30] sm:$0xff]  ;;  %v4220_v8 = vld [vmem:[%s14636_s3 + $0xa8] sm:$0xff] }
 0x283   : > { %v2820_v36 = vpop.f32.mrf.mxu0  ;;  %3784 = vmatmul.mubr.f32.gmra.mxu0 %v10902_v51  ;;  %7993 = vmatmul.mubr.f32.gmra.mxu1 %v3426_v58  ;;  %v4244_v51 = vld [vmem:[%s14636_s3 + $0x168] sm:$0xff]  ;;  %v4221_v58 = vld [vmem:[%s14636_s3 + $0xb0] sm:$0xff] }
 0x284   : > { %7995 = vmatprep.mubr.msk.f32.mxu1 %vm8942_vm1, %v14619_v1  ;;  %7250 = vmatprep.subr.mxu1 %v4260_v10 }
 0x285   : > { %7184 = vmatprep.subr.mxu0 %v4227_v46  ;;  %7251 = vmatpush3.msra.mxu1 %v4244_v51  ;;  %v4253_v46 = vld [vmem:[%s14636_s3 + $0x1b0] sm:$0xff] }
 0x286   : > { %v2998_v34 = vpop.f32.mrf.mxu1  ;;  %7185 = vmatpush3.msra.mxu0 %v4211_v25  ;;  %7252 = vmatprep.subr.mxu1 %v4259_v42  ;;  %v4204_v25 = vld [vmem:[%s14636_s3 + $0x28] sm:$0xff] }
 0x287   : > { %v11391_v21 = vadd.f32 %v2998_v34, %v2818_v7  ;;  %7996 = vmatmul.mubr.f32.gmra.mxu1 %v3428_v4  ;;  %7186 = vmatprep.subr.mxu0 %v4226_v2  ;;  %v4239_v7 = vld [vmem:[%s14636_s3 + $0x140] sm:$0xff]  ;;  %v4237_v4 = vld [vmem:[%s14636_s3 + $0x130] sm:$0xff] }
 0x288   : > { %v3000_v54 = vpop.f32.mrf.mxu1  ;;  %7253 = vmatpush3.msra.mxu1 %v4243_v52  ;;  %7187 = vmatpush3.msra.mxu0 %v4210_v45  ;;  %v4219_v2 = vld [vmem:[%s14636_s3 + $0xa0] sm:$0xff]  ;;  %v4236_v45 = vld [vmem:[%s14636_s3 + $0x128] sm:$0xff] }
 0x289   : > { %7254 = vmatprep.subr.mxu1 %v4258_v0  ;;  %7188 = vmatprep.subr.mxu0 %v4225_v55  ;;  %v4203_v52 = vld [vmem:[%s14636_s3 + $0x20] sm:$0xff]  ;;  %v4218_v55 = vld [vmem:[%s14636_s3 + $0x98] sm:$0xff] }
 0x28a   : > { %v2823_v37 = vpop.f32.mrf.mxu0  ;;  %7255 = vmatpush3.msra.mxu1 %v4242_v5  ;;  %7189 = vmatpush3.msra.mxu0 %v4209_v17  ;;  %v4251_v5 = vld [vmem:[%s14636_s3 + $0x1a0] sm:$0xff] }
 0x28b   : > { %7190 = vmatprep.subr.mxu0 %v4224_v22  ;;  %7256 = vmatprep.subr.mxu1 %v4257_v39  ;;  %v4202_v22 = vld [vmem:[%s14636_s3 + $0x18] sm:$0xff]  ;;  %v4235_v39 = vld [vmem:[%s14636_s3 + $0x120] sm:$0xff] }
 0x28c   : > { %v2825_v53 = vpop.f32.mrf.mxu0  ;;  %7191 = vmatpush3.msra.mxu0 %v4208_v14  ;;  %7257 = vmatpush3.msra.mxu1 %v4241_v35  ;;  %v4217_v35 = vld [vmem:[%s14636_s3 + $0x90] sm:$0xff] }
 0x28d   : > { %v3003_v20 = vpop.f32.mrf.mxu1  ;;  %7192 = vmatprep.subr.mxu0 %v4223_v9  ;;  %7258 = vmatprep.subr.mxu1 %v4256_v24  ;;  %v4201_v9 = vld [vmem:[%s14636_s3 + $0x10] sm:$0xff]  ;;  %v4234_v24 = vld [vmem:[%s14636_s3 + $0x118] sm:$0xff] }
 0x28e   : > { %v11441_v33 = vadd.f32 %v3003_v20, %v2823_v37  ;;  %v3073_v6 = vpop.f32.mrf.mxu0  ;;  %7193 = vmatpush3.msra.mxu0 %v4207_v31  ;;  %7259 = vmatpush3.msra.mxu1 %v4240_v41  ;;  %v4216_v31 = vld [vmem:[%s14636_s3 + $0x88] sm:$0xff]  ;;  %v4249_v41 = vld [vmem:[%s14636_s3 + $0x190] sm:$0xff] }
 0x28f   : > { %v11450_v11 = vadd.f32 %v3073_v6, %v10928_v18  ;;  %v3005_v44 = vpop.f32.mrf.mxu1  ;;  %v4254_v18 = vld [vmem:[%s14636_s3 + $0x1b8] sm:$0xff]  ;;  %7194 = vmatprep.subr.mxu0 %v4222_v29  ;;  %7260 = vmatprep.subr.mxu1 %v4255_v57  ;;  %v4200_v57 = vld [vmem:[%s14636_s3 + $0x8] sm:$0xff] }
 0x290   : > { %v7830_v59 = vpop.f32.mrf.mxu0  ;;  %7195 = vmatpush3.msra.mxu0 %v4206_v56  ;;  %7261 = vmatpush3.msra.mxu1 %v4239_v7  ;;  %v4233_v44 = vld [vmem:[%s14636_s3 + $0x110] sm:$0xff]  ;;  %v4215_v7 = vld [vmem:[%s14636_s3 + $0x80] sm:$0xff] }
 0x291   : > { %v11464_v36 = vpop.f32.mrf.mxu1  ;;  %7196 = vmatprep.subr.mxu0 %v4221_v58  ;;  %7262 = vmatprep.subr.mxu1 %v4254_v18  ;;  %v4199_v58 = vld [vmem:[%s14636_s3] sm:$0xff]  ;;  %v4232_v18 = vld [vmem:[%s14636_s3 + $0x108] sm:$0xff] }
 0x292   : > { %v3078_v10 = vpop.f32.mrf.mxu0  ;;  %7197 = vmatpush3.msra.mxu0 %v4205_v27  ;;  %7263 = vmatpush3.msra.mxu1 %v4238_v23  ;;  %v4247_v23 = vld [vmem:[%s14636_s3 + $0x180] sm:$0xff] }
 0x293   : > { %v11479_v34 = vadd.f32 %v3078_v10, %v10953_v32  ;;  %v3497_v51 = vpop.f32.mrf.mxu1  ;;  %v4252_v32 = vld [vmem:[%s14636_s3 + $0x1a8] sm:$0xff]  ;;  %7198 = vmatprep.subr.mxu0 %v4220_v8  ;;  %7264 = vmatprep.subr.mxu1 %v4253_v46  ;;  %v4231_v46 = vld [vmem:[%s14636_s3 + $0x100] sm:$0xff] }
 0x294   : > { %v7833_v42 = vpop.f32.mrf.mxu0  ;;  %7199 = vmatpush3.msra.mxu0 %v4204_v25  ;;  %7265 = vmatpush3.msra.mxu1 %v4237_v4 }
 0x295   : > { %v11493_v54 = vpop.f32.mrf.mxu1  ;;  %7200 = vmatprep.subr.mxu0 %v4219_v2  ;;  %7266 = vmatprep.subr.mxu1 %v4252_v32 }
 0x296   : > { %v3083_v0 = vpop.f32.mrf.mxu0  ;;  %7201 = vmatpush3.msra.mxu0 %v4203_v52  ;;  %7267 = vmatpush3.msra.mxu1 %v4236_v45 }
 0x297   : > { %v11508_v17 = vadd.f32 %v3083_v0, %v10981_v47  ;;  %v3502_v37 = vpop.f32.mrf.mxu1  ;;  %v4250_v47 = vld [vmem:[%s14636_s3 + $0x198] sm:$0xff]  ;;  %7202 = vmatprep.subr.mxu0 %v4218_v55  ;;  %7268 = vmatprep.subr.mxu1 %v4251_v5 }
 0x298   : > { %v7836_v14 = vpop.f32.mrf.mxu0  ;;  %7203 = vmatpush3.msra.mxu0 %v4202_v22  ;;  %7269 = vmatpush3.msra.mxu1 %v4235_v39 }
 0x299   : > { %v11522_v53 = vpop.f32.mrf.mxu1  ;;  %7204 = vmatprep.subr.mxu0 %v4217_v35  ;;  %7270 = vmatprep.subr.mxu1 %v4250_v47 }
 0x29a   : > { %v3088_v20 = vpop.f32.mrf.mxu0  ;;  %7205 = vmatpush3.msra.mxu0 %v4201_v9  ;;  %7271 = vmatpush3.msra.mxu1 %v4234_v24 }
 0x29b   : > { %v11537_v6 = vadd.f32 %v3088_v20, %v11013_v3  ;;  %v3507_v29 = vpop.f32.mrf.mxu1  ;;  %v4248_v3 = vld [vmem:[%s14636_s3 + $0x188] sm:$0xff]  ;;  %7206 = vmatprep.subr.mxu0 %v4216_v31  ;;  %7272 = vmatprep.subr.mxu1 %v4249_v41 }
 0x29c   : > { %v7839_v56 = vpop.f32.mrf.mxu0  ;;  %7207 = vmatpush3.msra.mxu0 %v4200_v57  ;;  %7273 = vmatpush3.msra.mxu1 %v4233_v44 }
 0x29d   : > { %v11551_v59 = vpop.f32.mrf.mxu1  ;;  %7208 = vmatprep.subr.mxu0 %v4215_v7  ;;  %7274 = vmatprep.subr.mxu1 %v4248_v3 }
 0x29e   : > { %v3093_v27 = vpop.f32.mrf.mxu0  ;;  %7209 = vmatpush3.msra.mxu0 %v4199_v58  ;;  %7275 = vmatpush3.msra.mxu1 %v4232_v18 }
 0x29f   : > { %v11563_v10 = vadd.f32 %v3093_v27, %v11052_v12  ;;  %v3512_v8 = vpop.f32.mrf.mxu1  ;;  %7276 = vmatprep.subr.mxu1 %v4247_v23 }
 0x2a0   : > { %v7842_v51 = vpop.f32.mrf.mxu0  ;;  %7277 = vmatpush3.msra.mxu1 %v4231_v46 }
 0x2a1   : > { %v11568_v25 = vpop.f32.mrf.mxu1  ;;  %7342 = vmatprep.subr.mxu1 %v11336_v49 }
 0x2a2   : > { %v3098_v4 = vpop.f32.mrf.mxu0 }
 0x2a3   : > { %v11571_v42 = vadd.f32 %v3098_v4, %v11082_v19  ;;  %v3517_v12 = vpop.f32.mrf.mxu1 }
 0x2a4   : > { %v7845_v2 = vpop.f32.mrf.mxu0 }
 0x2a5   : > { %v11574_v32 = vpop.f32.mrf.mxu1 }
 0x2a6   : > { %v3103_v52 = vpop.f32.mrf.mxu0 }
 0x2a7   : > { %v11577_v45 = vadd.f32 %v3103_v52, %v11107_v30  ;;  %v3522_v0 = vpop.f32.mrf.mxu1 }
 0x2a8   : > { %v7848_v55 = vpop.f32.mrf.mxu0 }
 0x2aa   : > { %v3108_v5 = vpop.f32.mrf.mxu0  ;;  %v11579_v37 = vpop.f32.mrf.mxu1 }
 0x2ab   : > { %v11582_v22 = vadd.f32 %v3108_v5, %v11140_v63 }
 0x2ac   : > { %v7851_v19 = vpop.f32.mrf.mxu0  ;;  %v3527_v39 = vpop.f32.mrf.mxu1 }
 0x2ae   : > { %v3113_v14 = vpop.f32.mrf.mxu0  ;;  %v11584_v35 = vpop.f32.mrf.mxu1 }
 0x2af   : > { %v11587_v49 = vadd.f32 %v3113_v14, %v11178_v28 }
 0x2b0   : > { %v7854_v47 = vpop.f32.mrf.mxu0  ;;  %v3532_v9 = vpop.f32.mrf.mxu1 }
 0x2b2   : > { %v3118_v30 = vpop.f32.mrf.mxu0  ;;  %v11589_v24 = vpop.f32.mrf.mxu1 }
 0x2b3   : > { %v11592_v20 = vadd.f32 %v3118_v30, %v11208_v16 }
 0x2b4   : > { %v7857_v31 = vpop.f32.mrf.mxu0  ;;  %v3537_v41 = vpop.f32.mrf.mxu1 }
 0x2b6   : > { %v3123_v63 = vpop.f32.mrf.mxu0  ;;  %v11594_v29 = vpop.f32.mrf.mxu1 }
 0x2b7   : > { %v11597_v57 = vadd.f32 %v3123_v63, %v11244_v38 }
 0x2b8   : > { %v7860_v44 = vpop.f32.mrf.mxu0  ;;  %v3542_v56 = vpop.f32.mrf.mxu1 }
 0x2b9   : > { %v11634_v44 = vld [vmem:[%s14636_s3 + $0x278] sm:$0xff] }
 0x2ba   : > { %v3128_v28 = vpop.f32.mrf.mxu0  ;;  %v11599_v7 = vpop.f32.mrf.mxu1  ;;  %7998 = vmatprep.subr.mxu0 %v11634_v44 }
 0x2bb   : > { %v11602_v3 = vadd.f32 %v3128_v28, %v11259_v26 }
 0x2bc   : > { %v7863_v58 = vpop.f32.mrf.mxu0  ;;  %v3547_v18 = vpop.f32.mrf.mxu1 }
 0x2be   : > { %v3133_v16 = vpop.f32.mrf.mxu0  ;;  %v11604_v27 = vpop.f32.mrf.mxu1 }
 0x2bf   : > { %v11607_v23 = vadd.f32 %v3133_v16, %v11267_v15 }
 0x2c0   : > { %v7866_v8 = vpop.f32.mrf.mxu0  ;;  %v3552_v46 = vpop.f32.mrf.mxu1 }
 0x2c2   : > { %v3138_v38 = vpop.f32.mrf.mxu0  ;;  %v11609_v51 = vpop.f32.mrf.mxu1 }
 0x2c3   : > { %v11612_v4 = vadd.f32 %v3138_v38, %v11275_v61 }
 0x2c4   : > { %v7869_v12 = vpop.f32.mrf.mxu0  ;;  %v3557_v2 = vpop.f32.mrf.mxu1 }
 0x2c5   : > { %v11657_v12 = vld [vmem:[%s14611_s8] ss:$0 sm:$0xff] }
 0x2c6   : > { %v3143_v26 = vpop.f32.mrf.mxu0  ;;  %v11614_v52 = vpop.f32.mrf.mxu1 }
 0x2c7   : > { %v11617_v0 = vadd.f32 %v3143_v26, %v11283_v13 }
 0x2c8   : > { %v7872_v55 = vpop.f32.mrf.mxu0  ;;  %v3562_v5 = vpop.f32.mrf.mxu1 }
 0x2ca   : > { %v3148_v15 = vpop.f32.mrf.mxu0  ;;  %v11619_v19 = vpop.f32.mrf.mxu1 }
 0x2cb   : > { %v11622_v39 = vadd.f32 %v3148_v15, %v11291_v62 }
 0x2cc   : > { %v7875_v14 = vpop.f32.mrf.mxu0  ;;  %v3567_v47 = vpop.f32.mrf.mxu1 }
 0x2ce   : > { %v3153_v61 = vpop.f32.mrf.mxu0  ;;  %v11624_v9 = vpop.f32.mrf.mxu1 }
 0x2cf   : > { %v11627_v30 = vadd.f32 %v3153_v61, %v11302_v43  ;;  %v11645_v43 = vld [vmem:[%s14610_s7] ss:$0 sm:$0xff] }
 0x2d0   : > { %v7878_v31 = vpop.f32.mrf.mxu0  ;;  %v3572_v41 = vpop.f32.mrf.mxu1  ;;  %v3194_v26 = vmul.f32 %v11645_v43, %v11479_v34 }
 0x2d2   : > { %v3158_v13 = vpop.f32.mrf.mxu0  ;;  %v11629_v63 = vpop.f32.mrf.mxu1  ;;  %v11672_v61 = vadd.f32 %v11657_v12, %v3194_v26 }
 0x2d3   : > { %v11637_v62 = vadd.f32 %v3158_v13, %v11310_v40  ;;  %v3193_v40 = vmul.f32 %v11645_v43, %v11450_v11  ;;  %v3195_v11 = vmul.f32 %v11645_v43, %v11508_v17 }
 0x2d4   : > { %v7881_v56 = vpop.f32.mrf.mxu0  ;;  %v3577_v28 = vpop.f32.mrf.mxu1  ;;  %vm3246_vm7 = vcmp.gt.f32.partialorder %v11672_v61, 0.0 }
 0x2d5   : > { %v11665_v15 = vadd.f32 %v11657_v12, %v3193_v40  ;;  %v3197_v56 = vmul.f32 %v11645_v43, %v11563_v10  ;;  %v11683_v17 = vadd.f32 %v11657_v12, %v3195_v11 }
 0x2d6   : > { %v11640_v58 = vpop.f32.mrf.mxu1 }
 0x2d7   : > { %v3163_v18 = vpop.f32.mrf.mxu0  ;;  %v3268_v13 = vmin.f32 %v11665_v15, 0.0  ;;  %v11695_v26 = vadd.f32 %v11657_v12, %v3197_v56  ;;  %v3270_v10 = vmin.f32 %v11683_v17, 0.0  ;;  %vm3245_vm1 = vcmp.gt.f32.partialorder %v11665_v15, 0.0 }
 0x2d8   : > { %v11648_v16 = vadd.f32 %v3163_v18, %v11318_v48  ;;  %v3582_v8 = vpop.f32.mrf.mxu1  ;;  %vm3247_vm8 = vcmp.gt.f32.partialorder %v11683_v17, 0.0 }
 0x2d9   : > { %v7884_v46 = vpop.f32.mrf.mxu0  ;;  %v3269_v8 = vmin.f32 %v11672_v61, 0.0  ;;  %v3295_v56 = vmul.f32 1.442695, %v3270_v10  ;;  %vm3249_vm10 = vcmp.gt.f32.partialorder %v11695_v26, 0.0 }
 0x2da   : > { %v11652_v38 = vpop.f32.mrf.mxu1 }
 0x2db   : > { %v3168_v2 = vpop.f32.mrf.mxu0 }
 0x2dc   : > { %v11662_v55 = vadd.f32 %v3168_v2, %v11327_v60  ;;  %v3587_v48 = vpop.f32.mrf.mxu1  ;;  %v3196_v60 = vmul.f32 %v11645_v43, %v11537_v6  ;;  %v3291_v2 = vmul.f32 1.442695, %v3268_v13  ;;  %v3272_v13 = vmin.f32 %v11695_v26, 0.0 }
 0x2dd   : > { %v7887_v5 = vpop.f32.mrf.mxu0  ;;  %v3198_v48 = vmul.f32 %v11645_v43, %v11571_v42  ;;  %v3199_v42 = vmul.f32 %v11645_v43, %v11577_v45 }
 0x2de   : > { %v11692_v6 = vadd.f32 %v11657_v12, %v3196_v60  ;;  %8360 = vpow2.f32 %v3291_v2  ;;  %v3299_v1 = vmul.f32 1.442695, %v3272_v13 }
 0x2df   : > { %v3173_v14 = vpop.f32.mrf.mxu0  ;;  %v11669_v47 = vpop.f32.mrf.mxu1  ;;  %v11717_v10 = vadd.f32 %v11657_v12, %v3199_v42 }
 0x2e0   : > { %14637 = vst [vmem:[#allocation9_spill] sm:$0xff] %v11669_v47  ;;  %v11675_v31 = vadd.f32 %v3173_v14, %v11345_v50  ;;  %v3293_v14 = vmul.f32 1.442695, %v3269_v8  ;;  %v3271_v60 = vmin.f32 %v11692_v6, 0.0  ;;  %vm3248_vm9 = vcmp.gt.f32.partialorder %v11692_v6, 0.0 }
 0x2e1   : > { %v7890_v34 = vpop.f32.mrf.mxu0  ;;  %v3592_v41 = vpop.f32.mrf.mxu1  ;;  %vm3251_vm12 = vcmp.gt.f32.partialorder %v11717_v10, 0.0 }
 0x2e2   : > { %14638 = vst [vmem:[#allocation10_spill] sm:$0xff] %v11675_v31  ;;  %8362 = vpow2.f32 %v3293_v14 }
 0x2e3   : > { %v3178_v28 = vpop.f32.mrf.mxu0  ;;  %v11685_v18 = vpop.f32.mrf.mxu1  ;;  %8364 = vpow2.f32 %v3295_v56 }
 0x2e4   : > { %14639 = vst [vmem:[#allocation11_spill] sm:$0xff] %v11685_v18  ;;  %v11689_v50 = vadd.f32 %v3178_v28, %v11391_v21  ;;  %v11708_v28 = vadd.f32 %v11657_v12, %v3198_v48 }
 0x2e5   : > { %v7893_v46 = vpop.f32.mrf.mxu0  ;;  %v3597_v40 = vpop.f32.mrf.mxu1 }
 0x2e6   : > { %14640 = vst [vmem:[#allocation12_spill] sm:$0xff] %v11689_v50  ;;  %v3273_v2 = vmin.f32 %v11708_v28, 0.0  ;;  %vm3250_vm11 = vcmp.gt.f32.partialorder %v11708_v28, 0.0 }
 0x2e7   : > { %v3183_v5 = vpop.f32.mrf.mxu0  ;;  %v11700_v11 = vpop.f32.mrf.mxu1 }
 0x2e8   : > { %14641 = vst [vmem:[#allocation13_spill] sm:$0xff] %v11700_v11  ;;  %v11703_v21 = vadd.f32 %v3183_v5, %v11441_v33  ;;  %v3297_v33 = vmul.f32 1.442695, %v3271_v60  ;;  %v3301_v13 = vmul.f32 1.442695, %v3273_v2  ;;  %v3201_v2 = vmul.f32 %v11645_v43, %v11587_v49 }
 0x2e9   : > { %v7896_v34 = vpop.f32.mrf.mxu0  ;;  %v3602_v41 = vpop.f32.mrf.mxu1 }
 0x2ea   : > { %14642 = vst [vmem:[#allocation14_spill] sm:$0xff] %v11703_v21  ;;  %8366 = vpow2.f32 %v3297_v33 }
 0x2eb   : > { %v11712_v46 = vpop.f32.mrf.mxu1  ;;  %v3675_v8 = vpop.f32.mrf.mxu0  ;;  %8368 = vpow2.f32 %v3299_v1 }
 0x2ec   : > { %14643 = vst [vmem:[#allocation15_spill] sm:$0xff] %v11712_v46  ;;  %v3676_v34 = vadd.f32 %v3675_v8, %v11464_v36  ;;  %v3274_v36 = vmin.f32 %v11717_v10, 0.0  ;;  %8370 = vpow2.f32 %v3301_v13  ;;  %v3202_v13 = vmul.f32 %v11645_v43, %v11592_v20 }
 0x2ed   : > { %v3607_v40 = vpop.f32.mrf.mxu1  ;;  %v3677_v5 = vpop.f32.mrf.mxu0 }
 0x2ee   : > { %v3200_v5 = vmul.f32 %v11645_v43, %v11582_v22 }
 0x2ef   : > { %v3680_v48 = vpop.f32.mrf.mxu0  ;;  %v3855_v41 = vpop.f32.mrf.mxu1 }
 0x2f0   : > { %v3856_v11 = vadd.f32 %v3855_v41, %v3676_v34  ;;  %v3681_v14 = vadd.f32 %v3680_v48, %v11493_v54 }
 0x2f1   : > { %v3682_v45 = vpop.f32.mrf.mxu0  ;;  %v7931_v46 = vpop.f32.mrf.mxu1 }
 0x2f2   : > { %v3969_v60 = vmul.f32 %v11645_v43, %v3856_v11  ;;  %v8361_v46 = vpop.eup %8360  ;;  %v3303_v11 = vmul.f32 1.442695, %v3274_v36 }
 0x2f3   : > { %v3685_v56 = vpop.f32.mrf.mxu0  ;;  %v3860_v8 = vpop.f32.mrf.mxu1 }
 0x2f4   : > { %v11723_v40 = vadd.f32 %v11657_v12, %v3969_v60  ;;  %v3861_v42 = vadd.f32 %v3860_v8, %v3681_v14  ;;  %v3686_v48 = vadd.f32 %v3685_v56, %v11522_v53  ;;  %v8363_v60 = vpop.eup %8362  ;;  %v11738_v8 = vadd.f32 %v11657_v12, %v3200_v5 }
 0x2f5   : > { %v3687_v33 = vpop.f32.mrf.mxu0  ;;  %v7934_v34 = vpop.f32.mrf.mxu1  ;;  %v6891_v56 = vadd.f32 -1.0, %v8361_v46 }
 0x2f6   : > { %v4038_v1 = vmin.f32 %v11723_v40, 0.0  ;;  %v3970_v54 = vmul.f32 %v11645_v43, %v3861_v42  ;;  %v11746_v34 = vadd.f32 %v11657_v12, %v3201_v2  ;;  %v8365_v20 = vpop.eup %8364  ;;  %vm4015_vm13 = vcmp.gt.f32.partialorder %v11723_v40, 0.0 }
 0x2f7   : > { %v3690_v41 = vpop.f32.mrf.mxu0  ;;  %v3865_v45 = vpop.f32.mrf.mxu1  ;;  %vm3252_vm0 = vcmp.gt.f32.partialorder %v11738_v8, 0.0 }
 0x2f8   : > { %v4061_v14 = vmul.f32 1.442695, %v4038_v1  ;;  %v11734_v22 = vadd.f32 %v11657_v12, %v3970_v54  ;;  %v3866_v49 = vadd.f32 %v3865_v45, %v3686_v48  ;;  %v3691_v33 = vadd.f32 %v3690_v41, %v11551_v59 }
 0x2f9   : > { %v3692_v36 = vpop.f32.mrf.mxu0  ;;  %v7937_v53 = vpop.f32.mrf.mxu1  ;;  %v6892_v48 = vadd.f32 -1.0, %v8363_v60  ;;  %v3275_v59 = vmin.f32 %v11738_v8, 0.0  ;;  %v11753_v41 = vadd.f32 %v11657_v12, %v3202_v13  ;;  %v11761_v60 = vsel %vm3245_vm1, %v11665_v15, %v6891_v56 }
 0x2fa   : > { %8372 = vpow2.f32 %v4061_v14  ;;  %v4039_v42 = vmin.f32 %v11734_v22, 0.0  ;;  %v3971_v5 = vmul.f32 %v11645_v43, %v3866_v49  ;;  %v8367_v49 = vpop.eup %8366  ;;  %v3276_v13 = vmin.f32 %v11746_v34, 0.0 }
 0x2fb   : > { %8374 = vpow2.f32 %v3303_v11  ;;  %v3695_v1 = vpop.f32.mrf.mxu0  ;;  %v3870_v54 = vpop.f32.mrf.mxu1  ;;  %v11772_v15 = vsel %vm3246_vm7, %v11672_v61, %v6892_v48  ;;  %vm4016_vm14 = vcmp.gt.f32.partialorder %v11734_v22, 0.0  ;;  %vm3253_vm2 = vcmp.gt.f32.partialorder %v11746_v34, 0.0 }
 0x2fc   : > { %v4063_v46 = vmul.f32 1.442695, %v4039_v42  ;;  %v3871_v45 = vadd.f32 %v3870_v54, %v3691_v33  ;;  %v11756_v11 = vadd.f32 %v11657_v12, %v3971_v5  ;;  %v3696_v36 = vadd.f32 %v3695_v1, %v11568_v25  ;;  %v8369_v42 = vpop.eup %8368 }
 0x2fd   : > { %v3697_v2 = vpop.f32.mrf.mxu0  ;;  %v7940_v14 = vpop.f32.mrf.mxu1  ;;  %v6893_v33 = vadd.f32 -1.0, %v8365_v20  ;;  %v3203_v5 = vmul.f32 %v11645_v43, %v11597_v57  ;;  %v3204_v25 = vmul.f32 %v11645_v43, %v11602_v3  ;;  %v6894_v20 = vadd.f32 -1.0, %v8367_v49 }
 0x2fe   : > { %8376 = vpow2.f32 %v4063_v46  ;;  %v3972_v53 = vmul.f32 %v11645_v43, %v3871_v45  ;;  %v4040_v54 = vmin.f32 %v11756_v11, 0.0  ;;  %v3305_v46 = vmul.f32 1.442695, %v3275_v59 }
 0x2ff   : > { %v3700_v2 = vpop.f32.mrf.mxu0  ;;  %v3875_v14 = vpop.f32.mrf.mxu1  ;;  %v3277_v57 = vmin.f32 %v11753_v41, 0.0  ;;  %v6895_v47 = vadd.f32 -1.0, %v8369_v42  ;;  %v11786_v3 = vsel %vm3247_vm8, %v11683_v17, %v6893_v33  ;;  %v11789_v59 = vadd.f32 %v11657_v12, %v3203_v5 }
 0x300   : > { %v11777_v56 = vadd.f32 %v11657_v12, %v3972_v53  ;;  %v3876_v1 = vadd.f32 %v3875_v14, %v3696_v36  ;;  %v4065_v45 = vmul.f32 1.442695, %v4040_v54  ;;  %v3701_v61 = vadd.f32 %v3700_v2, %v11574_v32 }
 0x301   : > { %v3702_v18 = vpop.f32.mrf.mxu0  ;;  %v7943_v21 = vpop.f32.mrf.mxu1  ;;  %v3307_v36 = vmul.f32 1.442695, %v3276_v13  ;;  %v11792_v53 = vadd.f32 %v11657_v12, %v3204_v25  ;;  %v11800_v17 = vsel %vm3248_vm9, %v11692_v6, %v6894_v20  ;;  %v3309_v33 = vmul.f32 1.442695, %v3277_v57 }
 0x302   : > { %v4041_v50 = vmin.f32 %v11777_v56, 0.0  ;;  %v3973_v48 = vmul.f32 %v11645_v43, %v3876_v1  ;;  %8378 = vpow2.f32 %v4065_v45  ;;  %v8371_v21 = vpop.eup %8370  ;;  %v3205_v13 = vmul.f32 %v11645_v43, %v11607_v23 }
 0x303   : > { %v3705_v49 = vpop.f32.mrf.mxu0  ;;  %v3880_v18 = vpop.f32.mrf.mxu1  ;;  %8380 = vpow2.f32 %v3305_v46  ;;  %v6896_v6 = vadd.f32 -1.0, %v8371_v21  ;;  %v3278_v23 = vmin.f32 %v11789_v59, 0.0  ;;  %vm4017_vm15 = vcmp.gt.f32.partialorder %v11756_v11, 0.0 }
 0x304   : > { %v4067_v42 = vmul.f32 1.442695, %v4041_v50  ;;  %v11795_v32 = vadd.f32 %v11657_v12, %v3973_v48  ;;  %v3881_v54 = vadd.f32 %v3880_v18, %v3701_v61  ;;  %v11807_v50 = vsel %vm3249_vm10, %v11695_v26, %v6895_v47 }
 0x305   : > { %v3707_v5 = vpop.f32.mrf.mxu0  ;;  %v7946_v2 = vpop.f32.mrf.mxu1  ;;  %v3706_v20 = vadd.f32 %v3705_v49, %v11579_v37  ;;  %v3279_v26 = vmin.f32 %v11792_v53, 0.0  ;;  %v11820_v18 = vadd.f32 %v11657_v12, %v3205_v13  ;;  %vm4018_vm3 = vcmp.gt.f32.partialorder %v11777_v56, 0.0 }
 0x306   : > { %8382 = vpow2.f32 %v4067_v42  ;;  %v4042_v14 = vmin.f32 %v11795_v32, 0.0  ;;  %v3974_v25 = vmul.f32 %v11645_v43, %v3881_v54  ;;  %vm4019_vm4 = vcmp.gt.f32.partialorder %v11795_v32, 0.0 }
 0x307   : > { %v8373_v1 = vpop.eup %8372  ;;  %8384 = vpow2.f32 %v3307_v36  ;;  %v3710_v46 = vpop.f32.mrf.mxu0  ;;  %v3313_v31 = vmul.f32 1.442695, %v3279_v26  ;;  %vm3254_vm6 = vcmp.gt.f32.partialorder %v11753_v41, 0.0  ;;  %vm3255_vm1 = vcmp.gt.f32.partialorder %v11789_v59, 0.0 }
 0x308   : > { %v3885_v57 = vpop.f32.mrf.mxu1  ;;  %v8375_v47 = vpop.eup %8374  ;;  %v6914_v45 = vadd.f32 -1.0, %v8373_v1  ;;  %v4069_v61 = vmul.f32 1.442695, %v4042_v14  ;;  %v11817_v48 = vadd.f32 %v11657_v12, %v3974_v25  ;;  %8386 = vpow2.f32 %v3309_v33 }
 0x309   : > { %v3886_v36 = vadd.f32 %v3885_v57, %v3706_v20  ;;  %v3712_v21 = vpop.f32.mrf.mxu0  ;;  %v3711_v54 = vadd.f32 %v3710_v46, %v11584_v35  ;;  %v6897_v2 = vadd.f32 -1.0, %v8375_v47  ;;  %v3311_v14 = vmul.f32 1.442695, %v3278_v23 }
 0x30a   : > { %v7949_v42 = vpop.f32.mrf.mxu1  ;;  %v4130_v37 = vsel %vm4015_vm13, %v11723_v40, %v6914_v45  ;;  %8388 = vpow2.f32 %v4069_v61  ;;  %v4043_v49 = vmin.f32 %v11817_v48, 0.0  ;;  %v3280_v40 = vmin.f32 %v11820_v18, 0.0 }
 0x30b   : > { %v8377_v5 = vpop.eup %8376  ;;  %v4153_v33 = vmax.f32 %v11761_v60, %v4130_v37  ;;  %v3975_v13 = vmul.f32 %v11645_v43, %v3886_v36  ;;  %v3715_v25 = vpop.f32.mrf.mxu0  ;;  %v3206_v45 = vmul.f32 %v11645_v43, %v11612_v4  ;;  %v3207_v61 = vmul.f32 %v11645_v43, %v11617_v0 }
 0x30c   : > { %v3890_v1 = vpop.f32.mrf.mxu1  ;;  %v6915_v20 = vadd.f32 -1.0, %v8377_v5  ;;  %v4071_v57 = vmul.f32 1.442695, %v4043_v49  ;;  %v3716_v47 = vadd.f32 %v3715_v25, %v11589_v24  ;;  %v11850_v24 = vsel %vm3251_vm12, %v11717_v10, %v6897_v2 }
 0x30d   : > { %v3891_v21 = vadd.f32 %v3890_v1, %v3711_v54  ;;  %4176 = vst [vmem:[#allocation3] sm:$0xff] %v4153_v33  ;;  %v11833_v35 = vadd.f32 %v11657_v12, %v3975_v13  ;;  %v3717_v60 = vpop.f32.mrf.mxu0  ;;  %v11862_v1 = vadd.f32 %v11657_v12, %v3207_v61  ;;  %vm4020_vm5 = vcmp.gt.f32.partialorder %v11817_v48, 0.0 }
 0x30e   : > { %v7952_v23 = vpop.f32.mrf.mxu1  ;;  %v4131_v46 = vsel %vm4016_vm14, %v11734_v22, %v6915_v20  ;;  %8390 = vpow2.f32 %v4071_v57  ;;  %v11845_v22 = vsel %vm3250_vm11, %v11708_v28, %v6896_v6  ;;  %v11856_v28 = vadd.f32 %v11657_v12, %v3206_v45 }
 0x30f   : > { %v3976_v26 = vmul.f32 %v11645_v43, %v3891_v21  ;;  %8392 = vpow2.f32 %v3311_v14  ;;  %v4154_v4 = vmax.f32 %v11772_v15, %v4131_v46  ;;  %v4044_v36 = vmin.f32 %v11833_v35, 0.0  ;;  %v3720_v42 = vpop.f32.mrf.mxu0  ;;  %v8379_v49 = vpop.eup %8378 }
 0x310   : > { %v3895_v37 = vpop.f32.mrf.mxu1  ;;  %8394 = vpow2.f32 %v3313_v31  ;;  %v3315_v15 = vmul.f32 1.442695, %v3280_v40  ;;  %v6916_v5 = vadd.f32 -1.0, %v8379_v49  ;;  %v8381_v25 = vpop.eup %8380  ;;  %v3721_v20 = vadd.f32 %v3720_v42, %v11594_v29 }
 0x311   : > { %v11853_v54 = vadd.f32 %v11657_v12, %v3976_v26  ;;  %v3896_v0 = vadd.f32 %v3895_v37, %v3716_v47  ;;  %4177 = vst [vmem:[#allocation3 + $0x8] sm:$0xff] %v4154_v4  ;;  %v4073_v14 = vmul.f32 1.442695, %v4044_v36  ;;  %v3722_v33 = vpop.f32.mrf.mxu0  ;;  %v6898_v47 = vadd.f32 -1.0, %v8381_v25 }
 0x312   : > { %v7955_v13 = vpop.f32.mrf.mxu1  ;;  %v4132_v31 = vsel %vm4017_vm15, %v11756_v11, %v6916_v5  ;;  %v3281_v37 = vmin.f32 %v11856_v28, 0.0  ;;  %v3282_v49 = vmin.f32 %v11862_v1, 0.0  ;;  %vm3256_vm7 = vcmp.gt.f32.partialorder %v11792_v53, 0.0 }
 0x313   : > { %v4045_v10 = vmin.f32 %v11853_v54, 0.0  ;;  %v3977_v6 = vmul.f32 %v11645_v43, %v3896_v0  ;;  %v8383_v2 = vpop.eup %8382  ;;  %8396 = vpow2.f32 %v4073_v14  ;;  %v3725_v57 = vpop.f32.mrf.mxu0  ;;  %v4155_v45 = vmax.f32 %v11786_v3, %v4132_v31 }
 0x314   : > { %v3900_v21 = vpop.f32.mrf.mxu1  ;;  %v8385_v40 = vpop.eup %8384  ;;  %v6917_v60 = vadd.f32 -1.0, %v8383_v2  ;;  %8398 = vpow2.f32 %v3315_v15  ;;  %v3726_v3 = vadd.f32 %v3725_v57, %v11599_v7  ;;  %v3208_v7 = vmul.f32 %v11645_v43, %v11622_v39  ;;  %v4277_v57 = vld [vmem:[%s14636_s3 + $0x270] sm:$0xff] }
 0x315   : > { %v4075_v23 = vmul.f32 1.442695, %v4045_v10  ;;  %v11870_v46 = vadd.f32 %v11657_v12, %v3977_v6  ;;  %v3901_v11 = vadd.f32 %v3900_v21, %v3721_v20  ;;  %v3727_v29 = vpop.f32.mrf.mxu0  ;;  %v8387_v61 = vpop.eup %8386  ;;  %4178 = vst [vmem:[#allocation3 + $0x10] sm:$0xff] %v4155_v45  ;;  %v6899_v33 = vadd.f32 -1.0, %v8385_v40 }
 0x316   : > { %v7958_v26 = vpop.f32.mrf.mxu1  ;;  %v4133_v4 = vsel %vm4018_vm3, %v11777_v56, %v6917_v60  ;;  %v11880_v6 = vadd.f32 -1.0, %v8387_v61  ;;  %v3317_v60 = vmul.f32 1.442695, %v3281_v37  ;;  %v11920_v37 = vadd.f32 %v11657_v12, %v3208_v7 }
 0x317   : > { %8400 = vpow2.f32 %v4075_v23  ;;  %v4046_v36 = vmin.f32 %v11870_v46, 0.0  ;;  %v8389_v42 = vpop.eup %8388  ;;  %v4156_v0 = vmax.f32 %v11800_v17, %v4133_v4  ;;  %v3978_v15 = vmul.f32 %v11645_v43, %v3901_v11  ;;  %v3730_v5 = vpop.f32.mrf.mxu0 }
 0x318   : > { %v3905_v14 = vpop.f32.mrf.mxu1  ;;  %v6918_v13 = vadd.f32 -1.0, %v8389_v42  ;;  %v4305_v10 = vld [vmem:[#allocation3 + $0x1] ss:$2 sm:$0xff]  ;;  %v4281_v20 = vld [vmem:[#allocation3] ss:$2 sm:$0xff]  ;;  %v3731_v40 = vadd.f32 %v3730_v5, %v11604_v27  ;;  %v11917_v42 = vsel %vm3253_vm2, %v11746_v34, %v6899_v33  ;;  %vm4021_vm8 = vcmp.gt.f32.partialorder %v11833_v35, 0.0 }
 0x319   : > { %v4077_v25 = vmul.f32 1.442695, %v4046_v36  ;;  %v3906_v56 = vadd.f32 %v3905_v14, %v3726_v3  ;;  %4179 = vst [vmem:[#allocation3 + $0x18] sm:$0xff] %v4156_v0  ;;  %v11886_v2 = vadd.f32 %v11657_v12, %v3978_v15  ;;  %v3732_v17 = vpop.f32.mrf.mxu0  ;;  %4464 = vmatprep.mubr.f32.mxu0 %v4305_v10  ;;  %v3319_v23 = vmul.f32 1.442695, %v3282_v49 }
 0x31a   : > { %v7961_v31 = vpop.f32.mrf.mxu1  ;;  %v4134_v21 = vsel %vm4019_vm4, %v11795_v32, %v6918_v13  ;;  %4465 = vmatmul.mubr.f32.vlgmr.msra.gmra.mxu0 %v4281_v20  ;;  %v4276_v32 = vld [vmem:[%s14636_s3 + $0x268] sm:$0xff]  ;;  %vm3257_vm9 = vcmp.gt.f32.partialorder %v11820_v18, 0.0  ;;  %vm4022_vm10 = vcmp.gt.f32.partialorder %v11853_v54, 0.0  ;;  %vm4023_vm11 = vcmp.gt.f32.partialorder %v11870_v46, 0.0 }
 0x31b   : > { %8402 = vpow2.f32 %v4077_v25  ;;  %v3979_v39 = vmul.f32 %v11645_v43, %v3906_v56  ;;  %v8391_v45 = vpop.eup %8390  ;;  %v4157_v11 = vmax.f32 %v11807_v50, %v4134_v21  ;;  %v4047_v29 = vmin.f32 %v11886_v2, 0.0  ;;  %v3735_v26 = vpop.f32.mrf.mxu0  ;;  %7999 = vmatpush3.msra.mxu0 %v11634_v44  ;;  %v11907_v50 = vld [vmem:[%s14636_s3 + $0x260] sm:$0xff] }
 0x31c   : > { %v3910_v61 = vpop.f32.mrf.mxu1  ;;  %v8393_v4 = vpop.eup %8392  ;;  %v6919_v27 = vadd.f32 -1.0, %v8391_v45  ;;  %8000 = vmatprep.subr.mxu0 %v4277_v57  ;;  %v11912_v44 = vsel %vm3252_vm0, %v11738_v8, %v6898_v47  ;;  %v4353_v5 = vld [vmem:[#allocation3 + $0x3] ss:$2 sm:$0xff]  ;;  %v11922_v14 = vld [vmem:[#allocation3 + $0x2] ss:$2 sm:$0xff]  ;;  %v3736_v34 = vadd.f32 %v3735_v26, %v11609_v51  ;;  %v3209_v56 = vmul.f32 %v11645_v43, %v11627_v30 }
 0x31d   : > { %v11902_v36 = vadd.f32 %v11657_v12, %v3979_v39  ;;  %v3911_v3 = vadd.f32 %v3910_v61, %v3731_v40  ;;  %4180 = vst [vmem:[#allocation3 + $0x20] sm:$0xff] %v4157_v11  ;;  %v4079_v49 = vmul.f32 1.442695, %v4047_v29  ;;  %v3737_v0 = vpop.f32.mrf.mxu0  ;;  %8001 = vmatpush3.msra.mxu0 %v4277_v57  ;;  %v8395_v13 = vpop.eup %8394  ;;  %4589 = vmatprep.mubr.f32.mxu1 %v4353_v5  ;;  %v11931_v25 = vadd.f32 -1.0, %v8393_v4  ;;  %v8679_v30 = vld [vmem:[%s14636_s3 + $0x78] sm:$0xff]  ;;  %v8680_v11 = vld [vmem:[%s14636_s3 + $0xf0] sm:$0xff] }
 0x31e   : > { %v7964_v15 = vpop.f32.mrf.mxu1  ;;  %v4135_v8 = vsel %vm4020_vm5, %v11817_v48, %v6919_v27  ;;  %8002 = vmatprep.subr.mxu0 %v4276_v32  ;;  %4590 = vmatmul.mubr.f32.vlgmr.msra.gmra.mxu1 %v11922_v14  ;;  %v3210_v40 = vmul.f32 %v11645_v43, %v11637_v62  ;;  %v8681_v61 = vld [vmem:[%s14636_s3 + $0x70] sm:$0xff]  ;;  %v11966_v4 = vadd.f32 -1.0, %v8395_v13  ;;  %v11969_v27 = vadd.f32 %v11657_v12, %v3209_v56  ;;  %v8682_v5 = vld [vmem:[%s14636_s3 + $0xe8] sm:$0xff] }
 0x31f   : > { %v4048_v47 = vmin.f32 %v11902_v36, 0.0  ;;  %v3980_v33 = vmul.f32 %v11645_v43, %v3911_v3  ;;  %v4158_v10 = vmax.f32 %v11845_v22, %v4135_v8  ;;  %8404 = vpow2.f32 %v4079_v49  ;;  %v3740_v48 = vpop.f32.mrf.mxu0  ;;  %8003 = vmatpush3.msra.mxu0 %v4276_v32  ;;  %7343 = vmatpush3.msra.mxu1 %v8679_v30 }
 0x320   : > { %v3915_v7 = vpop.f32.mrf.mxu1  ;;  %v8397_v51 = vpop.eup %8396  ;;  %8406 = vpow2.f32 %v3317_v60  ;;  %v11940_v57 = vld [vmem:[#allocation3 + $0x11] ss:$2 sm:$0xff]  ;;  %v4283_v21 = vld [vmem:[#allocation3 + $0x10] ss:$2 sm:$0xff]  ;;  %8004 = vmatprep.subr.mxu0 %v11907_v50  ;;  %v3283_v22 = vmin.f32 %v11920_v37, 0.0  ;;  %7344 = vmatprep.subr.mxu1 %v8680_v11  ;;  %v3741_v49 = vadd.f32 %v3740_v48, %v11614_v52  ;;  %vm4024_vm12 = vcmp.gt.f32.partialorder %v11886_v2, 0.0 }
 0x321   : > { %v4081_v17 = vmul.f32 1.442695, %v4048_v47  ;;  %v11938_v31 = vadd.f32 %v11657_v12, %v3980_v33  ;;  %v3916_v20 = vadd.f32 %v3915_v7, %v3736_v34  ;;  %8408 = vpow2.f32 %v3319_v23  ;;  %4181 = vst [vmem:[#allocation3 + $0x28] sm:$0xff] %v4158_v10  ;;  %v3742_v45 = vpop.f32.mrf.mxu0  ;;  %4469 = vmatprep.mubr.f32.mxu0 %v11940_v57  ;;  %v11956_v23 = vld [vmem:[%s14636_s3 + $0x258] sm:$0xff]  ;;  %v8399_v29 = vpop.eup %8398  ;;  %7345 = vmatpush3.msra.mxu1 %v8681_v61  ;;  %v8683_v52 = vld [vmem:[%s14636_s3 + $0x68] sm:$0xff] }
 0x322   : > { %v6920_v39 = vadd.f32 -1.0, %v8397_v51  ;;  %v7967_v60 = vpop.f32.mrf.mxu1  ;;  %4470 = vmatmul.mubr.f32.gmra.mxu0 %v4283_v21  ;;  %7346 = vmatprep.subr.mxu1 %v8682_v5  ;;  %v11991_v33 = vmul.f32 1.442695, %v3283_v22  ;;  %v8684_v51 = vld [vmem:[%s14636_s3 + $0xe0] sm:$0xff]  ;;  %v6903_v22 = vadd.f32 -1.0, %v8399_v29  ;;  %v8686_v61 = vld [vmem:[%s14636_s3 + $0xd8] sm:$0xff] }
 0x323   : > { %8410 = vpow2.f32 %v4081_v17  ;;  %v4049_v62 = vmin.f32 %v11938_v31, 0.0  ;;  %v3981_v26 = vmul.f32 %v11645_v43, %v3916_v20  ;;  %v3745_v0 = vpop.f32.mrf.mxu0  ;;  %8005 = vmatpush3.msra.mxu0 %v11907_v50  ;;  %7347 = vmatpush3.msra.mxu1 %v8683_v52  ;;  %v11989_v50 = vld [vmem:[%s14636_s3 + $0x250] sm:$0xff]  ;;  %v8687_v5 = vld [vmem:[%s14636_s3 + $0x58] sm:$0xff]  ;;  %vm3258_vm13 = vcmp.gt.f32.partialorder %v11856_v28, 0.0 }
 0x324   : > { %v8401_v32 = vpop.eup %8400  ;;  %v4136_v3 = vsel %vm4021_vm8, %v11833_v35, %v6920_v39  ;;  %v3920_v15 = vpop.f32.mrf.mxu1  ;;  %v4355_v35 = vld [vmem:[#allocation3 + $0x13] ss:$2 sm:$0xff]  ;;  %8006 = vmatprep.subr.mxu0 %v11956_v23  ;;  %v11997_v7 = vld [vmem:[#allocation3 + $0x12] ss:$2 sm:$0xff]  ;;  %7348 = vmatprep.subr.mxu1 %v8684_v51  ;;  %v3746_v21 = vadd.f32 %v3745_v0, %v11619_v19  ;;  %v12018_v19 = vsel %vm3254_vm6, %v11753_v41, %v11880_v6  ;;  %vm3259_vm14 = vcmp.gt.f32.partialorder %v11862_v1, 0.0 }
 0x325   : > { %v4159_v13 = vmax.f32 %v11850_v24, %v4136_v3  ;;  %v6921_v8 = vadd.f32 -1.0, %v8401_v32  ;;  %v4083_v47 = vmul.f32 1.442695, %v4049_v62  ;;  %v11980_v34 = vadd.f32 %v11657_v12, %v3981_v26  ;;  %v3747_v10 = vpop.f32.mrf.mxu0  ;;  %4594 = vmatprep.mubr.f32.mxu1 %v4355_v35  ;;  %8007 = vmatpush3.msra.mxu0 %v11956_v23  ;;  %v12029_v32 = vld [vmem:[%s14636_s3 + $0x248] sm:$0xff]  ;;  %v12051_v35 = vld [vmem:[%s14636_s3 + $0x240] sm:$0xff]  ;;  %v8689_v51 = vld [vmem:[%s14636_s3 + $0x50] sm:$0xff] }
 0x326   : > { %v11994_v24 = vadd.f32 %v11657_v12, %v3210_v40  ;;  %v3921_v56 = vadd.f32 %v3920_v15, %v3741_v49  ;;  %v7970_v48 = vpop.f32.mrf.mxu1  ;;  %4595 = vmatmul.mubr.f32.gmra.mxu1 %v11997_v7  ;;  %v3284_v40 = vmin.f32 %v11969_v27, 0.0  ;;  %8008 = vmatprep.subr.mxu0 %v11989_v50  ;;  %v3211_v6 = vmul.f32 %v11645_v43, %v11648_v16 }
 0x327   : > { %4182 = vst [vmem:[#allocation3 + $0x30] sm:$0xff] %v4159_v13  ;;  %v4137_v17 = vsel %vm4022_vm10, %v11853_v54, %v6921_v8  ;;  %8412 = vpow2.f32 %v4083_v47  ;;  %v4050_v20 = vmin.f32 %v11980_v34, 0.0  ;;  %v3750_v60 = vpop.f32.mrf.mxu0  ;;  %v8685_v54 = vld [vmem:[%s14636_s3 + $0x60] sm:$0xff]  ;;  %8009 = vmatpush3.msra.mxu0 %v11989_v50  ;;  %v8688_v47 = vld [vmem:[%s14636_s3 + $0xd0] sm:$0xff]  ;;  %vm4025_vm15 = vcmp.gt.f32.partialorder %v11902_v36, 0.0 }
 0x328   : > { %v8403_v30 = vpop.eup %8402  ;;  %v4160_v39 = vmax.f32 %v11912_v44, %v4137_v17  ;;  %v3982_v45 = vmul.f32 %v11645_v43, %v3921_v56  ;;  %v3925_v11 = vpop.f32.mrf.mxu1  ;;  %7349 = vmatpush3.msra.mxu1 %v8685_v54  ;;  %v12020_v26 = vld [vmem:[#allocation3 + $0x21] ss:$2 sm:$0xff]  ;;  %v3285_v41 = vmin.f32 %v11994_v24, 0.0  ;;  %v4285_v15 = vld [vmem:[#allocation3 + $0x20] ss:$2 sm:$0xff]  ;;  %v3751_v16 = vadd.f32 %v3750_v60, %v11624_v9  ;;  %8010 = vmatprep.subr.mxu0 %v12029_v32  ;;  %v8691_v60 = vld [vmem:[%s14636_s3 + $0x48] sm:$0xff] }
 0x329   : > { %v6922_v29 = vadd.f32 -1.0, %v8403_v30  ;;  %v4085_v62 = vmul.f32 1.442695, %v4050_v20  ;;  %v3926_v44 = vadd.f32 %v3925_v11, %v3746_v21  ;;  %7350 = vmatprep.subr.mxu1 %v8686_v61  ;;  %v3752_v49 = vpop.f32.mrf.mxu0  ;;  %4474 = vmatprep.mubr.f32.mxu0 %v12020_v26  ;;  %v12063_v9 = vsel %vm3256_vm7, %v11792_v53, %v11966_v4 }
 0x32a   : > { %4183 = vst [vmem:[#allocation3 + $0x38] sm:$0xff] %v4160_v39  ;;  %v12036_v3 = vadd.f32 %v11657_v12, %v3982_v45  ;;  %v7973_v0 = vpop.f32.mrf.mxu1  ;;  %7351 = vmatpush3.msra.mxu1 %v8687_v5  ;;  %4475 = vmatmul.mubr.f32.gmra.mxu0 %v4285_v15  ;;  %v12082_v20 = vsel %vm3257_vm9, %v11820_v18, %v6903_v22  ;;  %v12096_v18 = vld [vmem:[%s14636_s3 + $0x238] sm:$0xff]  ;;  %v3325_v11 = vmul.f32 1.442695, %v3285_v41  ;;  %vm4026_vm0 = vcmp.gt.f32.partialorder %v11938_v31, 0.0 }
 0x32b   : > { %v4138_v13 = vsel %vm4023_vm11, %v11870_v46, %v6922_v29  ;;  %8414 = vpow2.f32 %v4085_v62  ;;  %v3983_v8 = vmul.f32 %v11645_v43, %v3926_v44  ;;  %7352 = vmatprep.subr.mxu1 %v8688_v47  ;;  %v12057_v46 = vsel %vm3255_vm1, %v11789_v59, %v11931_v25  ;;  %v3755_v10 = vpop.f32.mrf.mxu0  ;;  %8011 = vmatpush3.msra.mxu0 %v12029_v32  ;;  %v8692_v44 = vld [vmem:[%s14636_s3 + $0xc0] sm:$0xff] }
 0x32c   : > { %v4161_v52 = vmax.f32 %v11917_v42, %v4138_v13  ;;  %v4051_v56 = vmin.f32 %v12036_v3, 0.0  ;;  %v3930_v48 = vpop.f32.mrf.mxu1  ;;  %7353 = vmatpush3.msra.mxu1 %v8689_v51  ;;  %v8405_v59 = vpop.eup %8404  ;;  %8416 = vpow2.f32 %v11991_v33  ;;  %v3323_v25 = vmul.f32 1.442695, %v3284_v40  ;;  %v8690_v42 = vld [vmem:[%s14636_s3 + $0xc8] sm:$0xff]  ;;  %8012 = vmatprep.subr.mxu0 %v12051_v35 }
 0x32d   : > { %v12073_v53 = vadd.f32 %v11657_v12, %v3983_v8  ;;  %v3931_v4 = vadd.f32 %v3930_v48, %v3751_v16  ;;  %7354 = vmatprep.subr.mxu1 %v8690_v42  ;;  %v8407_v17 = vpop.eup %8406  ;;  %v12085_v33 = vadd.f32 %v11657_v12, %v3211_v6  ;;  %v6923_v21 = vadd.f32 -1.0, %v8405_v59  ;;  %v3757_v40 = vpop.f32.mrf.mxu0  ;;  %8013 = vmatpush3.msra.mxu0 %v12051_v35  ;;  %v12136_v48 = vld [vmem:[%s14636_s3 + $0x230] sm:$0xff] }
 0x32e   : > { %4184 = vst [vmem:[#allocation3 + $0x40] sm:$0xff] %v4161_v52  ;;  %v4087_v30 = vmul.f32 1.442695, %v4051_v56  ;;  %v7976_v39 = vpop.f32.mrf.mxu1  ;;  %v12087_v45 = vld [vmem:[#allocation3 + $0x23] ss:$2 sm:$0xff]  ;;  %7355 = vmatpush3.msra.mxu1 %v8691_v60  ;;  %v12098_v22 = vpop.eup %8408  ;;  %v3212_v6 = vmul.f32 %v11645_v43, %v11662_v55  ;;  %v3756_v49 = vadd.f32 %v3755_v10, %v11629_v63  ;;  %8014 = vmatprep.subr.mxu0 %v12096_v18  ;;  %vm4027_vm2 = vcmp.gt.f32.partialorder %v11980_v34, 0.0 }
 0x32f   : > { %v4052_v54 = vmin.f32 %v12073_v53, 0.0  ;;  %v3984_v29 = vmul.f32 %v11645_v43, %v3931_v4  ;;  %4599 = vmatprep.mubr.f32.mxu1 %v12087_v45  ;;  %v12104_v62 = vld [vmem:[#allocation3 + $0x22] ss:$2 sm:$0xff]  ;;  %7356 = vmatprep.subr.mxu1 %v8692_v44  ;;  %v4139_v41 = vsel %vm4024_vm12, %v11886_v2, %v6923_v21  ;;  %v3760_v0 = vpop.f32.mrf.mxu0  ;;  %v3286_v8 = vmin.f32 %v12085_v33, 0.0 }
 0x330   : > { %v8411_v61 = vpop.eup %8410  ;;  %8418 = vpow2.f32 %v4087_v30  ;;  %4600 = vmatmul.mubr.f32.gmra.mxu1 %v12104_v62  ;;  %v3935_v15 = vpop.f32.mrf.mxu1  ;;  %v4162_v5 = vmax.f32 %v12018_v19, %v4139_v41  ;;  %v8693_v63 = vld [vmem:[%s14636_s3 + $0x40] sm:$0xff]  ;;  %v8694_v10 = vld [vmem:[%s14636_s3 + $0xb8] sm:$0xff]  ;;  %v6904_v21 = vadd.f32 -1.0, %v8407_v17  ;;  %v12145_v30 = vadd.f32 %v11657_v12, %v3212_v6  ;;  %8015 = vmatpush3.msra.mxu0 %v12096_v18 }
 0x331   : > { %v6924_v13 = vadd.f32 -1.0, %v8411_v61  ;;  %v4089_v16 = vmul.f32 1.442695, %v4052_v54  ;;  %v12119_v55 = vadd.f32 %v11657_v12, %v3984_v29  ;;  %v12121_v2 = vld [vmem:[#allocation3 + $0x31] ss:$2 sm:$0xff]  ;;  %7357 = vmatpush3.msra.mxu1 %v8693_v63  ;;  %8420 = vpow2.f32 %v3323_v25  ;;  %v3762_v47 = vpop.f32.mrf.mxu0  ;;  %v8695_v4 = vld [vmem:[%s14636_s3 + $0x38] sm:$0xff]  ;;  %8016 = vmatprep.subr.mxu0 %v12136_v48 }
 0x332   : > { %v3936_v19 = vadd.f32 %v3935_v15, %v3756_v49  ;;  %v7979_v52 = vpop.f32.mrf.mxu1  ;;  %4479 = vmatprep.mubr.f32.mxu0 %v12121_v2  ;;  %v4287_v56 = vld [vmem:[#allocation3 + $0x30] ss:$2 sm:$0xff]  ;;  %7358 = vmatprep.subr.mxu1 %v8694_v10  ;;  %4185 = vst [vmem:[#allocation3 + $0x48] sm:$0xff] %v4162_v5  ;;  %v3761_v25 = vadd.f32 %v3760_v0, %v11640_v58  ;;  %v6905_v61 = vadd.f32 -1.0, %v12098_v22  ;;  %v12180_v5 = vld [vmem:[%s14610_s7] ss:$0 sm:$0xff] }
 0x333   : > { %v4140_v51 = vsel %vm4025_vm15, %v11902_v36, %v6924_v13  ;;  %8422 = vpow2.f32 %v4089_v16  ;;  %v4053_v59 = vmin.f32 %v12119_v55, 0.0  ;;  %4480 = vmatmul.mubr.f32.gmra.mxu0 %v4287_v56  ;;  %7359 = vmatpush3.msra.mxu1 %v8695_v4  ;;  %v3765_v39 = vpop.f32.mrf.mxu0  ;;  %v8696_v58 = vld [vmem:[%s14636_s3 + $0xb0] sm:$0xff]  ;;  %v8699_v13 = vld [vmem:[%s14636_s3 + $0xa8] sm:$0xff]  ;;  %v3287_v16 = vmin.f32 %v12145_v30, 0.0  ;;  %v14644_v63 = vld [vmem:[#allocation10_spill] sm:$0xff] }
 0x334   : > { %v8413_v42 = vpop.eup %8412  ;;  %v4163_v40 = vmax.f32 %v12057_v46, %v4140_v51  ;;  %v3985_v36 = vmul.f32 %v11645_v43, %v3936_v19  ;;  %v3940_v60 = vpop.f32.mrf.mxu1  ;;  %7360 = vmatprep.subr.mxu1 %v8696_v58  ;;  %8424 = vpow2.f32 %v3325_v11  ;;  %v8697_v43 = vld [vmem:[%s14636_s3 + $0x30] sm:$0xff]  ;;  %v12162_v46 = vld [vmem:[%s14636_s3 + $0x228] sm:$0xff]  ;;  %v12165_v11 = vmul.f32 1.442695, %v3286_v8  ;;  %8017 = vmatpush3.msra.mxu0 %v12136_v48  ;;  %v8702_v4 = vld [vmem:[%s14636_s3 + $0xa0] sm:$0xff] }
 0x335   : > { %v6925_v54 = vadd.f32 -1.0, %v8413_v42  ;;  %v4091_v29 = vmul.f32 1.442695, %v4053_v59  ;;  %v3941_v17 = vadd.f32 %v3940_v60, %v3761_v25  ;;  %v12153_v44 = vld [vmem:[#allocation3 + $0x33] ss:$2 sm:$0xff]  ;;  %7361 = vmatpush3.msra.mxu1 %v8697_v43  ;;  %v3767_v41 = vpop.f32.mrf.mxu0  ;;  %v3766_v22 = vadd.f32 %v3765_v39, %v11652_v38  ;;  %8018 = vmatprep.subr.mxu0 %v12162_v46 }
 0x336   : > { %4186 = vst [vmem:[#allocation3 + $0x50] sm:$0xff] %v4163_v40  ;;  %v12169_v6 = vadd.f32 %v11657_v12, %v3985_v36  ;;  %v7982_v49 = vpop.f32.mrf.mxu1  ;;  %4604 = vmatprep.mubr.f32.mxu1 %v12153_v44  ;;  %v12172_v0 = vld [vmem:[#allocation3 + $0x32] ss:$2 sm:$0xff]  ;;  %7362 = vmatprep.subr.mxu1 %v8699_v13  ;;  %v3213_v8 = vmul.f32 %v12180_v5, %v14644_v63  ;;  %v12205_v59 = vld [vmem:[%s14611_s8] ss:$0 sm:$0xff]  ;;  %vm4028_vm3 = vcmp.gt.f32.partialorder %v12036_v3, 0.0 }
 0x337   : > { %v4141_v15 = vsel %vm4026_vm0, %v11938_v31, %v6925_v54  ;;  %8426 = vpow2.f32 %v4091_v29  ;;  %v3986_v12 = vmul.f32 %v12180_v5, %v3941_v17  ;;  %4605 = vmatmul.mubr.f32.gmra.mxu1 %v12172_v0  ;;  %v12190_v31 = vld [vmem:[%s14636_s3 + $0x220] sm:$0xff]  ;;  %v3770_v52 = vpop.f32.mrf.mxu0  ;;  %v8700_v10 = vld [vmem:[%s14636_s3 + $0x28] sm:$0xff]  ;;  %8019 = vmatpush3.msra.mxu0 %v12162_v46  ;;  %v12217_v42 = vld [vmem:[%s14636_s3 + $0x218] sm:$0xff]  ;;  %v12222_v36 = vsel %vm3258_vm13, %v11856_v28, %v6904_v21 }
 0x338   : > { %v8415_v38 = vpop.eup %8414  ;;  %v4164_v19 = vmax.f32 %v12063_v9, %v4141_v15  ;;  %v4054_v47 = vmin.f32 %v12169_v6, 0.0  ;;  %v3945_v56 = vpop.f32.mrf.mxu1  ;;  %7363 = vmatpush3.msra.mxu1 %v8700_v10  ;;  %v12227_v39 = vsel %vm3259_vm14, %v11862_v1, %v6905_v61  ;;  %v14645_v60 = vld [vmem:[#allocation12_spill] sm:$0xff]  ;;  %8020 = vmatprep.subr.mxu0 %v12190_v31  ;;  %v8703_v28 = vld [vmem:[%s14636_s3 + $0x20] sm:$0xff]  ;;  %v14646_v61 = vld [vmem:[#allocation9_spill] sm:$0xff]  ;;  %vm4029_vm4 = vcmp.gt.f32.partialorder %v12073_v53, 0.0 }
 0x339   : > { %v6926_v51 = vadd.f32 -1.0, %v8415_v38  ;;  %v12208_v9 = vadd.f32 %v12205_v59, %v3986_v12  ;;  %v3946_v25 = vadd.f32 %v3945_v56, %v3766_v22  ;;  %7364 = vmatprep.subr.mxu1 %v8702_v4  ;;  %v8417_v40 = vpop.eup %8416  ;;  %v3214_v58 = vmul.f32 %v12180_v5, %v14645_v60  ;;  %v3772_v29 = vpop.f32.mrf.mxu0  ;;  %v12231_v43 = vld [vmem:[#allocation3 + $0x41] ss:$2 sm:$0xff]  ;;  %v4289_v41 = vld [vmem:[#allocation3 + $0x40] ss:$2 sm:$0xff]  ;;  %8021 = vmatpush3.msra.mxu0 %v12190_v31 }
 0x33a   : > { %4187 = vst [vmem:[#allocation3 + $0x58] sm:$0xff] %v4164_v19  ;;  %v4093_v54 = vmul.f32 1.442695, %v4054_v47  ;;  %v7985_v17 = vpop.f32.mrf.mxu1  ;;  %7365 = vmatpush3.msra.mxu1 %v8703_v28  ;;  %v3771_v49 = vadd.f32 %v3770_v52, %v14646_v61  ;;  %4484 = vmatprep.mubr.f32.mxu0 %v12231_v43  ;;  %v12246_v22 = vadd.f32 %v12205_v59, %v3213_v8  ;;  %v14647_v12 = vld [vmem:[#allocation14_spill] sm:$0xff]  ;;  %v12255_v19 = vld [vmem:[%s14636_s3 + $0x210] sm:$0xff]  ;;  %vm3260_vm5 = vcmp.gt.f32.partialorder %v11920_v37, 0.0 }
 0x33b   : > { %v4142_v1 = vsel %vm4027_vm2, %v11980_v34, %v6926_v51  ;;  %v4055_v21 = vmin.f32 %v12208_v9, 0.0  ;;  %v3987_v15 = vmul.f32 %v12180_v5, %v3946_v25  ;;  %v3215_v13 = vmul.f32 %v12180_v5, %v14647_v12  ;;  %4485 = vmatmul.mubr.f32.gmra.mxu0 %v4289_v41  ;;  %v3775_v34 = vpop.f32.mrf.mxu0  ;;  %8022 = vmatprep.subr.mxu0 %v12217_v42  ;;  %v8704_v51 = vld [vmem:[%s14636_s3 + $0x98] sm:$0xff] }
 0x33c   : > { %v4165_v38 = vmax.f32 %v12082_v20, %v4142_v1  ;;  %8428 = vpow2.f32 %v4093_v54  ;;  %v3950_v63 = vpop.f32.mrf.mxu1  ;;  %7366 = vmatprep.subr.mxu1 %v8704_v51  ;;  %8023 = vmatpush3.msra.mxu0 %v12217_v42  ;;  %v12269_v25 = vadd.f32 -1.0, %v8417_v40  ;;  %v3329_v4 = vmul.f32 1.442695, %v3287_v16  ;;  %v8705_v17 = vld [vmem:[%s14636_s3 + $0x18] sm:$0xff]  ;;  %v12281_v40 = vld [vmem:[%s14636_s3 + $0x208] sm:$0xff]  ;;  %v8707_v51 = vld [vmem:[%s14636_s3 + $0x10] sm:$0xff] }
 0x33d   : > { %v8419_v47 = vpop.eup %8418  ;;  %8430 = vpow2.f32 %v12165_v11  ;;  %v4095_v8 = vmul.f32 1.442695, %v4055_v21  ;;  %v12259_v52 = vadd.f32 %v12205_v59, %v3987_v15  ;;  %v3951_v56 = vadd.f32 %v3950_v63, %v3771_v49  ;;  %v12261_v20 = vld [vmem:[#allocation3 + $0x43] ss:$2 sm:$0xff]  ;;  %v12263_v10 = vld [vmem:[#allocation3 + $0x42] ss:$2 sm:$0xff]  ;;  %v3777_v54 = vpop.f32.mrf.mxu0  ;;  %7367 = vmatpush3.msra.mxu1 %v8705_v17  ;;  %8024 = vmatprep.subr.mxu0 %v12255_v19 }
 0x33e   : > { %v12272_v11 = vadd.f32 %v12205_v59, %v3214_v58  ;;  %4188 = vst [vmem:[#allocation3 + $0x60] sm:$0xff] %v4165_v38  ;;  %v6927_v60 = vadd.f32 -1.0, %v8419_v47  ;;  %v7988_v29 = vpop.f32.mrf.mxu1  ;;  %4609 = vmatprep.mubr.f32.mxu1 %v12261_v20  ;;  %v12283_v16 = vpop.eup %8420  ;;  %v3288_v1 = vmin.f32 %v12246_v22, 0.0  ;;  %v12292_v21 = vadd.f32 %v12205_v59, %v3215_v13  ;;  %v14648_v49 = vld [vmem:[#allocation11_spill] sm:$0xff]  ;;  %8025 = vmatpush3.msra.mxu0 %v12255_v19  ;;  %v8706_v63 = vld [vmem:[%s14636_s3 + $0x90] sm:$0xff] }
 0x33f   : > { %8432 = vpow2.f32 %v4095_v8  ;;  %v4056_v58 = vmin.f32 %v12259_v52, 0.0  ;;  %v3988_v41 = vmul.f32 %v12180_v5, %v3951_v56  ;;  %4610 = vmatmul.mubr.f32.gmra.mxu1 %v12263_v10  ;;  %v3776_v15 = vadd.f32 %v3775_v34, %v14648_v49  ;;  %v3780_v12 = vpop.f32.mrf.mxu0  ;;  %7368 = vmatprep.subr.mxu1 %v8706_v63  ;;  %v12303_v47 = vld [vmem:[%s14636_s3 + $0x200] sm:$0xff] }
 0x340   : > { %v8423_v28 = vpop.eup %8422  ;;  %v4143_v61 = vsel %vm4028_vm3, %v12036_v3, %v6927_v60  ;;  %v3955_v38 = vpop.f32.mrf.mxu1  ;;  %8026 = vmatprep.subr.mxu0 %v12281_v40  ;;  %7369 = vmatpush3.msra.mxu1 %v8707_v51  ;;  %8434 = vpow2.f32 %v3329_v4  ;;  %v3289_v54 = vmin.f32 %v12272_v11, 0.0  ;;  %vm4030_vm6 = vcmp.gt.f32.partialorder %v12119_v55, 0.0 }
 0x341   : > { %v4166_v13 = vmax.f32 %v12222_v36, %v4143_v61  ;;  %v6928_v8 = vadd.f32 -1.0, %v8423_v28  ;;  %v4097_v3 = vmul.f32 1.442695, %v4056_v58  ;;  %v12307_v34 = vadd.f32 %v12205_v59, %v3988_v41  ;;  %v12309_v56 = vld [vmem:[#allocation3 + $0x51] ss:$2 sm:$0xff]  ;;  %v12315_v60 = vpop.eup %8424  ;;  %v3782_v29 = vpop.f32.mrf.mxu0  ;;  %8027 = vmatpush3.msra.mxu0 %v12281_v40 }
 0x342   : > { %v3956_v36 = vadd.f32 %v3955_v38, %v3776_v15  ;;  %v7991_v17 = vpop.f32.mrf.mxu1  ;;  %4489 = vmatprep.mubr.f32.mxu0 %v12309_v56  ;;  %v4291_v58 = vld [vmem:[#allocation3 + $0x50] ss:$2 sm:$0xff]  ;;  %8028 = vmatprep.subr.mxu0 %v12303_v47  ;;  %v3331_v15 = vmul.f32 1.442695, %v3288_v1  ;;  %v8710_v1 = vld [vmem:[%s14636_s3 + $0x1f8] sm:$0xff]  ;;  %vm3261_vm1 = vcmp.gt.f32.partialorder %v11969_v27, 0.0 }
 0x343   : > { %4189 = vst [vmem:[#allocation3 + $0x68] sm:$0xff] %v4166_v13  ;;  %v4144_v41 = vsel %vm4029_vm4, %v12073_v53, %v6928_v8  ;;  %8436 = vpow2.f32 %v4097_v3  ;;  %v4057_v28 = vmin.f32 %v12307_v34, 0.0  ;;  %v14649_v61 = vld [vmem:[#allocation13_spill] sm:$0xff]  ;;  %4490 = vmatmul.mubr.f32.gmra.mxu0 %v4291_v58  ;;  %v3785_v51 = vpop.f32.mrf.mxu0  ;;  %v8708_v53 = vld [vmem:[%s14636_s3 + $0x88] sm:$0xff]  ;;  %v3333_v58 = vmul.f32 1.442695, %v3289_v54 }
 0x344   : > { %v3781_v4 = vadd.f32 %v3780_v12, %v14649_v61  ;;  %v8427_v49 = vpop.eup %8426  ;;  %v4167_v38 = vmax.f32 %v12227_v39, %v4144_v41  ;;  %v3989_v63 = vmul.f32 %v12180_v5, %v3956_v36  ;;  %v3960_v13 = vpop.f32.mrf.mxu1  ;;  %7370 = vmatprep.subr.mxu1 %v8708_v53  ;;  %8029 = vmatpush3.msra.mxu0 %v12303_v47  ;;  %v3290_v12 = vmin.f32 %v12292_v21, 0.0  ;;  %v8709_v39 = vld [vmem:[%s14636_s3 + $0x8] sm:$0xff] }
 0x345   : > { %v6929_v8 = vadd.f32 -1.0, %v8427_v49  ;;  %v4099_v3 = vmul.f32 1.442695, %v4057_v28  ;;  %v12333_v17 = vld [vmem:[#allocation3 + $0x53] ss:$2 sm:$0xff]  ;;  %7371 = vmatpush3.msra.mxu1 %v8709_v39  ;;  %7410 = vmatprep.subr.mxu0 %v8710_v1  ;;  %v3375_v36 = vsel %vm3260_vm5, %v11920_v37, %v12269_v25  ;;  %v3787_v28 = vpop.f32.mrf.mxu0  ;;  %v8711_v49 = vld [vmem:[%s14636_s3 + $0x80] sm:$0xff] }
 0x346   : > { %v3961_v29 = vadd.f32 %v3960_v13, %v3781_v4  ;;  %4190 = vst [vmem:[#allocation3 + $0x70] sm:$0xff] %v4167_v38  ;;  %v12347_v41 = vadd.f32 %v12205_v59, %v3989_v63  ;;  %v7994_v61 = vpop.f32.mrf.mxu1  ;;  %4614 = vmatprep.mubr.f32.mxu1 %v12333_v17  ;;  %v12350_v4 = vld [vmem:[#allocation3 + $0x52] ss:$2 sm:$0xff]  ;;  %7372 = vmatprep.subr.mxu1 %v8711_v49  ;;  %v14650_v25 = vld [vmem:[#allocation15_spill] sm:$0xff]  ;;  %v6907_v63 = vadd.f32 -1.0, %v12283_v16  ;;  %vm4031_vm7 = vcmp.gt.f32.partialorder %v12169_v6, 0.0 }
 0x347   : > { %v4145_v37 = vsel %vm4030_vm6, %v12119_v55, %v6929_v8  ;;  %8438 = vpow2.f32 %v4099_v3  ;;  %v3786_v54 = vadd.f32 %v3785_v51, %v14650_v25  ;;  %4615 = vmatmul.mubr.f32.gmra.mxu1 %v12350_v4  ;;  %v8712_v1 = vld [vmem:[%s14636_s3] sm:$0xff]  ;;  %v3335_v51 = vmul.f32 1.442695, %v3290_v12  ;;  %v12371_v16 = vld [vmem:[%s14636_s3 + $0x278] sm:$0xff] }
 0x348   : > { %v3990_v38 = vmul.f32 %v12180_v5, %v3961_v29  ;;  %8440 = vpow2.f32 %v3331_v15  ;;  %v4168_v13 = vmax.f32 %v3375_v36, %v4145_v37  ;;  %v4058_v53 = vmin.f32 %v12347_v41, 0.0  ;;  %v3965_v39 = vpop.f32.mrf.mxu1  ;;  %7373 = vmatpush3.msra.mxu1 %v8712_v1 }
 0x349   : > { %v8429_v55 = vpop.eup %8428  ;;  %v3966_v3 = vadd.f32 %v3965_v39, %v3786_v54  ;;  %8048 = vmatprep.subr.mxu1 %v12371_v16  ;;  %v6908_v29 = vadd.f32 -1.0, %v12315_v60  ;;  %8442 = vpow2.f32 %v3333_v58  ;;  %v3376_v60 = vsel %vm3261_vm1, %v11969_v27, %v6907_v63 }
 0x34a   : > { %v12366_v8 = vadd.f32 %v12205_v59, %v3990_v38  ;;  %v8431_v15 = vpop.eup %8430  ;;  %4191 = vst [vmem:[#allocation3 + $0x78] sm:$0xff] %v4168_v13  ;;  %v6930_v36 = vadd.f32 -1.0, %v8429_v55  ;;  %v4101_v28 = vmul.f32 1.442695, %v4058_v53  ;;  %v7997_v61 = vpop.f32.mrf.mxu1  ;;  %v12375_v49 = vld [vmem:[#allocation3 + $0x61] ss:$2 sm:$0xff] }
 0x34b   : > { %v3991_v37 = vmul.f32 %v12180_v5, %v3966_v3  ;;  %4494 = vmatprep.mubr.f32.mxu0 %v12375_v49  ;;  %v4293_v25 = vld [vmem:[#allocation3 + $0x60] ss:$2 sm:$0xff]  ;;  %vm3262_vm8 = vcmp.gt.f32.partialorder %v11994_v24, 0.0  ;;  %vm4032_vm9 = vcmp.gt.f32.partialorder %v12208_v9, 0.0  ;;  %v6909_v63 = vadd.f32 -1.0, %v8431_v15 }
 0x34c   : > { %v4059_v12 = vmin.f32 %v12366_v8, 0.0  ;;  %v8433_v54 = vpop.eup %8432  ;;  %v4146_v38 = vsel %vm4031_vm7, %v12169_v6, %v6930_v36  ;;  %8444 = vpow2.f32 %v4101_v28  ;;  %4495 = vmatmul.mubr.f32.gmra.mxu0 %v4293_v25  ;;  %v3377_v1 = vsel %vm3262_vm8, %v11994_v24, %v6908_v29 }
 0x34d   : > { %v4169_v58 = vmax.f32 %v3376_v60, %v4146_v38  ;;  %v6931_v13 = vadd.f32 -1.0, %v8433_v54  ;;  %v12387_v39 = vadd.f32 %v12205_v59, %v3991_v37  ;;  %v12389_v5 = vld [vmem:[#allocation3 + $0x63] ss:$2 sm:$0xff]  ;;  %8446 = vpow2.f32 %v3335_v51  ;;  %v12394_v27 = vld [vmem:[#allocation3 + $0x62] ss:$2 sm:$0xff]  ;;  %v8435_v6 = vpop.eup %8434 }
 0x34e   : > { %v4103_v53 = vmul.f32 1.442695, %v4059_v12  ;;  %4619 = vmatprep.mubr.f32.mxu1 %v12389_v5  ;;  %vm3263_vm10 = vcmp.gt.f32.partialorder %v12085_v33, 0.0  ;;  %vm4033_vm11 = vcmp.gt.f32.partialorder %v12259_v52, 0.0  ;;  %v6910_v28 = vadd.f32 -1.0, %v8435_v6 }
 0x34f   : > { %4192 = vst [vmem:[#allocation3 + $0x80] sm:$0xff] %v4169_v58  ;;  %v4147_v55 = vsel %vm4032_vm9, %v12208_v9, %v6931_v13  ;;  %v4060_v59 = vmin.f32 %v12387_v39, 0.0  ;;  %4620 = vmatmul.mubr.f32.gmra.mxu1 %v12394_v27  ;;  %v3378_v9 = vsel %vm3263_vm10, %v12085_v33, %v6909_v63  ;;  %vm3264_vm12 = vcmp.gt.f32.partialorder %v12145_v30, 0.0 }
 0x350   : > { %8448 = vpow2.f32 %v4103_v53  ;;  %v8437_v3 = vpop.eup %8436  ;;  %v4170_v36 = vmax.f32 %v3377_v1, %v4147_v55  ;;  %vm4034_vm13 = vcmp.gt.f32.partialorder %v12307_v34, 0.0  ;;  %v3379_v33 = vsel %vm3264_vm12, %v12145_v30, %v6910_v28 }
 0x351   : > { %v6932_v24 = vadd.f32 -1.0, %v8437_v3  ;;  %v4105_v51 = vmul.f32 1.442695, %v4060_v59  ;;  %v12399_v29 = vld [vmem:[#allocation3 + $0x71] ss:$2 sm:$0xff]  ;;  %vm3265_vm14 = vcmp.gt.f32.partialorder %v12246_v22, 0.0 }
 0x352   : > { %4193 = vst [vmem:[#allocation3 + $0x88] sm:$0xff] %v4170_v36  ;;  %4499 = vmatprep.mubr.f32.mxu0 %v12399_v29  ;;  %v4295_v15 = vld [vmem:[#allocation3 + $0x70] ss:$2 sm:$0xff]  ;;  %vm4035_vm15 = vcmp.gt.f32.partialorder %v12347_v41, 0.0  ;;  %vm3266_vm0 = vcmp.gt.f32.partialorder %v12272_v11, 0.0  ;;  %vm4036_vm2 = vcmp.gt.f32.partialorder %v12366_v8, 0.0 }
 0x353   : > { %v4148_v61 = vsel %vm4033_vm11, %v12259_v52, %v6932_v24  ;;  %8450 = vpow2.f32 %v4105_v51  ;;  %4500 = vmatmul.mubr.f32.gmra.mxu0 %v4295_v15  ;;  %vm3267_vm3 = vcmp.gt.f32.partialorder %v12292_v21, 0.0  ;;  %vm4037_vm4 = vcmp.gt.f32.partialorder %v12387_v39, 0.0 }
 0x354   : > { %v8439_v12 = vpop.eup %8438  ;;  %v4171_v37 = vmax.f32 %v3378_v9, %v4148_v61 }
 0x355   : > { %v8441_v25 = vpop.eup %8440  ;;  %v6933_v54 = vadd.f32 -1.0, %v8439_v12 }
 0x356   : > { %4194 = vst [vmem:[#allocation3 + $0x90] sm:$0xff] %v4171_v37  ;;  %v12408_v60 = vld [vmem:[#allocation3 + $0x73] ss:$2 sm:$0xff]  ;;  %v12410_v38 = vld [vmem:[#allocation3 + $0x72] ss:$2 sm:$0xff]  ;;  %v8443_v52 = vpop.eup %8442  ;;  %v6911_v13 = vadd.f32 -1.0, %v8441_v25 }
 0x357   : > { %v4149_v58 = vsel %vm4034_vm13, %v12307_v34, %v6933_v54  ;;  %4624 = vmatprep.mubr.f32.mxu1 %v12408_v60  ;;  %v6912_v30 = vadd.f32 -1.0, %v8443_v52 }
 0x358   : > { %v4172_v53 = vmax.f32 %v3379_v33, %v4149_v58  ;;  %4625 = vmatmul.mubr.f32.gmra.mxu1 %v12410_v38  ;;  %v3380_v3 = vsel %vm3265_vm14, %v12246_v22, %v6911_v13 }
 0x359   : > { %v8445_v1 = vpop.eup %8444  ;;  %v12416_v6 = vld [vmem:[#allocation3 + $0x81] ss:$2 sm:$0xff]  ;;  %v4297_v63 = vld [vmem:[#allocation3 + $0x80] ss:$2 sm:$0xff]  ;;  %v3381_v28 = vsel %vm3266_vm0, %v12272_v11, %v6912_v30 }
 0x35a   : > { %4195 = vst [vmem:[#allocation3 + $0x98] sm:$0xff] %v4172_v53  ;;  %v6934_v55 = vadd.f32 -1.0, %v8445_v1  ;;  %4504 = vmatprep.mubr.f32.mxu0 %v12416_v6  ;;  %v8447_v59 = vpop.eup %8446 }
 0x35b   : > { %4505 = vmatmul.mubr.f32.gmra.mxu0 %v4297_v63  ;;  %v6913_v61 = vadd.f32 -1.0, %v8447_v59  ;;  %v12460_v59 = vld [vmem:[#allocation3 + $0x4] ss:$2 sm:$0xff] }
 0x35c   : > { %v4150_v36 = vsel %vm4035_vm15, %v12347_v41, %v6934_v55 }
 0x35d   : > { %v8449_v34 = vpop.eup %8448  ;;  %v4173_v24 = vmax.f32 %v3380_v3, %v4150_v36  ;;  %v12423_v15 = vld [vmem:[#allocation3 + $0x83] ss:$2 sm:$0xff]  ;;  %v12425_v9 = vld [vmem:[#allocation3 + $0x82] ss:$2 sm:$0xff]  ;;  %v3382_v11 = vsel %vm3267_vm3, %v12292_v21, %v6913_v61 }
 0x35e   : > { %v6935_v51 = vadd.f32 -1.0, %v8449_v34  ;;  %4629 = vmatprep.mubr.f32.mxu1 %v12423_v15  ;;  %v12466_v34 = vld [vmem:[#allocation3 + $0x14] ss:$2 sm:$0xff]  ;;  %v12470_v3 = vld [vmem:[#allocation3 + $0x24] ss:$2 sm:$0xff] }
 0x35f   : > { %4196 = vst [vmem:[#allocation3 + $0xa0] sm:$0xff] %v4173_v24  ;;  %4630 = vmatmul.mubr.f32.gmra.mxu1 %v12425_v9  ;;  %v8714_v36 = vld [vmem:[%s14636_s3 + $0x178] sm:$0xff]  ;;  %v8715_v24 = vld [vmem:[%s14636_s3 + $0x1f0] sm:$0xff]  ;;  %v8717_v61 = vld [vmem:[%s14636_s3 + $0x1e8] sm:$0xff] }
 0x360   : > { %v4151_v22 = vsel %vm4036_vm2, %v12366_v8, %v6935_v51  ;;  %v8451_v41 = vpop.eup %8450  ;;  %v8716_v51 = vld [vmem:[%s14636_s3 + $0x170] sm:$0xff] }
 0x361   : > { %v4174_v12 = vmax.f32 %v3381_v28, %v4151_v22  ;;  %v6936_v37 = vadd.f32 -1.0, %v8451_v41  ;;  %v12433_v25 = vld [vmem:[#allocation3 + $0x91] ss:$2 sm:$0xff]  ;;  %v4299_v54 = vld [vmem:[#allocation3 + $0x90] ss:$2 sm:$0xff] }
 0x362   : > { %4509 = vmatprep.mubr.f32.mxu0 %v12433_v25  ;;  %v12483_v28 = vld [vmem:[#allocation3 + $0x34] ss:$2 sm:$0xff]  ;;  %v12492_v41 = vld [vmem:[#allocation3 + $0x44] ss:$2 sm:$0xff] }
 0x363   : > { %4197 = vst [vmem:[#allocation3 + $0xa8] sm:$0xff] %v4174_v12  ;;  %v4152_v33 = vsel %vm4037_vm4, %v12387_v39, %v6936_v37  ;;  %4510 = vmatmul.mubr.f32.gmra.mxu0 %v4299_v54  ;;  %v8719_v22 = vld [vmem:[%s14636_s3 + $0x168] sm:$0xff]  ;;  %v8720_v12 = vld [vmem:[%s14636_s3 + $0x1e0] sm:$0xff]  ;;  %v8722_v54 = vld [vmem:[%s14636_s3 + $0x270] sm:$0xff] }
 0x364   : > { %v4175_v8 = vmax.f32 %v3382_v11, %v4152_v33  ;;  %v8721_v37 = vld [vmem:[%s14636_s3 + $0x160] sm:$0xff]  ;;  %v8724_v33 = vld [vmem:[%s14636_s3 + $0x158] sm:$0xff] }
 0x365   : > { %v12513_v11 = vld [vmem:[#allocation3 + $0x64] ss:$2 sm:$0xff] }
 0x366   : > { %4198 = vst [vmem:[#allocation3 + $0xb0] sm:$0xff] %v4175_v8  ;;  %v12440_v58 = vld [vmem:[#allocation3 + $0x93] ss:$2 sm:$0xff]  ;;  %v12442_v52 = vld [vmem:[#allocation3 + $0x92] ss:$2 sm:$0xff] }
 0x367   : > { %4634 = vmatprep.mubr.f32.mxu1 %v12440_v58  ;;  %v8725_v8 = vld [vmem:[%s14636_s3 + $0x1d0] sm:$0xff] }
 0x368   : > { %4635 = vmatmul.mubr.f32.gmra.mxu1 %v12442_v52 }
 0x36a   : > { %v12446_v13 = vld [vmem:[#allocation3 + $0xa1] ss:$2 sm:$0xff]  ;;  %v4301_v53 = vld [vmem:[#allocation3 + $0xa0] ss:$2 sm:$0xff] }
 0x36b   : > { %4514 = vmatprep.mubr.f32.mxu0 %v12446_v13 }
 0x36c   : > { %4515 = vmatmul.mubr.f32.gmra.mxu0 %v4301_v53  ;;  %v8727_v53 = vld [vmem:[%s14636_s3 + $0x150] sm:$0xff] }
 0x36d   : > { %v12449_v21 = vld [vmem:[#allocation3 + $0xb1] ss:$2 sm:$0x3]  ;;  %v4303_v1 = vld [vmem:[#allocation3 + $0xb0] ss:$2 sm:$0x3] }
 0x36e   : > { %v12451_v39 = vld [vmem:[#allocation3 + $0xa3] ss:$2 sm:$0xff]  ;;  %4519 = vmatprep.mubr.f32.mxu0 %v12449_v21  ;;  %v12455_v63 = vld [vmem:[#allocation3 + $0xa2] ss:$2 sm:$0xff] }
 0x36f   : > { %4639 = vmatprep.mubr.f32.mxu1 %v12451_v39  ;;  %v12458_v55 = vld [vmem:[#allocation3 + $0xb3] ss:$2 sm:$0x3]  ;;  %v12464_v30 = vld [vmem:[#allocation3 + $0xb2] ss:$2 sm:$0x3] }
 0x370   : > { %4520 = vmatmul.mubr.f32.gmra.mxu0 %v4303_v1  ;;  %4640 = vmatmul.mubr.f32.gmra.mxu1 %v12455_v63  ;;  %v12532_v1 = vld [vmem:[#allocation3 + $0x74] ss:$2 sm:$0xff] }
 0x371   : > { %4644 = vmatprep.mubr.f32.mxu1 %v12458_v55  ;;  %8030 = vmatprep.mubr.f32.mxu0 %v12460_v59 }
 0x374   : > { %4645 = vmatmul.mubr.f32.gmra.mxu1 %v12464_v30  ;;  %8031 = vmatmul.mubr.f32.vlgmr.msra.gmra.mxu0 %v12466_v34 }
 0x375   : > { %7411 = vmatpush3.msra.mxu0 %v8714_v36  ;;  %8033 = vmatprep.mubr.f32.mxu0 %v12470_v3  ;;  %v8729_v36 = vld [vmem:[%s14636_s3 + $0x148] sm:$0xff] }
 0x376   : > { %4971 = vmatprep.mubr.f32.mxu1 %v11922_v14  ;;  %7412 = vmatprep.subr.mxu0 %v8715_v24  ;;  %v8718_v14 = vld [vmem:[#allocation3 + $0x1] ss:$2 sm:$0xff] }
 0x377   : > { %7413 = vmatpush3.msra.mxu0 %v8716_v51  ;;  %v8730_v24 = vld [vmem:[%s14636_s3 + $0x260] sm:$0xff] }
 0x378   : > { %7414 = vmatprep.subr.mxu0 %v8717_v61  ;;  %8034 = vmatmul.mubr.f32.gmra.mxu0 %v12483_v28  ;;  %v12542_v51 = vld [vmem:[#allocation3 + $0x84] ss:$2 sm:$0xff] }
 0x379   : > { %4972 = vmatmul.mubr.f32.vlgmr.msra.gmra.mxu1 %v8718_v14  ;;  %7415 = vmatpush3.msra.mxu0 %v8719_v22  ;;  %v8732_v61 = vld [vmem:[%s14636_s3 + $0x140] sm:$0xff]  ;;  %v12553_v14 = vld [vmem:[#allocation3 + $0x94] ss:$2 sm:$0xff] }
 0x37a   : > { %8049 = vmatpush3.msra.mxu1 %v12371_v16  ;;  %8036 = vmatprep.mubr.f32.mxu0 %v12492_v41  ;;  %v8723_v16 = vld [vmem:[%s14636_s3 + $0x1d8] sm:$0xff] }
 0x37b   : > { %4976 = vmatprep.mubr.f32.mxu1 %v11997_v7  ;;  %7416 = vmatprep.subr.mxu0 %v8720_v12  ;;  %v12509_v7 = vld [vmem:[#allocation3 + $0x54] ss:$2 sm:$0xff]  ;;  %v12563_v12 = vld [vmem:[#allocation3 + $0xa4] ss:$2 sm:$0xff] }
 0x37c   : > { %7417 = vmatpush3.msra.mxu0 %v8721_v37  ;;  %8050 = vmatprep.subr.mxu1 %v8722_v54  ;;  %v8733_v22 = vld [vmem:[%s14636_s3 + $0x1b8] sm:$0xff]  ;;  %v8735_v37 = vld [vmem:[%s14636_s3 + $0x1b0] sm:$0xff] }
 0x37d   : > { %7418 = vmatprep.subr.mxu0 %v8723_v16  ;;  %8051 = vmatpush3.msra.mxu1 %v8722_v54  ;;  %v8738_v54 = vld [vmem:[%s14636_s3 + $0x128] sm:$0xff]  ;;  %v8739_v16 = vld [vmem:[%s14636_s3 + $0x1a0] sm:$0xff] }
 0x37e   : > { %8037 = vmatmul.mubr.f32.gmra.mxu0 %v12509_v7  ;;  %4977 = vmatmul.mubr.f32.gmra.mxu1 %v11940_v57  ;;  %v8726_v57 = vld [vmem:[%s14636_s3 + $0x268] sm:$0xff] }
 0x37f   : > { %7419 = vmatpush3.msra.mxu0 %v8724_v33  ;;  %8039 = vmatprep.mubr.f32.mxu0 %v12513_v11  ;;  %v8748_v33 = vld [vmem:[%s14636_s3 + $0x100] sm:$0xff] }
 0x380   : > { %4981 = vmatprep.mubr.f32.mxu1 %v12104_v62  ;;  %7420 = vmatprep.subr.mxu0 %v8725_v8  ;;  %v8728_v62 = vld [vmem:[%s14636_s3 + $0x1c8] sm:$0xff] }
 0x381   : > { %8052 = vmatprep.subr.mxu1 %v8726_v57  ;;  %7421 = vmatpush3.msra.mxu0 %v8727_v53  ;;  %v5491_v8 = vld [vmem:[%s14651_s4 + $0x2c8] sm:$0xff]  ;;  %v5490_v53 = vld [vmem:[%s14651_s4 + $0x2c0] sm:$0xff] }
 0x382   : > { %8053 = vmatpush3.msra.mxu1 %v8726_v57  ;;  %7422 = vmatprep.subr.mxu0 %v8728_v62  ;;  %v5422_v57 = vld [vmem:[%s14651_s4 + $0xa0] sm:$0xff] }
 0x383   : > { %8040 = vmatmul.mubr.f32.gmra.mxu0 %v12532_v1  ;;  %4982 = vmatmul.mubr.f32.gmra.mxu1 %v12020_v26  ;;  %v8731_v26 = vld [vmem:[%s14636_s3 + $0x1c0] sm:$0xff] }
 0x384   : > { %7423 = vmatpush3.msra.mxu0 %v8729_v36  ;;  %8054 = vmatprep.subr.mxu1 %v8730_v24  ;;  %v5489_v36 = vld [vmem:[%s14651_s4 + $0x2b8] sm:$0xff] }
 0x385   : > { %8042 = vmatprep.mubr.f32.mxu0 %v12542_v51  ;;  %4986 = vmatprep.mubr.f32.mxu1 %v12172_v0  ;;  %v8734_v0 = vld [vmem:[%s14636_s3 + $0x138] sm:$0xff] }
 0x386   : > { %7424 = vmatprep.subr.mxu0 %v8731_v26  ;;  %8055 = vmatpush3.msra.mxu1 %v8730_v24  ;;  %v5420_v26 = vld [vmem:[%s14651_s4 + $0x90] sm:$0xff] }
 0x387   : > { %7425 = vmatpush3.msra.mxu0 %v8732_v61  ;;  %8056 = vmatprep.subr.mxu1 %v11956_v23  ;;  %v5488_v61 = vld [vmem:[%s14651_s4 + $0x2b0] sm:$0xff] }
 0x388   : > { %7426 = vmatprep.subr.mxu0 %v8733_v22  ;;  %8043 = vmatmul.mubr.f32.gmra.mxu0 %v12553_v14  ;;  %v5487_v22 = vld [vmem:[%s14651_s4 + $0x2a8] sm:$0xff] }
 0x389   : > { %4987 = vmatmul.mubr.f32.gmra.mxu1 %v12121_v2  ;;  %7427 = vmatpush3.msra.mxu0 %v8734_v0  ;;  %v8736_v2 = vld [vmem:[%s14636_s3 + $0x130] sm:$0xff] }
 0x38a   : > { %8057 = vmatpush3.msra.mxu1 %v11956_v23  ;;  %8045 = vmatprep.mubr.f32.mxu0 %v12563_v12  ;;  %v8737_v23 = vld [vmem:[%s14636_s3 + $0x1a8] sm:$0xff] }
 0x38b   : > { %4991 = vmatprep.mubr.f32.mxu1 %v12263_v10  ;;  %7428 = vmatprep.subr.mxu0 %v8735_v37  ;;  %v12579_v10 = vld [vmem:[#allocation3 + $0xb4] ss:$2 sm:$0x3]  ;;  %v5418_v37 = vld [vmem:[%s14651_s4 + $0x80] sm:$0xff] }
 0x38c   : > { %7429 = vmatpush3.msra.mxu0 %v8736_v2  ;;  %8058 = vmatprep.subr.mxu1 %v11989_v50  ;;  %v5486_v2 = vld [vmem:[%s14651_s4 + $0x2a0] sm:$0xff] }
 0x38d   : > { %7430 = vmatprep.subr.mxu0 %v8737_v23  ;;  %8059 = vmatpush3.msra.mxu1 %v11989_v50  ;;  %v8740_v50 = vld [vmem:[%s14636_s3 + $0x120] sm:$0xff] }
 0x38e   : > { %8046 = vmatmul.mubr.f32.gmra.mxu0 %v12579_v10  ;;  %4992 = vmatmul.mubr.f32.gmra.mxu1 %v12231_v43  ;;  %v8741_v43 = vld [vmem:[%s14636_s3 + $0x198] sm:$0xff] }
 0x38f   : > { %7431 = vmatpush3.msra.mxu0 %v8738_v54  ;;  %4996 = vmatprep.mubr.f32.mxu1 %v12350_v4  ;;  %v8742_v4 = vld [vmem:[%s14636_s3 + $0x118] sm:$0xff] }
 0x390   : > { %7432 = vmatprep.subr.mxu0 %v8739_v16  ;;  %5096 = vmatprep.mubr.f32.mxu0 %v12460_v59  ;;  %v8745_v59 = vld [vmem:[%s14636_s3 + $0x188] sm:$0xff]  ;;  %v5485_v54 = vld [vmem:[%s14651_s4 + $0x298] sm:$0xff] }
 0x391   : > { %8060 = vmatprep.subr.mxu1 %v12029_v32  ;;  %7433 = vmatpush3.msra.mxu0 %v8740_v50  ;;  %v5416_v50 = vld [vmem:[%s14651_s4 + $0x70] sm:$0xff] }
 0x392   : > { %8061 = vmatpush3.msra.mxu1 %v12029_v32  ;;  %7434 = vmatprep.subr.mxu0 %v8741_v43  ;;  %v8743_v32 = vld [vmem:[%s14636_s3 + $0x190] sm:$0xff] }
 0x393   : > { %4997 = vmatmul.mubr.f32.gmra.mxu1 %v12309_v56  ;;  %7435 = vmatpush3.msra.mxu0 %v8742_v4  ;;  %v8744_v56 = vld [vmem:[%s14636_s3 + $0x110] sm:$0xff]  ;;  %v5415_v4 = vld [vmem:[%s14651_s4 + $0x68] sm:$0xff] }
 0x394   : > { %8062 = vmatprep.subr.mxu1 %v12051_v35  ;;  %5001 = vmatprep.mubr.f32.mxu1 %v12394_v27  ;;  %v8746_v27 = vld [vmem:[%s14636_s3 + $0x108] sm:$0xff]  ;;  %v5484_v43 = vld [vmem:[%s14651_s4 + $0x290] sm:$0xff] }
 0x395   : > { %7436 = vmatprep.subr.mxu0 %v8743_v32  ;;  %8063 = vmatpush3.msra.mxu1 %v12051_v35  ;;  %v8747_v35 = vld [vmem:[%s14636_s3 + $0x180] sm:$0xff]  ;;  %v5483_v32 = vld [vmem:[%s14651_s4 + $0x288] sm:$0xff]  ;;  %s8879_s3 = scalar_lea.vmem %s6591_s2, 16 }
 0x396   : > { %7437 = vmatpush3.msra.mxu0 %v8744_v56  ;;  %8064 = vmatprep.subr.mxu1 %v12096_v18  ;;  %p8880_p11 = scmp.ne.s32.totalorder %s6591_s2, %s8879_s3  ;;  %p8887_p1 = scmp.lt.s32.totalorder %s8885_s26, %s8879_s3 }
 0x397   : > { %7438 = vmatprep.subr.mxu0 %v8745_v59  ;;  %5002 = vmatmul.mubr.f32.gmra.mxu1 %v12375_v49  ;;  %v8749_v49 = vld [vmem:[#allocation3 + $0x3] ss:$2 sm:$0xff] }
 0x398   : > { %7439 = vmatpush3.msra.mxu0 %v8746_v27  ;;  %8065 = vmatpush3.msra.mxu1 %v12096_v18  ;;  %v8750_v18 = vld [vmem:[#allocation3 + $0x13] ss:$2 sm:$0xff]  ;;  %v5414_v59 = vld [vmem:[%s14651_s4 + $0x60] sm:$0xff]  ;;  %p8881_p12 = pnand %p8880_p11, %p9062_p5  ;;  %p8888_p2 = por %p8887_p1, %p8886_p0 }
 0x399   : > { %5006 = vmatprep.mubr.f32.mxu1 %v12410_v38  ;;  %7440 = vmatprep.subr.mxu0 %v8747_v35  ;;  %v5431_v38 = vld [vmem:[%s14651_s4 + $0xe8] sm:$0xff]  ;;  %v5482_v27 = vld [vmem:[%s14651_s4 + $0x280] sm:$0xff] }
 0x39a   : > { %7441 = vmatpush3.msra.mxu0 %v8748_v33  ;;  %8066 = vmatprep.subr.mxu1 %v12136_v48  ;;  %v5413_v33 = vld [vmem:[%s14651_s4 + $0x58] sm:$0xff]  ;;  %p8882_p13 = pneg %p8881_p12 }
 0x39b   : > { %5097 = vmatmul.mubr.f32.vlgmr.msra.gmra.mxu0 %v8749_v49  ;;  %8067 = vmatpush3.msra.mxu1 %v12136_v48  ;;  %v4886_v48 = vld [vmem:[#allocation3 + $0x15] ss:$2 sm:$0xff] }
 0x39c   : > { %5007 = vmatmul.mubr.f32.gmra.mxu1 %v12399_v29  ;;  %5101 = vmatprep.mubr.f32.mxu0 %v12466_v34  ;;  %v12675_v29 = vld [vmem:[%s14651_s4 + $0xf8] sm:$0xff]  ;;  %p8889_p3 = pnand %p8888_p2, %p8882_p13 }
 0x39d   : > { %5011 = vmatprep.mubr.f32.mxu1 %v12425_v9  ;;  %8068 = vmatprep.subr.mxu1 %v12162_v46  ;;  %v5497_v9 = vld [vmem:[%s14651_s4 + $0x2f8] sm:$0xff] }
 0x39e   : > { %8069 = vmatpush3.msra.mxu1 %v12162_v46  ;;  %v4890_v46 = vld [vmem:[#allocation3 + $0x35] ss:$2 sm:$0xff]  ;;  %5623 = vmatprep.subr.mxu0 %v12675_v29 }
 0x39f   : > { %5102 = vmatmul.mubr.f32.gmra.mxu0 %v8750_v18  ;;  %8070 = vmatprep.subr.mxu1 %v12190_v31  ;;  %v5425_v34 = vld [vmem:[%s14651_s4 + $0xb8] sm:$0xff] }
 0x3a0   : > { %5012 = vmatmul.mubr.f32.gmra.mxu1 %v12416_v6  ;;  %5106 = vmatprep.mubr.f32.mxu0 %v12470_v3  ;;  %v5430_v6 = vld [vmem:[%s14651_s4 + $0xe0] sm:$0xff]  ;;  %v5493_v3 = vld [vmem:[%s14651_s4 + $0x2d8] sm:$0xff] }
 0x3a1   : > { %5016 = vmatprep.mubr.f32.mxu1 %v12442_v52  ;;  %8071 = vmatpush3.msra.mxu1 %v12190_v31  ;;  %v4892_v31 = vld [vmem:[#allocation3 + $0x45] ss:$2 sm:$0xff]  ;;  %v5496_v52 = vld [vmem:[%s14651_s4 + $0x2f0] sm:$0xff] }
 0x3a2   : > { %8072 = vmatprep.subr.mxu1 %v12217_v42  ;;  %v5481_v49 = vld [vmem:[%s14651_s4 + $0x278] sm:$0xff] }
 0x3a3   : > { %5107 = vmatmul.mubr.f32.gmra.mxu0 %v12087_v45  ;;  %8073 = vmatpush3.msra.mxu1 %v12217_v42  ;;  %v4884_v45 = vld [vmem:[#allocation3 + $0x5] ss:$2 sm:$0xff]  ;;  %v4894_v42 = vld [vmem:[#allocation3 + $0x55] ss:$2 sm:$0xff] }
 0x3a4   : > { %5017 = vmatmul.mubr.f32.gmra.mxu1 %v12433_v25  ;;  %5111 = vmatprep.mubr.f32.mxu0 %v12483_v28  ;;  %v5424_v28 = vld [vmem:[%s14651_s4 + $0xb0] sm:$0xff] }
 0x3a5   : > { %5021 = vmatprep.mubr.f32.mxu1 %v12455_v63  ;;  %8074 = vmatprep.subr.mxu1 %v12255_v19  ;;  %v5426_v63 = vld [vmem:[%s14651_s4 + $0xc0] sm:$0xff] }
 0x3a6   : > { %8075 = vmatpush3.msra.mxu1 %v12255_v19  ;;  %v4896_v19 = vld [vmem:[#allocation3 + $0x65] ss:$2 sm:$0xff] }
 0x3a7   : > { %5112 = vmatmul.mubr.f32.gmra.mxu0 %v12153_v44  ;;  %8076 = vmatprep.subr.mxu1 %v12281_v40  ;;  %v4888_v44 = vld [vmem:[#allocation3 + $0x25] ss:$2 sm:$0xff] }
 0x3a8   : > { %5022 = vmatmul.mubr.f32.gmra.mxu1 %v12446_v13  ;;  %5116 = vmatprep.mubr.f32.mxu0 %v12492_v41  ;;  %v5427_v13 = vld [vmem:[%s14651_s4 + $0xc8] sm:$0xff]  ;;  %v5492_v41 = vld [vmem:[%s14651_s4 + $0x2d0] sm:$0xff] }
 0x3a9   : > { %5026 = vmatprep.mubr.f32.mxu1 %v12464_v30  ;;  %8077 = vmatpush3.msra.mxu1 %v12281_v40  ;;  %v4900_v40 = vld [vmem:[#allocation3 + $0x85] ss:$2 sm:$0xff] }
 0x3aa   : > { %8078 = vmatprep.subr.mxu1 %v12303_v47 }
 0x3ab   : > { %5117 = vmatmul.mubr.f32.gmra.mxu0 %v12261_v20  ;;  %8079 = vmatpush3.msra.mxu1 %v12303_v47  ;;  %v4898_v20 = vld [vmem:[#allocation3 + $0x75] ss:$2 sm:$0xff] }
 0x3ac   : > { %5027 = vmatmul.mubr.f32.gmra.mxu1 %v12449_v21  ;;  %5121 = vmatprep.mubr.f32.mxu0 %v12509_v7  ;;  %v4902_v47 = vld [vmem:[#allocation3 + $0x95] ss:$2 sm:$0xff] }
 0x3ad   : > { %8080 = vmatprep.mubr.f32.mxu1 %v4884_v45  ;;  %5724 = vmatprep.subr.mxu1 %v5497_v9  ;;  %v5495_v21 = vld [vmem:[%s14651_s4 + $0x2e8] sm:$0xff]  ;;  %v5412_v45 = vld [vmem:[%s14651_s4 + $0x50] sm:$0xff]  ;;  %v5406_v9 = vld [vmem:[%s14651_s4 + $0x20] sm:$0xff] }
 0x3af   : > { %5122 = vmatmul.mubr.f32.gmra.mxu0 %v12333_v17  ;;  %v4904_v17 = vld [vmem:[#allocation3 + $0xa5] ss:$2 sm:$0xff] }
 0x3b0   : > { %5126 = vmatprep.mubr.f32.mxu0 %v12513_v11  ;;  %8081 = vmatmul.mubr.f32.vlgmr.msra.gmra.mxu1 %v4886_v48  ;;  %v5423_v11 = vld [vmem:[%s14651_s4 + $0xa8] sm:$0xff]  ;;  %v5480_v48 = vld [vmem:[%s14651_s4 + $0x270] sm:$0xff] }
 0x3b1   : > { %8083 = vmatprep.mubr.f32.mxu1 %v4888_v44  ;;  %5725 = vmatpush1.msra.mxu1 %v5496_v52  ;;  %v5405_v52 = vld [vmem:[%s14651_s4 + $0x18] sm:$0xff] }
 0x3b2   : > { %5726 = vmatprep.subr.mxu1 %v5495_v21 }
 0x3b3   : > { %5127 = vmatmul.mubr.f32.gmra.mxu0 %v12389_v5  ;;  %v4906_v5 = vld [vmem:[#allocation3 + $0xb5] ss:$2 sm:$0x3] }
 0x3b4   : > { %5131 = vmatprep.mubr.f32.mxu0 %v12532_v1  ;;  %8084 = vmatmul.mubr.f32.gmra.mxu1 %v4890_v46  ;;  %v5421_v1 = vld [vmem:[%s14651_s4 + $0x98] sm:$0xff]  ;;  %v5411_v46 = vld [vmem:[%s14651_s4 + $0x48] sm:$0xff] }
 0x3b5   : > { %8086 = vmatprep.mubr.f32.mxu1 %v4892_v31  ;;  %v5479_v31 = vld [vmem:[%s14651_s4 + $0x268] sm:$0xff] }
 0x3b7   : > { %5132 = vmatmul.mubr.f32.gmra.mxu0 %v12408_v60  ;;  %v5432_v60 = vld [vmem:[%s14651_s4 + $0xf0] sm:$0xff] }
 0x3b8   : > { %5136 = vmatprep.mubr.f32.mxu0 %v12542_v51  ;;  %8087 = vmatmul.mubr.f32.gmra.mxu1 %v4894_v42 }
 0x3b9   : > { %8089 = vmatprep.mubr.f32.mxu1 %v4896_v19  ;;  %5624 = vmatpush1.msra.mxu0 %v5432_v60  ;;  %v5410_v19 = vld [vmem:[%s14651_s4 + $0x40] sm:$0xff]  ;;  %v5476_v60 = vld [vmem:[%s14651_s4 + $0x250] sm:$0xff] }
 0x3ba   : > { %5625 = vmatprep.subr.mxu0 %v5431_v38 }
 0x3bb   : > { %5137 = vmatmul.mubr.f32.gmra.mxu0 %v12423_v15  ;;  %v5429_v15 = vld [vmem:[%s14651_s4 + $0xd8] sm:$0xff] }
 0x3bc   : > { %5141 = vmatprep.mubr.f32.mxu0 %v12553_v14  ;;  %8090 = vmatmul.mubr.f32.gmra.mxu1 %v4898_v20  ;;  %v5419_v14 = vld [vmem:[%s14651_s4 + $0x88] sm:$0xff]  ;;  %v5478_v20 = vld [vmem:[%s14651_s4 + $0x260] sm:$0xff] }
 0x3bd   : > { %8092 = vmatprep.mubr.f32.mxu1 %v4900_v40  ;;  %5626 = vmatpush1.msra.mxu0 %v5430_v6  ;;  %v5407_v6 = vld [vmem:[%s14651_s4 + $0x28] sm:$0xff] }
 0x3be   : > { %5627 = vmatprep.subr.mxu0 %v5429_v15  ;;  %v5475_v15 = vld [vmem:[%s14651_s4 + $0x248] sm:$0xff] }
 0x3bf   : > { %5142 = vmatmul.mubr.f32.gmra.mxu0 %v12440_v58  ;;  %v5428_v58 = vld [vmem:[%s14651_s4 + $0xd0] sm:$0xff] }
 0x3c0   : > { %5146 = vmatprep.mubr.f32.mxu0 %v12563_v12  ;;  %8093 = vmatmul.mubr.f32.gmra.mxu1 %v4902_v47  ;;  %v5409_v47 = vld [vmem:[%s14651_s4 + $0x38] sm:$0xff] }
 0x3c1   : > { %8095 = vmatprep.mubr.f32.mxu1 %v4904_v17  ;;  %5628 = vmatpush1.msra.mxu0 %v5428_v58  ;;  %v5477_v17 = vld [vmem:[%s14651_s4 + $0x258] sm:$0xff] }
 0x3c2   : > { %5629 = vmatprep.subr.mxu0 %v5427_v13  ;;  %v5473_v13 = vld [vmem:[%s14651_s4 + $0x238] sm:$0xff] }
 0x3c3   : > { %5147 = vmatmul.mubr.f32.gmra.mxu0 %v12451_v39 }
 0x3c4   : > { %5151 = vmatprep.mubr.f32.mxu0 %v12579_v10  ;;  %8096 = vmatmul.mubr.f32.gmra.mxu1 %v4906_v5  ;;  %v5417_v10 = vld [vmem:[%s14651_s4 + $0x78] sm:$0xff]  ;;  %v5408_v5 = vld [vmem:[%s14651_s4 + $0x30] sm:$0xff] }
 0x3c5   : > { %5630 = vmatpush1.msra.mxu0 %v5426_v63  ;;  %v5404_v63 = vld [vmem:[%s14651_s4 + $0x10] sm:$0xff] }
 0x3c6   : > { %5631 = vmatprep.subr.mxu0 %v5425_v34 }
 0x3c7   : > { %5152 = vmatmul.mubr.f32.gmra.mxu0 %v12458_v55  ;;  %v5494_v55 = vld [vmem:[%s14651_s4 + $0x2e0] sm:$0xff] }
 0x3c8   : > { %5727 = vmatpush1.msra.mxu1 %v5494_v55  ;;  %5632 = vmatpush1.msra.mxu0 %v5424_v28  ;;  %v5472_v55 = vld [vmem:[%s14651_s4 + $0x230] sm:$0xff]  ;;  %v5471_v28 = vld [vmem:[%s14651_s4 + $0x228] sm:$0xff] }
 0x3c9   : > { %5728 = vmatprep.subr.mxu1 %v5493_v3  ;;  %5633 = vmatprep.subr.mxu0 %v5423_v11  ;;  %v5403_v3 = vld [vmem:[%s14651_s4 + $0x8] sm:$0xff]  ;;  %v5470_v11 = vld [vmem:[%s14651_s4 + $0x220] sm:$0xff] }
 0x3ca   : > { %5729 = vmatpush1.msra.mxu1 %v5492_v41  ;;  %5634 = vmatpush1.msra.mxu0 %v5422_v57  ;;  %v5465_v57 = vld [vmem:[%s14651_s4 + $0x1f8] sm:$0xff] }
 0x3cb   : > { %5730 = vmatprep.subr.mxu1 %v5491_v8  ;;  %5635 = vmatprep.subr.mxu0 %v5421_v1  ;;  %v5468_v1 = vld [vmem:[%s14651_s4 + $0x210] sm:$0xff] }
 0x3cc   : > { %5731 = vmatpush1.msra.mxu1 %v5490_v53  ;;  %5636 = vmatpush1.msra.mxu0 %v5420_v26  ;;  %v5469_v53 = vld [vmem:[%s14651_s4 + $0x218] sm:$0xff] }
 0x3cd   : > { %5732 = vmatprep.subr.mxu1 %v5489_v36  ;;  %5637 = vmatprep.subr.mxu0 %v5419_v14  ;;  %v5466_v14 = vld [vmem:[%s14651_s4 + $0x200] sm:$0xff] }
 0x3ce   : > { %5733 = vmatpush1.msra.mxu1 %v5488_v61  ;;  %5638 = vmatpush1.msra.mxu0 %v5418_v37  ;;  %v5462_v61 = vld [vmem:[%s14651_s4 + $0x1e0] sm:$0xff] }
 0x3cf   : > { %5734 = vmatprep.subr.mxu1 %v5487_v22  ;;  %5639 = vmatprep.subr.mxu0 %v5417_v10  ;;  %v5461_v22 = vld [vmem:[%s14651_s4 + $0x1d8] sm:$0xff]  ;;  %v5528_v10 = vld [vmem:[%s14651_s4 + $0x3f0] sm:$0xff] }
 0x3d0   : > { %5735 = vmatpush1.msra.mxu1 %v5486_v2  ;;  %5640 = vmatpush1.msra.mxu0 %v5416_v50 }
 0x3d1   : > { %5736 = vmatprep.subr.mxu1 %v5485_v54  ;;  %5641 = vmatprep.subr.mxu0 %v5415_v4  ;;  %v5459_v54 = vld [vmem:[%s14651_s4 + $0x1c8] sm:$0xff]  ;;  %v5526_v4 = vld [vmem:[%s14651_s4 + $0x3e0] sm:$0xff] }
 0x3d2   : > { %5737 = vmatpush1.msra.mxu1 %v5484_v43  ;;  %5642 = vmatpush1.msra.mxu0 %v5414_v59  ;;  %v5458_v43 = vld [vmem:[%s14651_s4 + $0x1c0] sm:$0xff]  ;;  %v5457_v59 = vld [vmem:[%s14651_s4 + $0x1b8] sm:$0xff] }
 0x3d3   : > { %5738 = vmatprep.subr.mxu1 %v5483_v32  ;;  %5643 = vmatprep.subr.mxu0 %v5413_v33  ;;  %v5456_v33 = vld [vmem:[%s14651_s4 + $0x1b0] sm:$0xff] }
 0x3d4   : > { %5739 = vmatpush1.msra.mxu1 %v5482_v27  ;;  %5644 = vmatpush1.msra.mxu0 %v5412_v45  ;;  %v5525_v27 = vld [vmem:[%s14651_s4 + $0x3d8] sm:$0xff]  ;;  %v5455_v45 = vld [vmem:[%s14651_s4 + $0x1a8] sm:$0xff] }
 0x3d5   : > { %5740 = vmatprep.subr.mxu1 %v5481_v49  ;;  %5645 = vmatprep.subr.mxu0 %v5411_v46  ;;  %v5524_v49 = vld [vmem:[%s14651_s4 + $0x3d0] sm:$0xff] }
 0x3d6   : > { %5741 = vmatpush1.msra.mxu1 %v5480_v48  ;;  %5646 = vmatpush1.msra.mxu0 %v5410_v19  ;;  %v5523_v48 = vld [vmem:[%s14651_s4 + $0x3c8] sm:$0xff] }
 0x3d7   : > { %5742 = vmatprep.subr.mxu1 %v5479_v31  ;;  %5647 = vmatprep.subr.mxu0 %v5409_v47  ;;  %v5454_v31 = vld [vmem:[%s14651_s4 + $0x1a0] sm:$0xff] }
 0x3d8   : > { %5743 = vmatpush1.msra.mxu1 %v5478_v20  ;;  %5648 = vmatpush1.msra.mxu0 %v5408_v5  ;;  %v5453_v20 = vld [vmem:[%s14651_s4 + $0x198] sm:$0xff]  ;;  %v5520_v5 = vld [vmem:[%s14651_s4 + $0x3b0] sm:$0xff] }
 0x3d9   : > { %5744 = vmatprep.subr.mxu1 %v5477_v17  ;;  %5649 = vmatprep.subr.mxu0 %v5407_v6  ;;  %v5452_v17 = vld [vmem:[%s14651_s4 + $0x190] sm:$0xff]  ;;  %v5519_v6 = vld [vmem:[%s14651_s4 + $0x3a8] sm:$0xff] }
 0x3da   : > { %v7210_v25 = vpop.f32.mrf.mxu0  ;;  %5745 = vmatpush1.msra.mxu1 %v5476_v60  ;;  %5650 = vmatpush1.msra.mxu0 %v5406_v9  ;;  %v5450_v9 = vld [vmem:[%s14651_s4 + $0x180] sm:$0xff] }
 0x3db   : > { %5746 = vmatprep.subr.mxu1 %v5475_v15  ;;  %5651 = vmatprep.subr.mxu0 %v5405_v52  ;;  %v5517_v52 = vld [vmem:[%s14651_s4 + $0x398] sm:$0xff] }
 0x3dc   : > { %v7211_v39 = vpop.f32.mrf.mxu0  ;;  %5652 = vmatpush1.msra.mxu0 %v5404_v63 }
 0x3dd   : > { %v7212_v30 = vadd.f32 %v7211_v39, %v7210_v25  ;;  %v5474_v25 = vld [vmem:[%s14651_s4 + $0x240] sm:$0xff]  ;;  %5653 = vmatprep.subr.mxu0 %v5403_v3 }
 0x3de   : > { %v7278_v7 = vpop.f32.mrf.mxu1  ;;  %5747 = vmatpush1.msra.mxu1 %v5474_v25  ;;  %v5518_v25 = vld [vmem:[%s14651_s4 + $0x3a0] sm:$0xff] }
 0x3df   : > { %5748 = vmatprep.subr.mxu1 %v5473_v13  ;;  %v5446_v3 = vld [vmem:[%s14651_s4 + $0x160] sm:$0xff] }
 0x3e0   : > { %v7279_v62 = vpop.f32.mrf.mxu1  ;;  %5749 = vmatpush1.msra.mxu1 %v5472_v55  ;;  %v5447_v55 = vld [vmem:[%s14651_s4 + $0x168] sm:$0xff] }
 0x3e1   : > { %v7280_v24 = vadd.f32 %v7279_v62, %v7278_v7  ;;  %5750 = vmatprep.subr.mxu1 %v5471_v28  ;;  %v5402_v7 = vld [vmem:[%s14651_s4] sm:$0xff]  ;;  %v5464_v62 = vld [vmem:[%s14651_s4 + $0x1f0] sm:$0xff] }
 0x3e2   : > { %v7213_v51 = vpop.f32.mrf.mxu0  ;;  %5654 = vmatpush1.msra.mxu0 %v5402_v7  ;;  %5751 = vmatpush1.msra.mxu1 %v5470_v11  ;;  %v5514_v28 = vld [vmem:[%s14651_s4 + $0x380] sm:$0xff]  ;;  %v5445_v11 = vld [vmem:[%s14651_s4 + $0x158] sm:$0xff] }
 0x3e3   : > { %v12753_v12 = vadd.f32 %v7280_v24, %v7212_v30  ;;  %5655 = vmatprep.subr.mxu0 %v5465_v57  ;;  %5752 = vmatprep.subr.mxu1 %v5469_v53  ;;  %v5463_v24 = vld [vmem:[%s14651_s4 + $0x1e8] sm:$0xff]  ;;  %v5444_v57 = vld [vmem:[%s14651_s4 + $0x150] sm:$0xff] }
 0x3e4   : > { %v7214_v0 = vpop.f32.mrf.mxu0  ;;  %5656 = vmatpush2.msra.mxu0 %v5464_v62  ;;  %5753 = vmatpush1.msra.mxu1 %v5468_v1  ;;  %v5512_v53 = vld [vmem:[%s14651_s4 + $0x370] sm:$0xff]  ;;  %v5443_v1 = vld [vmem:[%s14651_s4 + $0x148] sm:$0xff] }
 0x3e5   : > { %v7215_v23 = vadd.f32 %v7214_v0, %v7213_v51  ;;  %v5467_v51 = vld [vmem:[%s14651_s4 + $0x208] sm:$0xff]  ;;  %5657 = vmatprep.subr.mxu0 %v5463_v24  ;;  %v5529_v0 = vld [vmem:[%s14651_s4 + $0x3f8] sm:$0xff] }
 0x3e6   : > { %v7281_v16 = vpop.f32.mrf.mxu1  ;;  %5754 = vmatprep.subr.mxu1 %v5467_v51  ;;  %5658 = vmatpush2.msra.mxu0 %v5462_v61  ;;  %v5510_v61 = vld [vmem:[%s14651_s4 + $0x360] sm:$0xff] }
 0x3e7   : > { %5755 = vmatpush1.msra.mxu1 %v5466_v14  ;;  %5659 = vmatprep.subr.mxu0 %v5461_v22  ;;  %v5441_v14 = vld [vmem:[%s14651_s4 + $0x138] sm:$0xff] }
 0x3e8   : > { %v7282_v56 = vpop.f32.mrf.mxu1  ;;  %5756 = vmatprep.subr.mxu1 %v5529_v0  ;;  %v5509_v22 = vld [vmem:[%s14651_s4 + $0x358] sm:$0xff] }
 0x3e9   : > { %v7283_v35 = vadd.f32 %v7282_v56, %v7281_v16  ;;  %5757 = vmatpush2.msra.mxu1 %v5528_v10  ;;  %v5527_v16 = vld [vmem:[%s14651_s4 + $0x3e8] sm:$0xff] }
 0x3ea   : > { %v7216_v18 = vpop.f32.mrf.mxu0  ;;  %5758 = vmatprep.subr.mxu1 %v5527_v16  ;;  %v5507_v16 = vld [vmem:[%s14651_s4 + $0x348] sm:$0xff] }
 0x3eb   : > { %v12797_v44 = vadd.f32 %v7283_v35, %v7215_v23  ;;  %v5460_v23 = vld [vmem:[%s14651_s4 + $0x1d0] sm:$0xff]  ;;  %5759 = vmatpush2.msra.mxu1 %v5526_v4  ;;  %v5506_v4 = vld [vmem:[%s14651_s4 + $0x340] sm:$0xff] }
 0x3ec   : > { %v7217_v42 = vpop.f32.mrf.mxu0  ;;  %5660 = vmatpush2.msra.mxu0 %v5460_v23  ;;  %5760 = vmatprep.subr.mxu1 %v5525_v27  ;;  %v5508_v23 = vld [vmem:[%s14651_s4 + $0x350] sm:$0xff] }
 0x3ed   : > { %v7218_v40 = vadd.f32 %v7217_v42, %v7216_v18  ;;  %5661 = vmatprep.subr.mxu0 %v5459_v54  ;;  %5761 = vmatpush2.msra.mxu1 %v5524_v49  ;;  %v5522_v42 = vld [vmem:[%s14651_s4 + $0x3c0] sm:$0xff]  ;;  %v5439_v54 = vld [vmem:[%s14651_s4 + $0x128] sm:$0xff] }
 0x3ee   : > { %5662 = vmatpush2.msra.mxu0 %v5458_v43  ;;  %5762 = vmatprep.subr.mxu1 %v5523_v48  ;;  %v5438_v43 = vld [vmem:[%s14651_s4 + $0x120] sm:$0xff] }
 0x3ef   : > { %5663 = vmatprep.subr.mxu0 %v5457_v59  ;;  %5763 = vmatpush2.msra.mxu1 %v5522_v42  ;;  %v5505_v59 = vld [vmem:[%s14651_s4 + $0x338] sm:$0xff]  ;;  %v5434_v48 = vld [vmem:[%s14651_s4 + $0x100] sm:$0xff] }
 0x3f0   : > { %v7284_v38 = vpop.f32.mrf.mxu1  ;;  %5664 = vmatpush2.msra.mxu0 %v5456_v33  ;;  %v5504_v33 = vld [vmem:[%s14651_s4 + $0x330] sm:$0xff]  ;;  %v5501_v42 = vld [vmem:[%s14651_s4 + $0x318] sm:$0xff] }
 0x3f1   : > { %5665 = vmatprep.subr.mxu0 %v5455_v45  ;;  %v5503_v45 = vld [vmem:[%s14651_s4 + $0x328] sm:$0xff] }
 0x3f2   : > { %v7285_v58 = vpop.f32.mrf.mxu1  ;;  %5666 = vmatpush2.msra.mxu0 %v5454_v31 }
 0x3f3   : > { %v7286_v21 = vadd.f32 %v7285_v58, %v7284_v38  ;;  %v7219_v39 = vpop.f32.mrf.mxu0  ;;  %5667 = vmatprep.subr.mxu0 %v5453_v20  ;;  %v5451_v38 = vld [vmem:[%s14651_s4 + $0x188] sm:$0xff]  ;;  %v5449_v58 = vld [vmem:[%s14651_s4 + $0x178] sm:$0xff] }
 0x3f4   : > { %5668 = vmatpush2.msra.mxu0 %v5452_v17  ;;  %v5561_v20 = vld [vmem:[%s14651_s4 + $0x4f8] sm:$0xff]  ;;  %v5499_v17 = vld [vmem:[%s14651_s4 + $0x308] sm:$0xff] }
 0x3f5   : > { %v7220_v30 = vpop.f32.mrf.mxu0  ;;  %v12847_v34 = vadd.f32 %v7286_v21, %v7218_v40  ;;  %v5521_v40 = vld [vmem:[%s14651_s4 + $0x3b8] sm:$0xff]  ;;  %5669 = vmatprep.subr.mxu0 %v5451_v38  ;;  %v5448_v21 = vld [vmem:[%s14651_s4 + $0x170] sm:$0xff]  ;;  %v5498_v38 = vld [vmem:[%s14651_s4 + $0x300] sm:$0xff] }
 0x3f6   : > { %v7221_v41 = vadd.f32 %v7220_v30, %v7219_v39  ;;  %5764 = vmatprep.subr.mxu1 %v5521_v40  ;;  %5670 = vmatpush2.msra.mxu0 %v5450_v9  ;;  %v5516_v39 = vld [vmem:[%s14651_s4 + $0x390] sm:$0xff]  ;;  %v5515_v30 = vld [vmem:[%s14651_s4 + $0x388] sm:$0xff] }
 0x3f7   : > { %v7287_v8 = vpop.f32.mrf.mxu1  ;;  %5765 = vmatpush2.msra.mxu1 %v5520_v5  ;;  %5671 = vmatprep.subr.mxu0 %v5449_v58  ;;  %v5500_v40 = vld [vmem:[%s14651_s4 + $0x310] sm:$0xff] }
 0x3f8   : > { %5766 = vmatprep.subr.mxu1 %v5519_v6  ;;  %5672 = vmatpush2.msra.mxu0 %v5448_v21 }
 0x3f9   : > { %v7288_v36 = vpop.f32.mrf.mxu1  ;;  %5767 = vmatpush2.msra.mxu1 %v5518_v25  ;;  %5673 = vmatprep.subr.mxu0 %v5447_v55 }
 0x3fa   : > { %v7289_v26 = vadd.f32 %v7288_v36, %v7287_v8  ;;  %5768 = vmatprep.subr.mxu1 %v5517_v52  ;;  %5674 = vmatpush2.msra.mxu0 %v5446_v3  ;;  %v5513_v8 = vld [vmem:[%s14651_s4 + $0x378] sm:$0xff]  ;;  %v5511_v36 = vld [vmem:[%s14651_s4 + $0x368] sm:$0xff] }
 0x3fb   : > { %v7222_v37 = vpop.f32.mrf.mxu0  ;;  %5769 = vmatpush2.msra.mxu1 %v5516_v39  ;;  %5675 = vmatprep.subr.mxu0 %v5445_v11 }
 0x3fc   : > { %v12891_v2 = vadd.f32 %v7289_v26, %v7221_v41  ;;  %5770 = vmatprep.subr.mxu1 %v5515_v30  ;;  %5676 = vmatpush2.msra.mxu0 %v5444_v57  ;;  %v5442_v26 = vld [vmem:[%s14651_s4 + $0x140] sm:$0xff] }
 0x3fd   : > { %v7223_v50 = vpop.f32.mrf.mxu0  ;;  %5771 = vmatpush2.msra.mxu1 %v5514_v28  ;;  %5677 = vmatprep.subr.mxu0 %v5443_v1 }
 0x3fe   : > { %v7224_v32 = vadd.f32 %v7223_v50, %v7222_v37  ;;  %5772 = vmatprep.subr.mxu1 %v5513_v8  ;;  %5678 = vmatpush2.msra.mxu0 %v5442_v26  ;;  %v5440_v37 = vld [vmem:[%s14651_s4 + $0x130] sm:$0xff] }
 0x3ff   : > { %v7290_v56 = vpop.f32.mrf.mxu1  ;;  %5773 = vmatpush2.msra.mxu1 %v5512_v53  ;;  %5679 = vmatprep.subr.mxu0 %v5441_v14 }
 0x400   : > { %5774 = vmatprep.subr.mxu1 %v5511_v36  ;;  %5680 = vmatpush2.msra.mxu0 %v5440_v37 }
 0x401   : > { %v7291_v35 = vpop.f32.mrf.mxu1  ;;  %5775 = vmatpush2.msra.mxu1 %v5510_v61  ;;  %5681 = vmatprep.subr.mxu0 %v5439_v54 }
 0x402   : > { %v7292_v18 = vadd.f32 %v7291_v35, %v7290_v56  ;;  %5776 = vmatprep.subr.mxu1 %v5509_v22  ;;  %5682 = vmatpush2.msra.mxu0 %v5438_v43  ;;  %v5437_v56 = vld [vmem:[%s14651_s4 + $0x118] sm:$0xff]  ;;  %v5436_v35 = vld [vmem:[%s14651_s4 + $0x110] sm:$0xff] }
 0x403   : > { %v7225_v46 = vpop.f32.mrf.mxu0  ;;  %5777 = vmatpush2.msra.mxu1 %v5508_v23  ;;  %5683 = vmatprep.subr.mxu0 %v5437_v56 }
 0x404   : > { %v12935_v19 = vadd.f32 %v7292_v18, %v7224_v32  ;;  %5778 = vmatprep.subr.mxu1 %v5507_v16  ;;  %5684 = vmatpush2.msra.mxu0 %v5436_v35  ;;  %v5435_v18 = vld [vmem:[%s14651_s4 + $0x108] sm:$0xff] }
 0x405   : > { %v7226_v47 = vpop.f32.mrf.mxu0  ;;  %5779 = vmatpush2.msra.mxu1 %v5506_v4  ;;  %5685 = vmatprep.subr.mxu0 %v5435_v18  ;;  %v13105_v18 = vld [vmem:[%s14612_s9] ss:$0 sm:$0xff] }
 0x406   : > { %v7227_v60 = vadd.f32 %v7226_v47, %v7225_v46  ;;  %5780 = vmatprep.subr.mxu1 %v5505_v59  ;;  %v5502_v46 = vld [vmem:[%s14651_s4 + $0x320] sm:$0xff]  ;;  %5686 = vmatpush2.msra.mxu0 %v5434_v48 }
 0x407   : > { %v7293_v15 = vpop.f32.mrf.mxu1  ;;  %5781 = vmatpush2.msra.mxu1 %v5504_v33  ;;  %5825 = vmatprep.subr.mxu0 %v5561_v20 }
 0x408   : > { %5782 = vmatprep.subr.mxu1 %v5503_v45 }
 0x409   : > { %v7294_v13 = vpop.f32.mrf.mxu1  ;;  %5783 = vmatpush2.msra.mxu1 %v5502_v46 }
 0x40a   : > { %v7295_v63 = vadd.f32 %v7294_v13, %v7293_v15  ;;  %5784 = vmatprep.subr.mxu1 %v5501_v42 }
 0x40b   : > { %5785 = vmatpush2.msra.mxu1 %v5500_v40 }
 0x40c   : > { %v7228_v41 = vpop.f32.mrf.mxu0  ;;  %v12985_v7 = vadd.f32 %v7295_v63, %v7227_v60  ;;  %5786 = vmatprep.subr.mxu1 %v5499_v17 }
 0x40d   : > { %5787 = vmatpush2.msra.mxu1 %v5498_v38 }
 0x40e   : > { %v7229_v62 = vpop.f32.mrf.mxu0  ;;  %6056 = vmatprep.subr.mxu1 %v12675_v29 }
 0x40f   : > { %v7230_v24 = vadd.f32 %v7229_v62, %v7228_v41  ;;  %v7296_v51 = vpop.f32.mrf.mxu1 }
 0x411   : > { %v7297_v0 = vpop.f32.mrf.mxu1 }
 0x412   : > { %v7298_v10 = vadd.f32 %v7297_v0, %v7296_v51 }
 0x413   : > { %v7231_v50 = vpop.f32.mrf.mxu0 }
 0x414   : > { %v13035_v32 = vadd.f32 %v7298_v10, %v7230_v24 }
 0x415   : > { %v7232_v27 = vpop.f32.mrf.mxu0 }
 0x416   : > { %v7233_v49 = vadd.f32 %v7232_v27, %v7231_v50 }
 0x418   : > { %v7299_v31 = vpop.f32.mrf.mxu1 }
 0x41a   : > { %v7300_v47 = vpop.f32.mrf.mxu1 }
 0x41b   : > { %v7301_v5 = vadd.f32 %v7300_v47, %v7299_v31  ;;  %v7234_v60 = vpop.f32.mrf.mxu0 }
 0x41d   : > { %v7235_v6 = vpop.f32.mrf.mxu0  ;;  %v13076_v15 = vadd.f32 %v7301_v5, %v7233_v49 }
 0x41e   : > { %v7236_v9 = vadd.f32 %v7235_v6, %v7234_v60 }
 0x41f   : > { %v7302_v25 = vpop.f32.mrf.mxu1 }
 0x421   : > { %v7303_v58 = vpop.f32.mrf.mxu1 }
 0x422   : > { %v7304_v52 = vadd.f32 %v7303_v58, %v7302_v25 }
 0x423   : > { %v7237_v13 = vpop.f32.mrf.mxu0 }
 0x424   : > { %v13079_v21 = vadd.f32 %v7304_v52, %v7236_v9 }
 0x425   : > { %v7238_v39 = vpop.f32.mrf.mxu0 }
 0x426   : > { %v7239_v63 = vadd.f32 %v7238_v39, %v7237_v13 }
 0x428   : > { %v7305_v55 = vpop.f32.mrf.mxu1 }
 0x42a   : > { %v7306_v30 = vpop.f32.mrf.mxu1 }
 0x42b   : > { %v7307_v3 = vadd.f32 %v7306_v30, %v7305_v55 }
 0x42c   : > { %v7240_v28 = vpop.f32.mrf.mxu0 }
 0x42d   : > { %v13081_v11 = vadd.f32 %v7307_v3, %v7239_v63 }
 0x42e   : > { %v7241_v41 = vpop.f32.mrf.mxu0 }
 0x42f   : > { %v7242_v8 = vadd.f32 %v7241_v41, %v7240_v28 }
 0x430   : > { %v7243_v57 = vpop.f32.mrf.mxu0  ;;  %v7308_v53 = vpop.f32.mrf.mxu1 }
 0x432   : > { %v7244_v29 = vpop.f32.mrf.mxu0  ;;  %v7309_v62 = vpop.f32.mrf.mxu1 }
 0x433   : > { %v7245_v1 = vadd.f32 %v7244_v29, %v7243_v57  ;;  %v7310_v36 = vadd.f32 %v7309_v62, %v7308_v53 }
 0x434   : > { %v7311_v24 = vpop.f32.mrf.mxu1  ;;  %v8032_v51 = vpop.f32.mrf.mxu0 }
 0x435   : > { %v13083_v26 = vadd.f32 %v7310_v36, %v7242_v8  ;;  %v4722_v35 = vadd.f32 %v8032_v51, %v12797_v44  ;;  %v13115_v44 = vld [vmem:[%s14613_s10] ss:$0 sm:$0xff] }
 0x436   : > { %v7312_v61 = vpop.f32.mrf.mxu1  ;;  %v4716_v14 = vpop.f32.mrf.mxu0 }
 0x437   : > { %v7313_v22 = vadd.f32 %v7312_v61, %v7311_v24  ;;  %v4717_v45 = vadd.f32 %v4716_v14, %v12753_v12  ;;  %v4782_v46 = vmul.f32 %v13105_v18, %v4722_v35 }
 0x438   : > { %v8035_v0 = vpop.f32.mrf.mxu0 }
 0x439   : > { %v13085_v37 = vpop.f32.mrf.mxu1  ;;  %v13087_v23 = vadd.f32 %v7313_v22, %v7245_v1  ;;  %v4732_v31 = vadd.f32 %v8035_v0, %v12891_v2  ;;  %v4781_v20 = vmul.f32 %v13105_v18, %v4717_v45  ;;  %v13123_v12 = vadd.f32 %v13115_v44, %v4782_v46 }
 0x43a   : > { %v4726_v10 = vpop.f32.mrf.mxu0 }
 0x43b   : > { %v13089_v54 = vpop.f32.mrf.mxu1  ;;  %v4784_v17 = vmul.f32 %v13105_v18, %v4732_v31  ;;  %v13127_v2 = vadd.f32 %v13115_v44, %v4781_v20  ;;  %v4824_v38 = vmin.f32 %v13123_v12, 0.0  ;;  %v4727_v63 = vadd.f32 %v4726_v10, %v12847_v34 }
 0x43c   : > { %vm4812_vm5 = vcmp.gt.f32.partialorder %v13123_v12, 0.0 }
 0x43d   : > { %v13133_v6 = vadd.f32 %v13115_v44, %v4784_v17  ;;  %v4823_v58 = vmin.f32 %v13127_v2, 0.0  ;;  %v4837_v13 = vmul.f32 1.442695, %v4824_v38  ;;  %v4783_v29 = vmul.f32 %v13105_v18, %v4727_v63 }
 0x43e   : > { %v8038_v16 = vpop.f32.mrf.mxu0  ;;  %v13091_v50 = vpop.f32.mrf.mxu1  ;;  %vm4811_vm6 = vcmp.gt.f32.partialorder %v13127_v2, 0.0 }
 0x43f   : > { %v4826_v39 = vmin.f32 %v13133_v6, 0.0  ;;  %v4835_v3 = vmul.f32 1.442695, %v4823_v58  ;;  %v4742_v28 = vadd.f32 %v8038_v16, %v12985_v7  ;;  %8452 = vpow2.f32 %v4837_v13 }
 0x440   : > { %v13093_v43 = vpop.f32.mrf.mxu1  ;;  %v4736_v4 = vpop.f32.mrf.mxu0  ;;  %v13162_v61 = vadd.f32 %v13115_v44, %v4783_v29  ;;  %v7376_v29 = vadd.f32 %v13089_v54, %v13085_v37  ;;  %vm4814_vm1 = vcmp.gt.f32.partialorder %v13133_v6, 0.0 }
 0x441   : > { %v4737_v41 = vadd.f32 %v4736_v4, %v12935_v19  ;;  %v4841_v53 = vmul.f32 1.442695, %v4826_v39  ;;  %8454 = vpow2.f32 %v4835_v3  ;;  %v4786_v34 = vmul.f32 %v13105_v18, %v4742_v28 }
 0x442   : > { %v4825_v35 = vmin.f32 %v13162_v61, 0.0  ;;  %v7379_v37 = vadd.f32 %v13093_v43, %v13091_v50  ;;  %vm4813_vm7 = vcmp.gt.f32.partialorder %v13162_v61, 0.0 }
 0x443   : > { %v13095_v56 = vpop.f32.mrf.mxu1  ;;  %v8041_v59 = vpop.f32.mrf.mxu0  ;;  %v4785_v24 = vmul.f32 %v13105_v18, %v4737_v41  ;;  %8456 = vpow2.f32 %v4841_v53  ;;  %v13166_v22 = vadd.f32 %v13115_v44, %v4786_v34 }
 0x444   : > { %v4752_v62 = vadd.f32 %v8041_v59, %v13076_v15  ;;  %v4839_v13 = vmul.f32 1.442695, %v4825_v35 }
 0x445   : > { %v13097_v27 = vpop.f32.mrf.mxu1  ;;  %v4746_v33 = vpop.f32.mrf.mxu0  ;;  %v13171_v10 = vadd.f32 %v13115_v44, %v4785_v24  ;;  %v4828_v46 = vmin.f32 %v13166_v22, 0.0  ;;  %vm4816_vm8 = vcmp.gt.f32.partialorder %v13166_v22, 0.0 }
 0x446   : > { %v4747_v7 = vadd.f32 %v4746_v33, %v13035_v32  ;;  %v4788_v14 = vmul.f32 %v13105_v18, %v4752_v62  ;;  %8458 = vpow2.f32 %v4839_v13 }
 0x447   : > { %v4827_v20 = vmin.f32 %v13171_v10, 0.0  ;;  %v4845_v28 = vmul.f32 1.442695, %v4828_v46  ;;  %v7382_v46 = vadd.f32 %v13097_v27, %v13095_v56  ;;  %vm4815_vm11 = vcmp.gt.f32.partialorder %v13171_v10, 0.0 }
 0x448   : > { %v8044_v42 = vpop.f32.mrf.mxu0  ;;  %v4787_v32 = vmul.f32 %v13105_v18, %v4747_v7  ;;  %v13179_v33 = vadd.f32 %v13115_v44, %v4788_v14 }
 0x449   : > { %v13100_v49 = vpop.f32.mrf.mxu1  ;;  %v4762_v4 = vadd.f32 %v8044_v42, %v13081_v11  ;;  %v4843_v62 = vmul.f32 1.442695, %v4827_v20  ;;  %8460 = vpow2.f32 %v4845_v28 }
 0x44a   : > { %v4756_v5 = vpop.f32.mrf.mxu0  ;;  %14652 = vst [vmem:[#allocation10_spill] sm:$0xff] %v13179_v33  ;;  %v13186_v17 = vadd.f32 %v13115_v44, %v4787_v32  ;;  %v4830_v39 = vmin.f32 %v13179_v33, 0.0 }
 0x44b   : > { %v13108_v48 = vpop.f32.mrf.mxu1  ;;  %v4790_v11 = vmul.f32 %v13105_v18, %v4762_v4  ;;  %v4757_v42 = vadd.f32 %v4756_v5, %v13079_v21  ;;  %8462 = vpow2.f32 %v4843_v62 }
 0x44c   : > { %14653 = vst [vmem:[#allocation12_spill] sm:$0xff] %v13186_v17  ;;  %v8453_v3 = vpop.eup %8452  ;;  %v4829_v34 = vmin.f32 %v13186_v17, 0.0  ;;  %v4849_v54 = vmul.f32 1.442695, %v4830_v39  ;;  %v7385_v43 = vadd.f32 %v13108_v48, %v13100_v49 }
 0x44d   : > { %v13202_v24 = vadd.f32 %v13115_v44, %v4790_v11  ;;  %v4789_v7 = vmul.f32 %v13105_v18, %v4757_v42 }
 0x44e   : > { %v13118_v40 = vpop.f32.mrf.mxu1  ;;  %v13135_v9 = vpop.f32.mrf.mxu0  ;;  %v4847_v11 = vmul.f32 1.442695, %v4829_v34  ;;  %8464 = vpow2.f32 %v4849_v54 }
 0x44f   : > { %v8455_v53 = vpop.eup %8454  ;;  %v4832_v33 = vmin.f32 %v13202_v24, 0.0  ;;  %v13215_v50 = vadd.f32 %v13115_v44, %v4789_v7 }
 0x450   : > { %v13120_v47 = vpop.f32.mrf.mxu1  ;;  %v13144_v55 = vpop.f32.mrf.mxu0  ;;  %v6939_v35 = vadd.f32 -1.0, %v8455_v53  ;;  %8466 = vpow2.f32 %v4847_v11 }
 0x451   : > { %v4767_v49 = vadd.f32 %v13144_v55, %v13083_v26  ;;  %v4853_v62 = vmul.f32 1.442695, %v4832_v33 }
 0x453   : > { %v13129_v60 = vpop.f32.mrf.mxu1  ;;  %v4791_v33 = vmul.f32 %v13105_v18, %v4767_v49  ;;  %8468 = vpow2.f32 %v4853_v62 }
 0x455   : > { %v13137_v25 = vpop.f32.mrf.mxu1 }
 0x457   : > { %v13140_v52 = vpop.f32.mrf.mxu1 }
 0x459   : > { %v13146_v30 = vpop.f32.mrf.mxu1 }
 0x45b   : > { %v7442_v8 = vpop.f32.mrf.mxu0 }
 0x45c   : > { %v13150_v57 = vpop.f32.mrf.mxu1 }
 0x45d   : > { %v7443_v1 = vpop.f32.mrf.mxu0 }
 0x45e   : > { %v13155_v36 = vpop.f32.mrf.mxu1  ;;  %v7444_v32 = vadd.f32 %v7443_v1, %v7442_v8  ;;  %v4772_v8 = vadd.f32 %v13135_v9, %v13087_v23 }
 0x45f   : > { %v7445_v19 = vpop.f32.mrf.mxu0 }
 0x460   : > { %v13159_v51 = vpop.f32.mrf.mxu1  ;;  %v13236_v34 = vmul.f32 %v13105_v18, %v4772_v8 }
 0x461   : > { %v7446_v15 = vpop.f32.mrf.mxu0 }
 0x462   : > { %v13168_v0 = vpop.f32.mrf.mxu1  ;;  %v7447_v21 = vadd.f32 %v7446_v15, %v7445_v19  ;;  %v8457_v19 = vpop.eup %8456  ;;  %v6940_v15 = vadd.f32 -1.0, %v8453_v3  ;;  %v5099_v3 = vadd.f32 %v7444_v32, %v7376_v29 }
 0x463   : > { %v7448_v16 = vpop.f32.mrf.mxu0  ;;  %v6942_v56 = vadd.f32 -1.0, %v8457_v19  ;;  %v7388_v19 = vadd.f32 %v13120_v47, %v13118_v40 }
 0x464   : > { %v13175_v59 = vpop.f32.mrf.mxu1  ;;  %v5104_v13 = vadd.f32 %v7447_v21, %v7379_v37  ;;  %v7391_v37 = vadd.f32 %v13137_v25, %v13129_v60 }
 0x465   : > { %v7449_v45 = vpop.f32.mrf.mxu0  ;;  %v13241_v26 = vsel %vm4814_vm1, %v13133_v6, %v6942_v56  ;;  %vm4820_vm1 = vcmp.gt.f32.partialorder %v13202_v24, 0.0 }
 0x466   : > { %v13182_v31 = vpop.f32.mrf.mxu1  ;;  %v7450_v23 = vadd.f32 %v7449_v45, %v7448_v16 }
 0x467   : > { %v7451_v38 = vpop.f32.mrf.mxu0 }
 0x468   : > { %v13190_v58 = vpop.f32.mrf.mxu1 }
 0x469   : > { %v7452_v63 = vpop.f32.mrf.mxu0 }
 0x46a   : > { %v13194_v41 = vpop.f32.mrf.mxu1  ;;  %v7453_v42 = vadd.f32 %v7452_v63, %v7451_v38  ;;  %v13224_v38 = vsel %vm4812_vm5, %v13123_v12, %v6940_v15  ;;  %v13229_v63 = vsel %vm4811_vm6, %v13127_v2, %v6939_v35  ;;  %v4831_v12 = vmin.f32 %v13215_v50, 0.0 }
 0x46b   : > { %v7454_v5 = vpop.f32.mrf.mxu0  ;;  %vm4819_vm5 = vcmp.gt.f32.partialorder %v13215_v50, 0.0 }
 0x46c   : > { %v13205_v14 = vpop.f32.mrf.mxu1  ;;  %v5114_v29 = vadd.f32 %v7453_v42, %v7385_v43  ;;  %v7397_v42 = vadd.f32 %v13155_v36, %v13150_v57  ;;  %v8459_v43 = vpop.eup %8458  ;;  %v7394_v57 = vadd.f32 %v13146_v30, %v13140_v52 }
 0x46d   : > { %v7455_v4 = vpop.f32.mrf.mxu0 }
 0x46e   : > { %v13211_v20 = vpop.f32.mrf.mxu1  ;;  %v7456_v54 = vadd.f32 %v7455_v4, %v7454_v5 }
 0x46f   : > { %v7457_v17 = vpop.f32.mrf.mxu0 }
 0x470   : > { %v8082_v1 = vpop.f32.mrf.mxu1 }
 0x471   : > { %v5229_v27 = vadd.f32 %v8082_v1, %v5104_v13  ;;  %v7458_v39 = vpop.f32.mrf.mxu0 }
 0x472   : > { %v5223_v48 = vpop.f32.mrf.mxu1  ;;  %v7459_v21 = vadd.f32 %v7458_v39, %v7457_v17  ;;  %v5109_v17 = vadd.f32 %v7450_v23, %v7382_v46 }
 0x473   : > { %v5283_v9 = vmul.f32 %v13105_v18, %v5229_v27  ;;  %v5224_v28 = vadd.f32 %v5223_v48, %v5099_v3  ;;  %v7460_v53 = vpop.f32.mrf.mxu0  ;;  %v5119_v27 = vadd.f32 %v7456_v54, %v7388_v19  ;;  %v13264_v3 = vpop.eup %8460 }
 0x474   : > { %v8085_v2 = vpop.f32.mrf.mxu1  ;;  %v5124_v60 = vadd.f32 %v7459_v21, %v7391_v37  ;;  %v13270_v48 = vpop.eup %8462  ;;  %v6941_v21 = vadd.f32 -1.0, %v8459_v43  ;;  %v13300_v43 = vadd.f32 %v13115_v44, %v13236_v34  ;;  %v7403_v34 = vadd.f32 %v13182_v31, %v13175_v59 }
 0x475   : > { %v13244_v55 = vadd.f32 %v13115_v44, %v5283_v9  ;;  %v5282_v16 = vmul.f32 %v13105_v18, %v5224_v28  ;;  %v5239_v45 = vadd.f32 %v8085_v2, %v5114_v29  ;;  %v7461_v7 = vpop.f32.mrf.mxu0  ;;  %v13276_v30 = vpop.eup %8464 }
 0x476   : > { %v5233_v32 = vpop.f32.mrf.mxu1  ;;  %v7462_v47 = vadd.f32 %v7461_v7, %v7460_v53  ;;  %v4834_v31 = vmin.f32 %v13300_v43, 0.0 }
 0x477   : > { %v5319_v6 = vmin.f32 %v13244_v55, 0.0  ;;  %v13254_v15 = vadd.f32 %v13115_v44, %v5282_v16  ;;  %v5285_v35 = vmul.f32 %v13105_v18, %v5239_v45  ;;  %v7463_v11 = vpop.f32.mrf.mxu0  ;;  %v5234_v13 = vadd.f32 %v5233_v32, %v5109_v17 }
 0x478   : > { %v8088_v25 = vpop.f32.mrf.mxu1  ;;  %v5129_v52 = vadd.f32 %v7462_v47, %v7394_v57  ;;  %v7400_v45 = vadd.f32 %v13168_v0, %v13159_v51  ;;  %vm5307_vm9 = vcmp.gt.f32.partialorder %v13244_v55, 0.0 }
 0x479   : > { %v5332_v5 = vmul.f32 1.442695, %v5319_v6  ;;  %v5318_v4 = vmin.f32 %v13254_v15, 0.0  ;;  %v13261_v40 = vadd.f32 %v13115_v44, %v5285_v35  ;;  %v7464_v46 = vpop.f32.mrf.mxu0  ;;  %v5284_v8 = vmul.f32 %v13105_v18, %v5234_v13 }
 0x47a   : > { %v5249_v1 = vadd.f32 %v8088_v25, %v5124_v60  ;;  %v7465_v56 = vadd.f32 %v7464_v46, %v7463_v11  ;;  %v5243_v39 = vpop.f32.mrf.mxu1  ;;  %v13285_v11 = vpop.eup %8466  ;;  %v13294_v25 = vadd.f32 %v13115_v44, %v4791_v33  ;;  %vm5306_vm10 = vcmp.gt.f32.partialorder %v13254_v15, 0.0 }
 0x47b   : > { %8470 = vpow2.f32 %v5332_v5  ;;  %v5330_v36 = vmul.f32 1.442695, %v5318_v4  ;;  %v5321_v49 = vmin.f32 %v13261_v40, 0.0  ;;  %v7466_v23 = vpop.f32.mrf.mxu0  ;;  %v13273_v9 = vadd.f32 %v13115_v44, %v5284_v8 }
 0x47c   : > { %v5287_v28 = vmul.f32 %v13105_v18, %v5249_v1  ;;  %v5244_v53 = vadd.f32 %v5243_v39, %v5119_v27  ;;  %v5134_v29 = vadd.f32 %v7465_v56, %v7397_v42  ;;  %v8091_v62 = vpop.f32.mrf.mxu1  ;;  %v4851_v42 = vmul.f32 1.442695, %v4831_v12 }
 0x47d   : > { %8472 = vpow2.f32 %v5330_v36  ;;  %v5336_v2 = vmul.f32 1.442695, %v5321_v49  ;;  %v7467_v16 = vpop.f32.mrf.mxu0  ;;  %v5320_v7 = vmin.f32 %v13273_v9, 0.0  ;;  %v13312_v36 = vsel %vm4813_vm7, %v13162_v61, %v6941_v21 }
 0x47e   : > { %v13282_v37 = vadd.f32 %v13115_v44, %v5287_v28  ;;  %v5286_v54 = vmul.f32 %v13105_v18, %v5244_v53  ;;  %v5253_v17 = vpop.f32.mrf.mxu1  ;;  %v5259_v32 = vadd.f32 %v8091_v62, %v5134_v29  ;;  %v7468_v19 = vadd.f32 %v7467_v16, %v7466_v23  ;;  %v13316_v23 = vpop.eup %8468 }
 0x47f   : > { %8474 = vpow2.f32 %v5336_v2  ;;  %v5254_v6 = vadd.f32 %v5253_v17, %v5129_v52  ;;  %v7469_v35 = vpop.f32.mrf.mxu0  ;;  %v5334_v13 = vmul.f32 1.442695, %v5320_v7  ;;  %v4833_v28 = vmin.f32 %v13294_v25, 0.0 }
 0x480   : > { %v5323_v51 = vmin.f32 %v13282_v37, 0.0  ;;  %v13291_v0 = vadd.f32 %v13115_v44, %v5286_v54  ;;  %v8094_v60 = vpop.f32.mrf.mxu1  ;;  %v5289_v5 = vmul.f32 %v13105_v18, %v5259_v32  ;;  %v5139_v46 = vadd.f32 %v7468_v19, %v7400_v45 }
 0x481   : > { %v5288_v4 = vmul.f32 %v13105_v18, %v5254_v6  ;;  %v7470_v47 = vpop.f32.mrf.mxu0  ;;  %8476 = vpow2.f32 %v5334_v13  ;;  %v7406_v53 = vadd.f32 %v13194_v41, %v13190_v58  ;;  %v6944_v58 = vadd.f32 -1.0, %v13264_v3 }
 0x482   : > { %v5340_v12 = vmul.f32 1.442695, %v5323_v51  ;;  %v5322_v8 = vmin.f32 %v13291_v0, 0.0  ;;  %v5263_v1 = vpop.f32.mrf.mxu1  ;;  %v13304_v56 = vadd.f32 %v13115_v44, %v5289_v5  ;;  %v7471_v27 = vadd.f32 %v7470_v47, %v7469_v35 }
 0x483   : > { %v13307_v33 = vadd.f32 %v13115_v44, %v5288_v4  ;;  %v5264_v39 = vadd.f32 %v5263_v1, %v5139_v46  ;;  %v7472_v57 = vpop.f32.mrf.mxu0  ;;  %v4855_v19 = vmul.f32 1.442695, %v4833_v28  ;;  %v7409_v6 = vadd.f32 %v13211_v20, %v13205_v14 }
 0x484   : > { %8478 = vpow2.f32 %v5340_v12  ;;  %v5338_v49 = vmul.f32 1.442695, %v5322_v8  ;;  %v5325_v29 = vmin.f32 %v13304_v56, 0.0  ;;  %v5144_v61 = vadd.f32 %v7471_v27, %v7403_v34  ;;  %v8097_v16 = vpop.f32.mrf.mxu1 }
 0x485   : > { %v5324_v62 = vmin.f32 %v13307_v33, 0.0  ;;  %v7473_v2 = vpop.f32.mrf.mxu0  ;;  %v5290_v21 = vmul.f32 %v13105_v18, %v5264_v39  ;;  %vm5309_vm12 = vcmp.gt.f32.partialorder %v13261_v40, 0.0  ;;  %vm5308_vm13 = vcmp.gt.f32.partialorder %v13273_v9, 0.0 }
 0x486   : > { %8480 = vpow2.f32 %v5338_v49  ;;  %v7474_v59 = vadd.f32 %v7473_v2, %v7472_v57  ;;  %v5344_v52 = vmul.f32 1.442695, %v5325_v29  ;;  %v5269_v41 = vadd.f32 %v8094_v60, %v5144_v61  ;;  %v5273_v60 = vpop.f32.mrf.mxu1 }
 0x487   : > { %8482 = vpow2.f32 %v4851_v42  ;;  %v5342_v45 = vmul.f32 1.442695, %v5324_v62  ;;  %v7475_v7 = vpop.f32.mrf.mxu0  ;;  %v13327_v17 = vadd.f32 %v13115_v44, %v5290_v21  ;;  %v4857_v49 = vmul.f32 1.442695, %v4834_v31 }
 0x488   : > { %v8471_v54 = vpop.eup %8470  ;;  %v5149_v32 = vadd.f32 %v7474_v59, %v7406_v53  ;;  %8484 = vpow2.f32 %v5344_v52  ;;  %v5291_v3 = vmul.f32 %v13105_v18, %v5269_v41  ;;  %v6943_v29 = vadd.f32 -1.0, %v13270_v48 }
 0x489   : > { %v6952_v35 = vadd.f32 -1.0, %v8471_v54  ;;  %v7476_v42 = vpop.f32.mrf.mxu0  ;;  %8486 = vpow2.f32 %v5342_v45  ;;  %v5326_v51 = vmin.f32 %v13327_v17, 0.0  ;;  %vm5311_vm14 = vcmp.gt.f32.partialorder %v13282_v37, 0.0 }
 0x48a   : > { %v8473_v13 = vpop.eup %8472  ;;  %v5274_v47 = vadd.f32 %v5273_v60, %v5149_v32  ;;  %v7477_v46 = vadd.f32 %v7476_v42, %v7475_v7  ;;  %v13339_v20 = vadd.f32 %v13115_v44, %v5291_v3  ;;  %vm5310_vm15 = vcmp.gt.f32.partialorder %v13291_v0, 0.0 }
 0x48b   : > { %v5367_v5 = vsel %vm5307_vm9, %v13244_v55, %v6952_v35  ;;  %v6951_v4 = vadd.f32 -1.0, %v8473_v13  ;;  %v5346_v8 = vmul.f32 1.442695, %v5326_v51  ;;  %v6945_v41 = vadd.f32 -1.0, %v13285_v11  ;;  %v14654_v11 = vld [vmem:[#allocation10_spill] sm:$0xff] }
 0x48c   : > { %v8475_v12 = vpop.eup %8474  ;;  %v5379_v14 = vmax.f32 %v13224_v38, %v5367_v5  ;;  %v5292_v39 = vmul.f32 %v13105_v18, %v5274_v47  ;;  %v5154_v55 = vadd.f32 %v7477_v46, %v7409_v6  ;;  %v5327_v38 = vmin.f32 %v13339_v20, 0.0  ;;  %v13396_v5 = vld [vmem:[%s14651_s4 + $0x4e0] sm:$0xff] }
 0x48d   : > { %v5366_v1 = vsel %vm5306_vm10, %v13254_v15, %v6951_v4  ;;  %v6954_v27 = vadd.f32 -1.0, %v8475_v12  ;;  %8488 = vpow2.f32 %v5346_v8  ;;  %vm4818_vm0 = vcmp.gt.f32.partialorder %v14654_v11, 0.0 }
 0x48e   : > { %5391 = vst [vmem:[#allocation4 + $0x8] sm:$0xff] %v5379_v14  ;;  %v5378_v57 = vmax.f32 %v13229_v63, %v5366_v1  ;;  %v8477_v34 = vpop.eup %8476  ;;  %v13349_v53 = vadd.f32 %v13115_v44, %v5292_v39  ;;  %v5279_v15 = vadd.f32 %v8097_v16, %v5154_v55  ;;  %v5348_v63 = vmul.f32 1.442695, %v5327_v38  ;;  %v13410_v1 = vld [vmem:[%s14651_s4 + $0x4d0] sm:$0xff]  ;;  %v13420_v55 = vld [vmem:[%s14651_s4 + $0x4c8] sm:$0xff] }
 0x48f   : > { %v5369_v28 = vsel %vm5309_vm12, %v13261_v40, %v6954_v27  ;;  %v6953_v2 = vadd.f32 -1.0, %v8477_v34  ;;  %8490 = vpow2.f32 %v4855_v19  ;;  %v4876_v40 = vsel %vm4816_vm8, %v13166_v22, %v6944_v58 }
 0x490   : > { %5390 = vst [vmem:[#allocation4] sm:$0xff] %v5378_v57  ;;  %v5381_v62 = vmax.f32 %v13241_v26, %v5369_v28  ;;  %v5328_v21 = vmin.f32 %v13349_v53, 0.0  ;;  %v5293_v59 = vmul.f32 %v13105_v18, %v5279_v15  ;;  %8492 = vpow2.f32 %v5348_v63 }
 0x491   : > { %v8479_v61 = vpop.eup %8478  ;;  %v5368_v48 = vsel %vm5308_vm13, %v13273_v9, %v6953_v2  ;;  %v6946_v18 = vadd.f32 -1.0, %v13276_v30  ;;  %8494 = vpow2.f32 %v4857_v49  ;;  %vm5313_vm3 = vcmp.gt.f32.partialorder %v13304_v56, 0.0 }
 0x492   : > { %5393 = vst [vmem:[#allocation4 + $0x18] sm:$0xff] %v5381_v62  ;;  %v6956_v16 = vadd.f32 -1.0, %v8479_v61  ;;  %v5380_v31 = vmax.f32 %v13312_v36, %v5368_v48  ;;  %v5350_v52 = vmul.f32 1.442695, %v5328_v21  ;;  %v13363_v45 = vadd.f32 %v13115_v44, %v5293_v59  ;;  %v13450_v61 = vld [vmem:[%s14651_s4 + $0x4b8] sm:$0xff] }
 0x493   : > { %v8481_v26 = vpop.eup %8480  ;;  %v4875_v44 = vsel %vm4815_vm11, %v13171_v10, %v6943_v29  ;;  %v13384_v10 = vld [vmem:[%s14651_s4 + $0x4e8] sm:$0xff]  ;;  %v4878_v51 = vsel %vm4818_vm0, %v14654_v11, %v6946_v18  ;;  %vm5312_vm4 = vcmp.gt.f32.partialorder %v13307_v33, 0.0  ;;  %vm5314_vm6 = vcmp.gt.f32.partialorder %v13327_v17, 0.0  ;;  %v13435_v29 = vld [vmem:[%s14651_s4 + $0x4c0] sm:$0xff]  ;;  %v13469_v18 = vld [vmem:[%s14651_s4 + $0x4b0] sm:$0xff] }
 0x494   : > { %v8483_v7 = vpop.eup %8482  ;;  %v5371_v22 = vsel %vm5311_vm14, %v13282_v37, %v6956_v16  ;;  %v6955_v54 = vadd.f32 -1.0, %v8481_v26  ;;  %5392 = vst [vmem:[#allocation4 + $0x10] sm:$0xff] %v5380_v31  ;;  %8496 = vpow2.f32 %v5350_v52  ;;  %v5329_v36 = vmin.f32 %v13363_v45, 0.0  ;;  %v13377_v37 = vld [vmem:[%s14651_s4 + $0x4f0] sm:$0xff]  ;;  %v8753_v52 = vld [vmem:[%s14651_s4 + $0xe0] sm:$0xff] }
 0x495   : > { %v5383_v9 = vmax.f32 %v4876_v40, %v5371_v22  ;;  %v8485_v58 = vpop.eup %8484  ;;  %v6947_v47 = vadd.f32 -1.0, %v8483_v7  ;;  %v6948_v49 = vadd.f32 -1.0, %v13316_v23  ;;  %vm5315_vm7 = vcmp.gt.f32.partialorder %v13339_v20, 0.0  ;;  %v8752_v40 = vld [vmem:[%s14651_s4 + $0xe8] sm:$0xff] }
 0x496   : > { %v5370_v30 = vsel %vm5310_vm15, %v13291_v0, %v6955_v54  ;;  %v8487_v32 = vpop.eup %8486  ;;  %v6958_v6 = vadd.f32 -1.0, %v8485_v58  ;;  %v5352_v35 = vmul.f32 1.442695, %v5329_v36  ;;  %v14655_v0 = vld [vmem:[#allocation12_spill] sm:$0xff]  ;;  %vm4821_vm8 = vcmp.gt.f32.partialorder %v13294_v25, 0.0 }
 0x497   : > { %5395 = vst [vmem:[#allocation4 + $0x28] sm:$0xff] %v5383_v9  ;;  %v5382_v19 = vmax.f32 %v4875_v44, %v5370_v30  ;;  %v13379_v42 = vld [vmem:[#allocation4 + $0x1] ss:$2 sm:$0xff]  ;;  %vm4817_vm2 = vcmp.gt.f32.partialorder %v14655_v0, 0.0  ;;  %v6957_v13 = vadd.f32 -1.0, %v8487_v32  ;;  %v4879_v28 = vsel %vm4819_vm5, %v13215_v50, %v6947_v47  ;;  %v13486_v9 = vld [vmem:[%s14651_s4 + $0x4a0] sm:$0xff] }
 0x498   : > { %5687 = vmatprep.mubr.f32.mxu0 %v13379_v42  ;;  %v5564_v3 = vld [vmem:[#allocation4] ss:$2 sm:$0xff]  ;;  %v5373_v60 = vsel %vm5313_vm3, %v13304_v56, %v6958_v6  ;;  %8498 = vpow2.f32 %v5352_v35  ;;  %v4877_v4 = vsel %vm4817_vm2, %v14655_v0, %v6945_v41  ;;  %v4880_v26 = vsel %vm4820_vm1, %v13202_v24, %v6948_v49  ;;  %v13476_v24 = vld [vmem:[%s14651_s4 + $0x4a8] sm:$0xff]  ;;  %v8757_v0 = vld [vmem:[%s14651_s4 + $0xc0] sm:$0xff] }
 0x499   : > { %5394 = vst [vmem:[#allocation4 + $0x20] sm:$0xff] %v5382_v19  ;;  %5688 = vmatmul.mubr.f32.vlgmr.msra.gmra.mxu0 %v5564_v3  ;;  %v5385_v46 = vmax.f32 %v4878_v51, %v5373_v60  ;;  %v5372_v12 = vsel %vm5312_vm4, %v13307_v33, %v6957_v13  ;;  %v13405_v56 = vld [vmem:[%s14651_s4 + $0x4d8] sm:$0xff]  ;;  %v8751_v50 = vld [vmem:[%s14651_s4 + $0xf0] sm:$0xff]  ;;  %vm5316_vm9 = vcmp.gt.f32.partialorder %v13349_v53, 0.0  ;;  %v8756_v35 = vld [vmem:[%s14651_s4 + $0xc8] sm:$0xff]  ;;  %vm4822_vm10 = vcmp.gt.f32.partialorder %v13300_v43, 0.0 }
 0x49a   : > { %5826 = vmatpush1.msra.mxu0 %v13377_v37  ;;  %v8489_v14 = vpop.eup %8488  ;;  %v5384_v8 = vmax.f32 %v4877_v4, %v5372_v12  ;;  %v8755_v19 = vld [vmem:[%s14651_s4 + $0xd0] sm:$0xff]  ;;  %vm5317_vm11 = vcmp.gt.f32.partialorder %v13363_v45, 0.0  ;;  %v13529_v4 = vld [vmem:[%s14651_s4 + $0x488] sm:$0xff] }
 0x49b   : > { %5827 = vmatprep.subr.mxu0 %v13384_v10  ;;  %5397 = vst [vmem:[#allocation4 + $0x38] sm:$0xff] %v5385_v46  ;;  %v6959_v27 = vadd.f32 -1.0, %v8489_v14  ;;  %v13413_v33 = vld [vmem:[#allocation4 + $0x11] ss:$2 sm:$0xff]  ;;  %v5566_v57 = vld [vmem:[#allocation4 + $0x10] ss:$2 sm:$0xff] }
 0x49c   : > { %5828 = vmatpush1.msra.mxu0 %v13396_v5  ;;  %v13415_v39 = vld [vmem:[#allocation4 + $0x3] ss:$2 sm:$0xff]  ;;  %5396 = vst [vmem:[#allocation4 + $0x30] sm:$0xff] %v5384_v8  ;;  %5693 = vmatprep.mubr.f32.mxu0 %v13413_v33  ;;  %v13426_v38 = vld [vmem:[#allocation4 + $0x2] ss:$2 sm:$0xff]  ;;  %v8491_v34 = vpop.eup %8490  ;;  %v8760_v8 = vld [vmem:[%s14651_s4 + $0xa8] sm:$0xff] }
 0x49d   : > { %5788 = vmatprep.mubr.f32.mxu1 %v13415_v39  ;;  %v5374_v15 = vsel %vm5314_vm6, %v13327_v17, %v6959_v27  ;;  %5829 = vmatprep.subr.mxu0 %v13405_v56  ;;  %v8493_v62 = vpop.eup %8492  ;;  %v6949_v59 = vadd.f32 -1.0, %v8491_v34  ;;  %v13520_v3 = vld [vmem:[%s14651_s4 + $0x490] sm:$0xff]  ;;  %v8758_v46 = vld [vmem:[%s14651_s4 + $0xb8] sm:$0xff]  ;;  %v8761_v34 = vld [vmem:[%s14651_s4 + $0xa0] sm:$0xff] }
 0x49e   : > { %5694 = vmatmul.mubr.f32.gmra.mxu0 %v5566_v57  ;;  %v5386_v2 = vmax.f32 %v4879_v28, %v5374_v15  ;;  %5789 = vmatmul.mubr.f32.vlgmr.msra.gmra.mxu1 %v13426_v38  ;;  %v6960_v63 = vadd.f32 -1.0, %v8493_v62  ;;  %v8495_v21 = vpop.eup %8494  ;;  %v8759_v12 = vld [vmem:[%s14651_s4 + $0xb0] sm:$0xff]  ;;  %v13550_v14 = vld [vmem:[%s14651_s4 + $0x478] sm:$0xff]  ;;  %v13570_v49 = vld [vmem:[%s14651_s4 + $0x468] sm:$0xff] }
 0x49f   : > { %5830 = vmatpush1.msra.mxu0 %v13410_v1  ;;  %6057 = vmatpush1.msra.mxu1 %v8751_v50  ;;  %v6950_v36 = vadd.f32 -1.0, %v8495_v21  ;;  %v4881_v58 = vsel %vm4821_vm8, %v13294_v25, %v6949_v59  ;;  %v13503_v25 = vld [vmem:[%s14651_s4 + $0x498] sm:$0xff]  ;;  %v13561_v57 = vld [vmem:[%s14651_s4 + $0x470] sm:$0xff]  ;;  %v13583_v62 = vld [vmem:[%s14651_s4 + $0x460] sm:$0xff] }
 0x4a0   : > { %5831 = vmatprep.subr.mxu0 %v13420_v55  ;;  %v13443_v23 = vld [vmem:[#allocation4 + $0x21] ss:$2 sm:$0xff]  ;;  %5398 = vst [vmem:[#allocation4 + $0x40] sm:$0xff] %v5386_v2  ;;  %6058 = vmatprep.subr.mxu1 %v8752_v40  ;;  %v5568_v48 = vld [vmem:[#allocation4 + $0x20] ss:$2 sm:$0xff]  ;;  %v5375_v31 = vsel %vm5315_vm7, %v13339_v20, %v6960_v63  ;;  %v8764_v21 = vld [vmem:[%s14651_s4 + $0x88] sm:$0xff] }
 0x4a1   : > { %v13445_v17 = vld [vmem:[#allocation4 + $0x13] ss:$2 sm:$0xff]  ;;  %5832 = vmatpush1.msra.mxu0 %v13435_v29  ;;  %v8497_v16 = vpop.eup %8496  ;;  %6059 = vmatpush1.msra.mxu1 %v8753_v52  ;;  %v13464_v7 = vld [vmem:[#allocation4 + $0x12] ss:$2 sm:$0xff]  ;;  %v5387_v22 = vmax.f32 %v4880_v26, %v5375_v31  ;;  %v8754_v20 = vld [vmem:[%s14651_s4 + $0xd8] sm:$0xff]  ;;  %v4882_v51 = vsel %vm4822_vm10, %v13300_v43, %v6950_v36 }
 0x4a2   : > { %5699 = vmatprep.mubr.f32.mxu0 %v13443_v23  ;;  %v6961_v54 = vadd.f32 -1.0, %v8497_v16  ;;  %5794 = vmatprep.mubr.f32.mxu1 %v13445_v17  ;;  %v13537_v43 = vld [vmem:[%s14651_s4 + $0x480] sm:$0xff]  ;;  %v8762_v28 = vld [vmem:[%s14651_s4 + $0x98] sm:$0xff]  ;;  %v8763_v2 = vld [vmem:[%s14651_s4 + $0x90] sm:$0xff] }
 0x4a3   : > { %5833 = vmatprep.subr.mxu0 %v13450_v61  ;;  %6060 = vmatprep.subr.mxu1 %v8754_v20  ;;  %5399 = vst [vmem:[#allocation4 + $0x48] sm:$0xff] %v5387_v22  ;;  %v13492_v41 = vld [vmem:[#allocation4 + $0x31] ss:$2 sm:$0xff]  ;;  %v5570_v11 = vld [vmem:[#allocation4 + $0x30] ss:$2 sm:$0xff]  ;;  %v13592_v50 = vld [vmem:[%s14651_s4 + $0x458] sm:$0xff] }
 0x4a4   : > { %5700 = vmatmul.mubr.f32.gmra.mxu0 %v5568_v48  ;;  %v5376_v44 = vsel %vm5316_vm9, %v13349_v53, %v6961_v54  ;;  %5795 = vmatmul.mubr.f32.gmra.mxu1 %v13464_v7  ;;  %v13498_v6 = vld [vmem:[#allocation4 + $0x23] ss:$2 sm:$0xff]  ;;  %v13515_v13 = vld [vmem:[#allocation4 + $0x22] ss:$2 sm:$0xff]  ;;  %v13610_v48 = vld [vmem:[%s14651_s4 + $0x448] sm:$0xff] }
 0x4a5   : > { %5834 = vmatpush1.msra.mxu0 %v13469_v18  ;;  %v8499_v30 = vpop.eup %8498  ;;  %v5388_v32 = vmax.f32 %v4881_v58, %v5376_v44  ;;  %6061 = vmatpush1.msra.mxu1 %v8755_v19  ;;  %v13601_v59 = vld [vmem:[%s14651_s4 + $0x450] sm:$0xff]  ;;  %v8765_v40 = vld [vmem:[%s14651_s4 + $0x80] sm:$0xff]  ;;  %v8766_v26 = vld [vmem:[%s14651_s4 + $0x78] sm:$0xff] }
 0x4a6   : > { %5835 = vmatprep.subr.mxu0 %v13476_v24  ;;  %v6962_v53 = vadd.f32 -1.0, %v8499_v30  ;;  %6062 = vmatprep.subr.mxu1 %v8756_v35  ;;  %v13624_v52 = vld [vmem:[%s14651_s4 + $0x440] sm:$0xff]  ;;  %v8767_v22 = vld [vmem:[%s14651_s4 + $0x70] sm:$0xff]  ;;  %v8768_v20 = vld [vmem:[%s14651_s4 + $0x68] sm:$0xff] }
 0x4a7   : > { %5836 = vmatpush1.msra.mxu0 %v13486_v9  ;;  %5400 = vst [vmem:[#allocation4 + $0x50] sm:$0xff] %v5388_v32  ;;  %6063 = vmatpush1.msra.mxu1 %v8757_v0  ;;  %v13556_v27 = vld [vmem:[#allocation4 + $0x32] ss:$2 sm:$0xff]  ;;  %v13639_v58 = vld [vmem:[%s14651_s4 + $0x438] sm:$0xff] }
 0x4a8   : > { %5705 = vmatprep.mubr.f32.mxu0 %v13492_v41  ;;  %v5377_v60 = vsel %vm5317_vm11, %v13363_v45, %v6962_v53  ;;  %5800 = vmatprep.mubr.f32.mxu1 %v13498_v6  ;;  %v13541_v45 = vld [vmem:[#allocation4 + $0x33] ss:$2 sm:$0xff]  ;;  %v8770_v53 = vld [vmem:[%s14651_s4 + $0x58] sm:$0xff] }
 0x4a9   : > { %5837 = vmatprep.subr.mxu0 %v13503_v25  ;;  %v5389_v47 = vmax.f32 %v4882_v51, %v5377_v60  ;;  %6064 = vmatprep.subr.mxu1 %v8758_v46  ;;  %v8769_v44 = vld [vmem:[%s14651_s4 + $0x60] sm:$0xff]  ;;  %v13649_v30 = vld [vmem:[%s14651_s4 + $0x430] sm:$0xff]  ;;  %v13658_v19 = vld [vmem:[%s14651_s4 + $0x428] sm:$0xff] }
 0x4aa   : > { %5706 = vmatmul.mubr.f32.gmra.mxu0 %v5570_v11  ;;  %5801 = vmatmul.mubr.f32.gmra.mxu1 %v13515_v13  ;;  %v13576_v15 = vld [vmem:[#allocation4 + $0x41] ss:$2 sm:$0xff]  ;;  %v5572_v63 = vld [vmem:[#allocation4 + $0x40] ss:$2 sm:$0xff]  ;;  %v13667_v35 = vld [vmem:[%s14651_s4 + $0x420] sm:$0xff] }
 0x4ab   : > { %5838 = vmatpush1.msra.mxu0 %v13520_v3  ;;  %5401 = vst [vmem:[#allocation4 + $0x58] sm:$0x3] %v5389_v47  ;;  %6065 = vmatpush1.msra.mxu1 %v8759_v12  ;;  %v8771_v11 = vld [vmem:[%s14651_s4 + $0x50] sm:$0xff]  ;;  %v13676_v0 = vld [vmem:[%s14651_s4 + $0x418] sm:$0xff]  ;;  %v8772_v51 = vld [vmem:[%s14651_s4 + $0x48] sm:$0xff] }
 0x4ac   : > { %5839 = vmatprep.subr.mxu0 %v13529_v4  ;;  %6066 = vmatprep.subr.mxu1 %v8760_v8  ;;  %v13685_v60 = vld [vmem:[%s14651_s4 + $0x410] sm:$0xff]  ;;  %v8773_v47 = vld [vmem:[%s14651_s4 + $0x40] sm:$0xff]  ;;  %v13698_v12 = vld [vmem:[%s14651_s4 + $0x408] sm:$0xff] }
 0x4ad   : > { %5840 = vmatpush1.msra.mxu0 %v13537_v43  ;;  %6067 = vmatpush1.msra.mxu1 %v8761_v34  ;;  %v8774_v8 = vld [vmem:[%s14651_s4 + $0x38] sm:$0xff]  ;;  %v13707_v34 = vld [vmem:[%s14651_s4 + $0x400] sm:$0xff] }
 0x4ae   : > { %5806 = vmatprep.mubr.f32.mxu1 %v13541_v45  ;;  %5841 = vmatprep.subr.mxu0 %v13550_v14  ;;  %v13613_v16 = vld [vmem:[#allocation4 + $0x51] ss:$2 sm:$0x7]  ;;  %v5574_v54 = vld [vmem:[#allocation4 + $0x50] ss:$2 sm:$0x7] }
 0x4af   : > { %6068 = vmatprep.subr.mxu1 %v8762_v28  ;;  %5807 = vmatmul.mubr.f32.gmra.mxu1 %v13556_v27  ;;  %v13619_v31 = vld [vmem:[#allocation4 + $0x43] ss:$2 sm:$0xff]  ;;  %v13634_v36 = vld [vmem:[#allocation4 + $0x42] ss:$2 sm:$0xff] }
 0x4b0   : > { %5842 = vmatpush1.msra.mxu0 %v13561_v57  ;;  %6069 = vmatpush1.msra.mxu1 %v8763_v2  ;;  %v13653_v32 = vld [vmem:[#allocation4 + $0x53] ss:$2 sm:$0x7]  ;;  %v13691_v46 = vld [vmem:[#allocation4 + $0x52] ss:$2 sm:$0x7] }
 0x4b1   : > { %5843 = vmatprep.subr.mxu0 %v13570_v49  ;;  %6070 = vmatprep.subr.mxu1 %v8764_v21  ;;  %v8775_v28 = vld [vmem:[%s14651_s4 + $0x30] sm:$0xff]  ;;  %v8776_v2 = vld [vmem:[%s14651_s4 + $0x28] sm:$0xff] }
 0x4b2   : > { %5711 = vmatprep.mubr.f32.mxu0 %v13576_v15  ;;  %5844 = vmatpush1.msra.mxu0 %v13583_v62  ;;  %v13719_v21 = vld [vmem:[#allocation4 + $0x4] ss:$2 sm:$0xff] }
 0x4b3   : > { %6071 = vmatpush1.msra.mxu1 %v8765_v40  ;;  %5712 = vmatmul.mubr.f32.gmra.mxu0 %v5572_v63  ;;  %v14656_v63 = vmov 0.0   ;;  %v8777_v40 = vld [vmem:[%s14651_s4 + $0x20] sm:$0xff] }
 0x4b4   : > { %5845 = vmatprep.subr.mxu0 %v13592_v50  ;;  %6072 = vmatprep.subr.mxu1 %v8766_v26  ;;  %v8779_v26 = vld [vmem:[%s14651_s4 + $0x2f8] sm:$0xff] }
 0x4b5   : > { %5846 = vmatpush1.msra.mxu0 %v13601_v59  ;;  %6073 = vmatpush1.msra.mxu1 %v8767_v22  ;;  %v8780_v22 = vld [vmem:[%s14651_s4 + $0x10] sm:$0xff] }
 0x4b6   : > { %5847 = vmatprep.subr.mxu0 %v13610_v48  ;;  %6074 = vmatprep.subr.mxu1 %v8768_v20  ;;  %v8782_v20 = vld [vmem:[%s14651_s4 + $0x8] sm:$0xff] }
 0x4b7   : > { %5717 = vmatprep.mubr.f32.mxu0 %v13613_v16  ;;  %5812 = vmatprep.mubr.f32.mxu1 %v13619_v31 }
 0x4b8   : > { %5848 = vmatpush1.msra.mxu0 %v13624_v52  ;;  %6075 = vmatpush1.msra.mxu1 %v8769_v44  ;;  %v8783_v44 = vld [vmem:[%s14651_s4 + $0x2e8] sm:$0xff] }
 0x4b9   : > { %5718 = vmatmul.mubr.f32.gmra.mxu0 %v5574_v54  ;;  %5813 = vmatmul.mubr.f32.gmra.mxu1 %v13634_v36  ;;  %v8781_v54 = vld [vmem:[%s14651_s4 + $0x2f0] sm:$0xff] }
 0x4ba   : > { %5849 = vmatprep.subr.mxu0 %v13639_v58  ;;  %6076 = vmatprep.subr.mxu1 %v8770_v53  ;;  %v8784_v53 = vld [vmem:[%s14651_s4] sm:$0xff] }
 0x4bb   : > { %5818 = vmatprep.mubr.f32.mxu1 %v13653_v32  ;;  %5850 = vmatpush1.msra.mxu0 %v13649_v30 }
 0x4bc   : > { %6077 = vmatpush1.msra.mxu1 %v8771_v11  ;;  %5851 = vmatprep.subr.mxu0 %v13658_v19  ;;  %v8785_v11 = vld [vmem:[%s14651_s4 + $0x2e0] sm:$0xff] }
 0x4bd   : > { %6078 = vmatprep.subr.mxu1 %v8772_v51  ;;  %5852 = vmatpush1.msra.mxu0 %v13667_v35  ;;  %v13750_v51 = vld [vmem:[#allocation4 + $0x14] ss:$2 sm:$0xff] }
 0x4be   : > { %6079 = vmatpush1.msra.mxu1 %v8773_v47  ;;  %5853 = vmatprep.subr.mxu0 %v13676_v0  ;;  %v8786_v47 = vld [vmem:[%s14651_s4 + $0x1f8] sm:$0xff] }
 0x4bf   : > { %5819 = vmatmul.mubr.f32.gmra.mxu1 %v13691_v46  ;;  %6080 = vmatprep.subr.mxu1 %v8774_v8  ;;  %v8787_v8 = vld [vmem:[%s14651_s4 + $0x2d8] sm:$0xff] }
 0x4c0   : > { %5854 = vmatpush1.msra.mxu0 %v13685_v60  ;;  %6081 = vmatpush1.msra.mxu1 %v8775_v28  ;;  %v8788_v28 = vld [vmem:[%s14651_s4 + $0x1f0] sm:$0xff] }
 0x4c1   : > { %6120 = vmatprep.mubr.f32.mxu1 %v13426_v38  ;;  %5855 = vmatprep.subr.mxu0 %v13698_v12  ;;  %v8778_v38 = vld [vmem:[%s14651_s4 + $0x18] sm:$0xff] }
 0x4c2   : > { %6082 = vmatprep.subr.mxu1 %v8776_v2  ;;  %5856 = vmatpush1.msra.mxu0 %v13707_v34  ;;  %v8789_v2 = vld [vmem:[%s14651_s4 + $0x2d0] sm:$0xff] }
 0x4c3   : > { %5889 = vmatprep.mubr.f32.mxu0 %v14656_v63  ;;  %6083 = vmatpush1.msra.mxu1 %v8777_v40  ;;  %v8790_v40 = vld [vmem:[%s14651_s4 + $0x1e8] sm:$0xff] }
 0x4c4   : > { %5890 = vmatmul.mubr.f32.vlgmr.msra.gmra.mxu0 %v13719_v21  ;;  %6084 = vmatprep.subr.mxu1 %v8778_v38  ;;  %v8791_v38 = vld [vmem:[%s14651_s4 + $0x2c8] sm:$0xff] }
 0x4c5   : > { %6157 = vmatprep.subr.mxu0 %v8779_v26  ;;  %6085 = vmatpush1.msra.mxu1 %v8780_v22  ;;  %v8792_v26 = vld [vmem:[%s14651_s4 + $0x1e0] sm:$0xff] }
 0x4c6   : > { %6158 = vmatpush1.msra.mxu0 %v8781_v54  ;;  %6086 = vmatprep.subr.mxu1 %v8782_v20  ;;  %v8793_v22 = vld [vmem:[%s14651_s4 + $0x2c0] sm:$0xff]  ;;  %v8794_v20 = vld [vmem:[%s14651_s4 + $0x1d8] sm:$0xff] }
 0x4c7   : > { %6159 = vmatprep.subr.mxu0 %v8783_v44  ;;  %5895 = vmatprep.mubr.f32.mxu0 %v14656_v63  ;;  %v13778_v54 = vld [vmem:[#allocation4 + $0x24] ss:$2 sm:$0xff] }
 0x4c8   : > { %6087 = vmatpush1.msra.mxu1 %v8784_v53  ;;  %6160 = vmatpush1.msra.mxu0 %v8785_v11  ;;  %v8795_v44 = vld [vmem:[%s14651_s4 + $0x2b8] sm:$0xff]  ;;  %v8796_v53 = vld [vmem:[%s14651_s4 + $0x1d0] sm:$0xff] }
 0x4c9   : > { %6088 = vmatprep.subr.mxu1 %v8786_v47  ;;  %5896 = vmatmul.mubr.f32.gmra.mxu0 %v13750_v51  ;;  %v8797_v11 = vld [vmem:[%s14651_s4 + $0x2b0] sm:$0xff]  ;;  %v8798_v47 = vld [vmem:[%s14651_s4 + $0x1c8] sm:$0xff] }
 0x4ca   : > { %6161 = vmatprep.subr.mxu0 %v8787_v8  ;;  %6089 = vmatpush2.msra.mxu1 %v8788_v28  ;;  %v8799_v8 = vld [vmem:[%s14651_s4 + $0x2a8] sm:$0xff]  ;;  %v8800_v28 = vld [vmem:[%s14651_s4 + $0x1c0] sm:$0xff] }
 0x4cb   : > { %6162 = vmatpush1.msra.mxu0 %v8789_v2  ;;  %6090 = vmatprep.subr.mxu1 %v8790_v40  ;;  %v8801_v2 = vld [vmem:[%s14651_s4 + $0x2a0] sm:$0xff] }
 0x4cc   : > { %6163 = vmatprep.subr.mxu0 %v8791_v38  ;;  %5901 = vmatprep.mubr.f32.mxu0 %v14656_v63  ;;  %v13806_v40 = vld [vmem:[#allocation4 + $0x34] ss:$2 sm:$0xff]  ;;  %v8802_v38 = vld [vmem:[%s14651_s4 + $0x1b8] sm:$0xff] }
 0x4cd   : > { %6091 = vmatpush2.msra.mxu1 %v8792_v26  ;;  %6164 = vmatpush1.msra.mxu0 %v8793_v22  ;;  %v8803_v26 = vld [vmem:[%s14651_s4 + $0x298] sm:$0xff]  ;;  %v8804_v22 = vld [vmem:[%s14651_s4 + $0x1b0] sm:$0xff] }
 0x4ce   : > { %6092 = vmatprep.subr.mxu1 %v8794_v20  ;;  %5902 = vmatmul.mubr.f32.gmra.mxu0 %v13778_v54  ;;  %v8805_v20 = vld [vmem:[%s14651_s4 + $0x290] sm:$0xff] }
 0x4cf   : > { %6165 = vmatprep.subr.mxu0 %v8795_v44  ;;  %6093 = vmatpush2.msra.mxu1 %v8796_v53  ;;  %v8806_v44 = vld [vmem:[%s14651_s4 + $0x1a8] sm:$0xff] }
 0x4d0   : > { %6166 = vmatpush1.msra.mxu0 %v8797_v11  ;;  %6094 = vmatprep.subr.mxu1 %v8798_v47  ;;  %v8807_v53 = vld [vmem:[%s14651_s4 + $0x288] sm:$0xff]  ;;  %v8808_v11 = vld [vmem:[%s14651_s4 + $0x1a0] sm:$0xff] }
 0x4d1   : > { %6167 = vmatprep.subr.mxu0 %v8799_v8  ;;  %5907 = vmatprep.mubr.f32.mxu0 %v14656_v63  ;;  %v8809_v47 = vld [vmem:[%s14651_s4 + $0x280] sm:$0xff] }
 0x4d2   : > { %6095 = vmatpush2.msra.mxu1 %v8800_v28  ;;  %6168 = vmatpush1.msra.mxu0 %v8801_v2  ;;  %v13834_v8 = vld [vmem:[#allocation4 + $0x44] ss:$2 sm:$0xff] }
 0x4d3   : > { %6096 = vmatprep.subr.mxu1 %v8802_v38  ;;  %5908 = vmatmul.mubr.f32.gmra.mxu0 %v13806_v40  ;;  %v8810_v28 = vld [vmem:[%s14651_s4 + $0x198] sm:$0xff]  ;;  %v8812_v38 = vld [vmem:[%s14651_s4 + $0x190] sm:$0xff] }
 0x4d4   : > { %6169 = vmatprep.subr.mxu0 %v8803_v26  ;;  %6097 = vmatpush2.msra.mxu1 %v8804_v22  ;;  %v8811_v2 = vld [vmem:[%s14651_s4 + $0x278] sm:$0xff]  ;;  %v8813_v26 = vld [vmem:[%s14651_s4 + $0x270] sm:$0xff]  ;;  %v8814_v22 = vld [vmem:[%s14651_s4 + $0x188] sm:$0xff] }
 0x4d5   : > { %6170 = vmatpush1.msra.mxu0 %v8805_v20  ;;  %6098 = vmatprep.subr.mxu1 %v8806_v44  ;;  %v8815_v20 = vld [vmem:[%s14651_s4 + $0x268] sm:$0xff]  ;;  %v8816_v44 = vld [vmem:[%s14651_s4 + $0x180] sm:$0xff] }
 0x4d6   : > { %6171 = vmatprep.subr.mxu0 %v8807_v53  ;;  %5913 = vmatprep.mubr.f32.mxu0 %v14656_v63  ;;  %v8817_v53 = vld [vmem:[%s14651_s4 + $0x260] sm:$0xff] }
 0x4d7   : > { %6099 = vmatpush2.msra.mxu1 %v8808_v11  ;;  %6172 = vmatpush1.msra.mxu0 %v8809_v47  ;;  %v13862_v11 = vld [vmem:[#allocation4 + $0x54] ss:$2 sm:$0x7]  ;;  %v8818_v47 = vld [vmem:[%s14651_s4 + $0x178] sm:$0xff] }
 0x4d8   : > { %6100 = vmatprep.subr.mxu1 %v8810_v28  ;;  %5914 = vmatmul.mubr.f32.gmra.mxu0 %v13834_v8  ;;  %v8819_v28 = vld [vmem:[%s14651_s4 + $0x258] sm:$0xff] }
 0x4d9   : > { %6173 = vmatprep.subr.mxu0 %v8811_v2  ;;  %6101 = vmatpush2.msra.mxu1 %v8812_v38  ;;  %v8820_v2 = vld [vmem:[%s14651_s4 + $0x170] sm:$0xff] }
 0x4da   : > { %6174 = vmatpush1.msra.mxu0 %v8813_v26  ;;  %6102 = vmatprep.subr.mxu1 %v8814_v22  ;;  %v8821_v38 = vld [vmem:[%s14651_s4 + $0x250] sm:$0xff]  ;;  %v8822_v26 = vld [vmem:[%s14651_s4 + $0x168] sm:$0xff] }
 0x4db   : > { %6175 = vmatprep.subr.mxu0 %v8815_v20  ;;  %5919 = vmatprep.mubr.f32.mxu0 %v14656_v63  ;;  %v8823_v22 = vld [vmem:[%s14651_s4 + $0x248] sm:$0xff]  ;;  %v8824_v20 = vld [vmem:[%s14651_s4 + $0x160] sm:$0xff] }
 0x4dc   : > { %6103 = vmatpush2.msra.mxu1 %v8816_v44  ;;  %6176 = vmatpush1.msra.mxu0 %v8817_v53  ;;  %v8825_v44 = vld [vmem:[%s14651_s4 + $0x240] sm:$0xff]  ;;  %v8827_v53 = vld [vmem:[%s14651_s4 + $0x238] sm:$0xff] }
 0x4dd   : > { %6104 = vmatprep.subr.mxu1 %v8818_v47  ;;  %5920 = vmatmul.mubr.f32.gmra.mxu0 %v13862_v11  ;;  %v8828_v47 = vld [vmem:[%s14651_s4 + $0x150] sm:$0xff] }
 0x4de   : > { %6177 = vmatprep.subr.mxu0 %v8819_v28  ;;  %6105 = vmatpush2.msra.mxu1 %v8820_v2  ;;  %v8829_v28 = vld [vmem:[%s14651_s4 + $0x230] sm:$0xff]  ;;  %v8830_v2 = vld [vmem:[%s14651_s4 + $0x148] sm:$0xff] }
 0x4df   : > { %6178 = vmatpush1.msra.mxu0 %v8821_v38  ;;  %6221 = vmatprep.mubr.f32.mxu0 %v13719_v21  ;;  %v8826_v21 = vld [vmem:[%s14651_s4 + $0x158] sm:$0xff]  ;;  %v8831_v38 = vld [vmem:[%s14651_s4 + $0x228] sm:$0xff] }
 0x4e0   : > { %6106 = vmatprep.subr.mxu1 %v8822_v26  ;;  %6179 = vmatprep.subr.mxu0 %v8823_v22  ;;  %v8832_v26 = vld [vmem:[%s14651_s4 + $0x140] sm:$0xff] }
 0x4e1   : > { %6107 = vmatpush2.msra.mxu1 %v8824_v20  ;;  %6180 = vmatpush1.msra.mxu0 %v8825_v44  ;;  %v8833_v22 = vld [vmem:[%s14651_s4 + $0x220] sm:$0xff]  ;;  %v8834_v20 = vld [vmem:[%s14651_s4 + $0x138] sm:$0xff] }
 0x4e2   : > { %6108 = vmatprep.subr.mxu1 %v8826_v21  ;;  %6181 = vmatprep.subr.mxu0 %v8827_v53  ;;  %v8835_v44 = vld [vmem:[%s14651_s4 + $0x218] sm:$0xff]  ;;  %v8836_v21 = vld [vmem:[%s14651_s4 + $0x130] sm:$0xff] }
 0x4e3   : > { %6109 = vmatpush2.msra.mxu1 %v8828_v47  ;;  %6182 = vmatpush1.msra.mxu0 %v8829_v28  ;;  %v8837_v53 = vld [vmem:[%s14651_s4 + $0x210] sm:$0xff]  ;;  %v8838_v47 = vld [vmem:[%s14651_s4 + $0x128] sm:$0xff] }
 0x4e4   : > { %6110 = vmatprep.subr.mxu1 %v8830_v2  ;;  %6183 = vmatprep.subr.mxu0 %v8831_v38  ;;  %v8839_v28 = vld [vmem:[%s14651_s4 + $0x208] sm:$0xff]  ;;  %v8840_v2 = vld [vmem:[%s14651_s4 + $0x120] sm:$0xff] }
 0x4e5   : > { %6111 = vmatpush2.msra.mxu1 %v8832_v26  ;;  %6184 = vmatpush1.msra.mxu0 %v8833_v22  ;;  %v8841_v38 = vld [vmem:[%s14651_s4 + $0x200] sm:$0xff]  ;;  %v8842_v26 = vld [vmem:[%s14651_s4 + $0x118] sm:$0xff] }
 0x4e6   : > { %6112 = vmatprep.subr.mxu1 %v8834_v20  ;;  %6185 = vmatprep.subr.mxu0 %v8835_v44  ;;  %v8843_v22 = vld [vmem:[%s14651_s4 + $0x3f8] sm:$0xff]  ;;  %v8844_v20 = vld [vmem:[%s14651_s4 + $0x110] sm:$0xff] }
 0x4e7   : > { %6113 = vmatpush2.msra.mxu1 %v8836_v21  ;;  %6186 = vmatpush1.msra.mxu0 %v8837_v53  ;;  %v8845_v44 = vld [vmem:[%s14651_s4 + $0x3f0] sm:$0xff]  ;;  %v8846_v21 = vld [vmem:[%s14651_s4 + $0x108] sm:$0xff] }
 0x4e8   : > { %6114 = vmatprep.subr.mxu1 %v8838_v47  ;;  %6187 = vmatprep.subr.mxu0 %v8839_v28  ;;  %v8847_v53 = vld [vmem:[%s14651_s4 + $0x3e8] sm:$0xff]  ;;  %v8848_v47 = vld [vmem:[%s14651_s4 + $0x100] sm:$0xff] }
 0x4e9   : > { %6115 = vmatpush2.msra.mxu1 %v8840_v2  ;;  %6188 = vmatpush1.msra.mxu0 %v8841_v38  ;;  %v8849_v28 = vld [vmem:[%s14651_s4 + $0x3e0] sm:$0xff]  ;;  %v8850_v2 = vld [vmem:[%s14651_s4 + $0x3d8] sm:$0xff] }
 0x4ea   : > { %6116 = vmatprep.subr.mxu1 %v8842_v26  ;;  %6189 = vmatprep.subr.mxu0 %v8843_v22  ;;  %v13969_v38 = vld [vmem:[%s14651_s4 + $0x4f8] sm:$0xff]  ;;  %v8852_v26 = vld [vmem:[%s14651_s4 + $0x3d0] sm:$0xff]  ;;  %v8854_v22 = vld [vmem:[%s14651_s4 + $0x3c0] sm:$0xff] }
 0x4eb   : > { %6117 = vmatpush2.msra.mxu1 %v8844_v20  ;;  %6190 = vmatpush2.msra.mxu0 %v8845_v44  ;;  %v8856_v20 = vld [vmem:[%s14651_s4 + $0x3b0] sm:$0xff]  ;;  %v8857_v44 = vld [vmem:[%s14651_s4 + $0x3a8] sm:$0xff] }
 0x4ec   : > { %6118 = vmatprep.subr.mxu1 %v8846_v21  ;;  %6191 = vmatprep.subr.mxu0 %v8847_v53  ;;  %v8860_v21 = vld [vmem:[%s14651_s4 + $0x390] sm:$0xff]  ;;  %v8861_v53 = vld [vmem:[%s14651_s4 + $0x388] sm:$0xff] }
 0x4ed   : > { %6119 = vmatpush2.msra.mxu1 %v8848_v47  ;;  %6192 = vmatpush2.msra.mxu0 %v8849_v28  ;;  %v8864_v47 = vld [vmem:[%s14651_s4 + $0x370] sm:$0xff]  ;;  %v8865_v28 = vld [vmem:[%s14651_s4 + $0x368] sm:$0xff] }
 0x4ee   : > { %6121 = vmatmul.mubr.f32.vlgmr.msra.gmra.mxu1 %v13379_v42  ;;  %6193 = vmatprep.subr.mxu0 %v8850_v2  ;;  %v8853_v42 = vld [vmem:[%s14651_s4 + $0x3c8] sm:$0xff]  ;;  %v8868_v2 = vld [vmem:[%s14651_s4 + $0x350] sm:$0xff] }
 0x4ef   : > { %8098 = vmatprep.subr.mxu1 %v13969_v38  ;;  %6126 = vmatprep.mubr.f32.mxu1 %v13464_v7  ;;  %v8855_v7 = vld [vmem:[%s14651_s4 + $0x3b8] sm:$0xff] }
 0x4f0   : > { %6194 = vmatpush2.msra.mxu0 %v8852_v26  ;;  %8114 = vmatpush1.msra.mxu1 %v13377_v37  ;;  %v8869_v26 = vld [vmem:[%s14651_s4 + $0x348] sm:$0xff] }
 0x4f1   : > { %6195 = vmatprep.subr.mxu0 %v8853_v42  ;;  %8099 = vmatprep.subr.mxu1 %v13384_v10  ;;  %v8872_v42 = vld [vmem:[%s14651_s4 + $0x330] sm:$0xff] }
 0x4f2   : > { %6196 = vmatpush2.msra.mxu0 %v8854_v22  ;;  %8115 = vmatpush1.msra.mxu1 %v13396_v5  ;;  %v8873_v22 = vld [vmem:[%s14651_s4 + $0x328] sm:$0xff] }
 0x4f3   : > { %6197 = vmatprep.subr.mxu0 %v8855_v7  ;;  %6127 = vmatmul.mubr.f32.gmra.mxu1 %v13413_v33  ;;  %v8858_v33 = vld [vmem:[%s14651_s4 + $0x3a0] sm:$0xff]  ;;  %v8875_v7 = vld [vmem:[%s14651_s4 + $0x318] sm:$0xff] }
 0x4f4   : > { %8100 = vmatprep.subr.mxu1 %v13405_v56  ;;  %6132 = vmatprep.mubr.f32.mxu1 %v13515_v13  ;;  %v8859_v13 = vld [vmem:[%s14651_s4 + $0x398] sm:$0xff] }
 0x4f5   : > { %6198 = vmatpush2.msra.mxu0 %v8856_v20  ;;  %8116 = vmatpush1.msra.mxu1 %v13410_v1  ;;  %v8876_v20 = vld [vmem:[%s14651_s4 + $0x310] sm:$0xff] }
 0x4f6   : > { %6199 = vmatprep.subr.mxu0 %v8857_v44  ;;  %8101 = vmatprep.subr.mxu1 %v13420_v55  ;;  %v8877_v44 = vld [vmem:[%s14651_s4 + $0x308] sm:$0xff] }
 0x4f7   : > { %6200 = vmatpush2.msra.mxu0 %v8858_v33  ;;  %8117 = vmatpush1.msra.mxu1 %v13435_v29  ;;  %v8878_v33 = vld [vmem:[%s14651_s4 + $0x300] sm:$0xff] }
 0x4f8   : > { %6201 = vmatprep.subr.mxu0 %v8859_v13  ;;  %6133 = vmatmul.mubr.f32.gmra.mxu1 %v13443_v23  ;;  %v8862_v23 = vld [vmem:[%s14651_s4 + $0x380] sm:$0xff]  ;;  %v5927_v13 = vlaneseq }
 0x4f9   : > { %8102 = vmatprep.subr.mxu1 %v13450_v61  ;;  %6138 = vmatprep.mubr.f32.mxu1 %v13556_v27  ;;  %v8863_v27 = vld [vmem:[%s14651_s4 + $0x378] sm:$0xff] }
 0x4fa   : > { %6202 = vmatpush2.msra.mxu0 %v8860_v21  ;;  %8118 = vmatpush1.msra.mxu1 %v13469_v18 }
 0x4fb   : > { %6203 = vmatprep.subr.mxu0 %v8861_v53  ;;  %8103 = vmatprep.subr.mxu1 %v13476_v24 }
 0x4fc   : > { %6204 = vmatpush2.msra.mxu0 %v8862_v23  ;;  %8119 = vmatpush1.msra.mxu1 %v13486_v9  ;;  %v5928_v23 = vshrl.u32 %v5927_v13, 7 }
 0x4fd   : > { %6205 = vmatprep.subr.mxu0 %v8863_v27  ;;  %6139 = vmatmul.mubr.f32.gmra.mxu1 %v13492_v41  ;;  %v8866_v41 = vld [vmem:[%s14651_s4 + $0x360] sm:$0xff] }
 0x4fe   : > { %8104 = vmatprep.subr.mxu1 %v13503_v25  ;;  %6144 = vmatprep.mubr.f32.mxu1 %v13634_v36  ;;  %v8867_v36 = vld [vmem:[%s14651_s4 + $0x358] sm:$0xff] }
 0x4ff   : > { %6206 = vmatpush2.msra.mxu0 %v8864_v47  ;;  %8120 = vmatpush1.msra.mxu1 %v13520_v3 }
 0x500   : > { %6207 = vmatprep.subr.mxu0 %v8865_v28  ;;  %8105 = vmatprep.subr.mxu1 %v13529_v4  ;;  %v5929_v28 = vsub.s32 0, %v5928_v23 }
 0x501   : > { %6208 = vmatpush2.msra.mxu0 %v8866_v41  ;;  %8121 = vmatpush1.msra.mxu1 %v13537_v43  ;;  %v5562_v41 = vld [vmem:[%s14614_s11] sm:$0x3] }
 0x502   : > { %6209 = vmatprep.subr.mxu0 %v8867_v36  ;;  %6145 = vmatmul.mubr.f32.gmra.mxu1 %v13576_v15  ;;  %v8870_v15 = vld [vmem:[%s14651_s4 + $0x340] sm:$0xff] }
 0x503   : > { %8106 = vmatprep.subr.mxu1 %v13550_v14  ;;  %6150 = vmatprep.mubr.f32.mxu1 %v13691_v46  ;;  %v8871_v46 = vld [vmem:[%s14651_s4 + $0x338] sm:$0xff] }
 0x504   : > { %6210 = vmatpush2.msra.mxu0 %v8868_v2  ;;  %8122 = vmatpush1.msra.mxu1 %v13561_v57 }
 0x505   : > { %6211 = vmatprep.subr.mxu0 %v8869_v26  ;;  %8107 = vmatprep.subr.mxu1 %v13570_v49  ;;  %v5933_v26 = vsub.s32 1, %v5928_v23 }
 0x506   : > { %6212 = vmatpush2.msra.mxu0 %v8870_v15  ;;  %8123 = vmatpush1.msra.mxu1 %v13583_v62 }
 0x507   : > { %6213 = vmatprep.subr.mxu0 %v8871_v46  ;;  %6151 = vmatmul.mubr.f32.gmra.mxu1 %v13613_v16  ;;  %v8874_v16 = vld [vmem:[%s14651_s4 + $0x320] sm:$0xff] }
 0x508   : > { %8108 = vmatprep.subr.mxu1 %v13592_v50  ;;  %6214 = vmatpush2.msra.mxu0 %v8872_v42 }
 0x509   : > { %8124 = vmatpush1.msra.mxu1 %v13601_v59  ;;  %6215 = vmatprep.subr.mxu0 %v8873_v22  ;;  %v14194_v22 = vrot.slane %v5562_v41, %v5929_v28 }
 0x50a   : > { %8109 = vmatprep.subr.mxu1 %v13610_v48  ;;  %6216 = vmatpush2.msra.mxu0 %v8874_v16 }
 0x50b   : > { %8125 = vmatpush1.msra.mxu1 %v13624_v52  ;;  %6217 = vmatprep.subr.mxu0 %v8875_v7  ;;  %v5563_v7 = vld [vmem:[%s14615_s12] sm:$0x3] }
 0x50c   : > { %8110 = vmatprep.subr.mxu1 %v13639_v58  ;;  %6218 = vmatpush2.msra.mxu0 %v8876_v20 }
 0x50d   : > { %8126 = vmatpush1.msra.mxu1 %v13649_v30  ;;  %6219 = vmatprep.subr.mxu0 %v8877_v44 }
 0x50e   : > { %8111 = vmatprep.subr.mxu1 %v13658_v19  ;;  %6220 = vmatpush2.msra.mxu0 %v8878_v33  ;;  %v14201_v33 = vrot.slane %v5562_v41, %v5933_v26 }
 0x50f   : > { %8127 = vmatpush1.msra.mxu1 %v13667_v35  ;;  %6222 = vmatmul.mubr.f32.vlgmr.msra.gmra.mxu0 %v13415_v39  ;;  %v6047_v39 = vld [vmem:[#allocation4 + $0x15] ss:$2 sm:$0xff] }
 0x510   : > { %6258 = vmatprep.subr.mxu0 %v13969_v38  ;;  %8112 = vmatprep.subr.mxu1 %v13676_v0 }
 0x511   : > { %6227 = vmatprep.mubr.f32.mxu0 %v13750_v51  ;;  %6259 = vmatpush1.msra.mxu0 %v13377_v37  ;;  %v6049_v37 = vld [vmem:[#allocation4 + $0x25] ss:$2 sm:$0xff] }
 0x512   : > { %8128 = vmatpush1.msra.mxu1 %v13685_v60  ;;  %6260 = vmatprep.subr.mxu0 %v13384_v10  ;;  %v6051_v10 = vld [vmem:[#allocation4 + $0x35] ss:$2 sm:$0xff] }
 0x513   : > { %8113 = vmatprep.subr.mxu1 %v13698_v12  ;;  %6261 = vmatpush1.msra.mxu0 %v13396_v5  ;;  %v6053_v5 = vld [vmem:[#allocation4 + $0x45] ss:$2 sm:$0xff] }
 0x514   : > { %8129 = vmatpush1.msra.mxu1 %v13707_v34  ;;  %6328 = vmatprep.mubr.f32.mxu1 %v14656_v63 }
 0x515   : > { %6228 = vmatmul.mubr.f32.gmra.mxu0 %v13445_v17  ;;  %6262 = vmatprep.subr.mxu0 %v13405_v56  ;;  %v6055_v56 = vld [vmem:[#allocation4 + $0x55] ss:$2 sm:$0x7] }
 0x516   : > { %6329 = vmatmul.mubr.f32.vlgmr.msra.gmra.mxu1 %v6047_v39  ;;  %6233 = vmatprep.mubr.f32.mxu0 %v13778_v54 }
 0x517   : > { %6263 = vmatpush1.msra.mxu0 %v13410_v1  ;;  %6334 = vmatprep.mubr.f32.mxu1 %v14656_v63  ;;  %v6045_v1 = vld [vmem:[#allocation4 + $0x5] ss:$2 sm:$0xff] }
 0x518   : > { %6264 = vmatprep.subr.mxu0 %v13420_v55 }
 0x519   : > { %6265 = vmatpush1.msra.mxu0 %v13435_v29 }
 0x51a   : > { %6234 = vmatmul.mubr.f32.gmra.mxu0 %v13498_v6  ;;  %6266 = vmatprep.subr.mxu0 %v13450_v61 }
 0x51b   : > { %6335 = vmatmul.mubr.f32.gmra.mxu1 %v6049_v37  ;;  %6239 = vmatprep.mubr.f32.mxu0 %v13806_v40 }
 0x51c   : > { %6267 = vmatpush1.msra.mxu0 %v13469_v18  ;;  %6340 = vmatprep.mubr.f32.mxu1 %v14656_v63 }
 0x51d   : > { %6268 = vmatprep.subr.mxu0 %v13476_v24 }
 0x51e   : > { %6269 = vmatpush1.msra.mxu0 %v13486_v9 }
 0x51f   : > { %6240 = vmatmul.mubr.f32.gmra.mxu0 %v13541_v45  ;;  %6270 = vmatprep.subr.mxu0 %v13503_v25 }
 0x520   : > { %6341 = vmatmul.mubr.f32.gmra.mxu1 %v6051_v10  ;;  %6245 = vmatprep.mubr.f32.mxu0 %v13834_v8 }
 0x521   : > { %6271 = vmatpush1.msra.mxu0 %v13520_v3  ;;  %6346 = vmatprep.mubr.f32.mxu1 %v14656_v63 }
 0x522   : > { %6272 = vmatprep.subr.mxu0 %v13529_v4 }
 0x523   : > { %6273 = vmatpush1.msra.mxu0 %v13537_v43 }
 0x524   : > { %6246 = vmatmul.mubr.f32.gmra.mxu0 %v13619_v31  ;;  %6274 = vmatprep.subr.mxu0 %v13550_v14 }
 0x525   : > { %6347 = vmatmul.mubr.f32.gmra.mxu1 %v6053_v5  ;;  %6251 = vmatprep.mubr.f32.mxu0 %v13862_v11 }
 0x526   : > { %6275 = vmatpush1.msra.mxu0 %v13561_v57  ;;  %6352 = vmatprep.mubr.f32.mxu1 %v14656_v63 }
 0x527   : > { %6276 = vmatprep.subr.mxu0 %v13570_v49 }
 0x528   : > { %6277 = vmatpush1.msra.mxu0 %v13583_v62 }
 0x529   : > { %6252 = vmatmul.mubr.f32.gmra.mxu0 %v13653_v32  ;;  %6278 = vmatprep.subr.mxu0 %v13592_v50 }
 0x52a   : > { %6353 = vmatmul.mubr.f32.gmra.mxu1 %v6055_v56  ;;  %6279 = vmatpush1.msra.mxu0 %v13601_v59  ;;  %v14206_v56 = vrot.slane %v5563_v7, %v5929_v28 }
 0x52b   : > { %6280 = vmatprep.subr.mxu0 %v13610_v48  ;;  %6322 = vmatprep.mubr.f32.mxu0 %v14656_v63 }
 0x52c   : > { %6281 = vmatpush1.msra.mxu0 %v13624_v52 }
 0x52d   : > { %6282 = vmatprep.subr.mxu0 %v13639_v58 }
 0x52e   : > { %6283 = vmatpush1.msra.mxu0 %v13649_v30 }
 0x52f   : > { %6284 = vmatprep.subr.mxu0 %v13658_v19 }
 0x530   : > { %6285 = vmatpush1.msra.mxu0 %v13667_v35 }
 0x531   : > { %6286 = vmatprep.subr.mxu0 %v13676_v0 }
 0x532   : > { %6287 = vmatpush1.msra.mxu0 %v13685_v60 }
 0x533   : > { %6288 = vmatprep.subr.mxu0 %v13698_v12 }
 0x534   : > { %6289 = vmatpush1.msra.mxu0 %v13707_v34 }
 0x535   : > { %6323 = vmatmul.mubr.f32.vlgmr.msra.gmra.mxu0 %v6045_v1 }
 0x559   : > { %v5689_v55 = vpop.f32.mrf.mxu0 }
 0x55b   : > { %v5691_v29 = vpop.f32.mrf.mxu0 }
 0x55e   : > { %v5695_v17 = vpop.f32.mrf.mxu0  ;;  %v5790_v61 = vpop.f32.mrf.mxu1 }
 0x55f   : > { %v5791_v2 = vadd.f32 %v5790_v61, %v5689_v55 }
 0x560   : > { %v5697_v18 = vpop.f32.mrf.mxu0  ;;  %v5792_v24 = vpop.f32.mrf.mxu1 }
 0x561   : > { %v5793_v46 = vadd.f32 %v5792_v24, %v5691_v29  ;;  %v14213_v24 = vrot.slane %v5563_v7, %v5933_v26 }
 0x564   : > { %v5701_v9 = vpop.f32.mrf.mxu0  ;;  %v5796_v6 = vpop.f32.mrf.mxu1 }
 0x565   : > { %v5797_v16 = vadd.f32 %v5796_v6, %v5695_v17 }
 0x566   : > { %v5703_v25 = vpop.f32.mrf.mxu0  ;;  %v5798_v3 = vpop.f32.mrf.mxu1 }
 0x567   : > { %v5799_v39 = vadd.f32 %v5798_v3, %v5697_v18 }
 0x56a   : > { %v14143_v4 = vpop.f32.mrf.mxu0  ;;  %v5802_v43 = vpop.f32.mrf.mxu1 }
 0x56b   : > { %v5803_v1 = vadd.f32 %v5802_v43, %v5701_v9 }
 0x56c   : > { %v14145_v45 = vpop.f32.mrf.mxu0  ;;  %v5804_v57 = vpop.f32.mrf.mxu1 }
 0x56d   : > { %v5805_v6 = vadd.f32 %v5804_v57, %v5703_v25 }
 0x56f   : > { %v14151_v62 = vpop.f32.mrf.mxu1 }
 0x570   : > { %v5809_v25 = vadd.f32 %v14151_v62, %v14143_v4 }
 0x571   : > { %v14155_v59 = vpop.f32.mrf.mxu1 }
 0x572   : > { %v5811_v28 = vadd.f32 %v14155_v59, %v14145_v45 }
 0x573   : > { %v14147_v14 = vpop.f32.mrf.mxu0 }
 0x575   : > { %v14149_v49 = vpop.f32.mrf.mxu0 }
 0x579   : > { %v14153_v50 = vpop.f32.mrf.mxu0  ;;  %v14157_v48 = vpop.f32.mrf.mxu1 }
 0x57a   : > { %v5815_v45 = vadd.f32 %v14157_v48, %v14147_v14 }
 0x57b   : > { %v14159_v31 = vpop.f32.mrf.mxu0  ;;  %v14161_v58 = vpop.f32.mrf.mxu1 }
 0x57c   : > { %v5817_v59 = vadd.f32 %v14161_v58, %v14149_v49 }
 0x57f   : > { %v14163_v32 = vpop.f32.mrf.mxu1 }
 0x581   : > { %v14165_v35 = vpop.f32.mrf.mxu1 }
 0x584   : > { %v5891_v52 = vpop.f32.mrf.mxu0 }
 0x585   : > { %v5892_v42 = vadd.f32 %v5891_v52, %v5791_v2 }
 0x586   : > { %v5893_v30 = vpop.f32.mrf.mxu0 }
 0x587   : > { %v5894_v44 = vadd.f32 %v5893_v30, %v5793_v46  ;;  %v5937_v5 = vmul.f32 %v14194_v22, %v5892_v42 }
 0x589   : > { %v5897_v19 = vpop.f32.mrf.mxu0  ;;  %v5938_v61 = vmul.f32 %v14201_v33, %v5894_v44  ;;  %v14219_v30 = vadd.f32 %v14206_v56, %v5937_v5 }
 0x58a   : > { %v5898_v37 = vadd.f32 %v5897_v19, %v5797_v16 }
 0x58b   : > { %v5899_v0 = vpop.f32.mrf.mxu0  ;;  %vm5972_vm12 = vcmp.gt.f32.partialorder %v14219_v30, 0.0 }
 0x58c   : > { %v5900_v55 = vadd.f32 %v5899_v0, %v5799_v39  ;;  %v5939_v18 = vmul.f32 %v14194_v22, %v5898_v37  ;;  %v14225_v0 = vadd.f32 %v14213_v24, %v5938_v61 }
 0x58e   : > { %v5903_v34 = vpop.f32.mrf.mxu0  ;;  %v5940_v9 = vmul.f32 %v14201_v33, %v5900_v55  ;;  %v14230_v57 = vadd.f32 %v14206_v56, %v5939_v18  ;;  %v5985_v4 = vmin.f32 %v14225_v0, 0.0  ;;  %vm5973_vm13 = vcmp.gt.f32.partialorder %v14225_v0, 0.0 }
 0x58f   : > { %v5904_v3 = vadd.f32 %v5903_v34, %v5803_v1 }
 0x590   : > { %v5905_v51 = vpop.f32.mrf.mxu0  ;;  %v14237_v2 = vadd.f32 %v14213_v24, %v5940_v9  ;;  %v5986_v16 = vmin.f32 %v14230_v57, 0.0  ;;  %vm5974_vm14 = vcmp.gt.f32.partialorder %v14230_v57, 0.0 }
 0x591   : > { %v5906_v43 = vadd.f32 %v5905_v51, %v5805_v6  ;;  %v5941_v34 = vmul.f32 %v14194_v22, %v5904_v3  ;;  %v5984_v51 = vmin.f32 %v14219_v30, 0.0  ;;  %v5998_v6 = vmul.f32 1.442695, %v5985_v4 }
 0x592   : > { %v5987_v5 = vmin.f32 %v14237_v2, 0.0  ;;  %v6000_v18 = vmul.f32 1.442695, %v5986_v16  ;;  %vm5975_vm15 = vcmp.gt.f32.partialorder %v14237_v2, 0.0 }
 0x593   : > { %v5909_v8 = vpop.f32.mrf.mxu0  ;;  %v5942_v26 = vmul.f32 %v14201_v33, %v5906_v43  ;;  %v14243_v7 = vadd.f32 %v14206_v56, %v5941_v34  ;;  %v5996_v39 = vmul.f32 1.442695, %v5984_v51 }
 0x594   : > { %v5910_v46 = vadd.f32 %v5909_v8, %v5809_v25 }
 0x595   : > { %v5911_v38 = vpop.f32.mrf.mxu0  ;;  %v5988_v3 = vmin.f32 %v14243_v7, 0.0  ;;  %8500 = vpow2.f32 %v5996_v39  ;;  %vm5976_vm0 = vcmp.gt.f32.partialorder %v14243_v7, 0.0 }
 0x596   : > { %v5912_v62 = vadd.f32 %v5911_v38, %v5811_v28  ;;  %v14252_v38 = vadd.f32 %v14213_v24, %v5942_v26  ;;  %v5943_v1 = vmul.f32 %v14194_v22, %v5910_v46  ;;  %8502 = vpow2.f32 %v5998_v6 }
 0x597   : > { %8504 = vpow2.f32 %v6000_v18 }
 0x598   : > { %v14181_v53 = vpop.f32.mrf.mxu0  ;;  %v5944_v14 = vmul.f32 %v14201_v33, %v5912_v62  ;;  %v14268_v34 = vadd.f32 %v14206_v56, %v5943_v1  ;;  %vm5977_vm2 = vcmp.gt.f32.partialorder %v14252_v38, 0.0 }
 0x599   : > { %v5916_v48 = vadd.f32 %v14181_v53, %v5815_v45  ;;  %v6002_v53 = vmul.f32 1.442695, %v5987_v5 }
 0x59a   : > { %v14185_v47 = vpop.f32.mrf.mxu0  ;;  %v14271_v28 = vadd.f32 %v14213_v24, %v5944_v14  ;;  %v5990_v16 = vmin.f32 %v14268_v34, 0.0  ;;  %vm5978_vm3 = vcmp.gt.f32.partialorder %v14268_v34, 0.0 }
 0x59b   : > { %v5918_v9 = vadd.f32 %v14185_v47, %v5817_v59  ;;  %v5945_v47 = vmul.f32 %v14194_v22, %v5916_v48  ;;  %8506 = vpow2.f32 %v6002_v53 }
 0x59c   : > { %v5991_v59 = vmin.f32 %v14271_v28, 0.0  ;;  %vm5979_vm4 = vcmp.gt.f32.partialorder %v14271_v28, 0.0 }
 0x59d   : > { %v14192_v15 = vpop.f32.mrf.mxu0  ;;  %v14283_v39 = vadd.f32 %v14206_v56, %v5945_v47 }
 0x59f   : > { %v14203_v10 = vpop.f32.mrf.mxu0  ;;  %vm5980_vm5 = vcmp.gt.f32.partialorder %v14283_v39, 0.0 }
 0x5ae   : > { %v14167_v60 = vpop.f32.mrf.mxu1 }
 0x5b0   : > { %v14169_v12 = vpop.f32.mrf.mxu1 }
 0x5b3   : > { %v14171_v63 = vpop.f32.mrf.mxu1 }
 0x5b5   : > { %v14173_v54 = vpop.f32.mrf.mxu1 }
 0x5b8   : > { %v14175_v40 = vpop.f32.mrf.mxu1 }
 0x5ba   : > { %v14177_v11 = vpop.f32.mrf.mxu1 }
 0x5bd   : > { %v14179_v21 = vpop.f32.mrf.mxu1 }
 0x5bf   : > { %v14183_v27 = vpop.f32.mrf.mxu1 }
 0x5c2   : > { %v14190_v36 = vpop.f32.mrf.mxu1 }
 0x5c4   : > { %v14199_v20 = vpop.f32.mrf.mxu1 }
 0x5c7   : > { %v14208_v29 = vpop.f32.mrf.mxu1 }
 0x5c9   : > { %v14222_v19 = vpop.f32.mrf.mxu1 }
 0x5cf   : > { %v14210_v17 = vpop.f32.mrf.mxu0 }
 0x5d1   : > { %v14216_v52 = vpop.f32.mrf.mxu0 }
 0x5d5   : > { %v6229_v13 = vpop.f32.mrf.mxu0 }
 0x5d6   : > { %v6330_v23 = vpop.f32.mrf.mxu1  ;;  %v6230_v37 = vadd.f32 %v6229_v13, %v14171_v63  ;;  %v5821_v63 = vadd.f32 %v14163_v32, %v14153_v50 }
 0x5d7   : > { %v6231_v41 = vpop.f32.mrf.mxu0 }
 0x5d8   : > { %v6332_v42 = vpop.f32.mrf.mxu1  ;;  %v6232_v55 = vadd.f32 %v6231_v41, %v14173_v54  ;;  %v5823_v54 = vadd.f32 %v14165_v35, %v14159_v31  ;;  %v6331_v43 = vadd.f32 %v6330_v23, %v6230_v37  ;;  %v6004_v23 = vmul.f32 1.442695, %v5988_v3 }
 0x5d9   : > { %v5922_v51 = vadd.f32 %v14192_v15, %v5821_v63  ;;  %v6010_v63 = vmul.f32 1.442695, %v5991_v59 }
 0x5da   : > { %v6235_v44 = vpop.f32.mrf.mxu0  ;;  %v6333_v50 = vadd.f32 %v6332_v42, %v6232_v55  ;;  %v5924_v26 = vadd.f32 %v14203_v10, %v5823_v54  ;;  %v6361_v46 = vmul.f32 %v6331_v43, %v14194_v22  ;;  %8508 = vpow2.f32 %v6004_v23 }
 0x5db   : > { %v6336_v8 = vpop.f32.mrf.mxu1  ;;  %v6236_v49 = vadd.f32 %v6235_v44, %v14175_v40  ;;  %v5989_v40 = vmin.f32 %v14252_v38, 0.0 }
 0x5dc   : > { %v6237_v61 = vpop.f32.mrf.mxu0  ;;  %v6362_v44 = vmul.f32 %v6333_v50, %v14201_v33  ;;  %v5948_v55 = vmul.f32 %v14201_v33, %v5924_v26 }
 0x5dd   : > { %v6338_v58 = vpop.f32.mrf.mxu1  ;;  %v6238_v13 = vadd.f32 %v6237_v61, %v14177_v11  ;;  %v6337_v31 = vadd.f32 %v6336_v8, %v6236_v49  ;;  %v5946_v11 = vmul.f32 %v14201_v33, %v5918_v9  ;;  %v6006_v62 = vmul.f32 1.442695, %v5989_v40 }
 0x5de   : > { %v5947_v8 = vmul.f32 %v14194_v22, %v5922_v51  ;;  %v14294_v61 = vadd.f32 %v6361_v46, %v14206_v56  ;;  %v14298_v49 = vadd.f32 %v6362_v44, %v14213_v24  ;;  %v14311_v40 = vadd.f32 %v14213_v24, %v5948_v55 }
 0x5df   : > { %v6241_v25 = vpop.f32.mrf.mxu0  ;;  %v6339_v42 = vadd.f32 %v6338_v58, %v6238_v13  ;;  %v6363_v15 = vmul.f32 %v6337_v31, %v14194_v22  ;;  %8510 = vpow2.f32 %v6006_v62  ;;  %v14318_v31 = vpop.eup %8500 }
 0x5e0   : > { %v6342_v32 = vpop.f32.mrf.mxu1  ;;  %v6242_v4 = vadd.f32 %v6241_v25, %v14179_v21  ;;  %v14288_v21 = vadd.f32 %v14213_v24, %v5946_v11  ;;  %v14307_v43 = vadd.f32 %v14206_v56, %v5947_v8  ;;  %vm5983_vm7 = vcmp.gt.f32.partialorder %v14311_v40, 0.0 }
 0x5e1   : > { %v6243_v35 = vpop.f32.mrf.mxu0  ;;  %v6364_v6 = vmul.f32 %v6339_v42, %v14201_v33  ;;  %v14303_v18 = vadd.f32 %v6363_v15, %v14206_v56  ;;  %v14324_v42 = vpop.eup %8502  ;;  %vm6385_vm8 = vcmp.gt.f32.partialorder %v14294_v61, 0.0  ;;  %vm6386_vm9 = vcmp.gt.f32.partialorder %v14298_v49, 0.0 }
 0x5e2   : > { %v6344_v41 = vpop.f32.mrf.mxu1  ;;  %v6244_v10 = vadd.f32 %v6243_v35, %v14183_v27  ;;  %v6343_v14 = vadd.f32 %v6342_v32, %v6242_v4  ;;  %v6008_v27 = vmul.f32 1.442695, %v5990_v16  ;;  %v5993_v54 = vmin.f32 %v14288_v21, 0.0 }
 0x5e3   : > { %v14315_v50 = vadd.f32 %v6364_v6, %v14213_v24  ;;  %v6398_v35 = vmin.f32 %v14298_v49, 0.0  ;;  %v5994_v62 = vmin.f32 %v14307_v43, 0.0  ;;  %vm5981_vm6 = vcmp.gt.f32.partialorder %v14288_v21, 0.0 }
 0x5e4   : > { %v6247_v45 = vpop.f32.mrf.mxu0  ;;  %v6345_v3 = vadd.f32 %v6344_v41, %v6244_v10  ;;  %v6365_v32 = vmul.f32 %v6343_v14, %v14194_v22  ;;  %8512 = vpow2.f32 %v6008_v27  ;;  %v6399_v41 = vmin.f32 %v14303_v18, 0.0 }
 0x5e5   : > { %v6348_v37 = vpop.f32.mrf.mxu1  ;;  %v6248_v5 = vadd.f32 %v6247_v45, %v14190_v36  ;;  %v5992_v36 = vmin.f32 %v14283_v39, 0.0  ;;  %v6014_v4 = vmul.f32 1.442695, %v5993_v54  ;;  %v14328_v45 = vpop.eup %8504  ;;  %8514 = vpow2.f32 %v6010_v63 }
 0x5e6   : > { %v6249_v1 = vpop.f32.mrf.mxu0  ;;  %v6366_v26 = vmul.f32 %v6345_v3, %v14201_v33  ;;  %v14332_v15 = vadd.f32 %v6365_v32, %v14206_v56  ;;  %v6413_v8 = vmul.f32 1.442695, %v6398_v35  ;;  %v6415_v55 = vmul.f32 1.442695, %v6399_v41 }
 0x5e7   : > { %v6350_v48 = vpop.f32.mrf.mxu1  ;;  %v6250_v58 = vadd.f32 %v6249_v1, %v14199_v20  ;;  %v6349_v13 = vadd.f32 %v6348_v37, %v6248_v5  ;;  %v6397_v20 = vmin.f32 %v14294_v61, 0.0  ;;  %v6012_v51 = vmul.f32 1.442695, %v5992_v36  ;;  %v14337_v1 = vpop.eup %8506 }
 0x5e8   : > { %v5995_v37 = vmin.f32 %v14311_v40, 0.0  ;;  %v14340_v6 = vadd.f32 %v6366_v26, %v14213_v24  ;;  %v6401_v36 = vmin.f32 %v14332_v15, 0.0  ;;  %v6224_v54 = vadd.f32 %v14210_v17, %v14167_v60 }
 0x5e9   : > { %v6253_v9 = vpop.f32.mrf.mxu0  ;;  %v6351_v23 = vadd.f32 %v6350_v48, %v6250_v58  ;;  %v6367_v16 = vmul.f32 %v6349_v13, %v14194_v22  ;;  %v6411_v59 = vmul.f32 1.442695, %v6397_v20  ;;  %8516 = vpow2.f32 %v6012_v51  ;;  %v14346_v58 = vpop.eup %8508 }
 0x5ea   : > { %v6254_v25 = vadd.f32 %v6253_v9, %v14208_v29  ;;  %v6354_v53 = vpop.f32.mrf.mxu1  ;;  %8518 = vpow2.f32 %v6014_v4  ;;  %v6016_v48 = vmul.f32 1.442695, %v5994_v62  ;;  %v6018_v9 = vmul.f32 1.442695, %v5995_v37 }
 0x5eb   : > { %v6255_v47 = vpop.f32.mrf.mxu0  ;;  %v6368_v5 = vmul.f32 %v6351_v23, %v14201_v33  ;;  %v14344_v27 = vadd.f32 %v6367_v16, %v14206_v56  ;;  %8520 = vpow2.f32 %v6411_v59  ;;  %v6419_v17 = vmul.f32 1.442695, %v6401_v36 }
 0x5ec   : > { %v6355_v11 = vadd.f32 %v6354_v53, %v6254_v25  ;;  %v6256_v29 = vadd.f32 %v6255_v47, %v14222_v19  ;;  %v6356_v46 = vpop.f32.mrf.mxu1  ;;  %v6400_v19 = vmin.f32 %v14315_v50, 0.0  ;;  %8522 = vpow2.f32 %v6413_v8  ;;  %v14357_v25 = vpop.eup %8510 }
 0x5ed   : > { %v14355_v13 = vadd.f32 %v6368_v5, %v14213_v24  ;;  %8524 = vpow2.f32 %v6415_v55  ;;  %v6402_v53 = vmin.f32 %v14340_v6, 0.0  ;;  %v6226_v47 = vadd.f32 %v14216_v52, %v14169_v12 }
 0x5ee   : > { %v6357_v44 = vadd.f32 %v6356_v46, %v6256_v29  ;;  %v6369_v10 = vmul.f32 %v6355_v11, %v14194_v22  ;;  %v6417_v63 = vmul.f32 1.442695, %v6400_v19  ;;  %8526 = vpow2.f32 %v6016_v48 }
 0x5ef   : > { %v6403_v35 = vmin.f32 %v14344_v27, 0.0  ;;  %v6404_v29 = vmin.f32 %v14355_v13, 0.0  ;;  %v6421_v26 = vmul.f32 1.442695, %v6402_v53  ;;  %vm5982_vm1 = vcmp.gt.f32.partialorder %v14307_v43, 0.0 }
 0x5f0   : > { %v6370_v14 = vmul.f32 %v6357_v44, %v14201_v33  ;;  %v14350_v3 = vadd.f32 %v6369_v10, %v14206_v56  ;;  %8528 = vpow2.f32 %v6417_v63  ;;  %v6963_v44 = vadd.f32 -1.0, %v14318_v31 }
 0x5f1   : > { %8530 = vpow2.f32 %v6018_v9  ;;  %v8513_v4 = vpop.eup %8512  ;;  %v6423_v62 = vmul.f32 1.442695, %v6403_v35  ;;  %v6425_v59 = vmul.f32 1.442695, %v6404_v29  ;;  %v6965_v31 = vadd.f32 -1.0, %v14328_v45 }
 0x5f2   : > { %v14361_v20 = vadd.f32 %v6370_v14, %v14213_v24  ;;  %v6405_v23 = vmin.f32 %v14350_v3, 0.0  ;;  %8532 = vpow2.f32 %v6419_v17  ;;  %v8515_v19 = vpop.eup %8514  ;;  %v14392_v14 = vsel %vm5972_vm12, %v14219_v30, %v6963_v44 }
 0x5f3   : > { %8534 = vpow2.f32 %v6421_v26  ;;  %v6966_v63 = vadd.f32 -1.0, %v14337_v1  ;;  %v6034_v30 = vsel %vm5974_vm14, %v14230_v57, %v6965_v31  ;;  %v6969_v35 = vadd.f32 -1.0, %v8513_v4 }
 0x5f4   : > { %v6406_v46 = vmin.f32 %v14361_v20, 0.0  ;;  %v6427_v12 = vmul.f32 1.442695, %v6405_v23  ;;  %8536 = vpow2.f32 %v6423_v62  ;;  %vm6387_vm10 = vcmp.gt.f32.partialorder %v14303_v18, 0.0 }
 0x5f5   : > { %v6324_v32 = vpop.f32.mrf.mxu0  ;;  %v6035_v57 = vsel %vm5975_vm15, %v14237_v2, %v6966_v63  ;;  %vm6388_vm11 = vcmp.gt.f32.partialorder %v14315_v50, 0.0  ;;  %vm6389_vm12 = vcmp.gt.f32.partialorder %v14332_v15, 0.0  ;;  %vm6391_vm14 = vcmp.gt.f32.partialorder %v14344_v27, 0.0 }
 0x5f6   : > { %v6325_v60 = vadd.f32 %v6324_v32, %v6224_v54  ;;  %v8517_v8 = vpop.eup %8516  ;;  %8538 = vpow2.f32 %v6427_v12  ;;  %v6967_v32 = vadd.f32 -1.0, %v14346_v58  ;;  %vm6392_vm15 = vcmp.gt.f32.partialorder %v14355_v13, 0.0 }
 0x5f7   : > { %v6326_v11 = vpop.f32.mrf.mxu0  ;;  %8540 = vpow2.f32 %v6425_v59  ;;  %v6971_v23 = vadd.f32 -1.0, %v8517_v8  ;;  %v6471_v8 = vld [vmem:[%s14616_s13 + $0x20] sm:$0xff] }
 0x5f8   : > { %v6359_v51 = vmul.f32 %v6325_v60, %v14194_v22  ;;  %v6327_v41 = vadd.f32 %v6326_v11, %v6226_v47  ;;  %v6429_v22 = vmul.f32 1.442695, %v6406_v46  ;;  %v6968_v47 = vadd.f32 -1.0, %v14357_v25 }
 0x5f9   : > { %v6970_v60 = vadd.f32 -1.0, %v8515_v19  ;;  %v6036_v25 = vsel %vm5976_vm0, %v14243_v7, %v6967_v32  ;;  %vm6393_vm0 = vcmp.gt.f32.partialorder %v14350_v3, 0.0 }
 0x5fa   : > { %v14371_v52 = vadd.f32 %v6359_v51, %v14206_v56  ;;  %v6360_v16 = vmul.f32 %v6327_v41, %v14201_v33  ;;  %v6964_v56 = vadd.f32 -1.0, %v14324_v42  ;;  %v8519_v33 = vpop.eup %8518  ;;  %8542 = vpow2.f32 %v6429_v22 }
 0x5fb   : > { %v8521_v5 = vpop.eup %8520  ;;  %v6972_v11 = vadd.f32 -1.0, %v8519_v33  ;;  %v6037_v2 = vsel %vm5977_vm2, %v14252_v38, %v6968_v47  ;;  %v14430_v4 = vsel %vm5979_vm4, %v14271_v28, %v6970_v60  ;;  %vm6394_vm2 = vcmp.gt.f32.partialorder %v14361_v20, 0.0  ;;  %v6992_v47 = vld [vmem:[%s14616_s13 + $0x88] sm:$0xff] }
 0x5fc   : > { %v6395_v10 = vmin.f32 %v14371_v52, 0.0  ;;  %v14378_v37 = vadd.f32 %v6360_v16, %v14213_v24  ;;  %v8523_v55 = vpop.eup %8522  ;;  %v14399_v48 = vsel %vm5973_vm13, %v14225_v0, %v6964_v56  ;;  %v6977_v54 = vadd.f32 -1.0, %v8521_v5  ;;  %v6991_v5 = vld [vmem:[%s14616_s13 + $0x80] sm:$0xff] }
 0x5fd   : > { %v8525_v45 = vpop.eup %8524  ;;  %v6978_v0 = vadd.f32 -1.0, %v8523_v55  ;;  %v14441_v38 = vsel %vm5981_vm6, %v14288_v21, %v6972_v11  ;;  %vm6390_vm13 = vcmp.gt.f32.partialorder %v14340_v6, 0.0  ;;  %v6987_v11 = vld [vmem:[%s14616_s13 + $0x60] sm:$0xff]  ;;  %vm6571_vm6 = vcmask 7168  }
 0x5fe   : > { %v6407_v24 = vmul.f32 1.442695, %v6395_v10  ;;  %v6396_v42 = vmin.f32 %v14378_v37, 0.0  ;;  %v8527_v9 = vpop.eup %8526  ;;  %v6979_v17 = vadd.f32 -1.0, %v8525_v45  ;;  %v6445_v58 = vsel %vm6385_vm8, %v14294_v61, %v6977_v54  ;;  %v6472_v45 = vld [vmem:[%s14616_s13 + $0x28] sm:$0xff] }
 0x5ff   : > { %v8529_v53 = vpop.eup %8528  ;;  %v6973_v29 = vadd.f32 -1.0, %v8527_v9  ;;  %v6446_v46 = vsel %vm6386_vm9, %v14298_v49, %v6978_v0  ;;  %v6038_v61 = vsel %vm5978_vm3, %v14268_v34, %v6969_v35  ;;  %v14436_v49 = vsel %vm5980_vm5, %v14283_v39, %v6971_v23  ;;  %v6989_v39 = vld [vmem:[%s14616_s13 + $0x70] sm:$0xff]  ;;  %v6467_v23 = vld [vmem:[%s14616_s13] sm:$0xff] }
 0x600   : > { %8544 = vpow2.f32 %v6407_v24  ;;  %v6409_v36 = vmul.f32 1.442695, %v6396_v42  ;;  %v8531_v1 = vpop.eup %8530  ;;  %v6980_v51 = vadd.f32 -1.0, %v8529_v53  ;;  %v6447_v7 = vsel %vm6387_vm10, %v14303_v18, %v6979_v17  ;;  %v6469_v18 = vld [vmem:[%s14616_s13 + $0x10] sm:$0xff] }
 0x601   : > { %v8533_v41 = vpop.eup %8532  ;;  %v6974_v26 = vadd.f32 -1.0, %v8531_v1  ;;  %v6457_v12 = vmax.f32 %v6034_v30, %v6445_v58  ;;  %v14447_v28 = vsel %vm5982_vm1, %v14307_v43, %v6973_v29  ;;  %v6458_v16 = vmax.f32 %v6035_v57, %v6446_v46  ;;  %v6470_v43 = vld [vmem:[%s14616_s13 + $0x18] sm:$0xff]  ;;  %v6993_v58 = vld [vmem:[%s14616_s13 + $0x90] sm:$0xff] }
 0x602   : > { %8546 = vpow2.f32 %v6409_v36  ;;  %v8535_v62 = vpop.eup %8534  ;;  %v6448_v21 = vsel %vm6388_vm11, %v14315_v50, %v6980_v51  ;;  %v6981_v44 = vadd.f32 -1.0, %v8533_v41  ;;  %v6459_v22 = vmax.f32 %v6036_v25, %v6447_v7  ;;  %v6990_v50 = vld [vmem:[%s14616_s13 + $0x78] sm:$0xff] }
 0x603   : > { %v8537_v34 = vpop.eup %8536  ;;  %v14459_v19 = vsel %vm5983_vm7, %v14311_v40, %v6974_v26  ;;  %v6982_v40 = vadd.f32 -1.0, %v8535_v62  ;;  %v6481_v33 = vmul.f32 %v6469_v18, %v6457_v12  ;;  %v6534_v31 = vmul.f32 %v6989_v39, %v6457_v12  ;;  %v6995_v18 = vld [vmem:[%s14616_s13 + $0xa0] sm:$0xff] }
 0x604   : > { %v8539_v59 = vpop.eup %8538  ;;  %v6460_v24 = vmax.f32 %v6037_v2, %v6448_v21  ;;  %v6482_v55 = vmul.f32 %v6470_v43, %v6458_v16  ;;  %v6449_v63 = vsel %vm6389_vm12, %v14332_v15, %v6981_v44  ;;  %v6983_v36 = vadd.f32 -1.0, %v8537_v34 }
 0x605   : > { %v8541_v10 = vpop.eup %8540  ;;  %v6985_v9 = vadd.f32 -1.0, %v8539_v59  ;;  %v6535_v30 = vmul.f32 %v6990_v50, %v6458_v16  ;;  %v6483_v54 = vmul.f32 %v6471_v8, %v6459_v22  ;;  %v6536_v1 = vmul.f32 %v6991_v5, %v6459_v22  ;;  %v6997_v16 = vld [vmem:[%s14616_s13 + $0xb0] sm:$0x7]  ;;  %v6998_v8 = vld [vmem:[%s14616_s13 + $0xb8] sm:$0x7] }
 0x606   : > { %v6984_v53 = vadd.f32 -1.0, %v8541_v10  ;;  %v6450_v35 = vsel %vm6390_vm13, %v14340_v6, %v6982_v40  ;;  %vm6383_vm3 = vcmp.gt.f32.partialorder %v14371_v52, 0.0  ;;  %v6484_v15 = vmul.f32 %v6472_v45, %v6460_v24  ;;  %v6473_v6 = vld [vmem:[%s14616_s13 + $0x30] sm:$0xff]  ;;  %v6996_v10 = vld [vmem:[%s14616_s13 + $0xa8] sm:$0xff] }
 0x607   : > { %v8543_v56 = vpop.eup %8542  ;;  %v6461_v17 = vmax.f32 %v6038_v61, %v6449_v63  ;;  %v6453_v51 = vsel %vm6393_vm0, %v14350_v3, %v6985_v9  ;;  %vm6384_vm4 = vcmp.gt.f32.partialorder %v14378_v37, 0.0  ;;  %vm6495_vm5 = vcmask 1042432   ;;  %v6988_v3 = vld [vmem:[%s14616_s13 + $0x68] sm:$0xff]  ;;  %v6994_v61 = vld [vmem:[%s14616_s13 + $0x98] sm:$0xff] }
 0x608   : > { %v6986_v60 = vadd.f32 -1.0, %v8543_v56  ;;  %v6537_v25 = vmul.f32 %v6992_v47, %v6460_v24  ;;  %v6462_v26 = vmax.f32 %v14430_v4, %v6450_v35  ;;  %v6452_v46 = vsel %vm6392_vm15, %v14355_v13, %v6984_v53 }
 0x609   : > { %v6485_v62 = vmul.f32 %v6473_v6, %v6461_v17  ;;  %v6538_v12 = vmul.f32 %v6993_v58, %v6461_v17  ;;  %v6465_v39 = vmax.f32 %v14447_v28, %v6453_v51  ;;  %v6464_v28 = vmax.f32 %v14441_v38, %v6452_v46  ;;  %v6478_v38 = vld [vmem:[%s14616_s13 + $0x58] sm:$0x7] }
 0x60a   : > { %v6454_v13 = vsel %vm6394_vm2, %v14361_v20, %v6986_v60  ;;  %v6539_v22 = vmul.f32 %v6994_v61, %v6462_v26  ;;  %vm6575_vm1 = vcmask 8192  }
 0x60b   : > { %v6466_v50 = vmax.f32 %v14459_v19, %v6454_v13 }
 0x60d   : > { %v8545_v42 = vpop.eup %8544 }
 0x60e   : > { %v6975_v32 = vadd.f32 -1.0, %v8545_v42  ;;  %v6542_v42 = vmul.f32 %v6997_v16, %v6465_v39 }
 0x60f   : > { %v8547_v0 = vpop.eup %8546 }
 0x610   : > { %v6443_v57 = vsel %vm6383_vm3, %v14371_v52, %v6975_v32  ;;  %v6976_v29 = vadd.f32 -1.0, %v8547_v0  ;;  %v6451_v52 = vsel %vm6391_vm14, %v14344_v27, %v6983_v36  ;;  %v6468_v27 = vld [vmem:[%s14616_s13 + $0x8] sm:$0xff]  ;;  %v6490_v0 = vmul.f32 %v6478_v38, %v6466_v50 }
 0x611   : > { %v6455_v41 = vmax.f32 %v14392_v14, %v6443_v57  ;;  %v6474_v14 = vld [vmem:[%s14616_s13 + $0x38] sm:$0xff]  ;;  %v6463_v34 = vmax.f32 %v14436_v49, %v6451_v52  ;;  %v6477_v49 = vld [vmem:[%s14616_s13 + $0x50] sm:$0x7] }
 0x612   : > { %v6444_v2 = vsel %vm6384_vm4, %v14378_v37, %v6976_v29  ;;  %v6486_v43 = vmul.f32 %v6474_v14, %v6462_v26  ;;  %v6489_v19 = vmul.f32 %v6477_v49, %v6465_v39 }
 0x613   : > { %v6479_v37 = vmul.f32 %v6467_v23, %v6455_v41  ;;  %v6532_v4 = vmul.f32 %v6987_v11, %v6455_v41  ;;  %v6456_v7 = vmax.f32 %v14399_v48, %v6444_v2  ;;  %v6475_v48 = vld [vmem:[%s14616_s13 + $0x40] sm:$0xff]  ;;  %v6540_v24 = vmul.f32 %v6995_v18, %v6463_v34 }
 0x614   : > { %v6487_v45 = vmul.f32 %v6475_v48, %v6463_v34  ;;  %v6496_v57 = vsel %vm6495_vm5, %v6489_v19, 0.0 }
 0x615   : > { %v6491_v21 = vadd.f32 %v6481_v33, %v6479_v37  ;;  %v6544_v20 = vadd.f32 %v6534_v31, %v6532_v4  ;;  %v6480_v44 = vmul.f32 %v6468_v27, %v6456_v7  ;;  %v6533_v59 = vmul.f32 %v6988_v3, %v6456_v7  ;;  %v6476_v33 = vld [vmem:[%s14616_s13 + $0x48] sm:$0xff] }
 0x616   : > { %v6488_v32 = vmul.f32 %v6476_v33, %v6464_v28 }
 0x617   : > { %v6504_v40 = vadd.f32 %v6482_v55, %v6480_v44  ;;  %v6556_v56 = vadd.f32 %v6535_v30, %v6533_v59  ;;  %v6492_v31 = vadd.f32 %v6491_v21, %v6483_v54  ;;  %v6545_v5 = vadd.f32 %v6544_v20, %v6536_v1 }
 0x618   : > { %v6541_v55 = vmul.f32 %v6996_v10, %v6464_v28  ;;  %v6543_v30 = vmul.f32 %v6998_v8, %v6466_v50  ;;  %v6548_v54 = vsel %vm6495_vm5, %v6542_v42, 0.0 }
 0x619   : > { %v6493_v63 = vadd.f32 %v6492_v31, %v6485_v62  ;;  %v6505_v36 = vadd.f32 %v6504_v40, %v6484_v15  ;;  %v6546_v9 = vadd.f32 %v6545_v5, %v6538_v12  ;;  %v6557_v53 = vadd.f32 %v6556_v56, %v6537_v25 }
 0x61a   : > { %v6508_v15 = vsel %vm6495_vm5, %v6490_v0, 0.0  ;;  %v6560_v6 = vsel %vm6495_vm5, %v6543_v30, 0.0 }
 0x61b   : > { %v6494_v47 = vadd.f32 %v6493_v63, %v6487_v45  ;;  %v6506_v35 = vadd.f32 %v6505_v36, %v6486_v43  ;;  %v6547_v60 = vadd.f32 %v6546_v9, %v6540_v24  ;;  %v6558_v17 = vadd.f32 %v6557_v53, %v6539_v22  ;;  %v6573_v22 = vld [vmem:[%s14617_s14] sm:$0x1] }
 0x61d   : > { %v6497_v1 = vadd.f32 %v6496_v57, %v6494_v47  ;;  %v6507_v23 = vadd.f32 %v6506_v35, %v6488_v32  ;;  %v6549_v11 = vadd.f32 %v6548_v54, %v6547_v60  ;;  %v6559_v29 = vadd.f32 %v6558_v17, %v6541_v55 }
 0x61f   : > { %v6498_v58 = vrot.slane %v6497_v1, 4  ;;  %v6509_v52 = vadd.f32 %v6508_v15, %v6507_v23  ;;  %v6550_v51 = vrot.slane %v6549_v11, 4  ;;  %v6561_v41 = vadd.f32 %v6560_v6, %v6559_v29 }
 0x621   : > { %v6499_v25 = vadd.f32 %v6498_v58, %v6497_v1  ;;  %v6510_v26 = vrot.slane %v6509_v52, 4  ;;  %v6551_v46 = vadd.f32 %v6550_v51, %v6549_v11  ;;  %v6562_v2 = vrot.slane %v6561_v41, 4 }
 0x623   : > { %v6500_v27 = vrot.slane %v6499_v25, 2  ;;  %v6511_v3 = vadd.f32 %v6510_v26, %v6509_v52  ;;  %v6552_v14 = vrot.slane %v6551_v46, 2  ;;  %v6563_v61 = vadd.f32 %v6562_v2, %v6561_v41 }
 0x625   : > { %v6501_v13 = vadd.f32 %v6500_v27, %v6499_v25  ;;  %v6512_v37 = vrot.slane %v6511_v3, 2  ;;  %v6553_v4 = vadd.f32 %v6552_v14, %v6551_v46  ;;  %v6564_v7 = vrot.slane %v6563_v61, 2 }
 0x627   : > { %v6502_v62 = vrot.slane %v6501_v13, 1  ;;  %v6513_v12 = vadd.f32 %v6512_v37, %v6511_v3  ;;  %v6554_v34 = vrot.slane %v6553_v4, 1  ;;  %v6565_v18 = vadd.f32 %v6564_v7, %v6563_v61 }
 0x629   : > { %v6514_v39 = vrot.slane %v6513_v12, 1  ;;  %v6566_v16 = vrot.slane %v6565_v18, 1  ;;  %v6503_v21 = vadd.f32 %v6502_v62, %v6501_v13  ;;  %v6555_v44 = vadd.f32 %v6554_v34, %v6553_v4 }
 0x62b   : > { %v6515_v20 = vadd.f32 %v6514_v39, %v6513_v12  ;;  %v6567_v59 = vadd.f32 %v6566_v16, %v6565_v18 }
 0x62d   : > { %v6516_v48 = vadd.f32 %v6515_v20, %v6503_v21  ;;  %v6568_v49 = vadd.f32 %v6567_v59, %v6555_v44 }
 0x62f   : > { %6517 = vadd.xlane.f32.xlu0 %v6516_v48 }
 0x633   : > { %6569 = vadd.xlane.f32.xlu0 %v6568_v49 }
 0x6b8   : > { %v6518_v43 = vpop.xlane.xlu0 %6517 }
 0x6bc   : > { %v6570_v28 = vpop.xlane.xlu0 %6569 }
 0x6bd   : > { %v6572_v10 = vsel %vm6571_vm6, %v6518_v43, %v6570_v28 }
 0x6be   : > { %v6574_v50 = vadd.f32 %v6573_v22, %v6572_v10 }
 0x6c0   : > { %6576 = vst.msk [vmem:[%s486_s16] sm:$0x1] %vm6575_vm1, %v6574_v50 }
 0x6c1   : > { %8892 = shalt.err (!%p8889_p3)
}
 0x6c2   : > { %s8893_s4 = scalar_lea.hbm %s6588_s1, 16  ;;  %s8897_s16 = scalar_lea.hbm %s14618_s15, 32 }
 0x6c3   : > { %p8894_p4 = scmp.ne.s32.totalorder %s6588_s1, %s8893_s4  ;;  %p8898_p9 = scmp.lt.s32.totalorder %s6588_s1, %s14618_s15 }
 0x6c4   : > { %p8899_p10 = scmp.lt.s32.totalorder %s8897_s16, %s8893_s4 }
 0x6c5   : > { %p8895_p7 = pnand %p8894_p4, %p9062_p5 }
 0x6c6   : > { %p8900_p11 = por %p8899_p10, %p8898_p9 }
 0x6c7   : > { %p8896_p8 = pneg %p8895_p7 }
 0x6c9   : > { %p8901_p12 = pnand %p8900_p11, %p8896_p8 }
 0x6cb   : > { %8904 = shalt.err (!%p8901_p12)
}
 0x6cc   : > { %8131 = dma.vmem_to_hbm [thread:$0]  (%p9062_p5), %s6591_s2, 16, %s6588_s1, %s6578_s27  }
 0x6cd PF: > { %p8137_p13 = scmp.ge.s32.totalorder %s8939_s21, 2  ;;  %s6602_s3 = sand.u32 1, %s8927_s18  }
 0x6ce   : > { %s6603_s25 = scalar_lea.sflag [#allocation6], %s6602_s3 }
 0x6cf   : > { %p8134_p0 = pnand %p8137_p13, %p9066_p6 }
 0x6d1   : > { %p8135_p1 = pneg %p8134_p0 }
 0x6d3   : > { %8922 = dma.done.wait (%p8135_p1), %s6603_s25, 16  }
 0x6d4   : > { %8924 = vsyncadd (%p8135_p1), %s6603_s25, 4294967280  ;;  %s14657_s4 = sld [smem:[#allocation8_spill]]  ;;  %p25_p2 = scmp.ge.s32.totalorder %s9049_s24, 4  }
 0x6d5   : > { %s14658_s18 = smov %s8931_s19  ;;  %s14659_s19 = smov %s8935_s20 }
 0x6d6   : > { %s14661_s21 = smov %s9049_s24  ;;  %27 = sbr.rel (!%p25_p2) target bundleno = 9 (0x9), region = 360 }
 0x6da   : > { %s14660_s20 = smov %s14657_s4 }
 0x6db   :  { %6607 = vsyncpa [#allocation6], 1 }
 0x6dc   :  { %6609 = vsyncpa [#allocation6 + $0x1], 1 }

</bundles_post_ra>
